<compile_context>
chip_gen: v7x
topology: tpu7x:2x2x1
jax: 0.10.0
libtpu: 0.0.40
codegen_flags: <defaults>
</compile_context>

<pallas_src>
import functools

import jax
import jax.numpy as jnp
from jax.experimental import pallas as pl
from jax.experimental.pallas import tpu as pltpu


def _sigmoid(y):
    # One transcendental (tanh) per element instead of exp + divide.
    # Mathematically identical to sigmoid(y).
    return 0.5 * jnp.tanh(0.5 * y) + 0.5


def _fused_kernel(x_ref, w1_ref, b1_ref, w2_ref, b2_ref, o_ref, *, mxu_bf16):
    # x_ref : (Cin, T)   w1_ref: (C1, Cin)  b1_ref: (C1, 1)
    # w2_ref: (C2, C1)   b2_ref: (C2, 1)    o_ref : (C2, T)
    x = x_ref[...]
    if x_ref.shape[0] == 1:
        # 1x1 conv with a single input channel is an outer product -> VPU.
        h = w1_ref[...] * x + b1_ref[...]                        # (C1, T)
    else:
        h = jnp.dot(w1_ref[...], x,
                    preferred_element_type=jnp.float32) + b1_ref[...]
    h = _sigmoid(h)

    w2 = w2_ref[...]
    if mxu_bf16:
        # bf16 operands avoid f32-MXU emulation; accumulate stays f32.
        h = h.astype(jnp.bfloat16)
        w2 = w2.astype(jnp.bfloat16)
    y = jnp.dot(w2, h, preferred_element_type=jnp.float32) + b2_ref[...]  # (C2, T)
    o_ref[...] = _sigmoid(y).astype(o_ref.dtype)


def _pick_pixel_tile(pixels_padded, target=7680):
    """Largest multiple-of-128 tile <= target that evenly divides the
    (already 128-aligned) padded pixel count.  target=7680 keeps the pixel
    grid axis at >=4 steps for the module's 30720-pixel input (2 steps per
    TensorCore on v7x) while amortizing per-step overhead."""
    assert pixels_padded % 128 == 0
    t = min((target // 128) * 128, pixels_padded)
    while pixels_padded % t != 0:
        t -= 128
    return max(t, 128)


def model_forward(x_nchw, w1, b1, w2, b2, *,
                  pixel_tile=None, out_dtype=jnp.float32, mxu_bf16=True):
    """Two stacked 1x1 convs + sigmoid, fused in one Pallas kernel.

    x_nchw : (N, Cin, H, W) float32
    w1     : (C1, Cin, 1, 1), b1: (C1,)
    w2     : (C2, C1, 1, 1),  b2: (C2,)
    returns (N, C2, H, W) in `out_dtype` (default float32 = module semantics;
    bfloat16 halves the dominant HBM writeback if tolerable downstream).
    """
    N, Cin, H, W = x_nchw.shape
    C1 = w1.shape[0]
    C2 = w2.shape[0]
    pixels = H * W

    # Channel-major views: pure reshapes, no transposes either side.
    x_cm = x_nchw.reshape(N, Cin, pixels)
    w1m = w1.reshape(C1, Cin).astype(jnp.float32)
    b1m = b1.reshape(C1, 1).astype(jnp.float32)
    w2m = w2.reshape(C2, C1).astype(jnp.float32)
    b2m = b2.reshape(C2, 1).astype(jnp.float32)

    # Keep the pixel axis lane-dense: pad to a multiple of 128, crop afterwards.
    pad = (-pixels) % 128
    pixels_p = pixels + pad
    if pad:
        x_cm = jnp.pad(x_cm, ((0, 0), (0, 0), (0, pad)))

    tile = pixel_tile if pixel_tile is not None else _pick_pixel_tile(pixels_p)
    assert tile % 128 == 0 and pixels_p % tile == 0

    grid = (N, pixels_p // tile)
    kernel = functools.partial(_fused_kernel, mxu_bf16=mxu_bf16)

    out_cm = pl.pallas_call(
        kernel,
        out_shape=jax.ShapeDtypeStruct((N, C2, pixels_p), out_dtype),
        grid_spec=pltpu.PrefetchScalarGridSpec(
            num_scalar_prefetch=0,
            grid=grid,
            in_specs=[
                pl.BlockSpec((None, Cin, tile), lambda n, j: (n, 0, j)),
                pl.BlockSpec((C1, Cin), lambda n, j: (0, 0)),
                pl.BlockSpec((C1, 1), lambda n, j: (0, 0)),
                pl.BlockSpec((C2, C1), lambda n, j: (0, 0)),
                pl.BlockSpec((C2, 1), lambda n, j: (0, 0)),
            ],
            out_specs=pl.BlockSpec((None, C2, tile), lambda n, j: (n, 0, j)),
        ),
        compiler_params=pltpu.CompilerParams(
            dimension_semantics=("parallel", "parallel")),
    )(x_cm, w1m, b1m, w2m, b2m)

    if pad:
        out_cm = out_cm[:, :, :pixels]
    return out_cm.reshape(N, C2, H, W)


if __name__ == "__main__":
    key = jax.random.PRNGKey(0)
    k_x, k_w1, k_b1, k_w2, k_b2 = jax.random.split(key, 5)

    # Shapes fixed by the PyTorch module: x1 = randn(1, 1, 96, 320), 1->13->78.
    N, Cin, H, W = 1, 1, 96, 320
    C1, C2 = 13, 78

    x = jax.random.normal(k_x, (N, Cin, H, W), dtype=jnp.float32)
    # deterministic "Conv2d-like" init (uniform, bounded) — synthetic weights
    w1 = jax.random.uniform(k_w1, (C1, Cin, 1, 1), jnp.float32, -1.0, 1.0)
    b1 = jax.random.uniform(k_b1, (C1,), jnp.float32, -1.0, 1.0)
    w2 = jax.random.uniform(k_w2, (C2, C1, 1, 1), jnp.float32, -0.3, 0.3)
    b2 = jax.random.uniform(k_b2, (C2,), jnp.float32, -0.3, 0.3)

    # pure-JAX f32 reference for the same math (channel-major, no transposes)
    xr = x.reshape(N, Cin, H * W)
    h = jax.nn.sigmoid(
        jnp.einsum('oc,nci->noi', w1.reshape(C1, Cin), xr) + b1[None, :, None])
    ref = jax.nn.sigmoid(
        jnp.einsum('oc,nci->noi', w2.reshape(C2, C1), h) + b2[None, :, None])
    ref = ref.reshape(N, C2, H, W)

    # Default (fast) path: bf16 MXU operands, f32 accumulate/output.
    out = jax.block_until_ready(model_forward(x, w1, b1, w2, b2))
    assert out.shape == (N, C2, H, W), out.shape
    assert out.dtype == jnp.float32
    assert jnp.allclose(out, ref, atol=3e-3, rtol=3e-3)

    # Exact f32 path (mxu_bf16=False) must match the reference tightly.
    out_f32 = jax.block_until_ready(
        model_forward(x, w1, b1, w2, b2, mxu_bf16=False))
    assert jnp.allclose(out_f32, ref, atol=1e-5, rtol=1e-5)

    print("KERNEL_OK")
</pallas_src>

<mosaic_0001>
module attributes {stable_mosaic.version = 11 : i64} {
  func.func @_fused_kernel(%arg0: i32, %arg1: i32, %arg2: memref<1x1x7680xf32, #tpu.memory_space<vmem>>, %arg3: memref<13x1xf32, #tpu.memory_space<vmem>>, %arg4: memref<13x1xf32, #tpu.memory_space<vmem>>, %arg5: memref<78x13xf32, #tpu.memory_space<vmem>>, %arg6: memref<78x1xf32, #tpu.memory_space<vmem>>, %arg7: memref<1x78x7680xf32, #tpu.memory_space<vmem>>) attributes {dimension_semantics = [#tpu.dimension_semantics<parallel>, #tpu.dimension_semantics<parallel>], iteration_bounds = array<i64: 1, 4>, scalar_prefetch = 0 : i64, scratch_operands = 0 : i64, tpu.core_type = #tpu.core_type<tc>, window_params = [{transform_indices = @transform_0, window_bounds = array<i64: 1, 1, 7680>}, {pipeline_mode = #tpu.pipeline_mode<synchronous>, transform_indices = @transform_1, window_bounds = array<i64: 13, 1>}, {pipeline_mode = #tpu.pipeline_mode<synchronous>, transform_indices = @transform_2, window_bounds = array<i64: 13, 1>}, {pipeline_mode = #tpu.pipeline_mode<synchronous>, transform_indices = @transform_3, window_bounds = array<i64: 78, 13>}, {pipeline_mode = #tpu.pipeline_mode<synchronous>, transform_indices = @transform_4, window_bounds = array<i64: 78, 1>}, {transform_indices = @transform_5, window_bounds = array<i64: 1, 78, 7680>}]} {
    %c0 = arith.constant 0 : index
    %c0_0 = arith.constant 0 : index
    %c0_1 = arith.constant 0 : index
    %0 = vector.load %arg2[%c0, %c0_0, %c0_1] : memref<1x1x7680xf32, #tpu.memory_space<vmem>>, vector<1x1x7680xf32>
    %1 = vector.shape_cast %0 : vector<1x1x7680xf32> to vector<1x7680xf32>
    %c0_2 = arith.constant 0 : index
    %c0_3 = arith.constant 0 : index
    %2 = vector.load %arg3[%c0_2, %c0_3] : memref<13x1xf32, #tpu.memory_space<vmem>>, vector<13x1xf32>
    %3 = vector.broadcast %2 : vector<13x1xf32> to vector<13x7680xf32>
    %4 = vector.broadcast %1 : vector<1x7680xf32> to vector<13x7680xf32>
    %5 = arith.mulf %3, %4 : vector<13x7680xf32>
    %c0_4 = arith.constant 0 : index
    %c0_5 = arith.constant 0 : index
    %6 = vector.load %arg4[%c0_4, %c0_5] : memref<13x1xf32, #tpu.memory_space<vmem>>, vector<13x1xf32>
    %7 = vector.broadcast %6 : vector<13x1xf32> to vector<13x7680xf32>
    %8 = arith.addf %5, %7 : vector<13x7680xf32>
    %cst = arith.constant 5.000000e-01 : f32
    %9 = vector.broadcast %cst : f32 to vector<13x7680xf32>
    %10 = arith.mulf %9, %8 : vector<13x7680xf32>
    %11 = math.tanh %10 : vector<13x7680xf32>
    %cst_6 = arith.constant 5.000000e-01 : f32
    %12 = vector.broadcast %cst_6 : f32 to vector<13x7680xf32>
    %13 = arith.mulf %12, %11 : vector<13x7680xf32>
    %cst_7 = arith.constant 5.000000e-01 : f32
    %14 = vector.broadcast %cst_7 : f32 to vector<13x7680xf32>
    %15 = arith.addf %13, %14 : vector<13x7680xf32>
    %c0_8 = arith.constant 0 : index
    %c0_9 = arith.constant 0 : index
    %16 = vector.load %arg5[%c0_8, %c0_9] : memref<78x13xf32, #tpu.memory_space<vmem>>, vector<78x13xf32>
    %17 = arith.truncf %15 : vector<13x7680xf32> to vector<13x7680xbf16>
    %18 = arith.truncf %16 : vector<78x13xf32> to vector<78x13xbf16>
    %cst_10 = arith.constant dense<0.000000e+00> : vector<78x7680xf32>
    %19 = tpu.matmul %18, %17, %cst_10 {dimension_numbers = #tpu.dot_dimension_numbers<[1], [0], [0], [1], [0, 0, 1, 1], [], []>} : vector<78x13xbf16>, vector<13x7680xbf16>, vector<78x7680xf32> -> vector<78x7680xf32>
    %c0_11 = arith.constant 0 : index
    %c0_12 = arith.constant 0 : index
    %20 = vector.load %arg6[%c0_11, %c0_12] : memref<78x1xf32, #tpu.memory_space<vmem>>, vector<78x1xf32>
    %21 = vector.broadcast %20 : vector<78x1xf32> to vector<78x7680xf32>
    %22 = arith.addf %19, %21 : vector<78x7680xf32>
    %cst_13 = arith.constant 5.000000e-01 : f32
    %23 = vector.broadcast %cst_13 : f32 to vector<78x7680xf32>
    %24 = arith.mulf %23, %22 : vector<78x7680xf32>
    %25 = math.tanh %24 : vector<78x7680xf32>
    %cst_14 = arith.constant 5.000000e-01 : f32
    %26 = vector.broadcast %cst_14 : f32 to vector<78x7680xf32>
    %27 = arith.mulf %26, %25 : vector<78x7680xf32>
    %cst_15 = arith.constant 5.000000e-01 : f32
    %28 = vector.broadcast %cst_15 : f32 to vector<78x7680xf32>
    %29 = arith.addf %27, %28 : vector<78x7680xf32>
    %c0_16 = arith.constant 0 : index
    %c0_17 = arith.constant 0 : index
    %c0_18 = arith.constant 0 : index
    %30 = vector.load %arg7[%c0_16, %c0_17, %c0_18] : memref<1x78x7680xf32, #tpu.memory_space<vmem>>, vector<1x78x7680xf32>
    %31 = vector.shape_cast %30 : vector<1x78x7680xf32> to vector<78x7680xf32>
    %32 = vector.shape_cast %29 : vector<78x7680xf32> to vector<1x78x7680xf32>
    tpu.vector_store %arg7[%c0_16, %c0_17, %c0_18], %32 {strides = array<i32>} : memref<1x78x7680xf32, #tpu.memory_space<vmem>>, vector<1x78x7680xf32>,
    return
  }
  func.func @transform_0(%arg0: i32, %arg1: i32) -> (i32, i32, i32) {
    %c0_i32 = arith.constant 0 : i32
    %c0_i32_0 = arith.constant 0 : i32
    return %arg0, %c0_i32, %arg1 : i32, i32, i32
  }
  func.func @transform_1(%arg0: i32, %arg1: i32) -> (i32, i32) {
    %c0_i32 = arith.constant 0 : i32
    %c0_i32_0 = arith.constant 0 : i32
    %c0_i32_1 = arith.constant 0 : i32
    return %c0_i32, %c0_i32_0 : i32, i32
  }
  func.func @transform_2(%arg0: i32, %arg1: i32) -> (i32, i32) {
    %c0_i32 = arith.constant 0 : i32
    %c0_i32_0 = arith.constant 0 : i32
    %c0_i32_1 = arith.constant 0 : i32
    return %c0_i32, %c0_i32_0 : i32, i32
  }
  func.func @transform_3(%arg0: i32, %arg1: i32) -> (i32, i32) {
    %c0_i32 = arith.constant 0 : i32
    %c0_i32_0 = arith.constant 0 : i32
    %c0_i32_1 = arith.constant 0 : i32
    return %c0_i32, %c0_i32_0 : i32, i32
  }
  func.func @transform_4(%arg0: i32, %arg1: i32) -> (i32, i32) {
    %c0_i32 = arith.constant 0 : i32
    %c0_i32_0 = arith.constant 0 : i32
    %c0_i32_1 = arith.constant 0 : i32
    return %c0_i32, %c0_i32_0 : i32, i32
  }
  func.func @transform_5(%arg0: i32, %arg1: i32) -> (i32, i32, i32) {
    %c0_i32 = arith.constant 0 : i32
    %c0_i32_0 = arith.constant 0 : i32
    return %arg0, %c0_i32, %arg1 : i32, i32, i32
  }
}

</mosaic_0001>

<bundles_post_ra>
// kernel: tpu_custom_call.1
= control target key start
LH: loop header
LB: loop body
LE: loop exit
PB: predicated region body
PF: predicated region fallthrough
CT: control target
= control target key end

     0   :  { %10 = vsyncpa [#allocation3], 0  ;;  %s15749_s0 = inlined_call_operand.hbm [shape: f32[1,1,30720], index: 0, kind: input, shape index: {}]   ;;  %s15750_s1 = inlined_call_operand.vmem [shape: f32[13,1], index: 1, kind: input, shape index: {}]   ;;  %s15751_s2 = inlined_call_operand.vmem [shape: f32[13,1], index: 2, kind: input, shape index: {}]   ;;  %s15752_s3 = inlined_call_operand.vmem [shape: f32[78,13], index: 3, kind: input, shape index: {}]   ;;  %s15753_s4 = inlined_call_operand.vmem [shape: f32[78,1], index: 4, kind: input, shape index: {}]   ;;  %s15754_s5 = inlined_call_operand.vmem [shape: f32[1,78,30720], index: 5, kind: output, shape index: {}]  }
   0x1   :  { %12 = vsyncpa [#allocation3 + $0x1], 0  ;;  %s10224_s18 = smov 0   ;;  %s10226_s19 = smov 0  }
   0x2   :  { %s10228_s20 = smov 0   ;;  %s10230_s21 = smov 0  }
   0x3   :  { %s10232_s22 = smov 0   ;;  %s10234_s23 = smov 0  }
   0x4 LB: > { %s8446_s24 = sadd.s32 4294967295, %s10189_s23   ;;  %s27_s25 = sadd.s32 1, %s10185_s22  ;;  %s10189_s23 = sphi %s10234_s23, %s18_s23   ;;  %s10185_s22 = sphi %s10232_s22, %s16295_s22   ;;  %s10181_s21 = sphi %s10230_s21, %s16294_s21   ;;  %s10177_s20 = sphi %s10228_s20, %s16293_s20   ;;  %s10173_s19 = sphi %s10226_s19, %s16292_s19   ;;  %s10169_s18 = sphi %s10224_s18, %s16291_s18  }
   0x5   : > { %p28_p0 = scmp.ge.s32.totalorder %s27_s25, 4  ;;  %s39_s26 = sadd.s32 1, %s10177_s20 }
   0x6   : > { %p46_p1 = scmp.ne.s32.totalorder %s10177_s20, %s10173_s19  ;;  %p47_p2 = scmp.eq.s32.totalorder %s10189_s23, 0 }
   0x7   : > { %s16297_s25 = smov (%p28_p0, %s27_s25), 0  ;;  %p52_p4 = scmp.ne.s32.totalorder %s10173_s19, %s10169_s18 }
   0x8   : > { %p10260_p3 = por %p47_p2, %p46_p1  ;;  %s35_s28 = ssub.s32 %s10185_s22, %s16297_s25 }
   0x9   : > { %p53_p5 = scmp.eq.s32.totalorder %s8446_s24, 0  ;;  %p37_p6 = scmp.eq.s32.totalorder %s35_s28, 0 }
   0xa   : > { %p162_p7 = scmp.eq.s32.totalorder %s8446_s24, 3  ;;  %p8616_p10 = scmp.lt.s32.totalorder %s10189_s23, 4 }
   0xb   : > { %p10267_p8 = por %p53_p5, %p52_p4  ;;  %s200_s7 = sand.u32 1, %s10177_s20  }
   0xc   : > { %s10272_s30 = scalar_select %p37_p6, %s10177_s20, %s39_s26  }
   0xd   : > { %p10274_p9 = por %p162_p7, %p46_p1  ;;  %s8605_s8 = smul.u32 960, %s10185_s22 }
   0xe   : > { %s8607_s9 = smul.u32 60, %s200_s7  ;;  %p10288_p11 = pnand %p8616_p10, %p10260_p3 }
   0xf   : > { %s15768_s6 = scalar_select %p10274_p9, 1, 0 }
  0x10   : > { %s10284_s12 = scalar_lea.hbm %s15749_s0, %s8605_s8  ;;  %s204_s14 = scalar_lea.vmem [#allocation2], %s8607_s9 }
  0x11   : > { %s214_s15 = sshll.u32 %s204_s14, 4  ;;  %s201_s16 = scalar_lea.sflag [#allocation3], %s200_s7  ;;  %s10293_s15 = int_to_ptr.vmem [resolvable:$true] %s214_s15 }
  0x12   : > { %s10109_s17 = scalar_lea.hbm %s10284_s12, 960  ;;  %p10111_p1 = pneg %p10288_p11 }
  0x13   : > { %p10110_p0 = scmp.ne.s32.totalorder %s10284_s12, %s10109_s17  ;;  %s10114_s26 = scalar_lea.hbm %s15749_s0, 3840 }
  0x14   : > { %p10115_p4 = scmp.lt.u32.totalorder %s10284_s12, %s15749_s0  ;;  %p10116_p5 = scmp.lt.u32.totalorder %s10114_s26, %s10109_s17 }
  0x15   : > { %p10112_p2 = pnand %p10111_p1, %p10110_p0  ;;  %p10118_p7 = scmp.lt.u32.totalorder %s10109_s17, %s10284_s12 }
  0x16   : > { %p10117_p6 = por %p10116_p5, %p10115_p4 }
  0x17   : > { %p10113_p3 = pneg %p10112_p2 }
  0x18   : > { %p10119_p10 = por %p10118_p7, %p10117_p6 }
  0x1a   : > { %p10120_p12 = pnand %p10119_p10, %p10113_p3 }
  0x1c   : > { %10123 = shalt.err (!%p10120_p12)
}
  0x1d   : > { %s10124_s7 = scalar_lea.vmem %s10293_s15, 960  ;;  %s10191_s8 = smov [#allocation2]  }
  0x1e   : > { %p10125_p0 = scmp.ne.s32.totalorder %s10293_s15, %s10124_s7  ;;  %s10129_s9 = sshll.u32 %s10191_s8, 4  ;;  %s10130_s9 = int_to_ptr.vmem [resolvable:$false] %s10129_s9 }
  0x1f   : > { %s10131_s10 = scalar_lea.vmem %s10130_s9, 1920  ;;  %p10132_p9 = scmp.lt.s32.totalorder %s10293_s15, %s10130_s9 }
  0x20   : > { %p10127_p2 = pnand %p10125_p0, %p10111_p1  ;;  %p10133_p4 = scmp.lt.s32.totalorder %s10131_s10, %s10124_s7 }
  0x22   : > { %p10128_p13 = pneg %p10127_p2  ;;  %p10134_p5 = por %p10133_p4, %p10132_p9 }
  0x24   : > { %p10135_p6 = pnand %p10134_p5, %p10128_p13 }
  0x26   : > { %10138 = shalt.err (!%p10135_p6)
}
  0x27   : > { %8615 = dma.hbm_to_vmem [thread:$0]  (!%p10288_p11), %s10284_s12, 960, %s10293_s15, %s201_s16  }
  0x28   : > { %p15770_p12 = scmp.lt.s32.totalorder %s10189_s23, 5  ;;  %p15771_p3 = scmp.ge.s32.totalorder %s10189_s23, 1 }
  0x2a   : > { %p220_p1 = pnand %p15771_p3, %p15770_p12 }
  0x2c   : > { %223 = sbr.rel (%p220_p1) target bundleno = 1496 (0x5d8), region = 40 }
  0x33   : > { %s10326_s11 = sand.u32 1, %s10173_s19  }
  0x34   : > { %s8608_s14 = smul.u32 60, %s10326_s11  ;;  %s226_s17 = scalar_lea.sflag [#allocation3], %s10326_s11 }
  0x36   : > { %s10330_s18 = scalar_lea.vmem [#allocation2], %s8608_s14 }
  0x37   : > { %10164 = dma.done.wait (%p10267_p8), %s226_s17, 960  }
  0x38   : > { %10166 = vsyncadd (%p10267_p8), %s226_s17, 4294966336  ;;  %v15755_v0 = vmov 0   ;;  %v706_v1 = vld [vmem:[%s15751_s2] sm:$0xff]  ;;  %v707_v3 = vld [vmem:[%s15751_s2 + $0x8] sm:$0x1f]  ;;  %v286_v15 = vlaneseq  ;;  %vm1469_vm0 = vcmask 1045504  }
  0x39   : > { %8668 = vset.pattern.permute.xlu1 %v15755_v0  ;;  %8667 = vset.pattern.permute.xlu0 %v15755_v0  ;;  %v266_v2 = vld [vmem:[%s15750_s1] sm:$0xff]  ;;  %v267_v4 = vld [vmem:[%s15750_s1 + $0x8] sm:$0x1f]  ;;  %v1396_v7 = vld [vmem:[%s15753_s4 + $0x18] sm:$0xff]  ;;  %vm1470_vm1 = vcmask 1046528   ;;  %vm1453_vm2 = vcmask 105472  }
  0x3a   : > { %1685 = vmatprep.mubr.bf16.mxu0 %v15755_v0  ;;  %1768 = vmatprep.mubr.bf16.mxu1 %v15755_v0  ;;  %v1394_v5 = vld [vmem:[%s15753_s4 + $0x8] sm:$0xff]  ;;  %v1393_v6 = vld [vmem:[%s15753_s4] sm:$0xff]  ;;  %v1395_v8 = vld [vmem:[%s15753_s4 + $0x10] sm:$0xff]  ;;  %v287_v16 = vshrl.u32 %v286_v15, 7  ;;  %p16290_p8 = scmp.ne.s32.totalorder %s15768_s6, 0 }
  0x3b   : > { %710 = vperm.xlu1 %8668, %v706_v1   ;;  %270 = vperm.xlu0 %8667, %v266_v2   ;;  %v1398_v9 = vld [vmem:[%s15753_s4 + $0x28] sm:$0xff]  ;;  %v1397_v10 = vld [vmem:[%s15753_s4 + $0x20] sm:$0xff]  ;;  %v1400_v11 = vld [vmem:[%s15753_s4 + $0x38] sm:$0xff] }
  0x3c   : > { %v1399_v12 = vld [vmem:[%s15753_s4 + $0x30] sm:$0xff]  ;;  %v1402_v13 = vld [vmem:[%s15753_s4 + $0x48] sm:$0x3f]  ;;  %v1401_v14 = vld [vmem:[%s15753_s4 + $0x40] sm:$0xff]  ;;  %v10382_v17 = vsub.s32 1, %v287_v16  ;;  %v10384_v18 = vsub.s32 3, %v287_v16 }
  0x3d   : > { %v10386_v19 = vsub.s32 0, %v287_v16  ;;  %v10388_v20 = vsub.s32 2, %v287_v16  ;;  %v258_v21 = vld [vmem:[%s10330_s18] sm:$0xff]  ;;  %v10391_v22 = vsub.s32 5, %v287_v16  ;;  %v10393_v23 = vsub.s32 7, %v287_v16  ;;  %v10404_v30 = vld [vmem:[%s10330_s18 + $0x8] sm:$0xff] }
  0x3e   : > { %v10395_v24 = vsub.s32 4, %v287_v16  ;;  %v10397_v25 = vsub.s32 6, %v287_v16  ;;  %v293_v26 = vrot.slane %v258_v21, %v10382_v17  ;;  %v301_v27 = vrot.slane %v258_v21, %v10384_v18 }
  0x3f   : > { %715 = vperm.xlu1 %8668, %v707_v3   ;;  %275 = vperm.xlu0 %8667, %v267_v4   ;;  %v289_v28 = vrot.slane %v258_v21, %v10386_v19  ;;  %v297_v29 = vrot.slane %v258_v21, %v10388_v20  ;;  %v309_v31 = vrot.slane %v258_v21, %v10391_v22 }
  0x40   : > { %v317_v32 = vrot.slane %v258_v21, %v10393_v23  ;;  %v305_v35 = vrot.slane %v258_v21, %v10395_v24  ;;  %v313_v36 = vrot.slane %v258_v21, %v10397_v25  ;;  %v325_v37 = vrot.slane %v10404_v30, %v10382_v17 }
  0x41   : > { %v333_v44 = vrot.slane %v10404_v30, %v10384_v18 }
  0x43   : > { %1410 = vperm.xlu1 %8668, %v1394_v5   ;;  %1405 = vperm.xlu0 %8667, %v1393_v6  }
  0x47   : > { %1420 = vperm.xlu1 %8668, %v1396_v7   ;;  %1415 = vperm.xlu0 %8667, %v1395_v8  }
  0x4b   : > { %1430 = vperm.xlu1 %8668, %v1398_v9   ;;  %1425 = vperm.xlu0 %8667, %v1397_v10  }
  0x4f   : > { %1440 = vperm.xlu1 %8668, %v1400_v11   ;;  %1435 = vperm.xlu0 %8667, %v1399_v12  }
  0x53   : > { %1450 = vperm.xlu1 %8668, %v1402_v13   ;;  %1445 = vperm.xlu0 %8667, %v1401_v14  }
  0xba   : > { %v10408_v33 = vpop.permute.xlu1 %710  ;;  %v10410_v34 = vpop.permute.xlu0 %270 }
  0xbb   : > { %v587_v38 = vmul.f32 %v293_v26, %v10410_v34  ;;  %v589_v39 = vmul.f32 %v301_v27, %v10410_v34  ;;  %v586_v40 = vmul.f32 %v289_v28, %v10410_v34  ;;  %v588_v41 = vmul.f32 %v297_v29, %v10410_v34 }
  0xbc   : > { %v591_v42 = vmul.f32 %v309_v31, %v10410_v34  ;;  %v593_v43 = vmul.f32 %v317_v32, %v10410_v34  ;;  %v590_v52 = vmul.f32 %v305_v35, %v10410_v34  ;;  %v592_v53 = vmul.f32 %v313_v36, %v10410_v34 }
  0xbd   : > { %v719_v45 = vadd.f32 %v10408_v33, %v587_v38  ;;  %v721_v46 = vadd.f32 %v10408_v33, %v589_v39  ;;  %v718_v47 = vadd.f32 %v10408_v33, %v586_v40  ;;  %v720_v48 = vadd.f32 %v10408_v33, %v588_v41 }
  0xbe   : > { %v10428_v49 = vpop.permute.xlu0 %275  ;;  %v723_v50 = vadd.f32 %v10408_v33, %v591_v42  ;;  %v725_v51 = vadd.f32 %v10408_v33, %v593_v43  ;;  %v10436_v58 = vpop.permute.xlu1 %715  ;;  %v722_v5 = vadd.f32 %v10408_v33, %v590_v52  ;;  %v724_v14 = vadd.f32 %v10408_v33, %v592_v53 }
  0xbf   : > { %v647_v54 = vmul.f32 %v293_v26, %v10428_v49  ;;  %v839_v55 = vmul.f32 0.5, %v719_v45  ;;  %v649_v56 = vmul.f32 %v301_v27, %v10428_v49  ;;  %v841_v57 = vmul.f32 0.5, %v721_v46 }
  0xc0   : > { %v646_v59 = vmul.f32 %v289_v28, %v10428_v49  ;;  %v838_v60 = vmul.f32 0.5, %v718_v47  ;;  %v648_v61 = vmul.f32 %v297_v29, %v10428_v49  ;;  %v840_v62 = vmul.f32 0.5, %v720_v48 }
  0xc1   : > { %v779_v63 = vadd.f32 %v10436_v58, %v647_v54  ;;  %8669 = vtanh.f32 %v839_v55  ;;  %v781_v1 = vadd.f32 %v10436_v58, %v649_v56  ;;  %v651_v2 = vmul.f32 %v309_v31, %v10428_v49 }
  0xc2   : > { %8671 = vtanh.f32 %v841_v57  ;;  %v778_v3 = vadd.f32 %v10436_v58, %v646_v59  ;;  %v780_v4 = vadd.f32 %v10436_v58, %v648_v61  ;;  %v653_v11 = vmul.f32 %v317_v32, %v10428_v49 }
  0xc3   : > { %v899_v6 = vmul.f32 0.5, %v779_v63  ;;  %v901_v7 = vmul.f32 0.5, %v781_v1  ;;  %8673 = vtanh.f32 %v838_v60  ;;  %v783_v8 = vadd.f32 %v10436_v58, %v651_v2 }
  0xc4   : > { %v898_v9 = vmul.f32 0.5, %v778_v3  ;;  %v900_v10 = vmul.f32 0.5, %v780_v4  ;;  %8675 = vtanh.f32 %v840_v62  ;;  %v843_v12 = vmul.f32 0.5, %v723_v50 }
  0xc5   : > { %8677 = vtanh.f32 %v899_v6  ;;  %v650_v13 = vmul.f32 %v305_v35, %v10428_v49  ;;  %v903_v15 = vmul.f32 0.5, %v783_v8  ;;  %v785_v16 = vadd.f32 %v10436_v58, %v653_v11 }
  0xc6   : > { %8679 = vtanh.f32 %v901_v7  ;;  %v652_v21 = vmul.f32 %v313_v36, %v10428_v49  ;;  %v845_v26 = vmul.f32 0.5, %v725_v51  ;;  %v595_v28 = vmul.f32 %v325_v37, %v10410_v34 }
  0xc7   : > { %8681 = vtanh.f32 %v898_v9  ;;  %v782_v27 = vadd.f32 %v10436_v58, %v650_v13  ;;  %v905_v29 = vmul.f32 0.5, %v785_v16  ;;  %v655_v32 = vmul.f32 %v325_v37, %v10428_v49 }
  0xc8   : > { %8683 = vtanh.f32 %v900_v10  ;;  %v784_v31 = vadd.f32 %v10436_v58, %v652_v21  ;;  %v842_v35 = vmul.f32 0.5, %v722_v5  ;;  %v727_v38 = vadd.f32 %v10408_v33, %v595_v28 }
  0xc9   : > { %8685 = vtanh.f32 %v843_v12  ;;  %v597_v39 = vmul.f32 %v333_v44, %v10410_v34  ;;  %v902_v36 = vmul.f32 0.5, %v782_v27  ;;  %v787_v40 = vadd.f32 %v10436_v58, %v655_v32 }
  0xca   : > { %8687 = vtanh.f32 %v903_v15  ;;  %v657_v41 = vmul.f32 %v333_v44, %v10428_v49  ;;  %v844_v43 = vmul.f32 0.5, %v724_v14  ;;  %v10193_v37 = vmov 65535  }
  0xcb   : > { %v8670_v42 = vpop.eup %8669  ;;  %8689 = vtanh.f32 %v845_v26  ;;  %v729_v45 = vadd.f32 %v10408_v33, %v597_v39  ;;  %v1471_v47 = vsel %vm1469_vm0, 4294967295, %v10193_v37  ;;  %v904_v48 = vmul.f32 0.5, %v784_v31  ;;  %v1319_v39 = vld [vmem:[%s15752_s3 + $0x8] sm:$0xff] }
  0xcc   : > { %v8672_v46 = vpop.eup %8671  ;;  %8691 = vtanh.f32 %v905_v29  ;;  %v789_v50 = vadd.f32 %v10436_v58, %v657_v41  ;;  %v1079_v52 = vmul.f32 0.5, %v8670_v42  ;;  %v847_v53 = vmul.f32 0.5, %v727_v38  ;;  %v1318_v38 = vld [vmem:[%s15752_s3] sm:$0xff] }
  0xcd   : > { %v8674_v51 = vpop.eup %8673  ;;  %8693 = vtanh.f32 %v842_v35  ;;  %v10465_v44 = vrot.slane %v10404_v30, %v10386_v19  ;;  %v1081_v55 = vmul.f32 0.5, %v8672_v46  ;;  %v907_v56 = vmul.f32 0.5, %v787_v40 }
  0xce   : > { %v8676_v54 = vpop.eup %8675  ;;  %8695 = vtanh.f32 %v902_v36  ;;  %v10469_v57 = vrot.slane %v10404_v30, %v10388_v20  ;;  %v10472_v60 = vsel %vm1470_vm1, %v1471_v47, 0  ;;  %v1078_v61 = vmul.f32 0.5, %v8674_v51 }
  0xcf   : > { %v8678_v59 = vpop.eup %8677  ;;  %8697 = vtanh.f32 %v844_v43  ;;  %v849_v62 = vmul.f32 0.5, %v729_v45  ;;  %v909_v2 = vmul.f32 0.5, %v789_v50  ;;  %v10476_v3 = vrot.slane %v10404_v30, %v10391_v22 }
  0xd0   : > { %v8680_v63 = vpop.eup %8679  ;;  %v1139_v1 = vmul.f32 0.5, %v8678_v59  ;;  %8699 = vtanh.f32 %v904_v48  ;;  %v1199_v5 = vadd.f32 0.5, %v1079_v52  ;;  %v1080_v7 = vmul.f32 0.5, %v8676_v54 }
  0xd1   : > { %v8682_v4 = vpop.eup %8681  ;;  %v1141_v6 = vmul.f32 0.5, %v8680_v63  ;;  %8701 = vtanh.f32 %v847_v53  ;;  %v1201_v10 = vadd.f32 0.5, %v1081_v55  ;;  %v1198_v14 = vadd.f32 0.5, %v1078_v61 }
  0xd2   : > { %v8684_v8 = vpop.eup %8683  ;;  %v1259_v9 = vadd.f32 0.5, %v1139_v1  ;;  %v1138_v11 = vmul.f32 0.5, %v8682_v4  ;;  %8703 = vtanh.f32 %v907_v56  ;;  %v1200_v31 = vadd.f32 0.5, %v1080_v7 }
  0xd3   : > { %v8686_v12 = vpop.eup %8685  ;;  %v1261_v13 = vadd.f32 0.5, %v1141_v6  ;;  %v1140_v15 = vmul.f32 0.5, %v8684_v8  ;;  %8705 = vtanh.f32 %v849_v62  ;;  %v10487_v53 = vpack.c.bf16 %v1319_v39, %v1318_v38 }
  0xd4   : > { %v8688_v16 = vpop.eup %8687  ;;  %v1329_v21 = vpack.c.bf16 %v1259_v9, %v1199_v5  ;;  %v1258_v26 = vadd.f32 0.5, %v1138_v11  ;;  %v1083_v27 = vmul.f32 0.5, %v8686_v12  ;;  %8707 = vtanh.f32 %v909_v2 }
  0xd5   : > { %v8690_v28 = vpop.eup %8689  ;;  %v1331_v29 = vpack.c.bf16 %v1261_v13, %v1201_v10  ;;  %v1260_v32 = vadd.f32 0.5, %v1140_v15  ;;  %v1143_v35 = vmul.f32 0.5, %v8688_v16  ;;  %v349_v4 = vrot.slane %v10404_v30, %v10393_v23 }
  0xd6   : > { %v8692_v36 = vpop.eup %8691  ;;  %v1477_v40 = vand.u32 %v10472_v60, %v1329_v21  ;;  %v1328_v41 = vpack.c.bf16 %v1258_v26, %v1198_v14  ;;  %v1203_v42 = vadd.f32 0.5, %v1083_v27  ;;  %v1085_v43 = vmul.f32 0.5, %v8690_v28  ;;  %v1320_v28 = vld [vmem:[%s15752_s3 + $0x10] sm:$0xff] }
  0xd7   : > { %v8694_v45 = vpop.eup %8693  ;;  %v1483_v46 = vand.u32 %v10472_v60, %v1331_v29  ;;  %v1330_v37 = vpack.c.bf16 %v1260_v32, %v1200_v31  ;;  %v1263_v47 = vadd.f32 0.5, %v1143_v35  ;;  %v1145_v48 = vmul.f32 0.5, %v8692_v36  ;;  %v1321_v29 = vld [vmem:[%s15752_s3 + $0x18] sm:$0xff] }
  0xd8   : > { %v8696_v50 = vpop.eup %8695  ;;  %1653 = vmatprep.subr.bf16.mxu0 %v1477_v40  ;;  %v1474_v51 = vand.u32 %v10472_v60, %v1328_v41  ;;  %v1205_v52 = vadd.f32 0.5, %v1085_v43  ;;  %v1082_v54 = vmul.f32 0.5, %v8694_v45  ;;  %v594_v13 = vmul.f32 %v10465_v44, %v10410_v34 }
  0xd9   : > { %v8698_v55 = vpop.eup %8697  ;;  %1736 = vmatprep.subr.bf16.mxu1 %v1483_v46  ;;  %v1480_v56 = vand.u32 %v10472_v60, %v1330_v37  ;;  %v1333_v59 = vpack.c.bf16 %v1263_v47, %v1203_v42  ;;  %v1265_v61 = vadd.f32 0.5, %v1145_v48  ;;  %v1142_v62 = vmul.f32 0.5, %v8696_v50 }
  0xda   : > { %v8700_v63 = vpop.eup %8699  ;;  %1654 = vmatpush1.bf16.msra.mxu0 %v1474_v51  ;;  %v1202_v1 = vadd.f32 0.5, %v1082_v54  ;;  %v1084_v2 = vmul.f32 0.5, %v8698_v55  ;;  %v654_v14 = vmul.f32 %v10465_v44, %v10428_v49  ;;  %v596_v35 = vmul.f32 %v10469_v57, %v10410_v34 }
  0xdb   : > { %v8702_v5 = vpop.eup %8701  ;;  %1737 = vmatpush1.bf16.msra.mxu1 %v1480_v56  ;;  %v1489_v6 = vand.u32 %v10472_v60, %v1333_v59  ;;  %v1335_v7 = vpack.c.bf16 %v1265_v61, %v1205_v52  ;;  %v1262_v8 = vadd.f32 0.5, %v1142_v62  ;;  %v1144_v9 = vmul.f32 0.5, %v8700_v63 }
  0xdc   : > { %v8704_v10 = vpop.eup %8703  ;;  %v1204_v11 = vadd.f32 0.5, %v1084_v2  ;;  %v1087_v12 = vmul.f32 0.5, %v8702_v5  ;;  %v656_v38 = vmul.f32 %v10469_v57, %v10428_v49  ;;  %v10515_v43 = vpack.c.bf16 %v1321_v29, %v1320_v28  ;;  %v1322_v2 = vld [vmem:[%s15752_s3 + $0x20] sm:$0xff] }
  0xdd   : > { %v8706_v15 = vpop.eup %8705  ;;  %1819 = vmatprep.subr.bf16.mxu0 %v1489_v6  ;;  %v1495_v16 = vand.u32 %v10472_v60, %v1335_v7  ;;  %8452 = vmatmul.mubr.msk.bf16.vlgmr.msra.gmra.mrb[0].mxu0 %vm1453_vm2, %v10487_v53  ;;  %v1332_v21 = vpack.c.bf16 %v1262_v8, %v1202_v1  ;;  %v1264_v26 = vadd.f32 0.5, %v1144_v9  ;;  %v1147_v27 = vmul.f32 0.5, %v8704_v10 }
  0xde   : > { %v8708_v31 = vpop.eup %8707  ;;  %8457 = vmatmul.mubr.msk.bf16.vlgmr.msra.gmra.mrb[0].mxu1 %vm1453_vm2, %v10487_v53  ;;  %v1207_v44 = vadd.f32 0.5, %v1087_v12  ;;  %v1089_v32 = vmul.f32 0.5, %v8706_v15  ;;  %1695 = vmatprep.mubr.bf16.mxu0 %v15755_v0  ;;  %v726_v45 = vadd.f32 %v10408_v33, %v594_v13  ;;  %v786_v46 = vadd.f32 %v10436_v58, %v654_v14  ;;  %v1324_v14 = vld [vmem:[%s15752_s3 + $0x30] sm:$0xff]  ;;  %v1325_v15 = vld [vmem:[%s15752_s3 + $0x38] sm:$0xff] }
  0xdf   : > { %1902 = vmatprep.subr.bf16.mxu1 %v1495_v16  ;;  %v1486_v39 = vand.u32 %v10472_v60, %v1332_v21  ;;  %v1334_v36 = vpack.c.bf16 %v1264_v26, %v1204_v11  ;;  %v1267_v40 = vadd.f32 0.5, %v1147_v27  ;;  %v1149_v41 = vmul.f32 0.5, %v8708_v31  ;;  %1778 = vmatprep.mubr.bf16.mxu1 %v15755_v0  ;;  %v1326_v31 = vld [vmem:[%s15752_s3 + $0x40] sm:$0xff] }
  0xe0   : > { %v1209_v42 = vadd.f32 0.5, %v1089_v32  ;;  %v659_v48 = vmul.f32 %v10476_v3, %v10428_v49  ;;  %v728_v50 = vadd.f32 %v10408_v33, %v596_v35  ;;  %v599_v51 = vmul.f32 %v10476_v3, %v10410_v34 }
  0xe1   : > { %1820 = vmatpush1.bf16.msra.mxu0 %v1486_v39  ;;  %v1492_v37 = vand.u32 %v10472_v60, %v1334_v36  ;;  %v1337_v47 = vpack.c.bf16 %v1267_v40, %v1207_v44  ;;  %v1269_v57 = vadd.f32 0.5, %v1149_v41  ;;  %v661_v52 = vmul.f32 %v349_v4, %v10428_v49  ;;  %v1327_v44 = vld [vmem:[%s15752_s3 + $0x48] sm:$0x3f] }
  0xe2   : > { %v788_v56 = vadd.f32 %v10436_v58, %v656_v38  ;;  %v601_v59 = vmul.f32 %v349_v4, %v10410_v34  ;;  %v846_v61 = vmul.f32 0.5, %v726_v45  ;;  %v791_v62 = vadd.f32 %v10436_v58, %v659_v48  ;;  %v1323_v4 = vld [vmem:[%s15752_s3 + $0x28] sm:$0xff] }
  0xe3   : > { %1903 = vmatpush1.bf16.msra.mxu1 %v1492_v37  ;;  %v1501_v54 = vand.u32 %v10472_v60, %v1337_v47  ;;  %v1339_v55 = vpack.c.bf16 %v1269_v57, %v1209_v42  ;;  %v906_v3 = vmul.f32 0.5, %v786_v46  ;;  %v793_v1 = vadd.f32 %v10436_v58, %v661_v52 }
  0xe4   : > { %v848_v5 = vmul.f32 0.5, %v728_v50  ;;  %v731_v6 = vadd.f32 %v10408_v33, %v599_v51  ;;  %v908_v7 = vmul.f32 0.5, %v788_v56  ;;  %v733_v8 = vadd.f32 %v10408_v33, %v601_v59  ;;  %v10585_v56 = vld [vmem:[%s10330_s18 + $0x10] sm:$0xff] }
  0xe5   : > { %1985 = vmatprep.subr.bf16.mxu0 %v1501_v54  ;;  %v1507_v63 = vand.u32 %v10472_v60, %v1339_v55  ;;  %8453 = vmatmul.mubr.msk.bf16.gmra.mrb[4].mxu0 %vm1453_vm2, %v10515_v43  ;;  %8709 = vtanh.f32 %v846_v61  ;;  %v911_v9 = vmul.f32 0.5, %v791_v62  ;;  %v10546_v10 = vpack.c.bf16 %v1323_v4, %v1322_v2 }
  0xe6   : > { %8458 = vmatmul.mubr.msk.bf16.gmra.mrb[4].mxu1 %vm1453_vm2, %v10515_v43  ;;  %1705 = vmatprep.mubr.bf16.mxu0 %v15755_v0  ;;  %8711 = vtanh.f32 %v906_v3  ;;  %v913_v11 = vmul.f32 0.5, %v793_v1  ;;  %v851_v12 = vmul.f32 0.5, %v731_v6  ;;  %v853_v13 = vmul.f32 0.5, %v733_v8 }
  0xe7   : > { %2068 = vmatprep.subr.bf16.mxu1 %v1507_v63  ;;  %1788 = vmatprep.mubr.bf16.mxu1 %v15755_v0  ;;  %8713 = vtanh.f32 %v848_v5  ;;  %v10560_v16 = vpack.c.bf16 %v1325_v15, %v1324_v14  ;;  %v10574_v36 = vpack.c.bf16 %v1327_v44, %v1326_v31  ;;  %v337_v42 = vrot.slane %v10404_v30, %v10395_v24 }
  0xe8   : > { %8715 = vtanh.f32 %v908_v7  ;;  %v345_v55 = vrot.slane %v10404_v30, %v10397_v25  ;;  %v357_v30 = vrot.slane %v10585_v56, %v10382_v17  ;;  %v365_v14 = vrot.slane %v10585_v56, %v10384_v18 }
  0xe9   : > { %8717 = vtanh.f32 %v911_v9  ;;  %v658_v57 = vmul.f32 %v337_v42, %v10428_v49  ;;  %v598_v54 = vmul.f32 %v337_v42, %v10410_v34 }
  0xea   : > { %8719 = vtanh.f32 %v913_v11  ;;  %v600_v7 = vmul.f32 %v345_v55, %v10410_v34  ;;  %v660_v9 = vmul.f32 %v345_v55, %v10428_v49  ;;  %v663_v31 = vmul.f32 %v357_v30, %v10428_v49 }
  0xeb   : > { %8721 = vtanh.f32 %v851_v12  ;;  %v790_v3 = vadd.f32 %v10436_v58, %v658_v57  ;;  %v730_v6 = vadd.f32 %v10408_v33, %v598_v54 }
  0xec   : > { %8723 = vtanh.f32 %v853_v13  ;;  %v603_v13 = vmul.f32 %v357_v30, %v10410_v34 }
  0xed   : > { %8454 = vmatmul.mubr.msk.bf16.gmra.mrb[8].mxu0 %vm1453_vm2, %v10546_v10  ;;  %v910_v11 = vmul.f32 0.5, %v790_v3 }
  0xee   : > { %8459 = vmatmul.mubr.msk.bf16.gmra.mrb[8].mxu1 %vm1453_vm2, %v10546_v10  ;;  %1715 = vmatprep.mubr.bf16.mxu0 %v15755_v0  ;;  %v735_v44 = vadd.f32 %v10408_v33, %v603_v13 }
  0xef   : > { %1798 = vmatprep.mubr.bf16.mxu1 %v15755_v0  ;;  %v8710_v21 = vpop.eup %8709  ;;  %8725 = vtanh.f32 %v910_v11 }
  0xf0   : > { %v8712_v26 = vpop.eup %8711  ;;  %v1086_v45 = vmul.f32 0.5, %v8710_v21  ;;  %v855_v42 = vmul.f32 0.5, %v735_v44 }
  0xf1   : > { %v8714_v27 = vpop.eup %8713  ;;  %v1146_v38 = vmul.f32 0.5, %v8712_v26  ;;  %v850_v26 = vmul.f32 0.5, %v730_v6 }
  0xf2   : > { %v8716_v28 = vpop.eup %8715  ;;  %v1088_v37 = vmul.f32 0.5, %v8714_v27  ;;  %v1206_v59 = vadd.f32 0.5, %v1086_v45  ;;  %v732_v27 = vadd.f32 %v10408_v33, %v600_v7 }
  0xf3   : > { %v8718_v29 = vpop.eup %8717  ;;  %v1148_v40 = vmul.f32 0.5, %v8716_v28  ;;  %v1266_v48 = vadd.f32 0.5, %v1146_v38  ;;  %8727 = vtanh.f32 %v850_v26  ;;  %v665_v38 = vmul.f32 %v365_v14, %v10428_v49 }
  0xf4   : > { %v8720_v32 = vpop.eup %8719  ;;  %v1151_v41 = vmul.f32 0.5, %v8718_v29  ;;  %v1208_v62 = vadd.f32 0.5, %v1088_v37  ;;  %v792_v29 = vadd.f32 %v10436_v58, %v660_v9  ;;  %v377_v9 = vrot.slane %v10585_v56, %v10397_v25 }
  0xf5   : > { %8455 = vmatmul.mubr.msk.bf16.gmra.mrb[12].mxu0 %vm1453_vm2, %v10560_v16  ;;  %v8722_v35 = vpop.eup %8721  ;;  %v1153_v46 = vmul.f32 0.5, %v8720_v32  ;;  %v1268_v51 = vadd.f32 0.5, %v1148_v40  ;;  %v1336_v1 = vpack.c.bf16 %v1266_v48, %v1206_v59  ;;  %v605_v32 = vmul.f32 %v365_v14, %v10410_v34 }
  0xf6   : > { %8460 = vmatmul.mubr.msk.bf16.gmra.mrb[12].mxu1 %vm1453_vm2, %v10560_v16  ;;  %1725 = vmatprep.mubr.bf16.mxu0 %v15755_v0  ;;  %v8724_v39 = vpop.eup %8723  ;;  %v1091_v47 = vmul.f32 0.5, %v8722_v35  ;;  %v1271_v52 = vadd.f32 0.5, %v1151_v41  ;;  %v852_v35 = vmul.f32 0.5, %v732_v27  ;;  %v912_v40 = vmul.f32 0.5, %v792_v29  ;;  %v10670_v29 = vld [vmem:[%s10330_s18 + $0x20] sm:$0xff] }
  0xf7   : > { %1808 = vmatprep.mubr.bf16.mxu1 %v15755_v0  ;;  %v1093_v50 = vmul.f32 0.5, %v8724_v39  ;;  %v1273_v61 = vadd.f32 0.5, %v1153_v46  ;;  %v1338_v4 = vpack.c.bf16 %v1268_v51, %v1208_v62  ;;  %v1498_v12 = vand.u32 %v10472_v60, %v1336_v1 }
  0xf8   : > { %v1211_v63 = vadd.f32 0.5, %v1091_v47  ;;  %v353_v39 = vrot.slane %v10585_v56, %v10386_v19  ;;  %v795_v41 = vadd.f32 %v10436_v58, %v663_v31  ;;  %v737_v45 = vadd.f32 %v10408_v33, %v605_v32 }
  0xf9   : > { %v1213_v2 = vadd.f32 0.5, %v1093_v50  ;;  %v1504_v15 = vand.u32 %v10472_v60, %v1338_v4  ;;  %8729 = vtanh.f32 %v852_v35  ;;  %v797_v46 = vadd.f32 %v10436_v58, %v665_v38  ;;  %v8726_v51 = vpop.eup %8725 }
  0xfa   : > { %v1341_v5 = vpack.c.bf16 %v1271_v52, %v1211_v63  ;;  %v602_v37 = vmul.f32 %v353_v39, %v10410_v34  ;;  %v361_v47 = vrot.slane %v10585_v56, %v10388_v20  ;;  %8731 = vtanh.f32 %v912_v40 }
  0xfb   : > { %v1343_v8 = vpack.c.bf16 %v1273_v61, %v1213_v2  ;;  %v915_v57 = vmul.f32 0.5, %v795_v41  ;;  %8733 = vtanh.f32 %v855_v42  ;;  %v857_v48 = vmul.f32 0.5, %v737_v45  ;;  %v261_v2 = vld [vmem:[%s10330_s18 + $0x18] sm:$0xff] }
  0xfc   : > { %v1513_v21 = vand.u32 %v10472_v60, %v1341_v5  ;;  %v662_v50 = vmul.f32 %v353_v39, %v10428_v49  ;;  %v917_v52 = vmul.f32 0.5, %v797_v46  ;;  %v734_v54 = vadd.f32 %v10408_v33, %v602_v37 }
  0xfd   : > { %8456 = vmatmul.mubr.msk.bf16.gmra.mrb[16].mxu0 %vm1453_vm2, %v10574_v36  ;;  %v1519_v28 = vand.u32 %v10472_v60, %v1343_v8  ;;  %v604_v55 = vmul.f32 %v361_v47, %v10410_v34  ;;  %8735 = vtanh.f32 %v915_v57  ;;  %v664_v59 = vmul.f32 %v361_v47, %v10428_v49  ;;  %v8728_v62 = vpop.eup %8727 }
  0xfe   : > { %8461 = vmatmul.mubr.msk.bf16.gmra.mrb[16].mxu1 %vm1453_vm2, %v10574_v36  ;;  %1851 = vmatprep.mubr.bf16.mxu0 %v15755_v0  ;;  %v373_v61 = vrot.slane %v10585_v56, %v10391_v22  ;;  %v1150_v63 = vmul.f32 0.5, %v8726_v51  ;;  %8737 = vtanh.f32 %v857_v48  ;;  %v794_v3 = vadd.f32 %v10436_v58, %v662_v50 }
  0xff   : > { %1934 = vmatprep.mubr.bf16.mxu1 %v15755_v0  ;;  %v381_v1 = vrot.slane %v10585_v56, %v10393_v23  ;;  %8739 = vtanh.f32 %v917_v52  ;;  %v854_v30 = vmul.f32 0.5, %v734_v54  ;;  %v736_v4 = vadd.f32 %v10408_v33, %v604_v55 }
 0x100   : > { %v369_v5 = vrot.slane %v10585_v56, %v10395_v24  ;;  %v1090_v6 = vmul.f32 0.5, %v8728_v62  ;;  %v796_v7 = vadd.f32 %v10436_v58, %v664_v59  ;;  %v607_v8 = vmul.f32 %v373_v61, %v10410_v34 }
 0x101   : > { %v10657_v13 = vrot.slane %v261_v2, %v10384_v18  ;;  %v10660_v14 = vrot.slane %v261_v2, %v10386_v19  ;;  %v1270_v26 = vadd.f32 0.5, %v1150_v63  ;;  %v914_v27 = vmul.f32 0.5, %v794_v3 }
 0x102   : > { %v667_v56 = vmul.f32 %v373_v61, %v10428_v49  ;;  %8741 = vtanh.f32 %v854_v30  ;;  %v856_v31 = vmul.f32 0.5, %v736_v4  ;;  %v10673_v44 = vrot.slane %v261_v2, %v10393_v23 }
 0x103   : > { %v8730_v11 = vpop.eup %8729  ;;  %v10676_v32 = vrot.slane %v261_v2, %v10395_v24  ;;  %v1210_v38 = vadd.f32 0.5, %v1090_v6  ;;  %v916_v39 = vmul.f32 0.5, %v796_v7  ;;  %v739_v40 = vadd.f32 %v10408_v33, %v607_v8 }
 0x104   : > { %v10680_v41 = vrot.slane %v261_v2, %v10397_v25  ;;  %v1092_v42 = vmul.f32 0.5, %v8730_v11  ;;  %v10684_v46 = vrot.slane %v10670_v29, %v10382_v17  ;;  %v10688_v37 = vrot.slane %v10670_v29, %v10384_v18 }
 0x105   : > { %8462 = vmatmul.mubr.msk.bf16.vlgmr.msra.gmra.mrb[20].mxu0 %vm1453_vm2, %v10487_v53  ;;  %v1340_v57 = vpack.c.bf16 %v1270_v26, %v1210_v38  ;;  %8743 = vtanh.f32 %v914_v27  ;;  %v799_v48 = vadd.f32 %v10436_v58, %v667_v56  ;;  %v609_v50 = vmul.f32 %v381_v1, %v10410_v34 }
 0x106   : > { %8467 = vmatmul.mubr.msk.bf16.vlgmr.msra.gmra.mrb[20].mxu1 %vm1453_vm2, %v10487_v53  ;;  %1986 = vmatpush1.bf16.msra.mxu0 %v1498_v12  ;;  %v10654_v12 = vrot.slane %v261_v2, %v10382_v17  ;;  %8745 = vtanh.f32 %v856_v31  ;;  %v669_v52 = vmul.f32 %v381_v1, %v10428_v49  ;;  %v10697_v54 = vrot.slane %v10670_v29, %v10386_v19 }
 0x107   : > { %2069 = vmatpush1.bf16.msra.mxu1 %v1504_v15  ;;  %2151 = vmatprep.subr.bf16.mxu0 %v1513_v21  ;;  %v10663_v15 = vrot.slane %v261_v2, %v10388_v20  ;;  %v8732_v21 = vpop.eup %8731  ;;  %8747 = vtanh.f32 %v916_v39  ;;  %v859_v59 = vmul.f32 0.5, %v739_v40  ;;  %v606_v61 = vmul.f32 %v369_v5, %v10410_v34 }
 0x108   : > { %2234 = vmatprep.subr.bf16.mxu1 %v1519_v28  ;;  %1861 = vmatprep.mubr.bf16.mxu0 %v15755_v0  ;;  %v10667_v28 = vrot.slane %v261_v2, %v10391_v22  ;;  %v8734_v35 = vpop.eup %8733  ;;  %v1152_v45 = vmul.f32 0.5, %v8732_v21  ;;  %v10705_v62 = vrot.slane %v10670_v29, %v10388_v20  ;;  %v1212_v3 = vadd.f32 0.5, %v1092_v42 }
 0x109   : > { %1944 = vmatprep.mubr.bf16.mxu1 %v15755_v0  ;;  %v8736_v47 = vpop.eup %8735  ;;  %v1095_v51 = vmul.f32 0.5, %v8734_v35  ;;  %v666_v30 = vmul.f32 %v369_v5, %v10428_v49  ;;  %v10710_v4 = vand.u32 %v10472_v60, %v1340_v57  ;;  %v919_v6 = vmul.f32 0.5, %v799_v48 }
 0x10a   : > { %v8738_v55 = vpop.eup %8737  ;;  %v1272_v1 = vadd.f32 0.5, %v1152_v45  ;;  %v1155_v2 = vmul.f32 0.5, %v8736_v47  ;;  %v741_v7 = vadd.f32 %v10408_v33, %v609_v50  ;;  %v608_v8 = vmul.f32 %v377_v9, %v10410_v34 }
 0x10b   : > { %v8740_v63 = vpop.eup %8739  ;;  %v1215_v11 = vadd.f32 0.5, %v1095_v51  ;;  %v1097_v21 = vmul.f32 0.5, %v8738_v55  ;;  %v801_v26 = vadd.f32 %v10436_v58, %v669_v52  ;;  %v668_v27 = vmul.f32 %v377_v9, %v10428_v49 }
 0x10c   : > { %v1157_v56 = vmul.f32 0.5, %v8740_v63  ;;  %8749 = vtanh.f32 %v859_v59  ;;  %v738_v31 = vadd.f32 %v10408_v33, %v606_v61  ;;  %v671_v5 = vmul.f32 %v10654_v12, %v10428_v49  ;;  %v8742_v35 = vpop.eup %8741 }
 0x10d   : > { %8463 = vmatmul.mubr.msk.bf16.gmra.mrb[24].mxu0 %vm1453_vm2, %v10515_v43  ;;  %v1342_v38 = vpack.c.bf16 %v1272_v1, %v1212_v3  ;;  %v1275_v39 = vadd.f32 0.5, %v1155_v2  ;;  %v798_v40 = vadd.f32 %v10436_v58, %v666_v30  ;;  %v673_v42 = vmul.f32 %v10657_v13, %v10428_v49 }
 0x10e   : > { %8468 = vmatmul.mubr.msk.bf16.gmra.mrb[24].mxu1 %vm1453_vm2, %v10515_v43  ;;  %1871 = vmatprep.mubr.bf16.mxu0 %v15755_v0  ;;  %8751 = vtanh.f32 %v919_v6  ;;  %v861_v45 = vmul.f32 0.5, %v741_v7  ;;  %v740_v47 = vadd.f32 %v10408_v33, %v608_v8  ;;  %v611_v9 = vmul.f32 %v10654_v12, %v10410_v34 }
 0x10f   : > { %1954 = vmatprep.mubr.bf16.mxu1 %v15755_v0  ;;  %v1217_v57 = vadd.f32 0.5, %v1097_v21  ;;  %v921_v48 = vmul.f32 0.5, %v801_v26  ;;  %v800_v50 = vadd.f32 %v10436_v58, %v668_v27  ;;  %v613_v51 = vmul.f32 %v10657_v13, %v10410_v34  ;;  %v8744_v52 = vpop.eup %8743 }
 0x110   : > { %v1277_v55 = vadd.f32 0.5, %v1157_v56  ;;  %v1094_v59 = vmul.f32 0.5, %v8742_v35  ;;  %v858_v61 = vmul.f32 0.5, %v738_v31  ;;  %v803_v12 = vadd.f32 %v10436_v58, %v671_v5  ;;  %v8746_v63 = vpop.eup %8745 }
 0x111   : > { %v1345_v3 = vpack.c.bf16 %v1275_v39, %v1215_v11  ;;  %v918_v1 = vmul.f32 0.5, %v798_v40  ;;  %v805_v2 = vadd.f32 %v10436_v58, %v673_v42  ;;  %v670_v13 = vmul.f32 %v10660_v14, %v10428_v49  ;;  %v8748_v30 = vpop.eup %8747 }
 0x112   : > { %8753 = vtanh.f32 %v861_v45  ;;  %v860_v6 = vmul.f32 0.5, %v740_v47  ;;  %v743_v7 = vadd.f32 %v10408_v33, %v611_v9  ;;  %v610_v8 = vmul.f32 %v10660_v14, %v10410_v34 }
 0x113   : > { %v1516_v21 = vand.u32 %v10472_v60, %v1342_v38  ;;  %8755 = vtanh.f32 %v921_v48  ;;  %v920_v26 = vmul.f32 0.5, %v800_v50  ;;  %v745_v11 = vadd.f32 %v10408_v33, %v613_v51 }
 0x114   : > { %v1347_v27 = vpack.c.bf16 %v1277_v55, %v1217_v57  ;;  %v1154_v56 = vmul.f32 0.5, %v8744_v52  ;;  %8757 = vtanh.f32 %v858_v61  ;;  %v923_v31 = vmul.f32 0.5, %v803_v12 }
 0x115   : > { %8464 = vmatmul.mubr.msk.bf16.gmra.mrb[28].mxu0 %vm1453_vm2, %v10546_v10  ;;  %v1525_v5 = vand.u32 %v10472_v60, %v1345_v3  ;;  %8759 = vtanh.f32 %v918_v1  ;;  %v925_v35 = vmul.f32 0.5, %v805_v2  ;;  %v802_v39 = vadd.f32 %v10436_v58, %v670_v13 }
 0x116   : > { %8469 = vmatmul.mubr.msk.bf16.gmra.mrb[28].mxu1 %vm1453_vm2, %v10546_v10  ;;  %1881 = vmatprep.mubr.bf16.mxu0 %v15755_v0  ;;  %v8750_v40 = vpop.eup %8749  ;;  %8761 = vtanh.f32 %v860_v6  ;;  %v863_v42 = vmul.f32 0.5, %v743_v7  ;;  %v742_v14 = vadd.f32 %v10408_v33, %v610_v8  ;;  %v612_v38 = vmul.f32 %v10663_v15, %v10410_v34 }
 0x117   : > { %1964 = vmatprep.mubr.bf16.mxu1 %v15755_v0  ;;  %v1156_v45 = vmul.f32 0.5, %v8748_v30  ;;  %8763 = vtanh.f32 %v920_v26  ;;  %v865_v47 = vmul.f32 0.5, %v745_v11  ;;  %v672_v9 = vmul.f32 %v10663_v15, %v10428_v49  ;;  %v10778_v26 = vld [vmem:[%s10330_s18 + $0x28] sm:$0xff] }
 0x118   : > { %v8752_v57 = vpop.eup %8751  ;;  %v1531_v48 = vand.u32 %v10472_v60, %v1347_v27  ;;  %8765 = vtanh.f32 %v923_v31  ;;  %v675_v50 = vmul.f32 %v10667_v28, %v10428_v49  ;;  %v10760_v51 = vrot.slane %v10670_v29, %v10391_v22 }
 0x119   : > { %v1274_v52 = vadd.f32 0.5, %v1154_v56  ;;  %v1096_v15 = vmul.f32 0.5, %v8746_v63  ;;  %8767 = vtanh.f32 %v925_v35  ;;  %v922_v55 = vmul.f32 0.5, %v802_v39 }
 0x11a   : > { %8769 = vtanh.f32 %v863_v42  ;;  %v744_v61 = vadd.f32 %v10408_v33, %v612_v38  ;;  %v615_v12 = vmul.f32 %v10667_v28, %v10410_v34  ;;  %v1214_v3 = vadd.f32 0.5, %v1094_v59 }
 0x11b   : > { %v1276_v1 = vadd.f32 0.5, %v1156_v45  ;;  %8771 = vtanh.f32 %v865_v47  ;;  %v804_v63 = vadd.f32 %v10436_v58, %v672_v9  ;;  %v1159_v13 = vmul.f32 0.5, %v8752_v57 }
 0x11c   : > { %v8754_v2 = vpop.eup %8753  ;;  %v807_v30 = vadd.f32 %v10436_v58, %v675_v50  ;;  %v617_v6 = vmul.f32 %v10673_v44, %v10410_v34  ;;  %v10773_v7 = vrot.slane %v10670_v29, %v10393_v23  ;;  %v1344_v8 = vpack.c.bf16 %v1274_v52, %v1214_v3 }
 0x11d   : > { %8465 = vmatmul.mubr.msk.bf16.gmra.mrb[32].mxu0 %vm1453_vm2, %v10560_v16  ;;  %v8756_v28 = vpop.eup %8755  ;;  %8773 = vtanh.f32 %v922_v55  ;;  %v677_v59 = vmul.f32 %v10673_v44, %v10428_v49  ;;  %v1099_v27 = vmul.f32 0.5, %v8750_v40  ;;  %v864_v56 = vmul.f32 0.5, %v744_v61 }
 0x11e   : > { %8470 = vmatmul.mubr.msk.bf16.gmra.mrb[32].mxu1 %vm1453_vm2, %v10560_v16  ;;  %1891 = vmatprep.mubr.bf16.mxu0 %v15755_v0  ;;  %v8758_v11 = vpop.eup %8757  ;;  %v747_v31 = vadd.f32 %v10408_v33, %v615_v12  ;;  %v924_v39 = vmul.f32 0.5, %v804_v63  ;;  %v10785_v42 = vrot.slane %v10670_v29, %v10395_v24  ;;  %v10789_v44 = vrot.slane %v10670_v29, %v10397_v25 }
 0x11f   : > { %1974 = vmatprep.mubr.bf16.mxu1 %v15755_v0  ;;  %v10794_v40 = vadd.f32 0.5, %v1159_v13  ;;  %v927_v38 = vmul.f32 0.5, %v807_v30  ;;  %v749_v45 = vadd.f32 %v10408_v33, %v617_v6  ;;  %v10799_v47 = vrot.slane %v10778_v26, %v10382_v17 }
 0x120   : > { %v10803_v29 = vand.u32 %v10472_v60, %v1344_v8  ;;  %v1101_v57 = vmul.f32 0.5, %v8754_v2  ;;  %v809_v50 = vadd.f32 %v10436_v58, %v677_v59  ;;  %v1098_v3 = vmul.f32 0.5, %v8758_v11 }
 0x121   : > { %v869_v13 = vmul.f32 0.5, %v749_v45  ;;  %v674_v30 = vmul.f32 %v10676_v32, %v10428_v49 }
 0x122   : > { %v929_v59 = vmul.f32 0.5, %v809_v50 }
 0x123   : > { %v806_v45 = vadd.f32 %v10436_v58, %v674_v30 }
 0x125   : > { %8466 = vmatmul.mubr.msk.bf16.gmra.mrb[36].mxu0 %vm1453_vm2, %v10574_v36  ;;  %v926_v30 = vmul.f32 0.5, %v806_v45 }
 0x126   : > { %8471 = vmatmul.mubr.msk.bf16.gmra.mrb[36].mxu1 %vm1453_vm2, %v10574_v36  ;;  %2017 = vmatprep.mubr.bf16.mxu0 %v15755_v0 }
 0x127   : > { %2100 = vmatprep.mubr.bf16.mxu1 %v15755_v0 }
 0x12d   : > { %8472 = vmatmul.mubr.msk.bf16.vlgmr.msra.gmra.mrb[40].mxu0 %vm1453_vm2, %v10487_v53 }
 0x12e   : > { %8477 = vmatmul.mubr.msk.bf16.vlgmr.msra.gmra.mrb[40].mxu1 %vm1453_vm2, %v10487_v53  ;;  %2152 = vmatpush1.bf16.msra.mxu0 %v10710_v4  ;;  %v862_v4 = vmul.f32 0.5, %v742_v14 }
 0x12f   : > { %2235 = vmatpush1.bf16.msra.mxu1 %v1516_v21  ;;  %2317 = vmatprep.subr.bf16.mxu0 %v1525_v5  ;;  %v1216_v21 = vadd.f32 0.5, %v1096_v15  ;;  %v8760_v5 = vpop.eup %8759  ;;  %v1219_v15 = vadd.f32 0.5, %v1099_v27 }
 0x130   : > { %2400 = vmatprep.subr.bf16.mxu1 %v1531_v48  ;;  %2027 = vmatprep.mubr.bf16.mxu0 %v15755_v0  ;;  %8775 = vtanh.f32 %v862_v4  ;;  %v8762_v14 = vpop.eup %8761  ;;  %v1161_v48 = vmul.f32 0.5, %v8756_v28  ;;  %v1158_v55 = vmul.f32 0.5, %v8760_v5  ;;  %v867_v4 = vmul.f32 0.5, %v747_v31 }
 0x131   : > { %2110 = vmatprep.mubr.bf16.mxu1 %v15755_v0  ;;  %v1346_v35 = vpack.c.bf16 %v1276_v1, %v1216_v21  ;;  %v8764_v9 = vpop.eup %8763  ;;  %8777 = vtanh.f32 %v864_v56  ;;  %v614_v1 = vmul.f32 %v10676_v32, %v10410_v34  ;;  %v1349_v2 = vpack.c.bf16 %v10794_v40, %v1219_v15 }
 0x132   : > { %v8766_v52 = vpop.eup %8765  ;;  %8779 = vtanh.f32 %v924_v39  ;;  %v1221_v28 = vadd.f32 0.5, %v1101_v57  ;;  %v1281_v8 = vadd.f32 0.5, %v1161_v48  ;;  %v1160_v21 = vmul.f32 0.5, %v8764_v9 }
 0x133   : > { %v8768_v61 = vpop.eup %8767  ;;  %v10807_v12 = vand.u32 %v10472_v60, %v1346_v35  ;;  %8781 = vtanh.f32 %v927_v38  ;;  %v1278_v27 = vadd.f32 0.5, %v1158_v55  ;;  %v1163_v56 = vmul.f32 0.5, %v8766_v52 }
 0x134   : > { %v8770_v63 = vpop.eup %8769  ;;  %v1165_v11 = vmul.f32 0.5, %v8768_v61  ;;  %8783 = vtanh.f32 %v867_v4  ;;  %v1218_v5 = vadd.f32 0.5, %v1098_v3  ;;  %v1100_v35 = vmul.f32 0.5, %v8762_v14 }
 0x135   : > { %8473 = vmatmul.mubr.msk.bf16.gmra.mrb[44].mxu0 %vm1453_vm2, %v10515_v43  ;;  %v8772_v6 = vpop.eup %8771  ;;  %v1103_v39 = vmul.f32 0.5, %v8770_v63  ;;  %v746_v40 = vadd.f32 %v10408_v33, %v614_v1  ;;  %8785 = vtanh.f32 %v869_v13  ;;  %v616_v9 = vmul.f32 %v10680_v41, %v10410_v34 }
 0x136   : > { %8478 = vmatmul.mubr.msk.bf16.gmra.mrb[44].mxu1 %vm1453_vm2, %v10515_v43  ;;  %2037 = vmatprep.mubr.bf16.mxu0 %v15755_v0  ;;  %v8774_v31 = vpop.eup %8773  ;;  %v1105_v32 = vmul.f32 0.5, %v8772_v6  ;;  %v1351_v57 = vpack.c.bf16 %v1281_v8, %v1221_v28  ;;  %v1280_v14 = vadd.f32 0.5, %v1160_v21  ;;  %8787 = vtanh.f32 %v929_v59 }
 0x137   : > { %2120 = vmatprep.mubr.bf16.mxu1 %v15755_v0  ;;  %v676_v48 = vmul.f32 %v10680_v41, %v10428_v49  ;;  %v1348_v50 = vpack.c.bf16 %v1278_v27, %v1218_v5  ;;  %v1283_v52 = vadd.f32 0.5, %v1163_v56  ;;  %v1285_v15 = vadd.f32 0.5, %v1165_v11 }
 0x138   : > { %v1162_v55 = vmul.f32 0.5, %v8774_v31  ;;  %v1220_v4 = vadd.f32 0.5, %v1100_v35  ;;  %v1223_v61 = vadd.f32 0.5, %v1103_v39  ;;  %v866_v1 = vmul.f32 0.5, %v746_v40 }
 0x139   : > { %v1225_v13 = vadd.f32 0.5, %v1105_v32  ;;  %v748_v6 = vadd.f32 %v10408_v33, %v616_v9  ;;  %v619_v28 = vmul.f32 %v10684_v46, %v10410_v34  ;;  %v10830_v21 = vand.u32 %v10472_v60, %v1349_v2 }
 0x13a   : > { %v8776_v38 = vpop.eup %8775  ;;  %v10833_v41 = vand.u32 %v10472_v60, %v1351_v57  ;;  %v1350_v59 = vpack.c.bf16 %v1280_v14, %v1220_v4  ;;  %v808_v27 = vadd.f32 %v10436_v58, %v676_v48  ;;  %v10837_v11 = vand.u32 %v10472_v60, %v1348_v50 }
 0x13b   : > { %v1102_v3 = vmul.f32 0.5, %v8776_v38  ;;  %v8778_v63 = vpop.eup %8777  ;;  %v1353_v31 = vpack.c.bf16 %v1283_v52, %v1223_v61  ;;  %v1355_v5 = vpack.c.bf16 %v1285_v15, %v1225_v13  ;;  %v1282_v35 = vadd.f32 0.5, %v1162_v55 }
 0x13c   : > { %v8780_v8 = vpop.eup %8779  ;;  %v1104_v40 = vmul.f32 0.5, %v8778_v63  ;;  %8789 = vtanh.f32 %v866_v1  ;;  %v679_v2 = vmul.f32 %v10684_v46, %v10428_v49  ;;  %v868_v32 = vmul.f32 0.5, %v748_v6 }
 0x13d   : > { %8474 = vmatmul.mubr.msk.bf16.gmra.mrb[48].mxu0 %vm1453_vm2, %v10546_v10  ;;  %v8782_v56 = vpop.eup %8781  ;;  %v1222_v39 = vadd.f32 0.5, %v1102_v3  ;;  %8791 = vtanh.f32 %v926_v30  ;;  %v751_v45 = vadd.f32 %v10408_v33, %v619_v28  ;;  %v681_v9 = vmul.f32 %v10688_v37, %v10428_v49 }
 0x13e   : > { %8479 = vmatmul.mubr.msk.bf16.gmra.mrb[48].mxu1 %vm1453_vm2, %v10546_v10  ;;  %2047 = vmatprep.mubr.bf16.mxu0 %v15755_v0  ;;  %v8784_v38 = vpop.eup %8783  ;;  %v10851_v57 = vand.u32 %v10472_v60, %v1350_v59  ;;  %v1164_v14 = vmul.f32 0.5, %v8780_v8  ;;  %v1167_v46 = vmul.f32 0.5, %v8782_v56  ;;  %v928_v48 = vmul.f32 0.5, %v808_v27 }
 0x13f   : > { %2130 = vmatprep.mubr.bf16.mxu1 %v15755_v0  ;;  %v8786_v50 = vpop.eup %8785  ;;  %v10854_v52 = vand.u32 %v10472_v60, %v1353_v31  ;;  %v10857_v15 = vand.u32 %v10472_v60, %v1355_v5  ;;  %v1352_v55 = vpack.c.bf16 %v1282_v35, %v1222_v39  ;;  %v621_v4 = vmul.f32 %v10688_v37, %v10410_v34 }
 0x140   : > { %v8788_v61 = vpop.eup %8787  ;;  %v1224_v3 = vadd.f32 0.5, %v1104_v40  ;;  %v1107_v1 = vmul.f32 0.5, %v8784_v38  ;;  %v811_v63 = vadd.f32 %v10436_v58, %v679_v2  ;;  %v618_v13 = vmul.f32 %v10697_v54, %v10410_v34 }
 0x141   : > { %8793 = vtanh.f32 %v868_v32  ;;  %v871_v30 = vmul.f32 0.5, %v751_v45  ;;  %v813_v6 = vadd.f32 %v10436_v58, %v681_v9  ;;  %v678_v28 = vmul.f32 %v10697_v54, %v10428_v49 }
 0x142   : > { %v1284_v8 = vadd.f32 0.5, %v1164_v14  ;;  %v1287_v59 = vadd.f32 0.5, %v1167_v46  ;;  %8795 = vtanh.f32 %v928_v48  ;;  %v680_v37 = vmul.f32 %v10705_v62, %v10428_v49 }
 0x143   : > { %v1109_v27 = vmul.f32 0.5, %v8786_v50  ;;  %v1169_v56 = vmul.f32 0.5, %v8788_v61  ;;  %v753_v31 = vadd.f32 %v10408_v33, %v621_v4  ;;  %v683_v5 = vmul.f32 %v10760_v51, %v10428_v49 }
 0x144   : > { %v1227_v35 = vadd.f32 0.5, %v1107_v1  ;;  %v931_v39 = vmul.f32 0.5, %v811_v63  ;;  %v750_v54 = vadd.f32 %v10408_v33, %v618_v13  ;;  %v620_v40 = vmul.f32 %v10705_v62, %v10410_v34 }
 0x145   : > { %8475 = vmatmul.mubr.msk.bf16.gmra.mrb[52].mxu0 %vm1453_vm2, %v10560_v16  ;;  %8797 = vtanh.f32 %v871_v30  ;;  %v933_v2 = vmul.f32 0.5, %v813_v6  ;;  %v810_v38 = vadd.f32 %v10436_v58, %v678_v28  ;;  %v623_v32 = vmul.f32 %v10760_v51, %v10410_v34 }
 0x146   : > { %8480 = vmatmul.mubr.msk.bf16.gmra.mrb[52].mxu1 %vm1453_vm2, %v10560_v16  ;;  %2057 = vmatprep.mubr.bf16.mxu0 %v15755_v0  ;;  %v8790_v45 = vpop.eup %8789  ;;  %v10885_v9 = vand.u32 %v10472_v60, %v1352_v55  ;;  %v1354_v14 = vpack.c.bf16 %v1284_v8, %v1224_v3  ;;  %v1357_v62 = vpack.c.bf16 %v1287_v59, %v1227_v35  ;;  %v1229_v50 = vadd.f32 0.5, %v1109_v27 }
 0x147   : > { %2140 = vmatprep.mubr.bf16.mxu1 %v15755_v0  ;;  %v812_v46 = vadd.f32 %v10436_v58, %v680_v37  ;;  %v8792_v48 = vpop.eup %8791  ;;  %v1289_v4 = vadd.f32 0.5, %v1169_v56  ;;  %v873_v61 = vmul.f32 0.5, %v753_v31  ;;  %v815_v1 = vadd.f32 %v10436_v58, %v683_v5 }
 0x148   : > { %8799 = vtanh.f32 %v931_v39  ;;  %v870_v63 = vmul.f32 0.5, %v750_v54  ;;  %v752_v51 = vadd.f32 %v10408_v33, %v620_v40  ;;  %v685_v13 = vmul.f32 %v10773_v7, %v10428_v49 }
 0x149   : > { %v1106_v30 = vmul.f32 0.5, %v8790_v45  ;;  %8801 = vtanh.f32 %v933_v2  ;;  %v930_v55 = vmul.f32 0.5, %v810_v38  ;;  %v755_v3 = vadd.f32 %v10408_v33, %v623_v32 }
 0x14a   : > { %v10894_v6 = vand.u32 %v10472_v60, %v1354_v14  ;;  %v10897_v28 = vand.u32 %v10472_v60, %v1357_v62  ;;  %v1166_v8 = vmul.f32 0.5, %v8792_v48  ;;  %v932_v59 = vmul.f32 0.5, %v812_v46 }
 0x14b   : > { %v8794_v37 = vpop.eup %8793  ;;  %v1359_v27 = vpack.c.bf16 %v1289_v4, %v1229_v50  ;;  %8803 = vtanh.f32 %v873_v61  ;;  %v935_v56 = vmul.f32 0.5, %v815_v1  ;;  %v625_v31 = vmul.f32 %v10773_v7, %v10410_v34 }
 0x14c   : > { %v8796_v5 = vpop.eup %8795  ;;  %8805 = vtanh.f32 %v870_v63  ;;  %v872_v35 = vmul.f32 0.5, %v752_v51  ;;  %v817_v39 = vadd.f32 %v10436_v58, %v685_v13  ;;  %v622_v54 = vmul.f32 %v10785_v42, %v10410_v34 }
 0x14d   : > { %8476 = vmatmul.mubr.msk.bf16.gmra.mrb[56].mxu0 %vm1453_vm2, %v10574_v36  ;;  %v10909_v40 = vadd.f32 0.5, %v1106_v30  ;;  %8807 = vtanh.f32 %v930_v55  ;;  %v875_v7 = vmul.f32 0.5, %v755_v3  ;;  %v682_v2 = vmul.f32 %v10785_v42, %v10428_v49 }
 0x14e   : > { %8481 = vmatmul.mubr.msk.bf16.gmra.mrb[56].mxu1 %vm1453_vm2, %v10574_v36  ;;  %2183 = vmatprep.mubr.bf16.mxu0 %v15755_v0  ;;  %v10915_v38 = vadd.f32 0.5, %v1166_v8  ;;  %v1108_v32 = vmul.f32 0.5, %v8794_v37  ;;  %8809 = vtanh.f32 %v932_v59  ;;  %v684_v45 = vmul.f32 %v10789_v44, %v10428_v49 }
 0x14f   : > { %2266 = vmatprep.mubr.bf16.mxu1 %v15755_v0  ;;  %v8798_v14 = vpop.eup %8797  ;;  %8811 = vtanh.f32 %v935_v56  ;;  %v757_v42 = vadd.f32 %v10408_v33, %v625_v31  ;;  %v754_v62 = vadd.f32 %v10408_v33, %v622_v54  ;;  %v624_v46 = vmul.f32 %v10789_v44, %v10410_v34 }
 0x150   : > { %8813 = vtanh.f32 %v872_v35  ;;  %v627_v48 = vmul.f32 %v10799_v47, %v10410_v34  ;;  %v461_v50 = vrot.slane %v10778_v26, %v10384_v18  ;;  %v10934_v61 = vand.u32 %v10472_v60, %v1359_v27 }
 0x151   : > { %8815 = vtanh.f32 %v875_v7  ;;  %v1356_v1 = vpack.c.bf16 %v10915_v38, %v10909_v40  ;;  %v1111_v63 = vmul.f32 0.5, %v8798_v14  ;;  %v816_v51 = vadd.f32 %v10436_v58, %v684_v45 }
 0x152   : > { %v8800_v4 = vpop.eup %8799  ;;  %v877_v30 = vmul.f32 0.5, %v757_v42  ;;  %v10945_v3 = vadd.f32 0.5, %v1108_v32  ;;  %v874_v8 = vmul.f32 0.5, %v754_v62  ;;  %v756_v59 = vadd.f32 %v10408_v33, %v624_v46 }
 0x153   : > { %v8802_v44 = vpop.eup %8801  ;;  %v759_v56 = vadd.f32 %v10408_v33, %v627_v48  ;;  %v629_v31 = vmul.f32 %v461_v50, %v10410_v34  ;;  %v10956_v54 = vadd.f32 0.5, %v1111_v63 }
 0x154   : > { %v1173_v7 = vmul.f32 0.5, %v8802_v44 }
 0x155   : > { %8482 = vmatmul.mubr.msk.bf16.vlgmr.msra.gmra.mrb[60].mxu0 %vm1453_vm2, %v10487_v53  ;;  %v8804_v37 = vpop.eup %8803  ;;  %v761_v48 = vadd.f32 %v10408_v33, %v629_v31 }
 0x156   : > { %8487 = vmatmul.mubr.msk.bf16.vlgmr.msra.gmra.mrb[60].mxu1 %vm1453_vm2, %v10487_v53  ;;  %2318 = vmatpush1.bf16.msra.mxu0 %v10803_v29  ;;  %v1168_v29 = vmul.f32 0.5, %v8796_v5  ;;  %v449_v5 = vrot.slane %v10778_v26, %v10386_v19  ;;  %v8806_v35 = vpop.eup %8805 }
 0x157   : > { %2401 = vmatpush1.bf16.msra.mxu1 %v10807_v12  ;;  %2483 = vmatprep.subr.bf16.mxu0 %v10830_v21  ;;  %v687_v12 = vmul.f32 %v10799_v47, %v10428_v49  ;;  %v937_v21 = vmul.f32 0.5, %v817_v39  ;;  %v689_v47 = vmul.f32 %v461_v50, %v10428_v49  ;;  %v1171_v39 = vmul.f32 0.5, %v8800_v4  ;;  %v8808_v32 = vpop.eup %8807 }
 0x158   : > { %2566 = vmatprep.subr.bf16.mxu1 %v10833_v41  ;;  %2193 = vmatprep.mubr.bf16.mxu0 %v15755_v0  ;;  %v814_v41 = vadd.f32 %v10436_v58, %v682_v2  ;;  %v10939_v13 = vadd.f32 0.5, %v1168_v29  ;;  %v936_v2 = vmul.f32 0.5, %v816_v51  ;;  %v8810_v42 = vpop.eup %8809  ;;  %v686_v62 = vmul.f32 %v449_v5, %v10428_v49 }
 0x159   : > { %2276 = vmatprep.mubr.bf16.mxu1 %v15755_v0  ;;  %v819_v55 = vadd.f32 %v10436_v58, %v687_v12  ;;  %8817 = vtanh.f32 %v937_v21  ;;  %v821_v29 = vadd.f32 %v10436_v58, %v689_v47  ;;  %v1113_v12 = vmul.f32 0.5, %v8804_v37  ;;  %v8812_v46 = vpop.eup %8811 }
 0x15a   : > { %v934_v27 = vmul.f32 0.5, %v814_v41  ;;  %v1358_v45 = vpack.c.bf16 %v10939_v13, %v10945_v3  ;;  %8819 = vtanh.f32 %v877_v30  ;;  %v876_v21 = vmul.f32 0.5, %v756_v59  ;;  %v8814_v4 = vpop.eup %8813 }
 0x15b   : > { %v939_v14 = vmul.f32 0.5, %v819_v55  ;;  %8821 = vtanh.f32 %v874_v8  ;;  %v879_v41 = vmul.f32 0.5, %v759_v56  ;;  %v626_v50 = vmul.f32 %v449_v5, %v10410_v34  ;;  %v8816_v13 = vpop.eup %8815 }
 0x15c   : > { %8823 = vtanh.f32 %v934_v27  ;;  %v1291_v63 = vadd.f32 0.5, %v1171_v39  ;;  %v1293_v51 = vadd.f32 0.5, %v1173_v7  ;;  %v1170_v44 = vmul.f32 0.5, %v8808_v32 }
 0x15d   : > { %8483 = vmatmul.mubr.msk.bf16.gmra.mrb[64].mxu0 %vm1453_vm2, %v10515_v43  ;;  %8825 = vtanh.f32 %v936_v2  ;;  %v1172_v30 = vmul.f32 0.5, %v8810_v42  ;;  %v941_v55 = vmul.f32 0.5, %v821_v29  ;;  %v457_v47 = vrot.slane %v10778_v26, %v10388_v20 }
 0x15e   : > { %8488 = vmatmul.mubr.msk.bf16.gmra.mrb[64].mxu1 %vm1453_vm2, %v10515_v43  ;;  %2203 = vmatprep.mubr.bf16.mxu0 %v15755_v0  ;;  %8827 = vtanh.f32 %v939_v14  ;;  %v1110_v3 = vmul.f32 0.5, %v8806_v35  ;;  %v1175_v8 = vmul.f32 0.5, %v8812_v46  ;;  %v818_v59 = vadd.f32 %v10436_v58, %v686_v62 }
 0x15f   : > { %2286 = vmatprep.mubr.bf16.mxu1 %v15755_v0  ;;  %8829 = vtanh.f32 %v876_v21  ;;  %v1112_v37 = vmul.f32 0.5, %v8814_v4  ;;  %v881_v27 = vmul.f32 0.5, %v761_v48  ;;  %v758_v56 = vadd.f32 %v10408_v33, %v626_v50 }
 0x160   : > { %8831 = vtanh.f32 %v879_v41  ;;  %v1361_v5 = vpack.c.bf16 %v1291_v63, %v10956_v54  ;;  %v1233_v35 = vadd.f32 0.5, %v1113_v12  ;;  %v1290_v39 = vadd.f32 0.5, %v1170_v44 }
 0x161   : > { %v1115_v7 = vmul.f32 0.5, %v8816_v13  ;;  %v1292_v2 = vadd.f32 0.5, %v1172_v30  ;;  %8833 = vtanh.f32 %v941_v55  ;;  %v628_v32 = vmul.f32 %v457_v47, %v10410_v34 }
 0x162   : > { %v469_v14 = vrot.slane %v10778_v26, %v10391_v22  ;;  %v1363_v29 = vpack.c.bf16 %v1293_v51, %v1233_v35  ;;  %v1230_v42 = vadd.f32 0.5, %v1110_v3  ;;  %v1295_v21 = vadd.f32 0.5, %v1175_v8 }
 0x163   : > { %v8818_v31 = vpop.eup %8817  ;;  %v938_v62 = vmul.f32 0.5, %v818_v59  ;;  %v1232_v41 = vadd.f32 0.5, %v1112_v37  ;;  %8835 = vtanh.f32 %v881_v27  ;;  %v878_v48 = vmul.f32 0.5, %v758_v56 }
 0x164   : > { %v8820_v46 = vpop.eup %8819  ;;  %v688_v54 = vmul.f32 %v457_v47, %v10428_v49  ;;  %v10983_v50 = vand.u32 %v10472_v60, %v1356_v1  ;;  %v1360_v4 = vpack.c.bf16 %v1290_v39, %v1230_v42  ;;  %v1235_v63 = vadd.f32 0.5, %v1115_v7 }
 0x165   : > { %8484 = vmatmul.mubr.msk.bf16.gmra.mrb[68].mxu0 %vm1453_vm2, %v10546_v10  ;;  %v8822_v12 = vpop.eup %8821  ;;  %v1177_v44 = vmul.f32 0.5, %v8818_v31  ;;  %v10986_v13 = vand.u32 %v10472_v60, %v1358_v45  ;;  %v1362_v30 = vpack.c.bf16 %v1292_v2, %v1232_v41  ;;  %v760_v55 = vadd.f32 %v10408_v33, %v628_v32 }
 0x166   : > { %8489 = vmatmul.mubr.msk.bf16.gmra.mrb[68].mxu1 %vm1453_vm2, %v10546_v10  ;;  %2213 = vmatprep.mubr.bf16.mxu0 %v15755_v0  ;;  %v8824_v51 = vpop.eup %8823  ;;  %v631_v3 = vmul.f32 %v469_v14, %v10410_v34  ;;  %v10993_v40 = vand.u32 %v10472_v60, %v1361_v5  ;;  %v1365_v38 = vpack.c.bf16 %v1295_v21, %v1235_v63  ;;  %v1117_v1 = vmul.f32 0.5, %v8820_v46 }
 0x167   : > { %2296 = vmatprep.mubr.bf16.mxu1 %v15755_v0  ;;  %v8826_v47 = vpop.eup %8825  ;;  %8837 = vtanh.f32 %v938_v62  ;;  %v10999_v45 = vand.u32 %v10472_v60, %v1363_v29  ;;  %v820_v59 = vadd.f32 %v10436_v58, %v688_v54  ;;  %v691_v37 = vmul.f32 %v469_v14, %v10428_v49 }
 0x168   : > { %v8828_v8 = vpop.eup %8827  ;;  %8839 = vtanh.f32 %v878_v48  ;;  %v11005_v56 = vand.u32 %v10472_v60, %v1360_v4  ;;  %v1297_v31 = vadd.f32 0.5, %v1177_v44  ;;  %v1114_v5 = vmul.f32 0.5, %v8822_v12 }
 0x169   : > { %v8830_v27 = vpop.eup %8829  ;;  %v477_v35 = vrot.slane %v10778_v26, %v10393_v23  ;;  %v11010_v7 = vand.u32 %v10472_v60, %v1362_v30  ;;  %v1174_v2 = vmul.f32 0.5, %v8824_v51  ;;  %v880_v32 = vmul.f32 0.5, %v760_v55 }
 0x16a   : > { %v8832_v39 = vpop.eup %8831  ;;  %v763_v29 = vadd.f32 %v10408_v33, %v631_v3  ;;  %v11014_v14 = vand.u32 %v10472_v60, %v1365_v38  ;;  %v1237_v42 = vadd.f32 0.5, %v1117_v1  ;;  %v1176_v21 = vmul.f32 0.5, %v8826_v47 }
 0x16b   : > { %v1179_v62 = vmul.f32 0.5, %v8828_v8  ;;  %v8834_v46 = vpop.eup %8833  ;;  %v1116_v41 = vmul.f32 0.5, %v8830_v27  ;;  %v940_v48 = vmul.f32 0.5, %v820_v59  ;;  %v823_v54 = vadd.f32 %v10436_v58, %v691_v37 }
 0x16c   : > { %v465_v12 = vrot.slane %v10778_v26, %v10395_v24  ;;  %v1367_v4 = vpack.c.bf16 %v1297_v31, %v1237_v42  ;;  %v1234_v63 = vadd.f32 0.5, %v1114_v5  ;;  %v1119_v44 = vmul.f32 0.5, %v8832_v39 }
 0x16d   : > { %8485 = vmatmul.mubr.msk.bf16.gmra.mrb[72].mxu0 %vm1453_vm2, %v10560_v16  ;;  %v633_v51 = vmul.f32 %v477_v35, %v10410_v34  ;;  %v8836_v30 = vpop.eup %8835  ;;  %v1294_v55 = vadd.f32 0.5, %v1174_v2  ;;  %8841 = vtanh.f32 %v880_v32  ;;  %v883_v3 = vmul.f32 0.5, %v763_v29 }
 0x16e   : > { %8490 = vmatmul.mubr.msk.bf16.gmra.mrb[72].mxu1 %vm1453_vm2, %v10560_v16  ;;  %2223 = vmatprep.mubr.bf16.mxu0 %v15755_v0  ;;  %v693_v47 = vmul.f32 %v477_v35, %v10428_v49  ;;  %v1296_v38 = vadd.f32 0.5, %v1176_v21  ;;  %v1299_v1 = vadd.f32 0.5, %v1179_v62  ;;  %v1181_v8 = vmul.f32 0.5, %v8834_v46 }
 0x16f   : > { %2306 = vmatprep.mubr.bf16.mxu1 %v15755_v0  ;;  %v473_v59 = vrot.slane %v10778_v26, %v10397_v25  ;;  %v1236_v37 = vadd.f32 0.5, %v1116_v41  ;;  %8843 = vtanh.f32 %v940_v48  ;;  %v943_v27 = vmul.f32 0.5, %v823_v54  ;;  %v11033_v26 = vld [vmem:[%s10330_s18 + $0x30] sm:$0xff] }
 0x170   : > { %v630_v31 = vmul.f32 %v465_v12, %v10410_v34  ;;  %v1239_v35 = vadd.f32 0.5, %v1119_v44  ;;  %v1121_v39 = vmul.f32 0.5, %v8836_v30  ;;  %v765_v2 = vadd.f32 %v10408_v33, %v633_v51 }
 0x171   : > { %v8838_v5 = vpop.eup %8837  ;;  %v690_v32 = vmul.f32 %v465_v12, %v10428_v49  ;;  %v11036_v42 = vand.u32 %v10472_v60, %v1367_v4  ;;  %v1364_v21 = vpack.c.bf16 %v1294_v55, %v1234_v63  ;;  %8845 = vtanh.f32 %v883_v3 }
 0x172   : > { %v8840_v29 = vpop.eup %8839  ;;  %v825_v62 = vadd.f32 %v10436_v58, %v693_v47  ;;  %v1366_v46 = vpack.c.bf16 %v1296_v38, %v1236_v37  ;;  %v1369_v41 = vpack.c.bf16 %v1299_v1, %v1239_v35  ;;  %v1301_v48 = vadd.f32 0.5, %v1181_v8 }
 0x173   : > { %v632_v54 = vmul.f32 %v473_v59, %v10410_v34  ;;  %v1178_v44 = vmul.f32 0.5, %v8838_v5  ;;  %8847 = vtanh.f32 %v943_v27  ;;  %v762_v51 = vadd.f32 %v10408_v33, %v630_v31 }
 0x174   : > { %v485_v12 = vrot.slane %v11033_v26, %v10382_v17  ;;  %v1241_v30 = vadd.f32 0.5, %v1121_v39  ;;  %v885_v4 = vmul.f32 0.5, %v765_v2  ;;  %v822_v63 = vadd.f32 %v10436_v58, %v690_v32 }
 0x175   : > { %8486 = vmatmul.mubr.msk.bf16.gmra.mrb[76].mxu0 %vm1453_vm2, %v10574_v36  ;;  %v11045_v55 = vand.u32 %v10472_v60, %v1364_v21  ;;  %v945_v3 = vmul.f32 0.5, %v825_v62  ;;  %v692_v47 = vmul.f32 %v473_v59, %v10428_v49  ;;  %v493_v38 = vrot.slane %v11033_v26, %v10384_v18 }
 0x176   : > { %8491 = vmatmul.mubr.msk.bf16.gmra.mrb[76].mxu1 %vm1453_vm2, %v10574_v36  ;;  %2349 = vmatprep.mubr.bf16.mxu0 %v15755_v0  ;;  %v11053_v1 = vand.u32 %v10472_v60, %v1366_v46  ;;  %v11056_v8 = vand.u32 %v10472_v60, %v1369_v41  ;;  %v1371_v37 = vpack.c.bf16 %v1301_v48, %v1241_v30  ;;  %v1298_v59 = vadd.f32 0.5, %v1178_v44 }
 0x177   : > { %2432 = vmatprep.mubr.bf16.mxu1 %v15755_v0  ;;  %v1118_v0 = vmul.f32 0.5, %v8840_v29  ;;  %v764_v27 = vadd.f32 %v10408_v33, %v632_v54  ;;  %v8842_v31 = vpop.eup %8841  ;;  %v882_v5 = vmul.f32 0.5, %v762_v51  ;;  %v635_v35 = vmul.f32 %v485_v12, %v10410_v34 }
 0x178   : > { %v481_v39 = vrot.slane %v11033_v26, %v10386_v19  ;;  %8849 = vtanh.f32 %v885_v4  ;;  %v942_v32 = vmul.f32 0.5, %v822_v63  ;;  %v695_v29 = vmul.f32 %v485_v12, %v10428_v49 }
 0x179   : > { %v1238_v2 = vadd.f32 0.5, %v1118_v0  ;;  %v8844_v21 = vpop.eup %8843  ;;  %8851 = vtanh.f32 %v945_v3  ;;  %v824_v62 = vadd.f32 %v10436_v58, %v692_v47  ;;  %v637_v46 = vmul.f32 %v493_v38, %v10410_v34 }
 0x17a   : > { %v11076_v0 = vand.u32 %v10472_v60, %v1371_v37  ;;  %v884_v41 = vmul.f32 0.5, %v764_v27  ;;  %v697_v48 = vmul.f32 %v493_v38, %v10428_v49  ;;  %8853 = vtanh.f32 %v882_v5 }
 0x17b   : > { %v1368_v54 = vpack.c.bf16 %v1298_v59, %v1238_v2  ;;  %v767_v44 = vadd.f32 %v10408_v33, %v635_v35  ;;  %v634_v51 = vmul.f32 %v481_v39, %v10410_v34  ;;  %v1180_v12 = vmul.f32 0.5, %v8844_v21 }
 0x17c   : > { %8855 = vtanh.f32 %v942_v32  ;;  %v827_v30 = vadd.f32 %v10436_v58, %v695_v29  ;;  %v694_v4 = vmul.f32 %v481_v39, %v10428_v49  ;;  %v944_v3 = vmul.f32 0.5, %v824_v62 }
 0x17d   : > { %8492 = vmatmul.mubr.msk.bf16.vlgmr.msra.gmra.mrb[80].mxu0 %vm1453_vm2, %v10487_v53  ;;  %v769_v47 = vadd.f32 %v10408_v33, %v637_v46  ;;  %v501_v38 = vrot.slane %v11033_v26, %v10391_v22  ;;  %8857 = vtanh.f32 %v884_v41  ;;  %v829_v59 = vadd.f32 %v10436_v58, %v697_v48 }
 0x17e   : > { %8497 = vmatmul.mubr.msk.bf16.vlgmr.msra.gmra.mrb[80].mxu1 %vm1453_vm2, %v10487_v53  ;;  %2484 = vmatpush1.bf16.msra.mxu0 %v10837_v11  ;;  %v15772_v11 = vmov 0   ;;  %v11094_v5 = vand.u32 %v10472_v60, %v1368_v54  ;;  %v887_v35 = vmul.f32 0.5, %v767_v44  ;;  %v766_v39 = vadd.f32 %v10408_v33, %v634_v51 }
 0x17f   : > { %2567 = vmatpush1.bf16.msra.mxu1 %v10851_v57  ;;  %2649 = vmatprep.subr.bf16.mxu0 %v10854_v52  ;;  %v489_v57 = vrot.slane %v11033_v26, %v10388_v20  ;;  %v1120_v52 = vmul.f32 0.5, %v8842_v31  ;;  %v1300_v2 = vadd.f32 0.5, %v1180_v12  ;;  %v947_v29 = vmul.f32 0.5, %v827_v30 }
 0x180   : > { %2732 = vmatprep.subr.bf16.mxu1 %v10857_v15  ;;  %2359 = vmatprep.mubr.bf16.mxu0 %v15772_v11  ;;  %v8846_v15 = vpop.eup %8845  ;;  %v826_v21 = vadd.f32 %v10436_v58, %v694_v4  ;;  %v889_v62 = vmul.f32 0.5, %v769_v47  ;;  %v509_v41 = vrot.slane %v11033_v26, %v10393_v23  ;;  %8859 = vtanh.f32 %v944_v3 }
 0x181   : > { %2442 = vmatprep.mubr.bf16.mxu1 %v15772_v11  ;;  %v8848_v63 = vpop.eup %8847  ;;  %v636_v37 = vmul.f32 %v489_v57, %v10410_v34  ;;  %v1240_v27 = vadd.f32 0.5, %v1120_v52  ;;  %v1123_v31 = vmul.f32 0.5, %v8846_v15  ;;  %v696_v22 = vmul.f32 %v489_v57, %v10428_v49 }
 0x182   : > { %v1183_v32 = vmul.f32 0.5, %v8848_v63  ;;  %v639_v52 = vmul.f32 %v501_v38, %v10410_v34  ;;  %v8850_v48 = vpop.eup %8849  ;;  %v949_v15 = vmul.f32 0.5, %v829_v59  ;;  %v699_v57 = vmul.f32 %v501_v38, %v10428_v49 }
 0x183   : > { %v768_v46 = vadd.f32 %v10408_v33, %v636_v37  ;;  %v497_v54 = vrot.slane %v11033_v26, %v10395_v24  ;;  %v8852_v44 = vpop.eup %8851  ;;  %8861 = vtanh.f32 %v887_v35  ;;  %v886_v51 = vmul.f32 0.5, %v766_v39 }
 0x184   : > { %v828_v12 = vadd.f32 %v10436_v58, %v696_v22  ;;  %v701_v30 = vmul.f32 %v509_v41, %v10428_v49  ;;  %v1370_v4 = vpack.c.bf16 %v1300_v2, %v1240_v27  ;;  %8863 = vtanh.f32 %v947_v29  ;;  %v11110_v47 = vpop.eup %8853  ;;  %v265_v29 = vld [vmem:[%s10330_s18 + $0x38] sm:$0xf]  ;;  %s8609_s18 = smul.u32 4800, %s10326_s11 }
 0x185   : > { %8493 = vmatmul.mubr.msk.bf16.gmra.mrb[84].mxu0 %vm1453_vm2, %v10515_v43  ;;  %v946_v63 = vmul.f32 0.5, %v826_v21  ;;  %v698_v23 = vmul.f32 %v497_v54, %v10428_v49  ;;  %8865 = vtanh.f32 %v889_v62  ;;  %v888_v3 = vmul.f32 0.5, %v768_v46  ;;  %s8606_s11 = smul.u32 (%p16290_p8), 480, %s10181_s21 }
 0x186   : > { %8498 = vmatmul.mubr.msk.bf16.gmra.mrb[84].mxu1 %vm1453_vm2, %v10515_v43  ;;  %2369 = vmatprep.mubr.bf16.mxu0 %v15772_v11  ;;  %v771_v37 = vadd.f32 %v10408_v33, %v639_v52  ;;  %v641_v24 = vmul.f32 %v509_v41, %v10410_v34  ;;  %v8856_v38 = vpop.eup %8855  ;;  %8867 = vtanh.f32 %v949_v15  ;;  %v831_v27 = vadd.f32 %v10436_v58, %v699_v57  ;;  %s11342_s16 = scalar_lea.vmem [#allocation4], %s8609_s18 }
 0x187   : > { %2452 = vmatprep.mubr.bf16.mxu1 %v15772_v11  ;;  %v638_v59 = vmul.f32 %v497_v54, %v10410_v34  ;;  %v505_v35 = vrot.slane %v11033_v26, %v10397_v25  ;;  %v11123_v39 = vadd.f32 0.5, %v1123_v31  ;;  %8869 = vtanh.f32 %v886_v51  ;;  %v8858_v21 = vpop.eup %8857  ;;  %s14535_s24 = scalar_lea.vmem (%p16290_p8), %s15754_s5, %s8606_s11 }
 0x188   : > { %v948_v22 = vmul.f32 0.5, %v828_v12  ;;  %v833_v2 = vadd.f32 %v10436_v58, %v701_v30  ;;  %v11128_v62 = vadd.f32 0.5, %v1183_v32  ;;  %8871 = vtanh.f32 %v946_v63 }
 0x189   : > { %v830_v25 = vadd.f32 %v10436_v58, %v698_v23  ;;  %v700_v26 = vmul.f32 %v505_v35, %v10428_v49  ;;  %v11133_v46 = vand.u32 %v10472_v60, %v1370_v4  ;;  %8873 = vtanh.f32 %v888_v3 }
 0x18a   : > { %v891_v31 = vmul.f32 0.5, %v771_v37  ;;  %v773_v52 = vadd.f32 %v10408_v33, %v641_v24  ;;  %v951_v41 = vmul.f32 0.5, %v831_v27  ;;  %v770_v15 = vadd.f32 %v10408_v33, %v638_v59  ;;  %v8860_v30 = vpop.eup %8859 }
 0x18b   : > { %15773 = vst [vmem:[#allocation6_spill] sm:$0xff] %v11133_v46  ;;  %v640_v57 = vmul.f32 %v505_v35, %v10410_v34  ;;  %v517_v32 = vrot.slane %v265_v29, %v10382_v17  ;;  %v1125_v54 = vmul.f32 0.5, %v8850_v48  ;;  %8875 = vtanh.f32 %v948_v22 }
 0x18c   : > { %v953_v51 = vmul.f32 0.5, %v833_v2  ;;  %v525_v12 = vrot.slane %v265_v29, %v10384_v18  ;;  %v950_v63 = vmul.f32 0.5, %v830_v25  ;;  %v832_v4 = vadd.f32 %v10436_v58, %v700_v26 }
 0x18d   : > { %8494 = vmatmul.mubr.msk.bf16.gmra.mrb[88].mxu0 %vm1453_vm2, %v10546_v10  ;;  %v703_v23 = vmul.f32 %v517_v32, %v10428_v49  ;;  %v513_v3 = vrot.slane %v265_v29, %v10386_v19  ;;  %v11143_v37 = vpop.eup %8861  ;;  %v1185_v24 = vmul.f32 0.5, %v8852_v44  ;;  %8877 = vtanh.f32 %v891_v31 }
 0x18e   : > { %8499 = vmatmul.mubr.msk.bf16.gmra.mrb[88].mxu1 %vm1453_vm2, %v10546_v10  ;;  %2379 = vmatprep.mubr.bf16.mxu0 %v15772_v11  ;;  %v893_v27 = vmul.f32 0.5, %v773_v52  ;;  %v705_v17 = vmul.f32 %v525_v12, %v10428_v49  ;;  %v11146_v48 = vpop.eup %8863  ;;  %8879 = vtanh.f32 %v951_v41  ;;  %v890_v18 = vmul.f32 0.5, %v770_v15 }
 0x18f   : > { %2462 = vmatprep.mubr.bf16.mxu1 %v15772_v11  ;;  %v772_v59 = vadd.f32 %v10408_v33, %v640_v57  ;;  %v702_v35 = vmul.f32 %v513_v3, %v10428_v49  ;;  %v11152_v22 = vpop.eup %8865  ;;  %v1182_v19 = vmul.f32 0.5, %v8856_v38  ;;  %8881 = vtanh.f32 %v953_v51 }
 0x190   : > { %v643_v44 = vmul.f32 %v517_v32, %v10410_v34  ;;  %v521_v2 = vrot.slane %v265_v29, %v10388_v20  ;;  %v8868_v25 = vpop.eup %8867  ;;  %8883 = vtanh.f32 %v950_v63  ;;  %v952_v26 = vmul.f32 0.5, %v832_v4 }
 0x191   : > { %v835_v31 = vadd.f32 %v10436_v58, %v703_v23  ;;  %v645_v52 = vmul.f32 %v525_v12, %v10410_v34  ;;  %v8870_v41 = vpop.eup %8869  ;;  %v1184_v15 = vmul.f32 0.5, %v8860_v30  ;;  %8885 = vtanh.f32 %v893_v27 }
 0x192   : > { %v837_v57 = vadd.f32 %v10436_v58, %v705_v17  ;;  %v642_v38 = vmul.f32 %v513_v3, %v10410_v34  ;;  %v8872_v51 = vpop.eup %8871  ;;  %8887 = vtanh.f32 %v890_v18  ;;  %v892_v32 = vmul.f32 0.5, %v772_v59 }
 0x193   : > { %v834_v20 = vadd.f32 %v10436_v58, %v702_v35  ;;  %v704_v29 = vmul.f32 %v521_v2, %v10428_v49  ;;  %v8874_v63 = vpop.eup %8873  ;;  %v1122_v4 = vmul.f32 0.5, %v11110_v47  ;;  %v1124_v23 = vmul.f32 0.5, %v8858_v21 }
 0x194   : > { %v775_v12 = vadd.f32 %v10408_v33, %v643_v44  ;;  %v644_v30 = vmul.f32 %v521_v2, %v10410_v34  ;;  %v11169_v27 = vadd.f32 0.5, %v1185_v24  ;;  %8889 = vtanh.f32 %v952_v26 }
 0x195   : > { %8495 = vmatmul.mubr.msk.bf16.gmra.mrb[92].mxu0 %vm1453_vm2, %v10560_v16  ;;  %v955_v17 = vmul.f32 0.5, %v835_v31  ;;  %v777_v3 = vadd.f32 %v10408_v33, %v645_v52  ;;  %v8876_v18 = vpop.eup %8875  ;;  %v11172_v59 = vadd.f32 0.5, %v1182_v19  ;;  %v11174_v35 = vadd.f32 0.5, %v1184_v15 }
 0x196   : > { %8500 = vmatmul.mubr.msk.bf16.gmra.mrb[92].mxu1 %vm1453_vm2, %v10560_v16  ;;  %2389 = vmatprep.mubr.bf16.mxu0 %v15772_v11  ;;  %v957_v49 = vmul.f32 0.5, %v837_v57  ;;  %v774_v46 = vadd.f32 %v10408_v33, %v642_v38  ;;  %v11179_v47 = vadd.f32 0.5, %v1125_v54  ;;  %8891 = vtanh.f32 %v892_v32 }
 0x197   : > { %2472 = vmatprep.mubr.bf16.mxu1 %v15772_v11  ;;  %v954_v34 = vmul.f32 0.5, %v834_v20  ;;  %v836_v21 = vadd.f32 %v10436_v58, %v704_v29  ;;  %v8878_v24 = vpop.eup %8877  ;;  %v11185_v19 = vadd.f32 0.5, %v1122_v4  ;;  %v11187_v44 = vadd.f32 0.5, %v1124_v23 }
 0x198   : > { %v895_v2 = vmul.f32 0.5, %v775_v12  ;;  %v776_v26 = vadd.f32 %v10408_v33, %v644_v30  ;;  %v8880_v31 = vpop.eup %8879  ;;  %8893 = vtanh.f32 %v955_v17  ;;  %v897_v52 = vmul.f32 0.5, %v777_v3 }
 0x199   : > { %v8882_v15 = vpop.eup %8881  ;;  %8895 = vtanh.f32 %v957_v49  ;;  %v894_v33 = vmul.f32 0.5, %v774_v46  ;;  %v1127_v20 = vmul.f32 0.5, %v11143_v37  ;;  %v1187_v29 = vmul.f32 0.5, %v11146_v48 }
 0x19a   : > { %v8884_v32 = vpop.eup %8883  ;;  %8897 = vtanh.f32 %v954_v34  ;;  %v956_v4 = vmul.f32 0.5, %v836_v21  ;;  %v1189_v12 = vmul.f32 0.5, %v8868_v25  ;;  %v1186_v30 = vmul.f32 0.5, %v8872_v51 }
 0x19b   : > { %v8886_v23 = vpop.eup %8885  ;;  %8899 = vtanh.f32 %v895_v2  ;;  %v896_v17 = vmul.f32 0.5, %v776_v26  ;;  %v1188_v58 = vmul.f32 0.5, %v8876_v18  ;;  %v1191_v57 = vmul.f32 0.5, %v8880_v31 }
 0x19c   : > { %v8888_v3 = vpop.eup %8887  ;;  %v1193_v54 = vmul.f32 0.5, %v8882_v15  ;;  %8901 = vtanh.f32 %v897_v52  ;;  %v1129_v49 = vmul.f32 0.5, %v11152_v22  ;;  %v1126_v46 = vmul.f32 0.5, %v8870_v41 }
 0x19d   : > { %8496 = vmatmul.mubr.msk.bf16.gmra.mrb[96].mxu0 %vm1453_vm2, %v10574_v36  ;;  %v1190_v38 = vmul.f32 0.5, %v8884_v32  ;;  %8903 = vtanh.f32 %v894_v33  ;;  %v1128_v48 = vmul.f32 0.5, %v8874_v63  ;;  %v1131_v34 = vmul.f32 0.5, %v8878_v24 }
 0x19e   : > { %8501 = vmatmul.mubr.msk.bf16.gmra.mrb[96].mxu1 %vm1453_vm2, %v10574_v36  ;;  %2515 = vmatprep.mubr.bf16.mxu0 %v15772_v11  ;;  %v8890_v37 = vpop.eup %8889  ;;  %v1133_v25 = vmul.f32 0.5, %v8886_v23  ;;  %8905 = vtanh.f32 %v956_v4  ;;  %v1307_v51 = vadd.f32 0.5, %v1187_v29  ;;  %v1309_v18 = vadd.f32 0.5, %v1189_v12 }
 0x19f   : > { %2598 = vmatprep.mubr.bf16.mxu1 %v15772_v11  ;;  %v1130_v21 = vmul.f32 0.5, %v8888_v3  ;;  %8907 = vtanh.f32 %v896_v17  ;;  %v1306_v41 = vadd.f32 0.5, %v1186_v30  ;;  %v1308_v2 = vadd.f32 0.5, %v1188_v58 }
 0x1a0   : > { %v8892_v22 = vpop.eup %8891  ;;  %v1311_v63 = vadd.f32 0.5, %v1191_v57  ;;  %v1313_v24 = vadd.f32 0.5, %v1193_v54  ;;  %v1247_v26 = vadd.f32 0.5, %v1127_v20  ;;  %v1249_v31 = vadd.f32 0.5, %v1129_v49 }
 0x1a1   : > { %v1192_v52 = vmul.f32 0.5, %v8890_v37  ;;  %v1246_v33 = vadd.f32 0.5, %v1126_v46  ;;  %v1248_v32 = vadd.f32 0.5, %v1128_v48  ;;  %v1253_v29 = vadd.f32 0.5, %v1133_v25 }
 0x1a2   : > { %v8894_v15 = vpop.eup %8893  ;;  %v1377_v4 = vpack.c.bf16 %v1307_v51, %v1247_v26  ;;  %v1379_v58 = vpack.c.bf16 %v1309_v18, %v1249_v31  ;;  %v1250_v57 = vadd.f32 0.5, %v1130_v21  ;;  %v1132_v54 = vmul.f32 0.5, %v8892_v22  ;;  %v11266_v31 = vpop.permute.xlu0 %1405 }
 0x1a3   : > { %v1378_v12 = vpack.c.bf16 %v1308_v2, %v1248_v32  ;;  %v1383_v20 = vpack.c.bf16 %v1313_v24, %v1253_v29  ;;  %v11218_v46 = vadd.f32 0.5, %v1192_v52  ;;  %v1195_v37 = vmul.f32 0.5, %v8894_v15 }
 0x1a4   : > { %v15778_v51 = vpack.c.bf16 %v11174_v35, %v11187_v44  ;;  %v11251_v44 = vpop.permute.xlu1 %1410 }
 0x1a5   : > { %8502 = vmatmul.mubr.msk.bf16.vlgmr.msra.gmra.mrb[100].mxu0 %vm1453_vm2, %v10487_v53  ;;  %v11258_v2 = vand.u32 %v10472_v60, %v1378_v12  ;;  %v11264_v24 = vand.u32 %v10472_v60, %v1383_v20  ;;  %v11273_v32 = vadd.f32 0.5, %v1195_v37 }
 0x1a6   : > { %8507 = vmatmul.mubr.msk.bf16.vlgmr.msra.gmra.mrb[100].mxu1 %vm1453_vm2, %v10487_v53  ;;  %2650 = vmatpush1.bf16.msra.mxu0 %v10885_v9  ;;  %v1310_v9 = vadd.f32 0.5, %v1190_v38  ;;  %v15774_v38 = vpack.c.bf16 %v11128_v62, %v11123_v39  ;;  %v15776_v39 = vpack.c.bf16 %v11172_v59, %v11185_v19  ;;  %v11238_v18 = vand.u32 %v10472_v60, %v15778_v51 }
 0x1a7   : > { %2733 = vmatpush1.bf16.msra.mxu1 %v10894_v6  ;;  %2815 = vmatprep.subr.bf16.mxu0 %v10897_v28  ;;  %v1251_v6 = vadd.f32 0.5, %v1131_v34  ;;  %v8896_v28 = vpop.eup %8895  ;;  %v15775_v34 = vpack.c.bf16 %v11169_v27, %v11179_v47  ;;  %v11244_v27 = vand.u32 %v10472_v60, %v1377_v4  ;;  %v11247_v59 = vand.u32 %v10472_v60, %v1379_v58 }
 0x1a8   : > { %2898 = vmatprep.subr.bf16.mxu1 %v10934_v61  ;;  %2525 = vmatprep.mubr.bf16.mxu0 %v15772_v11  ;;  %v8898_v23 = vpop.eup %8897  ;;  %v1376_v61 = vpack.c.bf16 %v1306_v41, %v1246_v33  ;;  %v11216_v3 = vand.u32 %v10472_v60, %v15774_v38  ;;  %v1380_v49 = vpack.c.bf16 %v1310_v9, %v1250_v57  ;;  %v1197_v21 = vmul.f32 0.5, %v8896_v28 }
 0x1a9   : > { %2608 = vmatprep.mubr.bf16.mxu1 %v15772_v11  ;;  %v1381_v30 = vpack.c.bf16 %v1311_v63, %v1251_v6  ;;  %v8900_v17 = vpop.eup %8899  ;;  %v11226_v25 = vand.u32 %v10472_v60, %v15775_v34  ;;  %v11232_v62 = vand.u32 %v10472_v60, %v15776_v39  ;;  %15779 = vst [vmem:[#allocation8_spill] sm:$0xff] %v11238_v18  ;;  %15780 = vst [vmem:[#allocation9_spill] sm:$0xff] %v11244_v27 }
 0x1aa   : > { %v8902_v48 = vpop.eup %8901  ;;  %15781 = vst [vmem:[#allocation10_spill] sm:$0xff] %v11247_v59  ;;  %v11249_v47 = vadd.f32 0.5, %v1132_v54  ;;  %v1194_v19 = vmul.f32 0.5, %v8898_v23  ;;  %v11255_v41 = vand.u32 %v10472_v60, %v1376_v61  ;;  %15783 = vst [vmem:[#allocation12_spill] sm:$0xff] %v11258_v2  ;;  %v11269_v52 = vand.u32 %v10472_v60, %v1380_v49 }
 0x1ab   : > { %15777 = vst [vmem:[#allocation7_spill] sm:$0xff] %v11232_v62  ;;  %v8904_v22 = vpop.eup %8903  ;;  %v11261_v63 = vand.u32 %v10472_v60, %v1381_v30  ;;  %15785 = vst [vmem:[#allocation14_spill] sm:$0xff] %v11264_v24  ;;  %v1135_v33 = vmul.f32 0.5, %v8900_v17  ;;  %v1137_v4 = vmul.f32 0.5, %v8902_v48  ;;  %v11276_v58 = vadd.f32 0.5, %v1197_v21 }
 0x1ac   : > { %v8906_v35 = vpop.eup %8905  ;;  %15782 = vst [vmem:[#allocation11_spill] sm:$0xff] %v11255_v41  ;;  %15786 = vst [vmem:[#allocation15_spill] sm:$0xff] %v11269_v52  ;;  %v1382_v15 = vpack.c.bf16 %v11218_v46, %v11249_v47  ;;  %v1134_v57 = vmul.f32 0.5, %v8904_v22  ;;  %v11280_v30 = vadd.f32 0.5, %v1194_v19 }
 0x1ad   : > { %8503 = vmatmul.mubr.msk.bf16.gmra.mrb[104].mxu0 %vm1453_vm2, %v10515_v43  ;;  %15784 = vst [vmem:[#allocation13_spill] sm:$0xff] %v11261_v63  ;;  %v8908_v26 = vpop.eup %8907  ;;  %v1196_v20 = vmul.f32 0.5, %v8906_v35 }
 0x1ae   : > { %8508 = vmatmul.mubr.msk.bf16.gmra.mrb[104].mxu1 %vm1453_vm2, %v10515_v43  ;;  %2535 = vmatprep.mubr.bf16.mxu0 %v15772_v11  ;;  %v1136_v48 = vmul.f32 0.5, %v8908_v26  ;;  %v1255_v26 = vadd.f32 0.5, %v1135_v33 }
 0x1af   : > { %2618 = vmatprep.mubr.bf16.mxu1 %v15772_v11 }
 0x1b0   : > { %v1687_v9 = vpop.f32.mrb[0].mxu0 }
 0x1b1   : > { %v1688_v6 = vadd.f32 %v1687_v9, %v11266_v31  ;;  %v1770_v29 = vpop.f32.mrb[0].mxu1  ;;  %v1689_v28 = vpop.f32.mrb[1].mxu0 }
 0x1b2   : > { %v1771_v54 = vadd.f32 %v1770_v29, %v11266_v31  ;;  %v1690_v23 = vadd.f32 %v1689_v28, %v11266_v31  ;;  %v1772_v61 = vpop.f32.mrb[1].mxu1  ;;  %v1691_v12 = vpop.f32.mrb[2].mxu0  ;;  %v11292_v28 = vadd.f32 0.5, %v1196_v20 }
 0x1b3   : > { %v4143_v17 = vmul.f32 0.5, %v1688_v6  ;;  %v1773_v38 = vadd.f32 %v1772_v61, %v11266_v31  ;;  %v1692_v49 = vadd.f32 %v1691_v12, %v11251_v44  ;;  %v1774_v37 = vpop.f32.mrb[2].mxu1  ;;  %v1693_v34 = vpop.f32.mrb[3].mxu0  ;;  %v1257_v61 = vadd.f32 0.5, %v1137_v4 }
 0x1b4   : > { %v4145_v39 = vmul.f32 0.5, %v1771_v54  ;;  %v4144_v51 = vmul.f32 0.5, %v1690_v23  ;;  %v1775_v21 = vadd.f32 %v1774_v37, %v11251_v44  ;;  %v1694_v22 = vadd.f32 %v1693_v34, %v11251_v44  ;;  %v1776_v9 = vpop.f32.mrb[3].mxu1  ;;  %v11294_v54 = vpop.permute.xlu1 %1420 }
 0x1b5   : > { %8909 = vtanh.f32 %v4143_v17  ;;  %v4146_v29 = vmul.f32 0.5, %v1773_v38  ;;  %v4203_v19 = vmul.f32 0.5, %v1692_v49  ;;  %v1777_v35 = vadd.f32 %v1776_v9, %v11251_v44  ;;  %8504 = vmatmul.mubr.msk.bf16.gmra.mrb[108].mxu0 %vm1453_vm2, %v10546_v10  ;;  %v11297_v17 = vpop.permute.xlu0 %1415 }
 0x1b6   : > { %8911 = vtanh.f32 %v4145_v39  ;;  %v4205_v6 = vmul.f32 0.5, %v1775_v21  ;;  %8509 = vmatmul.mubr.msk.bf16.gmra.mrb[108].mxu1 %vm1453_vm2, %v10546_v10  ;;  %2545 = vmatprep.mubr.bf16.mxu0 %v15772_v11  ;;  %v4204_v23 = vmul.f32 0.5, %v1694_v22  ;;  %v1254_v12 = vadd.f32 0.5, %v1134_v57  ;;  %15787 = vst [vmem:[#allocation16_spill] sm:$0xff] %v11297_v17 }
 0x1b7   : > { %8913 = vtanh.f32 %v4144_v51  ;;  %2628 = vmatprep.mubr.bf16.mxu1 %v15772_v11  ;;  %v4206_v38 = vmul.f32 0.5, %v1777_v35  ;;  %v1385_v37 = vpack.c.bf16 %v11273_v32, %v1255_v26  ;;  %v1256_v34 = vadd.f32 0.5, %v1136_v48 }
 0x1b8   : > { %8915 = vtanh.f32 %v4146_v29  ;;  %v1697_v49 = vpop.f32.mrb[4].mxu0  ;;  %v1387_v51 = vpack.c.bf16 %v11276_v58, %v1257_v61  ;;  %v1384_v21 = vpack.c.bf16 %v11280_v30, %v1254_v12 }
 0x1b9   : > { %8917 = vtanh.f32 %v4203_v19  ;;  %v1698_v33 = vadd.f32 %v1697_v49, %v11297_v17  ;;  %v1780_v20 = vpop.f32.mrb[4].mxu1  ;;  %v1699_v39 = vpop.f32.mrb[5].mxu0  ;;  %v1386_v32 = vpack.c.bf16 %v11292_v28, %v1256_v34 }
 0x1ba   : > { %8919 = vtanh.f32 %v4205_v6  ;;  %v1781_v4 = vadd.f32 %v1780_v20, %v11297_v17  ;;  %v1700_v57 = vadd.f32 %v1699_v39, %v11297_v17  ;;  %v1782_v22 = vpop.f32.mrb[5].mxu1  ;;  %v1701_v9 = vpop.f32.mrb[6].mxu0  ;;  %v11325_v39 = vand.u32 %v10472_v60, %v1385_v37 }
 0x1bb   : > { %8921 = vtanh.f32 %v4204_v23  ;;  %v4263_v48 = vmul.f32 0.5, %v1698_v33  ;;  %v1783_v29 = vadd.f32 %v1782_v22, %v11297_v17  ;;  %v1702_v19 = vadd.f32 %v1701_v9, %v11294_v54  ;;  %v1784_v35 = vpop.f32.mrb[6].mxu1  ;;  %v1703_v58 = vpop.f32.mrb[7].mxu0 }
 0x1bc   : > { %8923 = vtanh.f32 %v4206_v38  ;;  %v4265_v30 = vmul.f32 0.5, %v1781_v4  ;;  %v4264_v6 = vmul.f32 0.5, %v1700_v57  ;;  %v1785_v26 = vadd.f32 %v1784_v35, %v11294_v54  ;;  %v1786_v61 = vpop.f32.mrb[7].mxu1  ;;  %15789 = vst [vmem:[#allocation18_spill] sm:$0xff] %v11325_v39  ;;  %v11330_v22 = vpop.permute.xlu0 %1425 }
 0x1bd   : > { %8925 = vtanh.f32 %v4263_v48  ;;  %v4266_v12 = vmul.f32 0.5, %v1783_v29  ;;  %v4323_v49 = vmul.f32 0.5, %v1702_v19  ;;  %v1704_v28 = vadd.f32 %v1703_v58, %v11294_v54  ;;  %8505 = vmatmul.mubr.msk.bf16.gmra.mrb[112].mxu0 %vm1453_vm2, %v10560_v16 }
 0x1be   : > { %8927 = vtanh.f32 %v4265_v30  ;;  %v4325_v23 = vmul.f32 0.5, %v1785_v26  ;;  %v1787_v34 = vadd.f32 %v1786_v61, %v11294_v54  ;;  %8510 = vmatmul.mubr.msk.bf16.gmra.mrb[112].mxu1 %vm1453_vm2, %v10560_v16  ;;  %2555 = vmatprep.mubr.bf16.mxu0 %v15772_v11  ;;  %v11321_v38 = vand.u32 %v10472_v60, %v1382_v15 }
 0x1bf   : > { %v8910_v33 = vpop.eup %8909  ;;  %8929 = vtanh.f32 %v4264_v6  ;;  %v4324_v20 = vmul.f32 0.5, %v1704_v28  ;;  %2638 = vmatprep.mubr.bf16.mxu1 %v15772_v11  ;;  %v11328_v4 = vand.u32 %v10472_v60, %v1387_v51  ;;  %v11333_v15 = vand.u32 %v10472_v60, %v1384_v21 }
 0x1c0   : > { %15788 = vst [vmem:[#allocation17_spill] sm:$0xff] %v11321_v38  ;;  %v8912_v57 = vpop.eup %8911  ;;  %v5343_v9 = vmul.f32 0.5, %v8910_v33  ;;  %8931 = vtanh.f32 %v4266_v12  ;;  %v4326_v46 = vmul.f32 0.5, %v1787_v34  ;;  %v1707_v47 = vpop.f32.mrb[8].mxu0  ;;  %v11337_v51 = vand.u32 %v10472_v60, %v1386_v32 }
 0x1c1   : > { %15790 = vst [vmem:[#allocation19_spill] sm:$0xff] %v11328_v4  ;;  %15791 = vst [vmem:[#allocation20_spill] sm:$0xff] %v11333_v15  ;;  %v8914_v48 = vpop.eup %8913  ;;  %v5345_v29 = vmul.f32 0.5, %v8912_v57  ;;  %8933 = vtanh.f32 %v4323_v49  ;;  %v1708_v19 = vadd.f32 %v1707_v47, %v11330_v22  ;;  %v1790_v37 = vpop.f32.mrb[8].mxu1 }
 0x1c2   : > { %v1709_v35 = vpop.f32.mrb[9].mxu0  ;;  %15792 = vst [vmem:[#allocation21_spill] sm:$0xff] %v11337_v51  ;;  %v8916_v58 = vpop.eup %8915  ;;  %v5943_v30 = vadd.f32 0.5, %v5343_v9  ;;  %v5344_v6 = vmul.f32 0.5, %v8914_v48  ;;  %8935 = vtanh.f32 %v4325_v23  ;;  %v1791_v26 = vadd.f32 %v1790_v37, %v11330_v22 }
 0x1c3   : > { %v1792_v61 = vpop.f32.mrb[9].mxu1  ;;  %v1711_v21 = vpop.f32.mrb[10].mxu0  ;;  %v5945_v28 = vadd.f32 0.5, %v5345_v29  ;;  %v5346_v34 = vmul.f32 0.5, %v8916_v58  ;;  %8937 = vtanh.f32 %v4324_v20  ;;  %v4383_v49 = vmul.f32 0.5, %v1708_v19 }
 0x1c4   : > { %v8918_v12 = vpop.eup %8917  ;;  %v1794_v33 = vpop.f32.mrb[10].mxu1  ;;  %6543 = vst [vmem:[%s11342_s16] sm:$0xff] %v5943_v30  ;;  %v5944_v60 = vadd.f32 0.5, %v5344_v6  ;;  %8939 = vtanh.f32 %v4326_v46  ;;  %v4385_v23 = vmul.f32 0.5, %v1791_v26  ;;  %v1710_v19 = vadd.f32 %v1709_v35, %v11330_v22 }
 0x1c5   : > { %v1713_v57 = vpop.f32.mrb[11].mxu0  ;;  %v8920_v47 = vpop.eup %8919  ;;  %v5403_v32 = vmul.f32 0.5, %v8918_v12  ;;  %6545 = vst [vmem:[%s11342_s16 + $0x10] sm:$0xff] %v5945_v28  ;;  %v5946_v20 = vadd.f32 0.5, %v5346_v34  ;;  %8941 = vtanh.f32 %v4383_v49  ;;  %8506 = vmatmul.mubr.msk.bf16.gmra.mrb[116].mxu0 %vm1453_vm2, %v10574_v36  ;;  %v1793_v6 = vadd.f32 %v1792_v61, %v11330_v22 }
 0x1c6   : > { %v1796_v9 = vpop.f32.mrb[11].mxu1  ;;  %v8922_v48 = vpop.eup %8921  ;;  %v5405_v29 = vmul.f32 0.5, %v8920_v47  ;;  %6544 = vst [vmem:[%s11342_s16 + $0x8] sm:$0xff] %v5944_v60  ;;  %8943 = vtanh.f32 %v4385_v23  ;;  %8511 = vmatmul.mubr.msk.bf16.gmra.mrb[116].mxu1 %vm1453_vm2, %v10574_v36  ;;  %2681 = vmatprep.mubr.bf16.mxu0 %v15772_v11  ;;  %v4384_v28 = vmul.f32 0.5, %v1710_v19 }
 0x1c7   : > { %v8924_v37 = vpop.eup %8923  ;;  %v11349_v58 = vpop.permute.xlu1 %1430  ;;  %v6003_v30 = vadd.f32 0.5, %v5403_v32  ;;  %v5404_v46 = vmul.f32 0.5, %v8922_v48  ;;  %6546 = vst [vmem:[%s11342_s16 + $0x18] sm:$0xff] %v5946_v20  ;;  %2764 = vmatprep.mubr.bf16.mxu1 %v15772_v11  ;;  %v4386_v60 = vmul.f32 0.5, %v1793_v6 }
 0x1c8   : > { %v8926_v35 = vpop.eup %8925  ;;  %v6005_v26 = vadd.f32 0.5, %v5405_v29  ;;  %v5406_v12 = vmul.f32 0.5, %v8924_v37  ;;  %v1712_v34 = vadd.f32 %v1711_v21, %v11349_v58  ;;  %v1795_v32 = vadd.f32 %v1794_v33, %v11349_v58  ;;  %v1717_v23 = vpop.f32.mrb[12].mxu0 }
 0x1c9   : > { %v8928_v49 = vpop.eup %8927  ;;  %6603 = vst [vmem:[%s11342_s16 + $0x1e0] sm:$0xff] %v6003_v30  ;;  %v6004_v47 = vadd.f32 0.5, %v5404_v46  ;;  %v5463_v61 = vmul.f32 0.5, %v8926_v35  ;;  %8945 = vtanh.f32 %v4384_v28  ;;  %v1800_v37 = vpop.f32.mrb[12].mxu1 }
 0x1ca   : > { %v8930_v48 = vpop.eup %8929  ;;  %6605 = vst [vmem:[%s11342_s16 + $0x1f0] sm:$0xff] %v6005_v26  ;;  %v6006_v20 = vadd.f32 0.5, %v5406_v12  ;;  %v5465_v29 = vmul.f32 0.5, %v8928_v49  ;;  %v4443_v19 = vmul.f32 0.5, %v1712_v34  ;;  %v1719_v21 = vpop.f32.mrb[13].mxu0  ;;  %8947 = vtanh.f32 %v4386_v60 }
 0x1cb   : > { %v8932_v51 = vpop.eup %8931  ;;  %6604 = vst [vmem:[%s11342_s16 + $0x1e8] sm:$0xff] %v6004_v47  ;;  %v6063_v15 = vadd.f32 0.5, %v5463_v61  ;;  %v5464_v30 = vmul.f32 0.5, %v8930_v48  ;;  %v4445_v46 = vmul.f32 0.5, %v1795_v32  ;;  %v1802_v6 = vpop.f32.mrb[13].mxu1  ;;  %v1714_v12 = vadd.f32 %v1713_v57, %v11349_v58 }
 0x1cc   : > { %v1721_v35 = vpop.f32.mrb[14].mxu0  ;;  %v8934_v33 = vpop.eup %8933  ;;  %6606 = vst [vmem:[%s11342_s16 + $0x1f8] sm:$0xff] %v6006_v20  ;;  %v6065_v26 = vadd.f32 0.5, %v5465_v29  ;;  %v5466_v4 = vmul.f32 0.5, %v8932_v51  ;;  %8949 = vtanh.f32 %v4443_v19  ;;  %v1797_v32 = vadd.f32 %v1796_v9, %v11349_v58 }
 0x1cd   : > { %v1804_v28 = vpop.f32.mrb[14].mxu1  ;;  %v1723_v34 = vpop.f32.mrb[15].mxu0  ;;  %6663 = vst [vmem:[%s11342_s16 + $0x3c0] sm:$0xff] %v6063_v15  ;;  %v6064_v61 = vadd.f32 0.5, %v5464_v30  ;;  %v5523_v60 = vmul.f32 0.5, %v8934_v33  ;;  %8951 = vtanh.f32 %v4445_v46  ;;  %v4444_v19 = vmul.f32 0.5, %v1714_v12  ;;  %8512 = vmatmul.mubr.msk.bf16.vlgmr.msra.gmra.mrb[120].mxu0 %vm1453_vm2, %v10487_v53 }
 0x1ce   : > { %v8936_v49 = vpop.eup %8935  ;;  %v11365_v47 = vpop.permute.xlu0 %1435  ;;  %6665 = vst [vmem:[%s11342_s16 + $0x3d0] sm:$0xff] %v6065_v26  ;;  %v6066_v51 = vadd.f32 0.5, %v5466_v4  ;;  %v4446_v46 = vmul.f32 0.5, %v1797_v32  ;;  %8517 = vmatmul.mubr.msk.bf16.vlgmr.msra.gmra.mrb[120].mxu1 %vm1453_vm2, %v10487_v53  ;;  %2816 = vmatpush1.bf16.msra.mxu0 %v10983_v50 }
 0x1cf   : > { %15793 = vst [vmem:[#allocation22_spill] sm:$0xff] %v11365_v47  ;;  %v1806_v48 = vpop.f32.mrb[15].mxu1  ;;  %v8938_v20 = vpop.eup %8937  ;;  %v5525_v29 = vmul.f32 0.5, %v8936_v49  ;;  %v1718_v57 = vadd.f32 %v1717_v23, %v11365_v47  ;;  %6664 = vst [vmem:[%s11342_s16 + $0x3c8] sm:$0xff] %v6064_v61  ;;  %v6123_v15 = vadd.f32 0.5, %v5523_v60  ;;  %v1801_v9 = vadd.f32 %v1800_v37, %v11365_v47  ;;  %2899 = vmatpush1.bf16.msra.mxu1 %v10986_v13 }
 0x1d0   : > { %v8940_v39 = vpop.eup %8939  ;;  %v5524_v30 = vmul.f32 0.5, %v8938_v20  ;;  %6666 = vst [vmem:[%s11342_s16 + $0x3d8] sm:$0xff] %v6066_v51  ;;  %8953 = vtanh.f32 %v4444_v19  ;;  %2981 = vmatprep.subr.bf16.mxu0 %v10993_v40  ;;  %v11381_v49 = vpop.permute.xlu1 %1440  ;;  %3064 = vmatprep.subr.bf16.mxu1 %v10999_v45  ;;  %v1720_v40 = vadd.f32 %v1719_v21, %v11365_v47  ;;  %v1803_v45 = vadd.f32 %v1802_v6, %v11365_v47 }
 0x1d1   : > { %v8942_v4 = vpop.eup %8941  ;;  %v6125_v33 = vadd.f32 0.5, %v5525_v29  ;;  %v5526_v23 = vmul.f32 0.5, %v8940_v39  ;;  %v4503_v26 = vmul.f32 0.5, %v1718_v57  ;;  %15794 = vst [vmem:[#allocation23_spill] sm:$0xff] %v11381_v49  ;;  %6723 = vst [vmem:[%s11342_s16 + $0x5a0] sm:$0xff] %v6123_v15  ;;  %8955 = vtanh.f32 %v4446_v46  ;;  %v1727_v60 = vpop.f32.mrb[16].mxu0  ;;  %2691 = vmatprep.mubr.bf16.mxu0 %v15772_v11  ;;  %2774 = vmatprep.mubr.bf16.mxu1 %v15772_v11 }
 0x1d2   : > { %v8944_v12 = vpop.eup %8943  ;;  %v6124_v37 = vadd.f32 0.5, %v5524_v30  ;;  %v5583_v61 = vmul.f32 0.5, %v8942_v4  ;;  %v4505_v50 = vmul.f32 0.5, %v1801_v9  ;;  %v1810_v32 = vpop.f32.mrb[16].mxu1  ;;  %v1722_v29 = vadd.f32 %v1721_v35, %v11381_v49 }
 0x1d3   : > { %6725 = vst [vmem:[%s11342_s16 + $0x5b0] sm:$0xff] %v6125_v33  ;;  %v6126_v39 = vadd.f32 0.5, %v5526_v23  ;;  %v5585_v13 = vmul.f32 0.5, %v8944_v12  ;;  %8957 = vtanh.f32 %v4503_v26  ;;  %v1729_v20 = vpop.f32.mrb[17].mxu0  ;;  %v1812_v19 = vpop.f32.mrb[17].mxu1  ;;  %v4504_v21 = vmul.f32 0.5, %v1720_v40 }
 0x1d4   : > { %6724 = vst [vmem:[%s11342_s16 + $0x5a8] sm:$0xff] %v6124_v37  ;;  %v6183_v51 = vadd.f32 0.5, %v5583_v61  ;;  %8959 = vtanh.f32 %v4505_v50  ;;  %v11392_v57 = vpop.f32.mrb[18].mxu0  ;;  %v8946_v15 = vpop.eup %8945  ;;  %v1805_v46 = vadd.f32 %v1804_v28, %v11381_v49  ;;  %v1724_v9 = vadd.f32 %v1723_v34, %v11381_v49 }
 0x1d5   : > { %6726 = vst [vmem:[%s11342_s16 + $0x5b8] sm:$0xff] %v6126_v39  ;;  %v6185_v30 = vadd.f32 0.5, %v5585_v13  ;;  %v11397_v4 = vpop.f32.mrb[18].mxu1  ;;  %v11399_v33 = vpop.f32.mrb[19].mxu0  ;;  %v5584_v6 = vmul.f32 0.5, %v8946_v15  ;;  %v4506_v35 = vmul.f32 0.5, %v1803_v45  ;;  %v1807_v12 = vadd.f32 %v1806_v48, %v11381_v49  ;;  %8513 = vmatmul.mubr.msk.bf16.gmra.mrb[124].mxu0 %vm1453_vm2, %v10515_v43 }
 0x1d6   : > { %v8948_v23 = vpop.eup %8947  ;;  %6783 = vst [vmem:[%s11342_s16 + $0x780] sm:$0xff] %v6183_v51  ;;  %v4563_v26 = vmul.f32 0.5, %v1722_v29  ;;  %v11403_v37 = vpop.f32.mrb[19].mxu1  ;;  %8961 = vtanh.f32 %v4504_v21  ;;  %v4565_v28 = vmul.f32 0.5, %v1805_v46  ;;  %v4564_v39 = vmul.f32 0.5, %v1724_v9  ;;  %8518 = vmatmul.mubr.msk.bf16.gmra.mrb[124].mxu1 %vm1453_vm2, %v10515_v43  ;;  %2701 = vmatprep.mubr.bf16.mxu0 %v15772_v11 }
 0x1d7   : > { %v8950_v61 = vpop.eup %8949  ;;  %6785 = vst [vmem:[%s11342_s16 + $0x790] sm:$0xff] %v6185_v30  ;;  %v5586_v50 = vmul.f32 0.5, %v8948_v23  ;;  %v11408_v13 = vpop.permute.xlu0 %1445  ;;  %v6184_v40 = vadd.f32 0.5, %v5584_v6  ;;  %8963 = vtanh.f32 %v4506_v35  ;;  %v4566_v45 = vmul.f32 0.5, %v1807_v12  ;;  %2784 = vmatprep.mubr.bf16.mxu1 %v15772_v11 }
 0x1d8   : > { %v8952_v34 = vpop.eup %8951  ;;  %15795 = vst [vmem:[#allocation24_spill] sm:$0xff] %v11408_v13  ;;  %v5643_v51 = vmul.f32 0.5, %v8950_v61  ;;  %8965 = vtanh.f32 %v4563_v26  ;;  %v1728_v15 = vadd.f32 %v1727_v60, %v11408_v13  ;;  %v11415_v30 = vpop.permute.xlu1 %1450  ;;  %v1811_v46 = vadd.f32 %v1810_v32, %v11408_v13 }
 0x1d9   : > { %v6186_v48 = vadd.f32 0.5, %v5586_v50  ;;  %v5645_v29 = vmul.f32 0.5, %v8952_v34  ;;  %6784 = vst [vmem:[%s11342_s16 + $0x788] sm:$0xff] %v6184_v40  ;;  %8967 = vtanh.f32 %v4565_v28  ;;  %v1730_v9 = vadd.f32 %v1729_v20, %v11408_v13  ;;  %v1853_v23 = vpop.f32.mrb[20].mxu0  ;;  %v1936_v12 = vpop.f32.mrb[20].mxu1 }
 0x1da   : > { %v6243_v21 = vadd.f32 0.5, %v5643_v51  ;;  %v8954_v6 = vpop.eup %8953  ;;  %8969 = vtanh.f32 %v4564_v39  ;;  %v4623_v26 = vmul.f32 0.5, %v1728_v15  ;;  %v1813_v60 = vadd.f32 %v1812_v19, %v11408_v13  ;;  %v1855_v61 = vpop.f32.mrb[21].mxu0 }
 0x1db   : > { %6786 = vst [vmem:[%s11342_s16 + $0x798] sm:$0xff] %v6186_v48  ;;  %v6245_v35 = vadd.f32 0.5, %v5645_v29  ;;  %v8956_v50 = vpop.eup %8955  ;;  %v5644_v34 = vmul.f32 0.5, %v8954_v6  ;;  %8971 = vtanh.f32 %v4566_v45  ;;  %v4625_v28 = vmul.f32 0.5, %v1811_v46  ;;  %v11423_v32 = vpop.f32.mrb[21].mxu1 }
 0x1dc   : > { %6843 = vst [vmem:[%s11342_s16 + $0x960] sm:$0xff] %v6243_v21  ;;  %v4624_v40 = vmul.f32 0.5, %v1730_v9  ;;  %v11425_v20 = vpop.f32.mrb[22].mxu0  ;;  %v5646_v48 = vmul.f32 0.5, %v8956_v50  ;;  %8973 = vtanh.f32 %v4623_v26  ;;  %v4626_v39 = vmul.f32 0.5, %v1813_v60  ;;  %v11430_v29 = vpop.f32.mrb[22].mxu1 }
 0x1dd   : > { %v8958_v51 = vpop.eup %8957  ;;  %6845 = vst [vmem:[%s11342_s16 + $0x970] sm:$0xff] %v6245_v35  ;;  %v1732_v19 = vadd.f32 %v11392_v57, %v11415_v30  ;;  %v11432_v15 = vpop.f32.mrb[23].mxu0  ;;  %v6244_v21 = vadd.f32 0.5, %v5644_v34  ;;  %8975 = vtanh.f32 %v4625_v28  ;;  %v1815_v9 = vadd.f32 %v11397_v4, %v11415_v30  ;;  %8514 = vmatmul.mubr.msk.bf16.gmra.mrb[128].mxu0 %vm1453_vm2, %v10546_v10 }
 0x1de   : > { %v8960_v45 = vpop.eup %8959  ;;  %v5703_v46 = vmul.f32 0.5, %v8958_v51  ;;  %v11436_v6 = vpop.f32.mrb[23].mxu1  ;;  %v6246_v35 = vadd.f32 0.5, %v5646_v48  ;;  %8977 = vtanh.f32 %v4624_v40  ;;  %v1734_v34 = vadd.f32 %v11399_v33, %v11415_v30  ;;  %8519 = vmatmul.mubr.msk.bf16.gmra.mrb[128].mxu1 %vm1453_vm2, %v10546_v10  ;;  %2711 = vmatprep.mubr.bf16.mxu0 %v15772_v11 }
 0x1df   : > { %v5705_v26 = vmul.f32 0.5, %v8960_v45  ;;  %v4683_v60 = vmul.f32 0.5, %v1732_v19  ;;  %6844 = vst [vmem:[%s11342_s16 + $0x968] sm:$0xff] %v6244_v21  ;;  %8979 = vtanh.f32 %v4626_v39  ;;  %v4685_v50 = vmul.f32 0.5, %v1815_v9  ;;  %2794 = vmatprep.mubr.bf16.mxu1 %v15772_v11 }
 0x1e0   : > { %v6303_v57 = vadd.f32 0.5, %v5703_v46  ;;  %v8962_v4 = vpop.eup %8961  ;;  %6846 = vst [vmem:[%s11342_s16 + $0x978] sm:$0xff] %v6246_v35  ;;  %v1817_v40 = vadd.f32 %v11403_v37, %v11415_v30  ;;  %v1854_v51 = vadd.f32 %v1853_v23, %v11266_v31  ;;  %v4684_v39 = vmul.f32 0.5, %v1734_v34  ;;  %v11453_v45 = vpop.f32.mrb[24].mxu0 }
 0x1e1   : > { %v6305_v28 = vadd.f32 0.5, %v5705_v26  ;;  %8981 = vtanh.f32 %v4683_v60  ;;  %v8964_v48 = vpop.eup %8963  ;;  %v5704_v33 = vmul.f32 0.5, %v8962_v4  ;;  %v1937_v19 = vadd.f32 %v1936_v12, %v11266_v31  ;;  %v11457_v26 = vpop.f32.mrb[24].mxu1 }
 0x1e2   : > { %6903 = vst [vmem:[%s11342_s16 + $0xb40] sm:$0xff] %v6303_v57  ;;  %8983 = vtanh.f32 %v4685_v50  ;;  %v8966_v21 = vpop.eup %8965  ;;  %v5706_v46 = vmul.f32 0.5, %v8964_v48  ;;  %v4686_v9 = vmul.f32 0.5, %v1817_v40  ;;  %v4147_v35 = vmul.f32 0.5, %v1854_v51  ;;  %v11459_v23 = vpop.f32.mrb[25].mxu0 }
 0x1e3   : > { %6905 = vst [vmem:[%s11342_s16 + $0xb50] sm:$0xff] %v6305_v28  ;;  %v1856_v37 = vadd.f32 %v1855_v61, %v11266_v31  ;;  %v8968_v60 = vpop.eup %8967  ;;  %v6304_v57 = vadd.f32 0.5, %v5704_v33  ;;  %v5763_v50 = vmul.f32 0.5, %v8966_v21  ;;  %8985 = vtanh.f32 %v4684_v39  ;;  %v11461_v12 = vpop.f32.mrb[25].mxu1 }
 0x1e4   : > { %v4149_v34 = vmul.f32 0.5, %v1937_v19  ;;  %v11463_v4 = vpop.f32.mrb[26].mxu0  ;;  %v8970_v28 = vpop.eup %8969  ;;  %v6306_v40 = vadd.f32 0.5, %v5706_v46  ;;  %v5765_v51 = vmul.f32 0.5, %v8968_v60  ;;  %8987 = vtanh.f32 %v4686_v9 }
 0x1e5   : > { %v4148_v61 = vmul.f32 0.5, %v1856_v37  ;;  %v11465_v48 = vpop.f32.mrb[26].mxu1  ;;  %v11467_v38 = vpop.f32.mrb[27].mxu0  ;;  %6904 = vst [vmem:[%s11342_s16 + $0xb48] sm:$0xff] %v6304_v57  ;;  %v6363_v33 = vadd.f32 0.5, %v5763_v50  ;;  %v5764_v39 = vmul.f32 0.5, %v8970_v28  ;;  %8989 = vtanh.f32 %v4147_v35  ;;  %8515 = vmatmul.mubr.msk.bf16.gmra.mrb[132].mxu0 %vm1453_vm2, %v10560_v16 }
 0x1e6   : > { %v8972_v52 = vpop.eup %8971  ;;  %v1939_v19 = vadd.f32 %v11423_v32, %v11266_v31  ;;  %v11472_v21 = vpop.f32.mrb[27].mxu1  ;;  %6906 = vst [vmem:[%s11342_s16 + $0xb58] sm:$0xff] %v6306_v40  ;;  %v6365_v46 = vadd.f32 0.5, %v5765_v51  ;;  %8991 = vtanh.f32 %v4149_v34  ;;  %v1858_v37 = vadd.f32 %v11425_v20, %v11251_v44  ;;  %8520 = vmatmul.mubr.msk.bf16.gmra.mrb[132].mxu1 %vm1453_vm2, %v10560_v16  ;;  %2721 = vmatprep.mubr.bf16.mxu0 %v15772_v11 }
 0x1e7   : > { %v8974_v24 = vpop.eup %8973  ;;  %v5766_v9 = vmul.f32 0.5, %v8972_v52  ;;  %6963 = vst [vmem:[%s11342_s16 + $0xd20] sm:$0xff] %v6363_v33  ;;  %v6364_v35 = vadd.f32 0.5, %v5764_v39  ;;  %8993 = vtanh.f32 %v4148_v61  ;;  %v1941_v28 = vadd.f32 %v11430_v29, %v11251_v44  ;;  %2804 = vmatprep.mubr.bf16.mxu1 %v15772_v11 }
 0x1e8   : > { %v8976_v60 = vpop.eup %8975  ;;  %v5823_v57 = vmul.f32 0.5, %v8974_v24  ;;  %v4150_v32 = vmul.f32 0.5, %v1939_v19  ;;  %6965 = vst [vmem:[%s11342_s16 + $0xd30] sm:$0xff] %v6365_v46  ;;  %v4207_v34 = vmul.f32 0.5, %v1858_v37  ;;  %v1860_v61 = vadd.f32 %v11432_v15, %v11251_v44  ;;  %v11490_v33 = vpop.f32.mrb[28].mxu0 }
 0x1e9   : > { %v8978_v52 = vpop.eup %8977  ;;  %v6366_v50 = vadd.f32 0.5, %v5766_v9  ;;  %v5825_v20 = vmul.f32 0.5, %v8976_v60  ;;  %6964 = vst [vmem:[%s11342_s16 + $0xd28] sm:$0xff] %v6364_v35  ;;  %v4209_v29 = vmul.f32 0.5, %v1941_v28  ;;  %v11493_v9 = vpop.f32.mrb[28].mxu1  ;;  %v1943_v15 = vadd.f32 %v11436_v6, %v11251_v44 }
 0x1ea   : > { %v8980_v40 = vpop.eup %8979  ;;  %v6423_v24 = vadd.f32 0.5, %v5823_v57  ;;  %v5824_v51 = vmul.f32 0.5, %v8978_v52  ;;  %8995 = vtanh.f32 %v4150_v32  ;;  %v11495_v37 = vpop.f32.mrb[29].mxu0  ;;  %v4208_v32 = vmul.f32 0.5, %v1860_v61 }
 0x1eb   : > { %v8982_v39 = vpop.eup %8981  ;;  %6966 = vst [vmem:[%s11342_s16 + $0xd38] sm:$0xff] %v6366_v50  ;;  %v6425_v19 = vadd.f32 0.5, %v5825_v20  ;;  %v5826_v46 = vmul.f32 0.5, %v8980_v40  ;;  %8997 = vtanh.f32 %v4207_v34  ;;  %v11500_v52 = vpop.f32.mrb[29].mxu1  ;;  %v1864_v28 = vadd.f32 %v11453_v45, %v11297_v17 }
 0x1ec   : > { %v8984_v60 = vpop.eup %8983  ;;  %7023 = vst [vmem:[%s11342_s16 + $0xf00] sm:$0xff] %v6423_v24  ;;  %v6424_v35 = vadd.f32 0.5, %v5824_v51  ;;  %v5883_v57 = vmul.f32 0.5, %v8982_v39  ;;  %v11502_v50 = vpop.f32.mrb[30].mxu0  ;;  %8999 = vtanh.f32 %v4209_v29  ;;  %v4210_v61 = vmul.f32 0.5, %v1943_v15 }
 0x1ed   : > { %7025 = vst [vmem:[%s11342_s16 + $0xf10] sm:$0xff] %v6425_v19  ;;  %v6426_v20 = vadd.f32 0.5, %v5826_v46  ;;  %v5885_v34 = vmul.f32 0.5, %v8984_v60  ;;  %v11507_v40 = vpop.f32.mrb[30].mxu1  ;;  %v11509_v24 = vpop.f32.mrb[31].mxu0  ;;  %9001 = vtanh.f32 %v4208_v32  ;;  %v1947_v39 = vadd.f32 %v11457_v26, %v11297_v17  ;;  %8516 = vmatmul.mubr.msk.bf16.gmra.mrb[136].mxu0 %vm1453_vm2, %v10574_v36 }
 0x1ee   : > { %v8986_v51 = vpop.eup %8985  ;;  %7024 = vst [vmem:[%s11342_s16 + $0xf08] sm:$0xff] %v6424_v35  ;;  %v6483_v6 = vadd.f32 0.5, %v5883_v57  ;;  %v11514_v19 = vpop.f32.mrb[31].mxu1  ;;  %v4267_v60 = vmul.f32 0.5, %v1864_v28  ;;  %v1866_v63 = vadd.f32 %v11459_v23, %v11297_v17  ;;  %9003 = vtanh.f32 %v4210_v61  ;;  %8521 = vmatmul.mubr.msk.bf16.gmra.mrb[136].mxu1 %vm1453_vm2, %v10574_v36  ;;  %2847 = vmatprep.mubr.bf16.mxu0 %v15772_v11 }
 0x1ef   : > { %v8988_v46 = vpop.eup %8987  ;;  %7026 = vst [vmem:[%s11342_s16 + $0xf18] sm:$0xff] %v6426_v20  ;;  %v6485_v29 = vadd.f32 0.5, %v5885_v34  ;;  %v5884_v45 = vmul.f32 0.5, %v8986_v51  ;;  %v4269_v32 = vmul.f32 0.5, %v1947_v39  ;;  %v1949_v26 = vadd.f32 %v11461_v12, %v11297_v17  ;;  %2930 = vmatprep.mubr.bf16.mxu1 %v15772_v11 }
 0x1f0   : > { %v8990_v35 = vpop.eup %8989  ;;  %7083 = vst [vmem:[%s11342_s16 + $0x10e0] sm:$0x3f] %v6483_v6  ;;  %v5886_v57 = vmul.f32 0.5, %v8988_v46  ;;  %9005 = vtanh.f32 %v4267_v60  ;;  %v4268_v34 = vmul.f32 0.5, %v1866_v63  ;;  %v11529_v61 = vpop.f32.mrb[32].mxu0  ;;  %v1874_v2 = vadd.f32 %v11490_v33, %v11330_v22 }
 0x1f1   : > { %v8992_v15 = vpop.eup %8991  ;;  %7085 = vst [vmem:[%s11342_s16 + $0x10f0] sm:$0x3f] %v6485_v29  ;;  %v6484_v23 = vadd.f32 0.5, %v5884_v45  ;;  %v5347_v20 = vmul.f32 0.5, %v8990_v35  ;;  %9007 = vtanh.f32 %v4269_v32  ;;  %v4270_v12 = vmul.f32 0.5, %v1949_v26  ;;  %v11534_v45 = vpop.f32.mrb[32].mxu1 }
 0x1f2   : > { %v8994_v28 = vpop.eup %8993  ;;  %v6486_v51 = vadd.f32 0.5, %v5886_v57  ;;  %v5349_v6 = vmul.f32 0.5, %v8992_v15  ;;  %9009 = vtanh.f32 %v4268_v34  ;;  %v1868_v29 = vadd.f32 %v11463_v4, %v11294_v54  ;;  %v11536_v63 = vpop.f32.mrb[33].mxu0 }
 0x1f3   : > { %7084 = vst [vmem:[%s11342_s16 + $0x10e8] sm:$0x3f] %v6484_v23  ;;  %v5947_v39 = vadd.f32 0.5, %v5347_v20  ;;  %v5348_v46 = vmul.f32 0.5, %v8994_v28  ;;  %9011 = vtanh.f32 %v4270_v12  ;;  %v1951_v57 = vadd.f32 %v11465_v48, %v11294_v54  ;;  %v11543_v26 = vpop.f32.mrb[33].mxu1  ;;  %v11545_v15 = vpop.f32.mrb[34].mxu0 }
 0x1f4   : > { %v8996_v60 = vpop.eup %8995  ;;  %7086 = vst [vmem:[%s11342_s16 + $0x10f8] sm:$0x3f] %v6486_v51  ;;  %v5949_v35 = vadd.f32 0.5, %v5349_v6  ;;  %v1870_v32 = vadd.f32 %v11467_v38, %v11294_v54  ;;  %v4327_v34 = vmul.f32 0.5, %v1868_v29  ;;  %v1953_v28 = vadd.f32 %v11472_v21, %v11294_v54  ;;  %v11550_v51 = vpop.f32.mrb[34].mxu1 }
 0x1f5   : > { %v8998_v4 = vpop.eup %8997  ;;  %6547 = vst [vmem:[%s11342_s16 + $0x20] sm:$0xff] %v5947_v39  ;;  %v5948_v23 = vadd.f32 0.5, %v5348_v46  ;;  %v5350_v20 = vmul.f32 0.5, %v8996_v60  ;;  %v11552_v6 = vpop.f32.mrb[35].mxu0  ;;  %v4329_v38 = vmul.f32 0.5, %v1951_v57  ;;  %v1957_v21 = vadd.f32 %v11493_v9, %v11330_v22  ;;  %8522 = vmatmul.mubr.msk.bf16.vlgmr.msra.gmra.mrb[140].mxu0 %vm1453_vm2, %v10487_v53 }
 0x1f6   : > { %6549 = vst [vmem:[%s11342_s16 + $0x30] sm:$0xff] %v5949_v35  ;;  %v5407_v48 = vmul.f32 0.5, %v8998_v4  ;;  %v4328_v12 = vmul.f32 0.5, %v1870_v32  ;;  %v11557_v41 = vpop.f32.mrb[35].mxu1  ;;  %v9000_v39 = vpop.eup %8999  ;;  %9013 = vtanh.f32 %v4327_v34  ;;  %v4330_v29 = vmul.f32 0.5, %v1953_v28  ;;  %8527 = vmatmul.mubr.msk.bf16.vlgmr.msra.gmra.mrb[140].mxu1 %vm1453_vm2, %v10487_v53  ;;  %2982 = vmatpush1.bf16.msra.mxu0 %v11005_v56 }
 0x1f7   : > { %6548 = vst [vmem:[%s11342_s16 + $0x28] sm:$0xff] %v5948_v23  ;;  %v5950_v46 = vadd.f32 0.5, %v5350_v20  ;;  %v9002_v60 = vpop.eup %9001  ;;  %v5409_v57 = vmul.f32 0.5, %v9000_v39  ;;  %9015 = vtanh.f32 %v4329_v38  ;;  %v4387_v33 = vmul.f32 0.5, %v1874_v2  ;;  %3065 = vmatpush1.bf16.msra.mxu1 %v11010_v7  ;;  %3147 = vmatprep.subr.bf16.mxu0 %v11014_v14 }
 0x1f8   : > { %v6007_v35 = vadd.f32 0.5, %v5407_v48  ;;  %v5408_v32 = vmul.f32 0.5, %v9002_v60  ;;  %9017 = vtanh.f32 %v4328_v12  ;;  %v4389_v4 = vmul.f32 0.5, %v1957_v21  ;;  %v9004_v23 = vpop.eup %9003  ;;  %3230 = vmatprep.subr.bf16.mxu1 %v11036_v42  ;;  %v11578_v34 = vpop.f32.mrb[36].mxu0  ;;  %2857 = vmatprep.mubr.bf16.mxu0 %v15772_v11 }
 0x1f9   : > { %6550 = vst [vmem:[%s11342_s16 + $0x38] sm:$0xff] %v5950_v46  ;;  %v1876_v9 = vadd.f32 %v11495_v37, %v11330_v22  ;;  %v6009_v20 = vadd.f32 0.5, %v5409_v57  ;;  %9019 = vtanh.f32 %v4330_v29  ;;  %v1959_v2 = vadd.f32 %v11500_v52, %v11330_v22  ;;  %v11581_v48 = vpop.f32.mrb[36].mxu1  ;;  %v11583_v38 = vpop.f32.mrb[37].mxu0  ;;  %2940 = vmatprep.mubr.bf16.mxu1 %v15772_v11 }
 0x1fa   : > { %6607 = vst [vmem:[%s11342_s16 + $0x200] sm:$0xff] %v6007_v35  ;;  %v1878_v56 = vadd.f32 %v11502_v50, %v11349_v58  ;;  %v9006_v7 = vpop.eup %9005  ;;  %v6008_v37 = vadd.f32 0.5, %v5408_v32  ;;  %v5410_v14 = vmul.f32 0.5, %v9004_v23  ;;  %9021 = vtanh.f32 %v4387_v33  ;;  %v11587_v39 = vpop.f32.mrb[37].mxu1 }
 0x1fb   : > { %v4388_v28 = vmul.f32 0.5, %v1876_v9  ;;  %v9008_v52 = vpop.eup %9007  ;;  %6609 = vst [vmem:[%s11342_s16 + $0x210] sm:$0xff] %v6009_v20  ;;  %v5467_v50 = vmul.f32 0.5, %v9006_v7  ;;  %9023 = vtanh.f32 %v4389_v4  ;;  %v4390_v42 = vmul.f32 0.5, %v1959_v2  ;;  %v11589_v46 = vpop.f32.mrb[38].mxu0 }
 0x1fc   : > { %v4447_v12 = vmul.f32 0.5, %v1878_v56  ;;  %v9010_v29 = vpop.eup %9009  ;;  %6608 = vst [vmem:[%s11342_s16 + $0x208] sm:$0xff] %v6008_v37  ;;  %v6010_v21 = vadd.f32 0.5, %v5410_v14  ;;  %v5469_v60 = vmul.f32 0.5, %v9008_v52  ;;  %v1961_v35 = vadd.f32 %v11507_v40, %v11349_v58  ;;  %v11594_v57 = vpop.f32.mrb[38].mxu1 }
 0x1fd   : > { %9025 = vtanh.f32 %v4388_v28  ;;  %v11596_v33 = vpop.f32.mrb[39].mxu0  ;;  %v9012_v32 = vpop.eup %9011  ;;  %v6067_v4 = vadd.f32 0.5, %v5467_v50  ;;  %v5468_v9 = vmul.f32 0.5, %v9010_v29  ;;  %v1880_v23 = vadd.f32 %v11509_v24, %v11349_v58  ;;  %8523 = vmatmul.mubr.msk.bf16.gmra.mrb[144].mxu0 %vm1453_vm2, %v10515_v43 }
 0x1fe   : > { %9027 = vtanh.f32 %v4390_v42  ;;  %v11600_v20 = vpop.f32.mrb[39].mxu1  ;;  %6610 = vst [vmem:[%s11342_s16 + $0x218] sm:$0xff] %v6010_v21  ;;  %v6069_v2 = vadd.f32 0.5, %v5469_v60  ;;  %v5470_v56 = vmul.f32 0.5, %v9012_v32  ;;  %v4449_v7 = vmul.f32 0.5, %v1961_v35  ;;  %8528 = vmatmul.mubr.msk.bf16.gmra.mrb[144].mxu1 %vm1453_vm2, %v10515_v43  ;;  %2867 = vmatprep.mubr.bf16.mxu0 %v15772_v11 }
 0x1ff   : > { %9029 = vtanh.f32 %v4447_v12  ;;  %6667 = vst [vmem:[%s11342_s16 + $0x3e0] sm:$0xff] %v6067_v4  ;;  %v6068_v40 = vadd.f32 0.5, %v5468_v9  ;;  %v4448_v37 = vmul.f32 0.5, %v1880_v23  ;;  %v1963_v14 = vadd.f32 %v11514_v19, %v11349_v58  ;;  %2950 = vmatprep.mubr.bf16.mxu1 %v15772_v11 }
 0x200   : > { %v1884_v24 = vadd.f32 %v11529_v61, %v11365_v47  ;;  %v9014_v28 = vpop.eup %9013  ;;  %6669 = vst [vmem:[%s11342_s16 + $0x3f0] sm:$0xff] %v6069_v2  ;;  %v6070_v52 = vadd.f32 0.5, %v5470_v56  ;;  %9031 = vtanh.f32 %v4449_v7  ;;  %v1967_v50 = vadd.f32 %v11534_v45, %v11365_v47  ;;  %v11620_v21 = vpop.f32.mrb[40].mxu0 }
 0x201   : > { %v1886_v42 = vadd.f32 %v11536_v63, %v11365_v47  ;;  %v9016_v19 = vpop.eup %9015  ;;  %6668 = vst [vmem:[%s11342_s16 + $0x3e8] sm:$0xff] %v6068_v40  ;;  %v5527_v61 = vmul.f32 0.5, %v9014_v28  ;;  %9033 = vtanh.f32 %v4448_v37  ;;  %v4450_v12 = vmul.f32 0.5, %v1963_v14  ;;  %v11625_v9 = vpop.f32.mrb[40].mxu1 }
 0x202   : > { %v4507_v29 = vmul.f32 0.5, %v1884_v24  ;;  %v9018_v60 = vpop.eup %9017  ;;  %6670 = vst [vmem:[%s11342_s16 + $0x3f8] sm:$0xff] %v6070_v52  ;;  %v5529_v35 = vmul.f32 0.5, %v9016_v19  ;;  %v4509_v32 = vmul.f32 0.5, %v1967_v50  ;;  %v1969_v45 = vadd.f32 %v11543_v26, %v11365_v47  ;;  %v11627_v63 = vpop.f32.mrb[41].mxu0 }
 0x203   : > { %v4508_v4 = vmul.f32 0.5, %v1886_v42  ;;  %v9020_v23 = vpop.eup %9019  ;;  %v6127_v2 = vadd.f32 0.5, %v5527_v61  ;;  %v5528_v56 = vmul.f32 0.5, %v9018_v60  ;;  %9035 = vtanh.f32 %v4450_v12  ;;  %v11631_v40 = vpop.f32.mrb[41].mxu1 }
 0x204   : > { %v1888_v7 = vadd.f32 %v11545_v15, %v11381_v49  ;;  %v11633_v37 = vpop.f32.mrb[42].mxu0  ;;  %v9022_v14 = vpop.eup %9021  ;;  %v6129_v24 = vadd.f32 0.5, %v5529_v35  ;;  %v5530_v26 = vmul.f32 0.5, %v9020_v23  ;;  %9037 = vtanh.f32 %v4507_v29 }
 0x205   : > { %v4510_v28 = vmul.f32 0.5, %v1969_v45  ;;  %v11635_v52 = vpop.f32.mrb[42].mxu1  ;;  %v11637_v50 = vpop.f32.mrb[43].mxu0  ;;  %6727 = vst [vmem:[%s11342_s16 + $0x5c0] sm:$0xff] %v6127_v2  ;;  %v6128_v19 = vadd.f32 0.5, %v5528_v56  ;;  %v5587_v61 = vmul.f32 0.5, %v9022_v14  ;;  %9039 = vtanh.f32 %v4509_v32  ;;  %8524 = vmatmul.mubr.msk.bf16.gmra.mrb[148].mxu0 %vm1453_vm2, %v10546_v10 }
 0x206   : > { %v9024_v42 = vpop.eup %9023  ;;  %v4567_v15 = vmul.f32 0.5, %v1888_v7  ;;  %v11640_v12 = vpop.f32.mrb[43].mxu1  ;;  %6729 = vst [vmem:[%s11342_s16 + $0x5d0] sm:$0xff] %v6129_v24  ;;  %v6130_v35 = vadd.f32 0.5, %v5530_v26  ;;  %9041 = vtanh.f32 %v4508_v4  ;;  %v1971_v29 = vadd.f32 %v11550_v51, %v11381_v49  ;;  %8529 = vmatmul.mubr.msk.bf16.gmra.mrb[148].mxu1 %vm1453_vm2, %v10546_v10  ;;  %2877 = vmatprep.mubr.bf16.mxu0 %v15772_v11 }
 0x207   : > { %v9026_v60 = vpop.eup %9025  ;;  %v5589_v23 = vmul.f32 0.5, %v9024_v42  ;;  %6728 = vst [vmem:[%s11342_s16 + $0x5c8] sm:$0xff] %v6128_v19  ;;  %v6187_v2 = vadd.f32 0.5, %v5587_v61  ;;  %9043 = vtanh.f32 %v4510_v28  ;;  %v1890_v56 = vadd.f32 %v11552_v6, %v11381_v49  ;;  %2960 = vmatprep.mubr.bf16.mxu1 %v15772_v11 }
 0x208   : > { %v9028_v45 = vpop.eup %9027  ;;  %v5588_v32 = vmul.f32 0.5, %v9026_v60  ;;  %6730 = vst [vmem:[%s11342_s16 + $0x5d8] sm:$0xff] %v6130_v35  ;;  %9045 = vtanh.f32 %v4567_v15  ;;  %v4569_v14 = vmul.f32 0.5, %v1971_v29  ;;  %v1973_v6 = vadd.f32 %v11557_v41, %v11381_v49  ;;  %v11658_v42 = vpop.f32.mrb[44].mxu0 }
 0x209   : > { %v9030_v4 = vpop.eup %9029  ;;  %v6189_v51 = vadd.f32 0.5, %v5589_v23  ;;  %v5590_v7 = vmul.f32 0.5, %v9028_v45  ;;  %6787 = vst [vmem:[%s11342_s16 + $0x7a0] sm:$0xff] %v6187_v2  ;;  %v4568_v28 = vmul.f32 0.5, %v1890_v56  ;;  %v1894_v15 = vadd.f32 %v11578_v34, %v11408_v13  ;;  %v11665_v35 = vpop.f32.mrb[44].mxu1 }
 0x20a   : > { %v6188_v24 = vadd.f32 0.5, %v5588_v32  ;;  %v5647_v26 = vmul.f32 0.5, %v9030_v4  ;;  %v9032_v19 = vpop.eup %9031  ;;  %9047 = vtanh.f32 %v4569_v14  ;;  %v1977_v60 = vadd.f32 %v11581_v48, %v11408_v13  ;;  %v11667_v23 = vpop.f32.mrb[45].mxu0 }
 0x20b   : > { %6789 = vst [vmem:[%s11342_s16 + $0x7b0] sm:$0xff] %v6189_v51  ;;  %v6190_v61 = vadd.f32 0.5, %v5590_v7  ;;  %v9034_v29 = vpop.eup %9033  ;;  %v5649_v45 = vmul.f32 0.5, %v9032_v19  ;;  %9049 = vtanh.f32 %v4568_v28  ;;  %v4570_v2 = vmul.f32 0.5, %v1973_v6  ;;  %v11670_v32 = vpop.f32.mrb[45].mxu1 }
 0x20c   : > { %6788 = vst [vmem:[%s11342_s16 + $0x7a8] sm:$0xff] %v6188_v24  ;;  %v6247_v41 = vadd.f32 0.5, %v5647_v26  ;;  %v11672_v56 = vpop.f32.mrb[46].mxu0  ;;  %v5648_v34 = vmul.f32 0.5, %v9034_v29  ;;  %v4627_v4 = vmul.f32 0.5, %v1894_v15  ;;  %v4629_v51 = vmul.f32 0.5, %v1977_v60 }
 0x20d   : > { %6790 = vst [vmem:[%s11342_s16 + $0x7b8] sm:$0xff] %v6190_v61  ;;  %v1896_v48 = vadd.f32 %v11583_v38, %v11408_v13  ;;  %v11677_v7 = vpop.f32.mrb[46].mxu1  ;;  %v11679_v14 = vpop.f32.mrb[47].mxu0  ;;  %v6249_v26 = vadd.f32 0.5, %v5649_v45  ;;  %9051 = vtanh.f32 %v4570_v2  ;;  %v1979_v28 = vadd.f32 %v11587_v39, %v11408_v13  ;;  %8525 = vmatmul.mubr.msk.bf16.gmra.mrb[152].mxu0 %vm1453_vm2, %v10560_v16 }
 0x20e   : > { %v9036_v24 = vpop.eup %9035  ;;  %6847 = vst [vmem:[%s11342_s16 + $0x980] sm:$0xff] %v6247_v41  ;;  %v1898_v6 = vadd.f32 %v11589_v46, %v11415_v30  ;;  %v11686_v19 = vpop.f32.mrb[47].mxu1  ;;  %v6248_v38 = vadd.f32 0.5, %v5648_v34  ;;  %9053 = vtanh.f32 %v4627_v4  ;;  %8530 = vmatmul.mubr.msk.bf16.gmra.mrb[152].mxu1 %vm1453_vm2, %v10560_v16  ;;  %2887 = vmatprep.mubr.bf16.mxu0 %v15772_v11  ;;  %v1981_v4 = vadd.f32 %v11594_v57, %v11415_v30 }
 0x20f   : > { %v9038_v61 = vpop.eup %9037  ;;  %v5650_v15 = vmul.f32 0.5, %v9036_v24  ;;  %v4628_v60 = vmul.f32 0.5, %v1896_v48  ;;  %6849 = vst [vmem:[%s11342_s16 + $0x990] sm:$0xff] %v6249_v26  ;;  %9055 = vtanh.f32 %v4629_v51  ;;  %v4630_v45 = vmul.f32 0.5, %v1979_v28  ;;  %2970 = vmatprep.mubr.bf16.mxu1 %v15772_v11 }
 0x210   : > { %v9040_v29 = vpop.eup %9039  ;;  %v5707_v41 = vmul.f32 0.5, %v9038_v61  ;;  %v4687_v39 = vmul.f32 0.5, %v1898_v6  ;;  %6848 = vst [vmem:[%s11342_s16 + $0x988] sm:$0xff] %v6248_v38  ;;  %v1900_v26 = vadd.f32 %v11596_v33, %v11415_v30  ;;  %v11700_v28 = vpop.f32.mrb[48].mxu0  ;;  %v1983_v33 = vadd.f32 %v11600_v20, %v11415_v30 }
 0x211   : > { %v9042_v46 = vpop.eup %9041  ;;  %v6250_v2 = vadd.f32 0.5, %v5650_v15  ;;  %v5709_v34 = vmul.f32 0.5, %v9040_v29  ;;  %9057 = vtanh.f32 %v4628_v60  ;;  %v4689_v15 = vmul.f32 0.5, %v1981_v4  ;;  %v11703_v57 = vpop.f32.mrb[48].mxu1 }
 0x212   : > { %v9044_v51 = vpop.eup %9043  ;;  %v6307_v48 = vadd.f32 0.5, %v5707_v41  ;;  %v5708_v24 = vmul.f32 0.5, %v9042_v46  ;;  %9059 = vtanh.f32 %v4630_v45  ;;  %v11705_v60 = vpop.f32.mrb[49].mxu0  ;;  %v4688_v45 = vmul.f32 0.5, %v1900_v26 }
 0x213   : > { %v9046_v6 = vpop.eup %9045  ;;  %6850 = vst [vmem:[%s11342_s16 + $0x998] sm:$0xff] %v6250_v2  ;;  %v6309_v61 = vadd.f32 0.5, %v5709_v34  ;;  %v5710_v38 = vmul.f32 0.5, %v9044_v51  ;;  %9061 = vtanh.f32 %v4687_v39  ;;  %v11710_v46 = vpop.f32.mrb[49].mxu1  ;;  %v2020_v34 = vadd.f32 %v11620_v21, %v11266_v31 }
 0x214   : > { %6907 = vst [vmem:[%s11342_s16 + $0xb60] sm:$0xff] %v6307_v48  ;;  %v6308_v29 = vadd.f32 0.5, %v5708_v24  ;;  %v5767_v41 = vmul.f32 0.5, %v9046_v6  ;;  %v11712_v59 = vpop.f32.mrb[50].mxu0  ;;  %v9048_v2 = vpop.eup %9047  ;;  %9063 = vtanh.f32 %v4689_v15  ;;  %v2103_v4 = vadd.f32 %v11625_v9, %v11266_v31 }
 0x215   : > { %6909 = vst [vmem:[%s11342_s16 + $0xb70] sm:$0xff] %v6309_v61  ;;  %v6310_v39 = vadd.f32 0.5, %v5710_v38  ;;  %v11719_v51 = vpop.f32.mrb[50].mxu1  ;;  %v11721_v48 = vpop.f32.mrb[51].mxu0  ;;  %v5769_v26 = vmul.f32 0.5, %v9048_v2  ;;  %9065 = vtanh.f32 %v4688_v45  ;;  %v4690_v6 = vmul.f32 0.5, %v1983_v33  ;;  %8526 = vmatmul.mubr.msk.bf16.gmra.mrb[156].mxu0 %vm1453_vm2, %v10574_v36 }
 0x216   : > { %v9050_v20 = vpop.eup %9049  ;;  %6908 = vst [vmem:[%s11342_s16 + $0xb68] sm:$0xff] %v6308_v29  ;;  %v6367_v24 = vadd.f32 0.5, %v5767_v41  ;;  %v11724_v61 = vpop.f32.mrb[51].mxu1  ;;  %v4151_v15 = vmul.f32 0.5, %v2020_v34  ;;  %v4153_v21 = vmul.f32 0.5, %v2103_v4  ;;  %v2022_v9 = vadd.f32 %v11627_v63, %v11266_v31  ;;  %8531 = vmatmul.mubr.msk.bf16.gmra.mrb[156].mxu1 %vm1453_vm2, %v10574_v36  ;;  %3013 = vmatprep.mubr.bf16.mxu0 %v15772_v11 }
 0x217   : > { %6910 = vst [vmem:[%s11342_s16 + $0xb78] sm:$0xff] %v6310_v39  ;;  %v5768_v38 = vmul.f32 0.5, %v9050_v20  ;;  %v9052_v27 = vpop.eup %9051  ;;  %v6369_v29 = vadd.f32 0.5, %v5769_v26  ;;  %9067 = vtanh.f32 %v4690_v6  ;;  %v2105_v41 = vadd.f32 %v11631_v40, %v11266_v31  ;;  %3096 = vmatprep.mubr.bf16.mxu1 %v15772_v11 }
 0x218   : > { %6967 = vst [vmem:[%s11342_s16 + $0xd40] sm:$0xff] %v6367_v24  ;;  %v2024_v45 = vadd.f32 %v11633_v37, %v11251_v44  ;;  %v9054_v63 = vpop.eup %9053  ;;  %v5770_v2 = vmul.f32 0.5, %v9052_v27  ;;  %9069 = vtanh.f32 %v4151_v15  ;;  %v4152_v39 = vmul.f32 0.5, %v2022_v9  ;;  %v11741_v37 = vpop.f32.mrb[52].mxu0 }
 0x219   : > { %v6368_v33 = vadd.f32 0.5, %v5768_v38  ;;  %v9056_v34 = vpop.eup %9055  ;;  %6969 = vst [vmem:[%s11342_s16 + $0xd50] sm:$0xff] %v6369_v29  ;;  %v5827_v4 = vmul.f32 0.5, %v9054_v63  ;;  %9071 = vtanh.f32 %v4153_v21  ;;  %v4154_v40 = vmul.f32 0.5, %v2105_v41  ;;  %v11746_v38 = vpop.f32.mrb[52].mxu1 }
 0x21a   : > { %v4211_v20 = vmul.f32 0.5, %v2024_v45  ;;  %v6370_v26 = vadd.f32 0.5, %v5770_v2  ;;  %v5829_v6 = vmul.f32 0.5, %v9056_v34  ;;  %9073 = vtanh.f32 %v4152_v39  ;;  %v11748_v15 = vpop.f32.mrb[53].mxu0  ;;  %v11752_v45 = vpop.f32.mrb[53].mxu1 }
 0x21b   : > { %v9058_v24 = vpop.eup %9057  ;;  %6968 = vst [vmem:[%s11342_s16 + $0xd48] sm:$0xff] %v6368_v33  ;;  %v2107_v27 = vadd.f32 %v11635_v52, %v11251_v44  ;;  %v6427_v21 = vadd.f32 0.5, %v5827_v4  ;;  %9075 = vtanh.f32 %v4154_v40  ;;  %v2026_v41 = vadd.f32 %v11637_v50, %v11251_v44  ;;  %v11754_v63 = vpop.f32.mrb[54].mxu0 }
 0x21c   : > { %v9060_v9 = vpop.eup %9059  ;;  %v5828_v29 = vmul.f32 0.5, %v9058_v24  ;;  %6970 = vst [vmem:[%s11342_s16 + $0xd58] sm:$0xff] %v6370_v26  ;;  %v6429_v52 = vadd.f32 0.5, %v5829_v6  ;;  %9077 = vtanh.f32 %v4211_v20  ;;  %v11757_v34 = vpop.f32.mrb[54].mxu1  ;;  %v2109_v18 = vadd.f32 %v11640_v12, %v11251_v44 }
 0x21d   : > { %v9062_v33 = vpop.eup %9061  ;;  %v5830_v2 = vmul.f32 0.5, %v9060_v9  ;;  %v4213_v39 = vmul.f32 0.5, %v2107_v27  ;;  %v11759_v4 = vpop.f32.mrb[55].mxu0  ;;  %7027 = vst [vmem:[%s11342_s16 + $0xf20] sm:$0xff] %v6427_v21  ;;  %v4212_v50 = vmul.f32 0.5, %v2026_v41  ;;  %v2030_v20 = vadd.f32 %v11658_v42, %v11297_v17  ;;  %8532 = vmatmul.mubr.msk.bf16.vlgmr.msra.gmra.mrb[160].mxu0 %vm1453_vm2, %v10487_v53 }
 0x21e   : > { %v6428_v40 = vadd.f32 0.5, %v5828_v29  ;;  %v5887_v24 = vmul.f32 0.5, %v9062_v33  ;;  %v11764_v62 = vpop.f32.mrb[55].mxu1  ;;  %v9064_v26 = vpop.eup %9063  ;;  %7029 = vst [vmem:[%s11342_s16 + $0xf30] sm:$0xff] %v6429_v52  ;;  %v2113_v27 = vadd.f32 %v11665_v35, %v11297_v17  ;;  %v4214_v29 = vmul.f32 0.5, %v2109_v18  ;;  %8537 = vmatmul.mubr.msk.bf16.vlgmr.msra.gmra.mrb[160].mxu1 %vm1453_vm2, %v10487_v53  ;;  %3148 = vmatpush1.bf16.msra.mxu0 %v11045_v55 }
 0x21f   : > { %v6430_v6 = vadd.f32 0.5, %v5830_v2  ;;  %9079 = vtanh.f32 %v4213_v39  ;;  %v9066_v9 = vpop.eup %9065  ;;  %v5889_v21 = vmul.f32 0.5, %v9064_v26  ;;  %v4271_v41 = vmul.f32 0.5, %v2030_v20  ;;  %3231 = vmatpush1.bf16.msra.mxu1 %v11053_v1  ;;  %3313 = vmatprep.subr.bf16.mxu0 %v11056_v8 }
 0x220   : > { %7028 = vst [vmem:[%s11342_s16 + $0xf28] sm:$0xff] %v6428_v40  ;;  %v6487_v12 = vadd.f32 0.5, %v5887_v24  ;;  %9081 = vtanh.f32 %v4212_v50  ;;  %v5888_v42 = vmul.f32 0.5, %v9066_v9  ;;  %v4273_v33 = vmul.f32 0.5, %v2113_v27  ;;  %3396 = vmatprep.subr.bf16.mxu1 %v11076_v0  ;;  %v11788_v39 = vpop.f32.mrb[56].mxu0  ;;  %3023 = vmatprep.mubr.bf16.mxu0 %v15772_v11 }
 0x221   : > { %7030 = vst [vmem:[%s11342_s16 + $0xf38] sm:$0xff] %v6430_v6  ;;  %v2032_v35 = vadd.f32 %v11667_v23, %v11297_v17  ;;  %v9068_v52 = vpop.eup %9067  ;;  %v6489_v2 = vadd.f32 0.5, %v5889_v21  ;;  %9083 = vtanh.f32 %v4214_v29  ;;  %v2115_v18 = vadd.f32 %v11670_v32, %v11297_v17  ;;  %v11791_v24 = vpop.f32.mrb[56].mxu1  ;;  %3106 = vmatprep.mubr.bf16.mxu1 %v15772_v11 }
 0x222   : > { %7087 = vst [vmem:[%s11342_s16 + $0x1100] sm:$0x3f] %v6487_v12  ;;  %v2034_v55 = vadd.f32 %v11672_v56, %v11294_v54  ;;  %v9070_v1 = vpop.eup %9069  ;;  %v6488_v23 = vadd.f32 0.5, %v5888_v42  ;;  %v5890_v8 = vmul.f32 0.5, %v9068_v52  ;;  %9085 = vtanh.f32 %v4271_v41  ;;  %v11793_v50 = vpop.f32.mrb[57].mxu0 }
 0x223   : > { %v4272_v40 = vmul.f32 0.5, %v2032_v35  ;;  %v9072_v32 = vpop.eup %9071  ;;  %7089 = vst [vmem:[%s11342_s16 + $0x1110] sm:$0x3f] %v6489_v2  ;;  %v5351_v56 = vmul.f32 0.5, %v9070_v1  ;;  %9087 = vtanh.f32 %v4273_v33  ;;  %v4274_v0 = vmul.f32 0.5, %v2115_v18  ;;  %v11797_v6 = vpop.f32.mrb[57].mxu1 }
 0x224   : > { %v4331_v26 = vmul.f32 0.5, %v2034_v55  ;;  %v11799_v20 = vpop.f32.mrb[58].mxu0  ;;  %v9074_v27 = vpop.eup %9073  ;;  %7088 = vst [vmem:[%s11342_s16 + $0x1108] sm:$0x3f] %v6488_v23  ;;  %v6490_v9 = vadd.f32 0.5, %v5890_v8  ;;  %v5353_v12 = vmul.f32 0.5, %v9072_v32  ;;  %v2117_v21 = vadd.f32 %v11677_v7, %v11294_v54 }
 0x225   : > { %9089 = vtanh.f32 %v4272_v40  ;;  %v11804_v29 = vpop.f32.mrb[58].mxu1  ;;  %v11806_v42 = vpop.f32.mrb[59].mxu0  ;;  %v5951_v33 = vadd.f32 0.5, %v5351_v56  ;;  %v5352_v35 = vmul.f32 0.5, %v9074_v27  ;;  %v2036_v52 = vadd.f32 %v11679_v14, %v11294_v54  ;;  %8533 = vmatmul.mubr.msk.bf16.gmra.mrb[164].mxu0 %vm1453_vm2, %v10515_v43 }
 0x226   : > { %v9076_v41 = vpop.eup %9075  ;;  %9091 = vtanh.f32 %v4274_v0  ;;  %v11810_v2 = vpop.f32.mrb[59].mxu1  ;;  %7090 = vst [vmem:[%s11342_s16 + $0x1118] sm:$0x3f] %v6490_v9  ;;  %v5953_v55 = vadd.f32 0.5, %v5353_v12  ;;  %v4333_v7 = vmul.f32 0.5, %v2117_v21  ;;  %v2119_v14 = vadd.f32 %v11686_v19, %v11294_v54  ;;  %8538 = vmatmul.mubr.msk.bf16.gmra.mrb[164].mxu1 %vm1453_vm2, %v10515_v43  ;;  %3033 = vmatprep.mubr.bf16.mxu0 %v15772_v11 }
 0x227   : > { %v9078_v18 = vpop.eup %9077  ;;  %v5354_v1 = vmul.f32 0.5, %v9076_v41  ;;  %9093 = vtanh.f32 %v4331_v26  ;;  %6551 = vst [vmem:[%s11342_s16 + $0x40] sm:$0xff] %v5951_v33  ;;  %v5952_v23 = vadd.f32 0.5, %v5352_v35  ;;  %v4332_v40 = vmul.f32 0.5, %v2036_v52  ;;  %3116 = vmatprep.mubr.bf16.mxu1 %v15772_v11 }
 0x228   : > { %v5411_v8 = vmul.f32 0.5, %v9078_v18  ;;  %6553 = vst [vmem:[%s11342_s16 + $0x50] sm:$0xff] %v5953_v55  ;;  %9095 = vtanh.f32 %v4333_v7  ;;  %v2040_v0 = vadd.f32 %v11700_v28, %v11330_v22  ;;  %v2123_v26 = vadd.f32 %v11703_v57, %v11330_v22  ;;  %v11828_v21 = vpop.f32.mrb[60].mxu0 }
 0x229   : > { %v9080_v32 = vpop.eup %9079  ;;  %v5954_v56 = vadd.f32 0.5, %v5354_v1  ;;  %6552 = vst [vmem:[%s11342_s16 + $0x48] sm:$0xff] %v5952_v23  ;;  %9097 = vtanh.f32 %v4332_v40  ;;  %v4334_v12 = vmul.f32 0.5, %v2119_v14  ;;  %v2042_v28 = vadd.f32 %v11705_v60, %v11330_v22  ;;  %v11833_v52 = vpop.f32.mrb[60].mxu1 }
 0x22a   : > { %v9082_v19 = vpop.eup %9081  ;;  %v6011_v27 = vadd.f32 0.5, %v5411_v8  ;;  %v5413_v9 = vmul.f32 0.5, %v9080_v32  ;;  %v4391_v33 = vmul.f32 0.5, %v2040_v0  ;;  %v4393_v35 = vmul.f32 0.5, %v2123_v26  ;;  %v11835_v57 = vpop.f32.mrb[61].mxu0 }
 0x22b   : > { %6554 = vst [vmem:[%s11342_s16 + $0x58] sm:$0xff] %v5954_v56  ;;  %v5412_v41 = vmul.f32 0.5, %v9082_v19  ;;  %v9084_v18 = vpop.eup %9083  ;;  %9099 = vtanh.f32 %v4334_v12  ;;  %v2125_v1 = vadd.f32 %v11710_v46, %v11330_v22  ;;  %v2044_v7 = vadd.f32 %v11712_v59, %v11349_v58  ;;  %v11842_v23 = vpop.f32.mrb[61].mxu1 }
 0x22c   : > { %6611 = vst [vmem:[%s11342_s16 + $0x220] sm:$0xff] %v6011_v27  ;;  %v6013_v55 = vadd.f32 0.5, %v5413_v9  ;;  %v11844_v8 = vpop.f32.mrb[62].mxu0  ;;  %v9086_v60 = vpop.eup %9085  ;;  %v5414_v14 = vmul.f32 0.5, %v9084_v18  ;;  %9101 = vtanh.f32 %v4391_v33  ;;  %v4392_v32 = vmul.f32 0.5, %v2042_v28 }
 0x22d   : > { %v6012_v40 = vadd.f32 0.5, %v5412_v41  ;;  %v11846_v56 = vpop.f32.mrb[62].mxu1  ;;  %v11848_v0 = vpop.f32.mrb[63].mxu0  ;;  %v5471_v46 = vmul.f32 0.5, %v9086_v60  ;;  %9103 = vtanh.f32 %v4393_v35  ;;  %v4394_v19 = vmul.f32 0.5, %v2125_v1  ;;  %8534 = vmatmul.mubr.msk.bf16.gmra.mrb[168].mxu0 %vm1453_vm2, %v10546_v10 }
 0x22e   : > { %v9088_v26 = vpop.eup %9087  ;;  %6613 = vst [vmem:[%s11342_s16 + $0x230] sm:$0xff] %v6013_v55  ;;  %v4451_v59 = vmul.f32 0.5, %v2044_v7  ;;  %v11851_v27 = vpop.f32.mrb[63].mxu1  ;;  %v6014_v12 = vadd.f32 0.5, %v5414_v14  ;;  %9105 = vtanh.f32 %v4392_v32  ;;  %v2127_v33 = vadd.f32 %v11719_v51, %v11349_v58  ;;  %8539 = vmatmul.mubr.msk.bf16.gmra.mrb[168].mxu1 %vm1453_vm2, %v10546_v10  ;;  %3043 = vmatprep.mubr.bf16.mxu0 %v15772_v11 }
 0x22f   : > { %v9090_v9 = vpop.eup %9089  ;;  %6612 = vst [vmem:[%s11342_s16 + $0x228] sm:$0xff] %v6012_v40  ;;  %v5473_v41 = vmul.f32 0.5, %v9088_v26  ;;  %v6071_v18 = vadd.f32 0.5, %v5471_v46  ;;  %9107 = vtanh.f32 %v4394_v19  ;;  %v2046_v55 = vadd.f32 %v11721_v48, %v11349_v58  ;;  %3126 = vmatprep.mubr.bf16.mxu1 %v15772_v11 }
 0x230   : > { %v9092_v28 = vpop.eup %9091  ;;  %v5472_v35 = vmul.f32 0.5, %v9090_v9  ;;  %6614 = vst [vmem:[%s11342_s16 + $0x238] sm:$0xff] %v6014_v12  ;;  %9109 = vtanh.f32 %v4451_v59  ;;  %v4453_v60 = vmul.f32 0.5, %v2127_v33  ;;  %v2129_v48 = vadd.f32 %v11724_v61, %v11349_v58  ;;  %v11868_v26 = vpop.f32.mrb[64].mxu0 }
 0x231   : > { %v9094_v1 = vpop.eup %9093  ;;  %v6073_v51 = vadd.f32 0.5, %v5473_v41  ;;  %v5474_v7 = vmul.f32 0.5, %v9092_v28  ;;  %6671 = vst [vmem:[%s11342_s16 + $0x400] sm:$0xff] %v6071_v18  ;;  %v4452_v32 = vmul.f32 0.5, %v2046_v55  ;;  %v2050_v59 = vadd.f32 %v11741_v37, %v11365_v47  ;;  %v11875_v12 = vpop.f32.mrb[64].mxu1 }
 0x232   : > { %v6072_v40 = vadd.f32 0.5, %v5472_v35  ;;  %v5531_v14 = vmul.f32 0.5, %v9094_v1  ;;  %v9096_v46 = vpop.eup %9095  ;;  %9111 = vtanh.f32 %v4453_v60  ;;  %v2133_v9 = vadd.f32 %v11746_v38, %v11365_v47  ;;  %v11877_v41 = vpop.f32.mrb[65].mxu0 }
 0x233   : > { %6673 = vst [vmem:[%s11342_s16 + $0x410] sm:$0xff] %v6073_v51  ;;  %v6074_v19 = vadd.f32 0.5, %v5474_v7  ;;  %v9098_v33 = vpop.eup %9097  ;;  %v5533_v28 = vmul.f32 0.5, %v9096_v46  ;;  %9113 = vtanh.f32 %v4452_v32  ;;  %v4454_v18 = vmul.f32 0.5, %v2129_v48  ;;  %v11880_v35 = vpop.f32.mrb[65].mxu1 }
 0x234   : > { %6672 = vst [vmem:[%s11342_s16 + $0x408] sm:$0xff] %v6072_v40  ;;  %v6131_v61 = vadd.f32 0.5, %v5531_v14  ;;  %v11882_v55 = vpop.f32.mrb[66].mxu0  ;;  %v5532_v37 = vmul.f32 0.5, %v9098_v33  ;;  %v4511_v1 = vmul.f32 0.5, %v2050_v59  ;;  %v4513_v51 = vmul.f32 0.5, %v2133_v9 }
 0x235   : > { %6674 = vst [vmem:[%s11342_s16 + $0x418] sm:$0xff] %v6074_v19  ;;  %v2052_v38 = vadd.f32 %v11748_v15, %v11365_v47  ;;  %v11887_v7 = vpop.f32.mrb[66].mxu1  ;;  %v11889_v60 = vpop.f32.mrb[67].mxu0  ;;  %v6133_v14 = vadd.f32 0.5, %v5533_v28  ;;  %9115 = vtanh.f32 %v4454_v18  ;;  %v2135_v32 = vadd.f32 %v11752_v45, %v11365_v47  ;;  %8535 = vmatmul.mubr.msk.bf16.gmra.mrb[172].mxu0 %vm1453_vm2, %v10560_v16 }
 0x236   : > { %v9100_v40 = vpop.eup %9099  ;;  %6731 = vst [vmem:[%s11342_s16 + $0x5e0] sm:$0xff] %v6131_v61  ;;  %v2054_v48 = vadd.f32 %v11754_v63, %v11381_v49  ;;  %v11896_v46 = vpop.f32.mrb[67].mxu1  ;;  %v6132_v15 = vadd.f32 0.5, %v5532_v37  ;;  %9117 = vtanh.f32 %v4511_v1  ;;  %8540 = vmatmul.mubr.msk.bf16.gmra.mrb[172].mxu1 %vm1453_vm2, %v10560_v16  ;;  %3053 = vmatprep.mubr.bf16.mxu0 %v15772_v11  ;;  %v2137_v1 = vadd.f32 %v11757_v34, %v11381_v49 }
 0x237   : > { %v9102_v19 = vpop.eup %9101  ;;  %v5534_v59 = vmul.f32 0.5, %v9100_v40  ;;  %v4512_v9 = vmul.f32 0.5, %v2052_v38  ;;  %6733 = vst [vmem:[%s11342_s16 + $0x5f0] sm:$0xff] %v6133_v14  ;;  %9119 = vtanh.f32 %v4513_v51  ;;  %v4514_v28 = vmul.f32 0.5, %v2135_v32  ;;  %3136 = vmatprep.mubr.bf16.mxu1 %v15772_v11 }
 0x238   : > { %v9104_v33 = vpop.eup %9103  ;;  %v5591_v61 = vmul.f32 0.5, %v9102_v19  ;;  %v4571_v45 = vmul.f32 0.5, %v2054_v48  ;;  %6732 = vst [vmem:[%s11342_s16 + $0x5e8] sm:$0xff] %v6132_v15  ;;  %v2056_v14 = vadd.f32 %v11759_v4, %v11381_v49  ;;  %v11910_v32 = vpop.f32.mrb[68].mxu0  ;;  %v2139_v4 = vadd.f32 %v11764_v62, %v11381_v49 }
 0x239   : > { %v9106_v63 = vpop.eup %9105  ;;  %v6134_v18 = vadd.f32 0.5, %v5534_v59  ;;  %v5593_v37 = vmul.f32 0.5, %v9104_v33  ;;  %9121 = vtanh.f32 %v4512_v9  ;;  %v4573_v59 = vmul.f32 0.5, %v2137_v1  ;;  %v11913_v34 = vpop.f32.mrb[68].mxu1 }
 0x23a   : > { %v9108_v51 = vpop.eup %9107  ;;  %v6191_v38 = vadd.f32 0.5, %v5591_v61  ;;  %v5592_v40 = vmul.f32 0.5, %v9106_v63  ;;  %9123 = vtanh.f32 %v4514_v28  ;;  %v11915_v9 = vpop.f32.mrb[69].mxu0  ;;  %v4572_v28 = vmul.f32 0.5, %v2056_v14 }
 0x23b   : > { %v9110_v48 = vpop.eup %9109  ;;  %6734 = vst [vmem:[%s11342_s16 + $0x5f8] sm:$0xff] %v6134_v18  ;;  %v6193_v19 = vadd.f32 0.5, %v5593_v37  ;;  %v5594_v15 = vmul.f32 0.5, %v9108_v51  ;;  %9125 = vtanh.f32 %v4571_v45  ;;  %v11920_v63 = vpop.f32.mrb[69].mxu1  ;;  %v2060_v37 = vadd.f32 %v11788_v39, %v11408_v13 }
 0x23c   : > { %6791 = vst [vmem:[%s11342_s16 + $0x7c0] sm:$0xff] %v6191_v38  ;;  %v6192_v33 = vadd.f32 0.5, %v5592_v40  ;;  %v5651_v61 = vmul.f32 0.5, %v9110_v48  ;;  %v11922_v47 = vpop.f32.mrb[70].mxu0  ;;  %v9112_v18 = vpop.eup %9111  ;;  %9127 = vtanh.f32 %v4573_v59  ;;  %v2143_v1 = vadd.f32 %v11791_v24, %v11408_v13 }
 0x23d   : > { %6793 = vst [vmem:[%s11342_s16 + $0x7d0] sm:$0xff] %v6193_v19  ;;  %v6194_v45 = vadd.f32 0.5, %v5594_v15  ;;  %v11929_v51 = vpop.f32.mrb[70].mxu1  ;;  %v11931_v38 = vpop.f32.mrb[71].mxu0  ;;  %v5653_v14 = vmul.f32 0.5, %v9112_v18  ;;  %9129 = vtanh.f32 %v4572_v28  ;;  %v4574_v48 = vmul.f32 0.5, %v2139_v4  ;;  %8536 = vmatmul.mubr.msk.bf16.gmra.mrb[176].mxu0 %vm1453_vm2, %v10574_v36 }
 0x23e   : > { %v9114_v62 = vpop.eup %9113  ;;  %6792 = vst [vmem:[%s11342_s16 + $0x7c8] sm:$0xff] %v6192_v33  ;;  %v6251_v40 = vadd.f32 0.5, %v5651_v61  ;;  %v11934_v19 = vpop.f32.mrb[71].mxu1  ;;  %v4631_v59 = vmul.f32 0.5, %v2060_v37  ;;  %v4633_v39 = vmul.f32 0.5, %v2143_v1  ;;  %v2062_v24 = vadd.f32 %v11793_v50, %v11408_v13  ;;  %8541 = vmatmul.mubr.msk.bf16.gmra.mrb[176].mxu1 %vm1453_vm2, %v10574_v36  ;;  %3179 = vmatprep.mubr.bf16.mxu0 %v15772_v11 }
 0x23f   : > { %6794 = vst [vmem:[%s11342_s16 + $0x7d8] sm:$0xff] %v6194_v45  ;;  %v5652_v15 = vmul.f32 0.5, %v9114_v62  ;;  %v9116_v49 = vpop.eup %9115  ;;  %v6253_v33 = vadd.f32 0.5, %v5653_v14  ;;  %9131 = vtanh.f32 %v4574_v48  ;;  %v2145_v61 = vadd.f32 %v11797_v6, %v11408_v13  ;;  %3262 = vmatprep.mubr.bf16.mxu1 %v15772_v11 }
 0x240   : > { %6851 = vst [vmem:[%s11342_s16 + $0x9a0] sm:$0xff] %v6251_v40  ;;  %v2064_v28 = vadd.f32 %v11799_v20, %v11415_v30  ;;  %v9118_v50 = vpop.eup %9117  ;;  %v5654_v18 = vmul.f32 0.5, %v9116_v49  ;;  %9133 = vtanh.f32 %v4631_v59  ;;  %v4632_v45 = vmul.f32 0.5, %v2062_v24  ;;  %v11951_v20 = vpop.f32.mrb[72].mxu0 }
 0x241   : > { %v6252_v4 = vadd.f32 0.5, %v5652_v15  ;;  %v9120_v37 = vpop.eup %9119  ;;  %6853 = vst [vmem:[%s11342_s16 + $0x9b0] sm:$0xff] %v6253_v33  ;;  %v5711_v1 = vmul.f32 0.5, %v9118_v50  ;;  %9135 = vtanh.f32 %v4633_v39  ;;  %v4634_v6 = vmul.f32 0.5, %v2145_v61  ;;  %v11956_v15 = vpop.f32.mrb[72].mxu1 }
 0x242   : > { %v4691_v62 = vmul.f32 0.5, %v2064_v28  ;;  %v6254_v14 = vadd.f32 0.5, %v5654_v18  ;;  %v5713_v48 = vmul.f32 0.5, %v9120_v37  ;;  %9137 = vtanh.f32 %v4632_v45  ;;  %v11958_v59 = vpop.f32.mrb[73].mxu0  ;;  %v11962_v28 = vpop.f32.mrb[73].mxu1 }
 0x243   : > { %v9122_v40 = vpop.eup %9121  ;;  %6852 = vst [vmem:[%s11342_s16 + $0x9a8] sm:$0xff] %v6252_v4  ;;  %v2147_v49 = vadd.f32 %v11804_v29, %v11415_v30  ;;  %v6311_v39 = vadd.f32 0.5, %v5711_v1  ;;  %9139 = vtanh.f32 %v4634_v6  ;;  %v2066_v61 = vadd.f32 %v11806_v42, %v11415_v30  ;;  %v11964_v50 = vpop.f32.mrb[74].mxu0 }
 0x244   : > { %v9124_v24 = vpop.eup %9123  ;;  %v5712_v33 = vmul.f32 0.5, %v9122_v40  ;;  %15796 = vst [vmem:[#allocation25_spill] sm:$0xff] %v11964_v50  ;;  %6854 = vst [vmem:[%s11342_s16 + $0x9b8] sm:$0xff] %v6254_v14  ;;  %v6313_v29 = vadd.f32 0.5, %v5713_v48  ;;  %9141 = vtanh.f32 %v4691_v62  ;;  %v11967_v37 = vpop.f32.mrb[74].mxu1  ;;  %v2149_v13 = vadd.f32 %v11810_v2, %v11415_v30 }
 0x245   : > { %v9126_v4 = vpop.eup %9125  ;;  %v5714_v18 = vmul.f32 0.5, %v9124_v24  ;;  %v4693_v45 = vmul.f32 0.5, %v2147_v49  ;;  %v11969_v1 = vpop.f32.mrb[75].mxu0  ;;  %6911 = vst [vmem:[%s11342_s16 + $0xb80] sm:$0xff] %v6311_v39  ;;  %v4692_v42 = vmul.f32 0.5, %v2066_v61  ;;  %v2186_v62 = vadd.f32 %v11828_v21, %v11266_v31  ;;  %8542 = vmatmul.mubr.msk.bf16.vlgmr.msra.gmra.mrb[180].mxu0 %vm1453_vm2, %v10487_v53 }
 0x246   : > { %v6312_v6 = vadd.f32 0.5, %v5712_v33  ;;  %v5771_v40 = vmul.f32 0.5, %v9126_v4  ;;  %v11974_v50 = vpop.f32.mrb[75].mxu1  ;;  %v9128_v14 = vpop.eup %9127  ;;  %6913 = vst [vmem:[%s11342_s16 + $0xb90] sm:$0xff] %v6313_v29  ;;  %v2269_v49 = vadd.f32 %v11833_v52, %v11266_v31  ;;  %v4694_v33 = vmul.f32 0.5, %v2149_v13  ;;  %8547 = vmatmul.mubr.msk.bf16.vlgmr.msra.gmra.mrb[180].mxu1 %vm1453_vm2, %v10487_v53  ;;  %3314 = vmatpush1.bf16.msra.mxu0 %v11094_v5  ;;  %v15797_v29 = vld [vmem:[#allocation6_spill] sm:$0xff] }
 0x247   : > { %v6314_v48 = vadd.f32 0.5, %v5714_v18  ;;  %9143 = vtanh.f32 %v4693_v45  ;;  %v9130_v24 = vpop.eup %9129  ;;  %v5773_v39 = vmul.f32 0.5, %v9128_v14  ;;  %v4155_v61 = vmul.f32 0.5, %v2186_v62  ;;  %3397 = vmatpush1.bf16.msra.mxu1 %v15797_v29  ;;  %3479 = vmatprep.subr.bf16.mxu0 %v11216_v3 }
 0x248   : > { %6912 = vst [vmem:[%s11342_s16 + $0xb88] sm:$0xff] %v6312_v6  ;;  %v6371_v2 = vadd.f32 0.5, %v5771_v40  ;;  %9145 = vtanh.f32 %v4692_v42  ;;  %v5772_v21 = vmul.f32 0.5, %v9130_v24  ;;  %v4157_v4 = vmul.f32 0.5, %v2269_v49  ;;  %3562 = vmatprep.subr.bf16.mxu1 %v11226_v25  ;;  %v11998_v6 = vpop.f32.mrb[76].mxu0  ;;  %3189 = vmatprep.mubr.bf16.mxu0 %v15772_v11 }
 0x249   : > { %6914 = vst [vmem:[%s11342_s16 + $0xb98] sm:$0xff] %v6314_v48  ;;  %v2188_v52 = vadd.f32 %v11835_v57, %v11266_v31  ;;  %v9132_v18 = vpop.eup %9131  ;;  %v6373_v45 = vadd.f32 0.5, %v5773_v39  ;;  %9147 = vtanh.f32 %v4694_v33  ;;  %v2271_v13 = vadd.f32 %v11842_v23, %v11266_v31  ;;  %v12001_v14 = vpop.f32.mrb[76].mxu1  ;;  %3272 = vmatprep.mubr.bf16.mxu1 %v15772_v11 }
 0x24a   : > { %6971 = vst [vmem:[%s11342_s16 + $0xd60] sm:$0xff] %v6371_v2  ;;  %v2190_v5 = vadd.f32 %v11844_v8, %v11251_v44  ;;  %v9134_v57 = vpop.eup %9133  ;;  %v6372_v40 = vadd.f32 0.5, %v5772_v21  ;;  %v5774_v3 = vmul.f32 0.5, %v9132_v18  ;;  %9149 = vtanh.f32 %v4155_v61  ;;  %v12003_v48 = vpop.f32.mrb[77].mxu0 }
 0x24b   : > { %v4156_v42 = vmul.f32 0.5, %v2188_v52  ;;  %v9136_v23 = vpop.eup %9135  ;;  %6973 = vst [vmem:[%s11342_s16 + $0xd70] sm:$0xff] %v6373_v45  ;;  %v5831_v8 = vmul.f32 0.5, %v9134_v57  ;;  %9151 = vtanh.f32 %v4157_v4  ;;  %v4158_v25 = vmul.f32 0.5, %v2271_v13  ;;  %v12007_v49 = vpop.f32.mrb[77].mxu1 }
 0x24c   : > { %v4215_v62 = vmul.f32 0.5, %v2190_v5  ;;  %v12009_v24 = vpop.f32.mrb[78].mxu0  ;;  %v9138_v2 = vpop.eup %9137  ;;  %6972 = vst [vmem:[%s11342_s16 + $0xd68] sm:$0xff] %v6372_v40  ;;  %v6374_v39 = vadd.f32 0.5, %v5774_v3  ;;  %v5833_v33 = vmul.f32 0.5, %v9136_v23  ;;  %v2273_v21 = vadd.f32 %v11846_v56, %v11251_v44 }
 0x24d   : > { %9153 = vtanh.f32 %v4156_v42  ;;  %v12014_v61 = vpop.f32.mrb[78].mxu1  ;;  %v12016_v52 = vpop.f32.mrb[79].mxu0  ;;  %v6431_v29 = vadd.f32 0.5, %v5831_v8  ;;  %v5832_v18 = vmul.f32 0.5, %v9138_v2  ;;  %v2192_v45 = vadd.f32 %v11848_v0, %v11251_v44  ;;  %8543 = vmatmul.mubr.msk.bf16.gmra.mrb[184].mxu0 %vm1453_vm2, %v10515_v43 }
 0x24e   : > { %v9140_v4 = vpop.eup %9139  ;;  %9155 = vtanh.f32 %v4158_v25  ;;  %v12020_v13 = vpop.f32.mrb[79].mxu1  ;;  %6974 = vst [vmem:[%s11342_s16 + $0xd78] sm:$0xff] %v6374_v39  ;;  %v6433_v57 = vadd.f32 0.5, %v5833_v33  ;;  %v4217_v56 = vmul.f32 0.5, %v2273_v21  ;;  %v2275_v0 = vadd.f32 %v11851_v27, %v11251_v44  ;;  %8548 = vmatmul.mubr.msk.bf16.gmra.mrb[184].mxu1 %vm1453_vm2, %v10515_v43  ;;  %3199 = vmatprep.mubr.bf16.mxu0 %v15772_v11 }
 0x24f   : > { %v9142_v5 = vpop.eup %9141  ;;  %v5834_v40 = vmul.f32 0.5, %v9140_v4  ;;  %9157 = vtanh.f32 %v4215_v62  ;;  %7031 = vst [vmem:[%s11342_s16 + $0xf40] sm:$0xff] %v6431_v29  ;;  %v6432_v3 = vadd.f32 0.5, %v5832_v18  ;;  %v4216_v23 = vmul.f32 0.5, %v2192_v45  ;;  %3282 = vmatprep.mubr.bf16.mxu1 %v15772_v11 }
 0x250   : > { %v5891_v42 = vmul.f32 0.5, %v9142_v5  ;;  %7033 = vst [vmem:[%s11342_s16 + $0xf50] sm:$0xff] %v6433_v57  ;;  %9159 = vtanh.f32 %v4217_v56  ;;  %v2196_v62 = vadd.f32 %v11868_v26, %v11297_v17  ;;  %v2279_v2 = vadd.f32 %v11875_v12, %v11297_v17  ;;  %v12038_v4 = vpop.f32.mrb[80].mxu0 }
 0x251   : > { %v9144_v8 = vpop.eup %9143  ;;  %v6434_v25 = vadd.f32 0.5, %v5834_v40  ;;  %7032 = vst [vmem:[%s11342_s16 + $0xf48] sm:$0xff] %v6432_v3  ;;  %9161 = vtanh.f32 %v4216_v23  ;;  %v4218_v21 = vmul.f32 0.5, %v2275_v0  ;;  %v2198_v26 = vadd.f32 %v11877_v41, %v11297_v17  ;;  %v12043_v5 = vpop.f32.mrb[80].mxu1 }
 0x252   : > { %v9146_v27 = vpop.eup %9145  ;;  %v6491_v39 = vadd.f32 0.5, %v5891_v42  ;;  %v5893_v33 = vmul.f32 0.5, %v9144_v8  ;;  %v4275_v18 = vmul.f32 0.5, %v2196_v62  ;;  %v4277_v45 = vmul.f32 0.5, %v2279_v2  ;;  %v12045_v12 = vpop.f32.mrb[81].mxu0 }
 0x253   : > { %7034 = vst [vmem:[%s11342_s16 + $0xf58] sm:$0xff] %v6434_v25  ;;  %v5892_v29 = vmul.f32 0.5, %v9146_v27  ;;  %v9148_v57 = vpop.eup %9147  ;;  %9163 = vtanh.f32 %v4218_v21  ;;  %v2281_v56 = vadd.f32 %v11880_v35, %v11297_v17  ;;  %v2200_v3 = vadd.f32 %v11882_v55, %v11294_v54  ;;  %v12052_v42 = vpop.f32.mrb[81].mxu1 }
 0x254   : > { %7091 = vst [vmem:[%s11342_s16 + $0x1120] sm:$0x3f] %v6491_v39  ;;  %v6493_v40 = vadd.f32 0.5, %v5893_v33  ;;  %v12054_v23 = vpop.f32.mrb[82].mxu0  ;;  %v9150_v41 = vpop.eup %9149  ;;  %v5894_v8 = vmul.f32 0.5, %v9148_v57  ;;  %9165 = vtanh.f32 %v4275_v18  ;;  %v4276_v25 = vmul.f32 0.5, %v2198_v26 }
 0x255   : > { %v6492_v0 = vadd.f32 0.5, %v5892_v29  ;;  %v12056_v62 = vpop.f32.mrb[82].mxu1  ;;  %v12058_v2 = vpop.f32.mrb[83].mxu0  ;;  %v5355_v35 = vmul.f32 0.5, %v9150_v41  ;;  %9167 = vtanh.f32 %v4277_v45  ;;  %v4278_v39 = vmul.f32 0.5, %v2281_v56  ;;  %8544 = vmatmul.mubr.msk.bf16.gmra.mrb[188].mxu0 %vm1453_vm2, %v10546_v10 }
 0x256   : > { %v9152_v27 = vpop.eup %9151  ;;  %7093 = vst [vmem:[%s11342_s16 + $0x1130] sm:$0x3f] %v6493_v40  ;;  %v4335_v55 = vmul.f32 0.5, %v2200_v3  ;;  %v12061_v33 = vpop.f32.mrb[83].mxu1  ;;  %v6494_v17 = vadd.f32 0.5, %v5894_v8  ;;  %9169 = vtanh.f32 %v4276_v25  ;;  %v2283_v18 = vadd.f32 %v11887_v7, %v11294_v54  ;;  %8549 = vmatmul.mubr.msk.bf16.gmra.mrb[188].mxu1 %vm1453_vm2, %v10546_v10  ;;  %3209 = vmatprep.mubr.bf16.mxu0 %v15772_v11 }
 0x257   : > { %v9154_v21 = vpop.eup %9153  ;;  %7092 = vst [vmem:[%s11342_s16 + $0x1128] sm:$0x3f] %v6492_v0  ;;  %v5357_v29 = vmul.f32 0.5, %v9152_v27  ;;  %v5955_v57 = vadd.f32 0.5, %v5355_v35  ;;  %9171 = vtanh.f32 %v4278_v39  ;;  %v2202_v40 = vadd.f32 %v11889_v60, %v11294_v54  ;;  %3292 = vmatprep.mubr.bf16.mxu1 %v15772_v11 }
 0x258   : > { %v9156_v26 = vpop.eup %9155  ;;  %v5356_v45 = vmul.f32 0.5, %v9154_v21  ;;  %7094 = vst [vmem:[%s11342_s16 + $0x1138] sm:$0x3f] %v6494_v17  ;;  %9173 = vtanh.f32 %v4335_v55  ;;  %v4337_v41 = vmul.f32 0.5, %v2283_v18  ;;  %v2285_v60 = vadd.f32 %v11896_v46, %v11294_v54  ;;  %v12078_v27 = vpop.f32.mrb[84].mxu0 }
 0x259   : > { %v9158_v56 = vpop.eup %9157  ;;  %v5957_v7 = vadd.f32 0.5, %v5357_v29  ;;  %v5358_v3 = vmul.f32 0.5, %v9156_v26  ;;  %6555 = vst [vmem:[%s11342_s16 + $0x60] sm:$0xff] %v5955_v57  ;;  %v4336_v25 = vmul.f32 0.5, %v2202_v40  ;;  %v2206_v39 = vadd.f32 %v11910_v32, %v11330_v22  ;;  %v12085_v21 = vpop.f32.mrb[84].mxu1 }
 0x25a   : > { %v5956_v0 = vadd.f32 0.5, %v5356_v45  ;;  %v5415_v8 = vmul.f32 0.5, %v9158_v56  ;;  %v9160_v35 = vpop.eup %9159  ;;  %9175 = vtanh.f32 %v4337_v41  ;;  %v2289_v55 = vadd.f32 %v11913_v34, %v11330_v22  ;;  %v12087_v29 = vpop.f32.mrb[85].mxu0 }
 0x25b   : > { %6557 = vst [vmem:[%s11342_s16 + $0x70] sm:$0xff] %v5957_v7  ;;  %v5958_v17 = vadd.f32 0.5, %v5358_v3  ;;  %v9162_v18 = vpop.eup %9161  ;;  %v5417_v26 = vmul.f32 0.5, %v9160_v35  ;;  %9177 = vtanh.f32 %v4336_v25  ;;  %v4338_v57 = vmul.f32 0.5, %v2285_v60  ;;  %v12090_v45 = vpop.f32.mrb[85].mxu1 }
 0x25c   : > { %6556 = vst [vmem:[%s11342_s16 + $0x68] sm:$0xff] %v5956_v0  ;;  %v6015_v46 = vadd.f32 0.5, %v5415_v8  ;;  %v12092_v40 = vpop.f32.mrb[86].mxu0  ;;  %v5416_v32 = vmul.f32 0.5, %v9162_v18  ;;  %v4395_v56 = vmul.f32 0.5, %v2206_v39  ;;  %v4397_v7 = vmul.f32 0.5, %v2289_v55 }
 0x25d   : > { %6558 = vst [vmem:[%s11342_s16 + $0x78] sm:$0xff] %v5958_v17  ;;  %v2208_v34 = vadd.f32 %v11915_v9, %v11330_v22  ;;  %v12097_v3 = vpop.f32.mrb[86].mxu1  ;;  %v12099_v41 = vpop.f32.mrb[87].mxu0  ;;  %v6017_v8 = vadd.f32 0.5, %v5417_v26  ;;  %9179 = vtanh.f32 %v4338_v57  ;;  %v2291_v25 = vadd.f32 %v11920_v63, %v11330_v22  ;;  %8545 = vmatmul.mubr.msk.bf16.gmra.mrb[192].mxu0 %vm1453_vm2, %v10560_v16 }
 0x25e   : > { %v9164_v0 = vpop.eup %9163  ;;  %6615 = vst [vmem:[%s11342_s16 + $0x240] sm:$0xff] %v6015_v46  ;;  %v2210_v60 = vadd.f32 %v11922_v47, %v11349_v58  ;;  %v12106_v35 = vpop.f32.mrb[87].mxu1  ;;  %v6016_v9 = vadd.f32 0.5, %v5416_v32  ;;  %9181 = vtanh.f32 %v4395_v56  ;;  %8550 = vmatmul.mubr.msk.bf16.gmra.mrb[192].mxu1 %vm1453_vm2, %v10560_v16  ;;  %3219 = vmatprep.mubr.bf16.mxu0 %v15772_v11  ;;  %v2293_v56 = vadd.f32 %v11929_v51, %v11349_v58 }
 0x25f   : > { %v9166_v17 = vpop.eup %9165  ;;  %v5418_v39 = vmul.f32 0.5, %v9164_v0  ;;  %v4396_v55 = vmul.f32 0.5, %v2208_v34  ;;  %6617 = vst [vmem:[%s11342_s16 + $0x250] sm:$0xff] %v6017_v8  ;;  %9183 = vtanh.f32 %v4397_v7  ;;  %v4398_v26 = vmul.f32 0.5, %v2291_v25  ;;  %3302 = vmatprep.mubr.bf16.mxu1 %v15772_v11 }
 0x260   : > { %v9168_v18 = vpop.eup %9167  ;;  %v5475_v46 = vmul.f32 0.5, %v9166_v17  ;;  %v4455_v63 = vmul.f32 0.5, %v2210_v60  ;;  %6616 = vst [vmem:[%s11342_s16 + $0x248] sm:$0xff] %v6016_v9  ;;  %v2212_v8 = vadd.f32 %v11931_v38, %v11349_v58  ;;  %v12120_v25 = vpop.f32.mrb[88].mxu0  ;;  %v2295_v38 = vadd.f32 %v11934_v19, %v11349_v58 }
 0x261   : > { %v9170_v47 = vpop.eup %9169  ;;  %v6018_v57 = vadd.f32 0.5, %v5418_v39  ;;  %v5477_v32 = vmul.f32 0.5, %v9168_v18  ;;  %9185 = vtanh.f32 %v4396_v55  ;;  %15798 = vst [vmem:[#allocation6_spill] sm:$0xff] %v12120_v25  ;;  %v4457_v39 = vmul.f32 0.5, %v2293_v56  ;;  %v12123_v51 = vpop.f32.mrb[88].mxu1 }
 0x262   : > { %v9172_v7 = vpop.eup %9171  ;;  %v6075_v34 = vadd.f32 0.5, %v5475_v46  ;;  %v5476_v0 = vmul.f32 0.5, %v9170_v47  ;;  %9187 = vtanh.f32 %v4398_v26  ;;  %v12125_v55 = vpop.f32.mrb[89].mxu0  ;;  %v4456_v26 = vmul.f32 0.5, %v2212_v8 }
 0x263   : > { %v9174_v60 = vpop.eup %9173  ;;  %6618 = vst [vmem:[%s11342_s16 + $0x258] sm:$0xff] %v6018_v57  ;;  %v6077_v17 = vadd.f32 0.5, %v5477_v32  ;;  %v5478_v9 = vmul.f32 0.5, %v9172_v7  ;;  %9189 = vtanh.f32 %v4455_v63  ;;  %v12130_v47 = vpop.f32.mrb[89].mxu1  ;;  %v15800_v32 = vld [vmem:[#allocation22_spill] sm:$0xff] }
 0x264   : > { %6675 = vst [vmem:[%s11342_s16 + $0x420] sm:$0xff] %v6075_v34  ;;  %v6076_v18 = vadd.f32 0.5, %v5476_v0  ;;  %v5535_v46 = vmul.f32 0.5, %v9174_v60  ;;  %v12132_v25 = vpop.f32.mrb[90].mxu0  ;;  %v9176_v57 = vpop.eup %9175  ;;  %9191 = vtanh.f32 %v4457_v39  ;;  %v2216_v56 = vadd.f32 %v11951_v20, %v15800_v32 }
 0x265   : > { %15799 = vst [vmem:[#allocation26_spill] sm:$0xff] %v12132_v25  ;;  %6677 = vst [vmem:[%s11342_s16 + $0x430] sm:$0xff] %v6077_v17  ;;  %v6078_v63 = vadd.f32 0.5, %v5478_v9  ;;  %v2299_v7 = vadd.f32 %v11956_v15, %v15800_v32  ;;  %v12139_v34 = vpop.f32.mrb[90].mxu1  ;;  %v12141_v0 = vpop.f32.mrb[91].mxu0  ;;  %v5537_v60 = vmul.f32 0.5, %v9176_v57  ;;  %9193 = vtanh.f32 %v4456_v26  ;;  %8546 = vmatmul.mubr.msk.bf16.gmra.mrb[196].mxu0 %vm1453_vm2, %v10574_v36 }
 0x266   : > { %15801 = vst [vmem:[#allocation27_spill] sm:$0xff] %v12141_v0  ;;  %v9178_v19 = vpop.eup %9177  ;;  %6676 = vst [vmem:[%s11342_s16 + $0x428] sm:$0xff] %v6076_v18  ;;  %v6135_v8 = vadd.f32 0.5, %v5535_v46  ;;  %v4458_v25 = vmul.f32 0.5, %v2295_v38  ;;  %v12144_v17 = vpop.f32.mrb[91].mxu1  ;;  %v4515_v39 = vmul.f32 0.5, %v2216_v56  ;;  %v2218_v15 = vadd.f32 %v11958_v59, %v15800_v32  ;;  %8551 = vmatmul.mubr.msk.bf16.gmra.mrb[196].mxu1 %vm1453_vm2, %v10574_v36  ;;  %3345 = vmatprep.mubr.bf16.mxu0 %v15772_v11 }
 0x267   : > { %15802 = vst [vmem:[#allocation28_spill] sm:$0xff] %v12144_v17  ;;  %6678 = vst [vmem:[%s11342_s16 + $0x438] sm:$0xff] %v6078_v63  ;;  %v5536_v9 = vmul.f32 0.5, %v9178_v19  ;;  %v4517_v20 = vmul.f32 0.5, %v2299_v7  ;;  %v9180_v0 = vpop.eup %9179  ;;  %v6137_v18 = vadd.f32 0.5, %v5537_v60  ;;  %v2301_v46 = vadd.f32 %v11962_v28, %v15800_v32  ;;  %v15803_v26 = vld [vmem:[#allocation23_spill] sm:$0xff]  ;;  %3428 = vmatprep.mubr.bf16.mxu1 %v15772_v11 }
 0x268   : > { %6735 = vst [vmem:[%s11342_s16 + $0x600] sm:$0xff] %v6135_v8  ;;  %9195 = vtanh.f32 %v4458_v25  ;;  %v15804_v38 = vld [vmem:[#allocation25_spill] sm:$0xff]  ;;  %v9182_v59 = vpop.eup %9181  ;;  %v5538_v56 = vmul.f32 0.5, %v9180_v0  ;;  %v4516_v7 = vmul.f32 0.5, %v2218_v15  ;;  %v12161_v60 = vpop.f32.mrb[92].mxu0  ;;  %v2303_v0 = vadd.f32 %v11967_v37, %v15803_v26 }
 0x269   : > { %v2220_v57 = vadd.f32 %v15804_v38, %v15803_v26  ;;  %v6136_v63 = vadd.f32 0.5, %v5536_v9  ;;  %9197 = vtanh.f32 %v4515_v39  ;;  %v9184_v25 = vpop.eup %9183  ;;  %6737 = vst [vmem:[%s11342_s16 + $0x610] sm:$0xff] %v6137_v18  ;;  %v5595_v19 = vmul.f32 0.5, %v9182_v59  ;;  %v12166_v9 = vpop.f32.mrb[92].mxu1 }
 0x26a   : > { %9199 = vtanh.f32 %v4517_v20  ;;  %v4518_v28 = vmul.f32 0.5, %v2301_v46  ;;  %v6138_v32 = vadd.f32 0.5, %v5538_v56  ;;  %v5597_v17 = vmul.f32 0.5, %v9184_v25  ;;  %v12168_v39 = vpop.f32.mrb[93].mxu0 }
 0x26b   : > { %v4575_v8 = vmul.f32 0.5, %v2220_v57  ;;  %v9186_v38 = vpop.eup %9185  ;;  %6736 = vst [vmem:[%s11342_s16 + $0x608] sm:$0xff] %v6136_v63  ;;  %9201 = vtanh.f32 %v4516_v7  ;;  %v6195_v20 = vadd.f32 0.5, %v5595_v19  ;;  %v2222_v46 = vadd.f32 %v11969_v1, %v15803_v26  ;;  %v12172_v57 = vpop.f32.mrb[93].mxu1 }
 0x26c   : > { %v9188_v15 = vpop.eup %9187  ;;  %v5596_v18 = vmul.f32 0.5, %v9186_v38  ;;  %9203 = vtanh.f32 %v4518_v28  ;;  %15805 = vst [vmem:[#allocation23_spill] sm:$0xff] %v12172_v57  ;;  %v12174_v59 = vpop.f32.mrb[94].mxu0  ;;  %6738 = vst [vmem:[%s11342_s16 + $0x618] sm:$0xff] %v6138_v32  ;;  %v6197_v37 = vadd.f32 0.5, %v5597_v17  ;;  %v4577_v7 = vmul.f32 0.5, %v2303_v0 }
 0x26d   : > { %15806 = vst [vmem:[#allocation25_spill] sm:$0xff] %v12174_v59  ;;  %v9190_v63 = vpop.eup %9189  ;;  %v5598_v56 = vmul.f32 0.5, %v9188_v15  ;;  %9205 = vtanh.f32 %v4575_v8  ;;  %v12177_v25 = vpop.f32.mrb[94].mxu1  ;;  %6795 = vst [vmem:[%s11342_s16 + $0x7e0] sm:$0xff] %v6195_v20  ;;  %v4576_v1 = vmul.f32 0.5, %v2222_v46  ;;  %v2305_v57 = vadd.f32 %v11974_v50, %v15803_v26  ;;  %v15808_v8 = vld [vmem:[#allocation24_spill] sm:$0xff]  ;;  %8552 = vmatmul.mubr.msk.bf16.vlgmr.msra.gmra.mrb[200].mxu0 %vm1453_vm2, %v10487_v53 }
 0x26e   : > { %v12179_v19 = vpop.f32.mrb[95].mxu0  ;;  %v6196_v28 = vadd.f32 0.5, %v5596_v18  ;;  %v5655_v38 = vmul.f32 0.5, %v9190_v63  ;;  %v12184_v59 = vpop.f32.mrb[95].mxu1  ;;  %6797 = vst [vmem:[%s11342_s16 + $0x7f0] sm:$0xff] %v6197_v37  ;;  %9207 = vtanh.f32 %v4577_v7  ;;  %v2226_v0 = vadd.f32 %v11998_v6, %v15808_v8  ;;  %8557 = vmatmul.mubr.msk.bf16.vlgmr.msra.gmra.mrb[200].mxu1 %vm1453_vm2, %v10487_v53  ;;  %v15809_v63 = vld [vmem:[#allocation7_spill] sm:$0xff]  ;;  %3355 = vmatprep.mubr.bf16.mxu0 %v15772_v11 }
 0x26f   : > { %15807 = vst [vmem:[#allocation29_spill] sm:$0xff] %v12184_v59  ;;  %v9192_v32 = vpop.eup %9191  ;;  %v6198_v17 = vadd.f32 0.5, %v5598_v56  ;;  %v2309_v15 = vadd.f32 %v12001_v14, %v15808_v8  ;;  %9209 = vtanh.f32 %v4576_v1  ;;  %v4578_v46 = vmul.f32 0.5, %v2305_v57  ;;  %3480 = vmatpush1.bf16.msra.mxu0 %v15809_v63  ;;  %v15810_v7 = vld [vmem:[#allocation8_spill] sm:$0xff]  ;;  %v15811_v59 = vld [vmem:[#allocation9_spill] sm:$0xff]  ;;  %3438 = vmatprep.mubr.bf16.mxu1 %v15772_v11 }
 0x270   : > { %v9194_v20 = vpop.eup %9193  ;;  %6796 = vst [vmem:[%s11342_s16 + $0x7e8] sm:$0xff] %v6196_v28  ;;  %v6255_v50 = vadd.f32 0.5, %v5655_v38  ;;  %v5657_v18 = vmul.f32 0.5, %v9192_v32  ;;  %v4635_v37 = vmul.f32 0.5, %v2226_v0  ;;  %v2228_v14 = vadd.f32 %v12003_v48, %v15808_v8  ;;  %3563 = vmatpush1.bf16.msra.mxu1 %v15810_v7  ;;  %3645 = vmatprep.subr.bf16.mxu0 %v15811_v59  ;;  %v15812_v32 = vld [vmem:[#allocation10_spill] sm:$0xff] }
 0x271   : > { %6798 = vst [vmem:[%s11342_s16 + $0x7f8] sm:$0xff] %v6198_v17  ;;  %v5656_v6 = vmul.f32 0.5, %v9194_v20  ;;  %v4637_v56 = vmul.f32 0.5, %v2309_v15  ;;  %9211 = vtanh.f32 %v4578_v46  ;;  %v2311_v57 = vadd.f32 %v12007_v49, %v15808_v8  ;;  %3728 = vmatprep.subr.bf16.mxu1 %v15812_v32  ;;  %v12208_v17 = vpop.f32.mrb[96].mxu0  ;;  %v12211_v20 = vpop.f32.mrb[96].mxu1 }
 0x272   : > { %v9196_v28 = vpop.eup %9195  ;;  %6855 = vst [vmem:[%s11342_s16 + $0x9c0] sm:$0xff] %v6255_v50  ;;  %v6257_v38 = vadd.f32 0.5, %v5657_v18  ;;  %v2230_v1 = vadd.f32 %v12009_v24, %v11415_v30  ;;  %9213 = vtanh.f32 %v4635_v37  ;;  %v4636_v15 = vmul.f32 0.5, %v2228_v14  ;;  %v12213_v50 = vpop.f32.mrb[97].mxu0 }
 0x273   : > { %v9198_v48 = vpop.eup %9197  ;;  %v6256_v0 = vadd.f32 0.5, %v5656_v6  ;;  %v5658_v59 = vmul.f32 0.5, %v9196_v28  ;;  %9215 = vtanh.f32 %v4637_v56  ;;  %v4638_v18 = vmul.f32 0.5, %v2311_v57  ;;  %v12217_v63 = vpop.f32.mrb[97].mxu1 }
 0x274   : > { %v9200_v49 = vpop.eup %9199  ;;  %6857 = vst [vmem:[%s11342_s16 + $0x9d0] sm:$0xff] %v6257_v38  ;;  %v5715_v24 = vmul.f32 0.5, %v9198_v48  ;;  %v4695_v46 = vmul.f32 0.5, %v2230_v1  ;;  %v12219_v7 = vpop.f32.mrb[98].mxu0  ;;  %9217 = vtanh.f32 %v4636_v15  ;;  %v2313_v28 = vadd.f32 %v12014_v61, %v11415_v30 }
 0x275   : > { %15813 = vst [vmem:[#allocation24_spill] sm:$0xff] %v12219_v7  ;;  %v9202_v6 = vpop.eup %9201  ;;  %6856 = vst [vmem:[%s11342_s16 + $0x9c8] sm:$0xff] %v6256_v0  ;;  %v6258_v37 = vadd.f32 0.5, %v5658_v59  ;;  %v5717_v14 = vmul.f32 0.5, %v9200_v49  ;;  %v12224_v32 = vpop.f32.mrb[98].mxu1  ;;  %9219 = vtanh.f32 %v4638_v18  ;;  %v2232_v48 = vadd.f32 %v12016_v52, %v11415_v30  ;;  %8553 = vmatmul.mubr.msk.bf16.gmra.mrb[204].mxu0 %vm1453_vm2, %v10515_v43 }
 0x276   : > { %v12226_v38 = vpop.f32.mrb[99].mxu0  ;;  %v9204_v56 = vpop.eup %9203  ;;  %v6315_v57 = vadd.f32 0.5, %v5715_v24  ;;  %v5716_v1 = vmul.f32 0.5, %v9202_v6  ;;  %9221 = vtanh.f32 %v4695_v46  ;;  %v4697_v61 = vmul.f32 0.5, %v2313_v28  ;;  %8558 = vmatmul.mubr.msk.bf16.gmra.mrb[204].mxu1 %vm1453_vm2, %v10515_v43  ;;  %3365 = vmatprep.mubr.bf16.mxu0 %v15772_v11 }
 0x277   : > { %v12230_v7 = vpop.f32.mrb[99].mxu1  ;;  %v9206_v0 = vpop.eup %9205  ;;  %6858 = vst [vmem:[%s11342_s16 + $0x9d8] sm:$0xff] %v6258_v37  ;;  %v6317_v59 = vadd.f32 0.5, %v5717_v14  ;;  %v5718_v15 = vmul.f32 0.5, %v9204_v56  ;;  %v4696_v18 = vmul.f32 0.5, %v2232_v48  ;;  %v2315_v52 = vadd.f32 %v12020_v13, %v11415_v30  ;;  %3448 = vmatprep.mubr.bf16.mxu1 %v15772_v11 }
 0x278   : > { %6915 = vst [vmem:[%s11342_s16 + $0xba0] sm:$0xff] %v6315_v57  ;;  %v6316_v49 = vadd.f32 0.5, %v5716_v1  ;;  %v5775_v24 = vmul.f32 0.5, %v9206_v0  ;;  %v9208_v6 = vpop.eup %9207  ;;  %9223 = vtanh.f32 %v4697_v61  ;;  %v2352_v37 = vadd.f32 %v12038_v4, %v11266_v31  ;;  %v12248_v1 = vpop.f32.mrb[100].mxu0 }
 0x279   : > { %6917 = vst [vmem:[%s11342_s16 + $0xbb0] sm:$0xff] %v6317_v59  ;;  %v6318_v46 = vadd.f32 0.5, %v5718_v15  ;;  %v2435_v14 = vadd.f32 %v12043_v5, %v11266_v31  ;;  %v9210_v13 = vpop.eup %9209  ;;  %v5777_v56 = vmul.f32 0.5, %v9208_v6  ;;  %9225 = vtanh.f32 %v4696_v18  ;;  %v12253_v15 = vpop.f32.mrb[100].mxu1 }
 0x27a   : > { %6916 = vst [vmem:[%s11342_s16 + $0xba8] sm:$0xff] %v6316_v49  ;;  %v6375_v28 = vadd.f32 0.5, %v5775_v24  ;;  %v4698_v57 = vmul.f32 0.5, %v2315_v52  ;;  %v5776_v48 = vmul.f32 0.5, %v9210_v13  ;;  %v4159_v0 = vmul.f32 0.5, %v2352_v37  ;;  %v12255_v5 = vpop.f32.mrb[101].mxu0 }
 0x27b   : > { %6918 = vst [vmem:[%s11342_s16 + $0xbb8] sm:$0xff] %v6318_v46  ;;  %v4161_v59 = vmul.f32 0.5, %v2435_v14  ;;  %v2354_v4 = vadd.f32 %v12045_v12, %v11266_v31  ;;  %15814 = vst [vmem:[#allocation7_spill] sm:$0xff] %v12255_v5  ;;  %v9212_v61 = vpop.eup %9211  ;;  %v6377_v49 = vadd.f32 0.5, %v5777_v56  ;;  %v2437_v24 = vadd.f32 %v12052_v42, %v11266_v31  ;;  %v12262_v52 = vpop.f32.mrb[101].mxu1 }
 0x27c   : > { %6975 = vst [vmem:[%s11342_s16 + $0xd80] sm:$0xff] %v6375_v28  ;;  %9227 = vtanh.f32 %v4698_v57  ;;  %v2356_v18 = vadd.f32 %v12054_v23, %v11251_v44  ;;  %15815 = vst [vmem:[#allocation8_spill] sm:$0xff] %v12262_v52  ;;  %v12264_v6 = vpop.f32.mrb[102].mxu0  ;;  %v9214_v12 = vpop.eup %9213  ;;  %v6376_v46 = vadd.f32 0.5, %v5776_v48  ;;  %v5778_v37 = vmul.f32 0.5, %v9212_v61 }
 0x27d   : > { %15816 = vst [vmem:[#allocation9_spill] sm:$0xff] %v12264_v6  ;;  %9229 = vtanh.f32 %v4159_v0  ;;  %v4160_v14 = vmul.f32 0.5, %v2354_v4  ;;  %v12266_v13 = vpop.f32.mrb[102].mxu1  ;;  %v12268_v28 = vpop.f32.mrb[103].mxu0  ;;  %6977 = vst [vmem:[%s11342_s16 + $0xd90] sm:$0xff] %v6377_v49  ;;  %v5835_v42 = vmul.f32 0.5, %v9214_v12  ;;  %v2439_v0 = vadd.f32 %v12056_v62, %v11251_v44  ;;  %8554 = vmatmul.mubr.msk.bf16.gmra.mrb[208].mxu0 %vm1453_vm2, %v10546_v10 }
 0x27e   : > { %v9216_v56 = vpop.eup %9215  ;;  %9231 = vtanh.f32 %v4161_v59  ;;  %v4162_v57 = vmul.f32 0.5, %v2437_v24  ;;  %v4219_v23 = vmul.f32 0.5, %v2356_v18  ;;  %v12271_v5 = vpop.f32.mrb[103].mxu1  ;;  %6976 = vst [vmem:[%s11342_s16 + $0xd88] sm:$0xff] %v6376_v46  ;;  %v6378_v52 = vadd.f32 0.5, %v5778_v37  ;;  %8559 = vmatmul.mubr.msk.bf16.gmra.mrb[208].mxu1 %vm1453_vm2, %v10546_v10  ;;  %3375 = vmatprep.mubr.bf16.mxu0 %v15772_v11 }
 0x27f   : > { %v9218_v6 = vpop.eup %9217  ;;  %v5837_v48 = vmul.f32 0.5, %v9216_v56  ;;  %9233 = vtanh.f32 %v4160_v14  ;;  %v6435_v61 = vadd.f32 0.5, %v5835_v42  ;;  %v2358_v49 = vadd.f32 %v12058_v2, %v11251_v44  ;;  %3458 = vmatprep.mubr.bf16.mxu1 %v15772_v11  ;;  %v15817_v42 = vld [vmem:[#allocation16_spill] sm:$0xff] }
 0x280   : > { %v9220_v4 = vpop.eup %9219  ;;  %v5836_v59 = vmul.f32 0.5, %v9218_v6  ;;  %9235 = vtanh.f32 %v4162_v57  ;;  %6978 = vst [vmem:[%s11342_s16 + $0xd98] sm:$0xff] %v6378_v52  ;;  %v4221_v12 = vmul.f32 0.5, %v2439_v0  ;;  %v2441_v2 = vadd.f32 %v12061_v33, %v11251_v44  ;;  %v12288_v14 = vpop.f32.mrb[104].mxu0 }
 0x281   : > { %v9222_v24 = vpop.eup %9221  ;;  %v6437_v62 = vadd.f32 0.5, %v5837_v48  ;;  %v5838_v18 = vmul.f32 0.5, %v9220_v4  ;;  %9237 = vtanh.f32 %v4219_v23  ;;  %7035 = vst [vmem:[%s11342_s16 + $0xf60] sm:$0xff] %v6435_v61  ;;  %v4220_v37 = vmul.f32 0.5, %v2358_v49  ;;  %v12295_v48 = vpop.f32.mrb[104].mxu1 }
 0x282   : > { %v6436_v6 = vadd.f32 0.5, %v5836_v59  ;;  %v5895_v46 = vmul.f32 0.5, %v9222_v24  ;;  %v9224_v56 = vpop.eup %9223  ;;  %9239 = vtanh.f32 %v4221_v12  ;;  %v2362_v57 = vadd.f32 %v12078_v27, %v15817_v42  ;;  %v12297_v0 = vpop.f32.mrb[105].mxu0 }
 0x283   : > { %7037 = vst [vmem:[%s11342_s16 + $0xf70] sm:$0xff] %v6437_v62  ;;  %v6438_v52 = vadd.f32 0.5, %v5838_v18  ;;  %v2445_v23 = vadd.f32 %v12085_v21, %v15817_v42  ;;  %15818 = vst [vmem:[#allocation10_spill] sm:$0xff] %v12297_v0  ;;  %v9226_v4 = vpop.eup %9225  ;;  %v5897_v61 = vmul.f32 0.5, %v9224_v56  ;;  %9241 = vtanh.f32 %v4220_v37  ;;  %v12300_v49 = vpop.f32.mrb[105].mxu1 }
 0x284   : > { %7036 = vst [vmem:[%s11342_s16 + $0xf68] sm:$0xff] %v6436_v6  ;;  %v6495_v33 = vadd.f32 0.5, %v5895_v46  ;;  %v4222_v59 = vmul.f32 0.5, %v2441_v2  ;;  %v12302_v24 = vpop.f32.mrb[106].mxu0  ;;  %v5896_v27 = vmul.f32 0.5, %v9226_v4  ;;  %v4279_v62 = vmul.f32 0.5, %v2362_v57 }
 0x285   : > { %7038 = vst [vmem:[%s11342_s16 + $0xf78] sm:$0xff] %v6438_v52  ;;  %v4281_v18 = vmul.f32 0.5, %v2445_v23  ;;  %v2364_v21 = vadd.f32 %v12087_v29, %v15817_v42  ;;  %v12307_v12 = vpop.f32.mrb[106].mxu1  ;;  %v12309_v0 = vpop.f32.mrb[107].mxu0  ;;  %v6497_v46 = vadd.f32 0.5, %v5897_v61  ;;  %v2447_v37 = vadd.f32 %v12090_v45, %v15817_v42  ;;  %8555 = vmatmul.mubr.msk.bf16.gmra.mrb[212].mxu0 %vm1453_vm2, %v10560_v16 }
 0x286   : > { %v9228_v6 = vpop.eup %9227  ;;  %7095 = vst [vmem:[%s11342_s16 + $0x1140] sm:$0x3f] %v6495_v33  ;;  %9243 = vtanh.f32 %v4222_v59  ;;  %v2366_v2 = vadd.f32 %v12092_v40, %v11294_v54  ;;  %v12316_v56 = vpop.f32.mrb[107].mxu1  ;;  %v6496_v29 = vadd.f32 0.5, %v5896_v27  ;;  %8560 = vmatmul.mubr.msk.bf16.gmra.mrb[212].mxu1 %vm1453_vm2, %v10560_v16  ;;  %3385 = vmatprep.mubr.bf16.mxu0 %v15772_v11 }
 0x287   : > { %v9230_v52 = vpop.eup %9229  ;;  %v5898_v57 = vmul.f32 0.5, %v9228_v6  ;;  %9245 = vtanh.f32 %v4279_v62  ;;  %v4280_v23 = vmul.f32 0.5, %v2364_v21  ;;  %7097 = vst [vmem:[%s11342_s16 + $0x1150] sm:$0x3f] %v6497_v46  ;;  %v4282_v61 = vmul.f32 0.5, %v2447_v37  ;;  %3468 = vmatprep.mubr.bf16.mxu1 %v15772_v11 }
 0x288   : > { %v9232_v4 = vpop.eup %9231  ;;  %v5359_v33 = vmul.f32 0.5, %v9230_v52  ;;  %9247 = vtanh.f32 %v4281_v18  ;;  %v4339_v45 = vmul.f32 0.5, %v2366_v2  ;;  %7096 = vst [vmem:[%s11342_s16 + $0x1148] sm:$0x3f] %v6496_v29  ;;  %v2449_v62 = vadd.f32 %v12097_v3, %v11294_v54  ;;  %v12330_v37 = vpop.f32.mrb[108].mxu0 }
 0x289   : > { %v9234_v40 = vpop.eup %9233  ;;  %v6498_v59 = vadd.f32 0.5, %v5898_v57  ;;  %v5361_v27 = vmul.f32 0.5, %v9232_v4  ;;  %9249 = vtanh.f32 %v4280_v23  ;;  %v2368_v46 = vadd.f32 %v12099_v41, %v11294_v54  ;;  %15819 = vst [vmem:[#allocation16_spill] sm:$0xff] %v12330_v37  ;;  %v12333_v3 = vpop.f32.mrb[108].mxu1 }
 0x28a   : > { %v9236_v18 = vpop.eup %9235  ;;  %v5959_v21 = vadd.f32 0.5, %v5359_v33  ;;  %v5360_v6 = vmul.f32 0.5, %v9234_v40  ;;  %9251 = vtanh.f32 %v4282_v61  ;;  %v4341_v57 = vmul.f32 0.5, %v2449_v62  ;;  %v12335_v23 = vpop.f32.mrb[109].mxu0 }
 0x28b   : > { %v9238_v2 = vpop.eup %9237  ;;  %7098 = vst [vmem:[%s11342_s16 + $0x1158] sm:$0x3f] %v6498_v59  ;;  %v5961_v52 = vadd.f32 0.5, %v5361_v27  ;;  %v5362_v29 = vmul.f32 0.5, %v9236_v18  ;;  %9253 = vtanh.f32 %v4339_v45  ;;  %v4340_v61 = vmul.f32 0.5, %v2368_v46  ;;  %v12340_v40 = vpop.f32.mrb[109].mxu1 }
 0x28c   : > { %6559 = vst [vmem:[%s11342_s16 + $0x80] sm:$0xff] %v5959_v21  ;;  %v5960_v4 = vadd.f32 0.5, %v5360_v6  ;;  %v5419_v33 = vmul.f32 0.5, %v9238_v2  ;;  %v2451_v41 = vadd.f32 %v12106_v35, %v11294_v54  ;;  %v12342_v37 = vpop.f32.mrb[110].mxu0  ;;  %v9240_v59 = vpop.eup %9239  ;;  %9255 = vtanh.f32 %v4341_v57  ;;  %v15821_v27 = vld [vmem:[#allocation6_spill] sm:$0xff] }
 0x28d   : > { %15820 = vst [vmem:[#allocation30_spill] sm:$0xff] %v12342_v37  ;;  %6561 = vst [vmem:[%s11342_s16 + $0x90] sm:$0xff] %v5961_v52  ;;  %v5962_v45 = vadd.f32 0.5, %v5362_v29  ;;  %v2372_v62 = vadd.f32 %v15821_v27, %v11330_v22  ;;  %v2455_v18 = vadd.f32 %v12123_v51, %v11330_v22  ;;  %v12349_v21 = vpop.f32.mrb[110].mxu1  ;;  %v12351_v6 = vpop.f32.mrb[111].mxu0  ;;  %v5421_v2 = vmul.f32 0.5, %v9240_v59  ;;  %8556 = vmatmul.mubr.msk.bf16.gmra.mrb[216].mxu0 %vm1453_vm2, %v10574_v36 }
 0x28e   : > { %15822 = vst [vmem:[#allocation6_spill] sm:$0xff] %v12351_v6  ;;  %v9242_v35 = vpop.eup %9241  ;;  %6560 = vst [vmem:[%s11342_s16 + $0x88] sm:$0xff] %v5960_v4  ;;  %v6019_v46 = vadd.f32 0.5, %v5419_v33  ;;  %9257 = vtanh.f32 %v4340_v61  ;;  %v4342_v37 = vmul.f32 0.5, %v2451_v41  ;;  %v12354_v52 = vpop.f32.mrb[111].mxu1  ;;  %v2374_v51 = vadd.f32 %v12125_v55, %v11330_v22  ;;  %v15824_v61 = vld [vmem:[#allocation26_spill] sm:$0xff]  ;;  %8561 = vmatmul.mubr.msk.bf16.gmra.mrb[216].mxu1 %vm1453_vm2, %v10574_v36  ;;  %3511 = vmatprep.mubr.bf16.mxu0 %v15772_v11 }
 0x28f   : > { %15823 = vst [vmem:[#allocation31_spill] sm:$0xff] %v12354_v52  ;;  %6562 = vst [vmem:[%s11342_s16 + $0x98] sm:$0xff] %v5962_v45  ;;  %v5420_v29 = vmul.f32 0.5, %v9242_v35  ;;  %v4399_v57 = vmul.f32 0.5, %v2372_v62  ;;  %v4401_v27 = vmul.f32 0.5, %v2455_v18  ;;  %v6021_v4 = vadd.f32 0.5, %v5421_v2  ;;  %3594 = vmatprep.mubr.bf16.mxu1 %v15772_v11 }
 0x290   : > { %v9244_v6 = vpop.eup %9243  ;;  %6619 = vst [vmem:[%s11342_s16 + $0x260] sm:$0xff] %v6019_v46  ;;  %9259 = vtanh.f32 %v4342_v37  ;;  %v2457_v33 = vadd.f32 %v12130_v47, %v11330_v22  ;;  %v2376_v41 = vadd.f32 %v15824_v61, %v11349_v58  ;;  %v4400_v62 = vmul.f32 0.5, %v2374_v51  ;;  %v12371_v46 = vpop.f32.mrb[112].mxu0 }
 0x291   : > { %v9246_v55 = vpop.eup %9245  ;;  %v6020_v59 = vadd.f32 0.5, %v5420_v29  ;;  %v5422_v45 = vmul.f32 0.5, %v9244_v6  ;;  %9261 = vtanh.f32 %v4399_v57  ;;  %6621 = vst [vmem:[%s11342_s16 + $0x270] sm:$0xff] %v6021_v4  ;;  %v2459_v6 = vadd.f32 %v12139_v34, %v11349_v58  ;;  %v12376_v29 = vpop.f32.mrb[112].mxu1 }
 0x292   : > { %v9248_v37 = vpop.eup %9247  ;;  %v5479_v18 = vmul.f32 0.5, %v9246_v55  ;;  %9263 = vtanh.f32 %v4401_v27  ;;  %v4402_v47 = vmul.f32 0.5, %v2457_v33  ;;  %v4459_v35 = vmul.f32 0.5, %v2376_v41  ;;  %15825 = vst [vmem:[#allocation26_spill] sm:$0xff] %v12376_v29  ;;  %v12378_v57 = vpop.f32.mrb[113].mxu0  ;;  %v15827_v33 = vld [vmem:[#allocation27_spill] sm:$0xff] }
 0x293   : > { %v9250_v2 = vpop.eup %9249  ;;  %6620 = vst [vmem:[%s11342_s16 + $0x268] sm:$0xff] %v6020_v59  ;;  %v6022_v61 = vadd.f32 0.5, %v5422_v45  ;;  %v5481_v52 = vmul.f32 0.5, %v9248_v37  ;;  %9265 = vtanh.f32 %v4400_v62  ;;  %15826 = vst [vmem:[#allocation32_spill] sm:$0xff] %v12378_v57  ;;  %v2378_v41 = vadd.f32 %v15827_v33, %v11349_v58  ;;  %v12382_v55 = vpop.f32.mrb[113].mxu1 }
 0x294   : > { %v9252_v51 = vpop.eup %9251  ;;  %v6079_v27 = vadd.f32 0.5, %v5479_v18  ;;  %v5480_v4 = vmul.f32 0.5, %v9250_v2  ;;  %9267 = vtanh.f32 %v4402_v47  ;;  %15828 = vst [vmem:[#allocation27_spill] sm:$0xff] %v12382_v55  ;;  %v12384_v59 = vpop.f32.mrb[114].mxu0  ;;  %v4461_v37 = vmul.f32 0.5, %v2459_v6  ;;  %v15830_v55 = vld [vmem:[#allocation28_spill] sm:$0xff] }
 0x295   : > { %15829 = vst [vmem:[#allocation33_spill] sm:$0xff] %v12384_v59  ;;  %v9254_v45 = vpop.eup %9253  ;;  %6622 = vst [vmem:[%s11342_s16 + $0x278] sm:$0xff] %v6022_v61  ;;  %v6081_v34 = vadd.f32 0.5, %v5481_v52  ;;  %v5482_v62 = vmul.f32 0.5, %v9252_v51  ;;  %9269 = vtanh.f32 %v4459_v35  ;;  %v12387_v57 = vpop.f32.mrb[114].mxu1  ;;  %v4460_v33 = vmul.f32 0.5, %v2378_v41  ;;  %8562 = vmatmul.mubr.msk.bf16.vlgmr.msra.gmra.mrb[220].mxu0 %vm1453_vm2, %v10487_v53 }
 0x296   : > { %v12389_v18 = vpop.f32.mrb[115].mxu0  ;;  %6679 = vst [vmem:[%s11342_s16 + $0x440] sm:$0xff] %v6079_v27  ;;  %v6080_v47 = vadd.f32 0.5, %v5480_v4  ;;  %v5539_v2 = vmul.f32 0.5, %v9254_v45  ;;  %v2461_v29 = vadd.f32 %v15830_v55, %v11349_v58  ;;  %v12394_v59 = vpop.f32.mrb[115].mxu1  ;;  %9271 = vtanh.f32 %v4461_v37  ;;  %v15832_v35 = vld [vmem:[#allocation22_spill] sm:$0xff]  ;;  %8567 = vmatmul.mubr.msk.bf16.vlgmr.msra.gmra.mrb[220].mxu1 %vm1453_vm2, %v10487_v53  ;;  %3521 = vmatprep.mubr.bf16.mxu0 %v15772_v11 }
 0x297   : > { %15831 = vst [vmem:[#allocation28_spill] sm:$0xff] %v12394_v59  ;;  %v9256_v61 = vpop.eup %9255  ;;  %6681 = vst [vmem:[%s11342_s16 + $0x450] sm:$0xff] %v6081_v34  ;;  %v6082_v52 = vadd.f32 0.5, %v5482_v62  ;;  %v2382_v6 = vadd.f32 %v12161_v60, %v15832_v35  ;;  %v2465_v51 = vadd.f32 %v12166_v9, %v15832_v35  ;;  %9273 = vtanh.f32 %v4460_v33  ;;  %v15833_v45 = vld [vmem:[#allocation11_spill] sm:$0xff]  ;;  %v15834_v37 = vld [vmem:[#allocation12_spill] sm:$0xff]  ;;  %3604 = vmatprep.mubr.bf16.mxu1 %v15772_v11 }
 0x298   : > { %v9258_v27 = vpop.eup %9257  ;;  %6680 = vst [vmem:[%s11342_s16 + $0x448] sm:$0xff] %v6080_v47  ;;  %v6139_v4 = vadd.f32 0.5, %v5539_v2  ;;  %v5541_v41 = vmul.f32 0.5, %v9256_v61  ;;  %v4462_v55 = vmul.f32 0.5, %v2461_v29  ;;  %3646 = vmatpush1.bf16.msra.mxu0 %v15833_v45  ;;  %v2384_v9 = vadd.f32 %v12168_v39, %v15832_v35  ;;  %3729 = vmatpush1.bf16.msra.mxu1 %v15834_v37  ;;  %v15835_v59 = vld [vmem:[#allocation13_spill] sm:$0xff]  ;;  %v15836_v29 = vld [vmem:[#allocation23_spill] sm:$0xff] }
 0x299   : > { %6682 = vst [vmem:[%s11342_s16 + $0x458] sm:$0xff] %v6082_v52  ;;  %v5540_v60 = vmul.f32 0.5, %v9258_v27  ;;  %v4519_v34 = vmul.f32 0.5, %v2382_v6  ;;  %v4521_v62 = vmul.f32 0.5, %v2465_v51  ;;  %3811 = vmatprep.subr.bf16.mxu0 %v15835_v59  ;;  %v2467_v33 = vadd.f32 %v15836_v29, %v15832_v35  ;;  %v15837_v61 = vld [vmem:[#allocation25_spill] sm:$0xff]  ;;  %v15838_v6 = vld [vmem:[#allocation14_spill] sm:$0xff] }
 0x29a   : > { %v9260_v47 = vpop.eup %9259  ;;  %6739 = vst [vmem:[%s11342_s16 + $0x620] sm:$0xff] %v6139_v4  ;;  %v6141_v2 = vadd.f32 0.5, %v5541_v41  ;;  %9275 = vtanh.f32 %v4462_v55  ;;  %v2386_v52 = vadd.f32 %v15837_v61, %v15803_v26  ;;  %3894 = vmatprep.subr.bf16.mxu1 %v15838_v6  ;;  %v12418_v51 = vpop.f32.mrb[116].mxu0  ;;  %v4520_v4 = vmul.f32 0.5, %v2384_v9 }
 0x29b   : > { %15839 = vst [vmem:[#allocation22_spill] sm:$0xff] %v12418_v51  ;;  %v9262_v39 = vpop.eup %9261  ;;  %v6140_v27 = vadd.f32 0.5, %v5540_v60  ;;  %v5542_v59 = vmul.f32 0.5, %v9260_v47  ;;  %9277 = vtanh.f32 %v4519_v34  ;;  %v12421_v41 = vpop.f32.mrb[116].mxu1  ;;  %v4522_v29 = vmul.f32 0.5, %v2467_v33 }
 0x29c   : > { %v12423_v55 = vpop.f32.mrb[117].mxu0  ;;  %v9264_v45 = vpop.eup %9263  ;;  %6741 = vst [vmem:[%s11342_s16 + $0x630] sm:$0xff] %v6141_v2  ;;  %v5599_v37 = vmul.f32 0.5, %v9262_v39  ;;  %9279 = vtanh.f32 %v4521_v62  ;;  %v4579_v61 = vmul.f32 0.5, %v2386_v52  ;;  %v2469_v47 = vadd.f32 %v12177_v25, %v15803_v26 }
 0x29d   : > { %15840 = vst [vmem:[#allocation11_spill] sm:$0xff] %v12423_v55  ;;  %v12427_v6 = vpop.f32.mrb[117].mxu1  ;;  %v12429_v51 = vpop.f32.mrb[118].mxu0  ;;  %6740 = vst [vmem:[%s11342_s16 + $0x628] sm:$0xff] %v6140_v27  ;;  %v6142_v34 = vadd.f32 0.5, %v5542_v59  ;;  %v5601_v9 = vmul.f32 0.5, %v9264_v45  ;;  %9281 = vtanh.f32 %v4520_v4  ;;  %v2388_v39 = vadd.f32 %v12179_v19, %v15803_v26  ;;  %8563 = vmatmul.mubr.msk.bf16.gmra.mrb[224].mxu0 %vm1453_vm2, %v10515_v43 }
 0x29e   : > { %15841 = vst [vmem:[#allocation12_spill] sm:$0xff] %v12429_v51  ;;  %v9266_v60 = vpop.eup %9265  ;;  %v12434_v55 = vpop.f32.mrb[118].mxu1  ;;  %v6199_v33 = vadd.f32 0.5, %v5599_v37  ;;  %9283 = vtanh.f32 %v4522_v29  ;;  %v4581_v25 = vmul.f32 0.5, %v2469_v47  ;;  %8568 = vmatmul.mubr.msk.bf16.gmra.mrb[224].mxu1 %vm1453_vm2, %v10515_v43  ;;  %3531 = vmatprep.mubr.bf16.mxu0 %v15772_v11  ;;  %v2475_v47 = vadd.f32 %v12211_v20, %v15808_v8 }
 0x29f   : > { %v12436_v2 = vpop.f32.mrb[119].mxu0  ;;  %v9268_v62 = vpop.eup %9267  ;;  %v5600_v52 = vmul.f32 0.5, %v9266_v60  ;;  %6742 = vst [vmem:[%s11342_s16 + $0x638] sm:$0xff] %v6142_v34  ;;  %v6201_v59 = vadd.f32 0.5, %v5601_v9  ;;  %9285 = vtanh.f32 %v4579_v61  ;;  %v4580_v29 = vmul.f32 0.5, %v2388_v39  ;;  %v15843_v60 = vld [vmem:[#allocation29_spill] sm:$0xff]  ;;  %3614 = vmatprep.mubr.bf16.mxu1 %v15772_v11 }
 0x2a0   : > { %v12440_v51 = vpop.f32.mrb[119].mxu1  ;;  %v9270_v27 = vpop.eup %9269  ;;  %v5602_v4 = vmul.f32 0.5, %v9268_v62  ;;  %6799 = vst [vmem:[%s11342_s16 + $0x800] sm:$0xff] %v6199_v33  ;;  %v2471_v19 = vadd.f32 %v15843_v60, %v15803_v26  ;;  %9287 = vtanh.f32 %v4581_v25  ;;  %v2392_v9 = vadd.f32 %v12208_v17, %v15808_v8 }
 0x2a1   : > { %15842 = vst [vmem:[#allocation13_spill] sm:$0xff] %v12440_v51  ;;  %v6200_v45 = vadd.f32 0.5, %v5600_v52  ;;  %v5659_v37 = vmul.f32 0.5, %v9270_v27  ;;  %v9272_v34 = vpop.eup %9271  ;;  %6801 = vst [vmem:[%s11342_s16 + $0x810] sm:$0xff] %v6201_v59  ;;  %9289 = vtanh.f32 %v4580_v29  ;;  %v12458_v27 = vpop.f32.mrb[120].mxu0  ;;  %v4641_v25 = vmul.f32 0.5, %v2475_v47 }
 0x2a2   : > { %v6202_v61 = vadd.f32 0.5, %v5602_v4  ;;  %v9274_v62 = vpop.eup %9273  ;;  %v5661_v52 = vmul.f32 0.5, %v9272_v34  ;;  %v4582_v39 = vmul.f32 0.5, %v2471_v19  ;;  %v4639_v4 = vmul.f32 0.5, %v2392_v9  ;;  %v12463_v60 = vpop.f32.mrb[120].mxu1  ;;  %v15846_v29 = vld [vmem:[#allocation24_spill] sm:$0xff] }
 0x2a3   : > { %6800 = vst [vmem:[%s11342_s16 + $0x808] sm:$0xff] %v6200_v45  ;;  %v6259_v33 = vadd.f32 0.5, %v5659_v37  ;;  %v5660_v59 = vmul.f32 0.5, %v9274_v62  ;;  %v2394_v17 = vadd.f32 %v12213_v50, %v15808_v8  ;;  %15844 = vst [vmem:[#allocation23_spill] sm:$0xff] %v12463_v60  ;;  %v12465_v20 = vpop.f32.mrb[121].mxu0  ;;  %v2477_v37 = vadd.f32 %v12217_v63, %v15808_v8  ;;  %v12472_v34 = vpop.f32.mrb[121].mxu1 }
 0x2a4   : > { %6802 = vst [vmem:[%s11342_s16 + $0x818] sm:$0xff] %v6202_v61  ;;  %15845 = vst [vmem:[#allocation25_spill] sm:$0xff] %v12465_v20  ;;  %v9276_v51 = vpop.eup %9275  ;;  %v6261_v45 = vadd.f32 0.5, %v5661_v52  ;;  %9291 = vtanh.f32 %v4582_v39  ;;  %v2396_v19 = vadd.f32 %v15846_v29, %v11415_v30  ;;  %v12474_v61 = vpop.f32.mrb[122].mxu0 }
 0x2a5   : > { %6859 = vst [vmem:[%s11342_s16 + $0x9e0] sm:$0xff] %v6259_v33  ;;  %15847 = vst [vmem:[#allocation14_spill] sm:$0xff] %v12472_v34  ;;  %v9278_v50 = vpop.eup %9277  ;;  %v6260_v9 = vadd.f32 0.5, %v5660_v59  ;;  %v5662_v47 = vmul.f32 0.5, %v9276_v51  ;;  %9293 = vtanh.f32 %v4639_v4  ;;  %v4640_v62 = vmul.f32 0.5, %v2394_v17  ;;  %v12476_v20 = vpop.f32.mrb[122].mxu1  ;;  %8564 = vmatmul.mubr.msk.bf16.gmra.mrb[228].mxu0 %vm1453_vm2, %v10546_v10 }
 0x2a6   : > { %15848 = vst [vmem:[#allocation29_spill] sm:$0xff] %v12474_v61  ;;  %v12478_v33 = vpop.f32.mrb[123].mxu0  ;;  %v9280_v52 = vpop.eup %9279  ;;  %6861 = vst [vmem:[%s11342_s16 + $0x9f0] sm:$0xff] %v6261_v45  ;;  %v5719_v63 = vmul.f32 0.5, %v9278_v50  ;;  %9295 = vtanh.f32 %v4641_v25  ;;  %v4642_v39 = vmul.f32 0.5, %v2477_v37  ;;  %v4699_v29 = vmul.f32 0.5, %v2396_v19  ;;  %8569 = vmatmul.mubr.msk.bf16.gmra.mrb[228].mxu1 %vm1453_vm2, %v10546_v10  ;;  %3541 = vmatprep.mubr.bf16.mxu0 %v15772_v11 }
 0x2a7   : > { %v12481_v60 = vpop.f32.mrb[123].mxu1  ;;  %v9282_v61 = vpop.eup %9281  ;;  %6860 = vst [vmem:[%s11342_s16 + $0x9e8] sm:$0xff] %v6260_v9  ;;  %v6262_v34 = vadd.f32 0.5, %v5662_v47  ;;  %v5721_v59 = vmul.f32 0.5, %v9280_v52  ;;  %9297 = vtanh.f32 %v4640_v62  ;;  %v2479_v51 = vadd.f32 %v12224_v32, %v11415_v30  ;;  %3624 = vmatprep.mubr.bf16.mxu1 %v15772_v11 }
 0x2a8   : > { %v9284_v4 = vpop.eup %9283  ;;  %v6319_v17 = vadd.f32 0.5, %v5719_v63  ;;  %v5720_v25 = vmul.f32 0.5, %v9282_v61  ;;  %9299 = vtanh.f32 %v4642_v39  ;;  %v2398_v45 = vadd.f32 %v12226_v38, %v11415_v30  ;;  %v12498_v62 = vpop.f32.mrb[124].mxu0 }
 0x2a9   : > { %v9286_v37 = vpop.eup %9285  ;;  %6862 = vst [vmem:[%s11342_s16 + $0x9f8] sm:$0xff] %v6262_v34  ;;  %v6321_v32 = vadd.f32 0.5, %v5721_v59  ;;  %v5722_v19 = vmul.f32 0.5, %v9284_v4  ;;  %9301 = vtanh.f32 %v4699_v29  ;;  %v4701_v50 = vmul.f32 0.5, %v2479_v51  ;;  %v12505_v29 = vpop.f32.mrb[124].mxu1 }
 0x2aa   : > { %6919 = vst [vmem:[%s11342_s16 + $0xbc0] sm:$0xff] %v6319_v17  ;;  %v6320_v61 = vadd.f32 0.5, %v5720_v25  ;;  %v5779_v9 = vmul.f32 0.5, %v9286_v37  ;;  %v4700_v47 = vmul.f32 0.5, %v2398_v45  ;;  %v2481_v38 = vadd.f32 %v12230_v7, %v11415_v30  ;;  %v9288_v52 = vpop.eup %9287  ;;  %v12507_v59 = vpop.f32.mrb[125].mxu0 }
 0x2ab   : > { %6921 = vst [vmem:[%s11342_s16 + $0xbd0] sm:$0xff] %v6321_v32  ;;  %v6322_v34 = vadd.f32 0.5, %v5722_v19  ;;  %9303 = vtanh.f32 %v4701_v50  ;;  %v2518_v63 = vadd.f32 %v12248_v1, %v11266_v31  ;;  %v2601_v39 = vadd.f32 %v12253_v15, %v11266_v31  ;;  %15849 = vst [vmem:[#allocation24_spill] sm:$0xff] %v12507_v59  ;;  %v9290_v51 = vpop.eup %9289  ;;  %v12510_v25 = vpop.f32.mrb[125].mxu1  ;;  %v15850_v15 = vld [vmem:[#allocation7_spill] sm:$0xff] }
 0x2ac   : > { %6920 = vst [vmem:[%s11342_s16 + $0xbc8] sm:$0xff] %v6320_v61  ;;  %v6379_v7 = vadd.f32 0.5, %v5779_v9  ;;  %v5781_v4 = vmul.f32 0.5, %v9288_v52  ;;  %9305 = vtanh.f32 %v4700_v47  ;;  %v4702_v17 = vmul.f32 0.5, %v2481_v38  ;;  %v12512_v45 = vpop.f32.mrb[126].mxu0  ;;  %v12517_v50 = vpop.f32.mrb[126].mxu1 }
 0x2ad   : > { %6922 = vst [vmem:[%s11342_s16 + $0xbd8] sm:$0xff] %v6322_v34  ;;  %v5780_v1 = vmul.f32 0.5, %v9290_v51  ;;  %v4163_v37 = vmul.f32 0.5, %v2518_v63  ;;  %v4165_v32 = vmul.f32 0.5, %v2601_v39  ;;  %v2520_v19 = vadd.f32 %v15850_v15, %v11266_v31  ;;  %15851 = vst [vmem:[#allocation7_spill] sm:$0xff] %v12517_v50  ;;  %v12519_v59 = vpop.f32.mrb[127].mxu0  ;;  %8565 = vmatmul.mubr.msk.bf16.gmra.mrb[232].mxu0 %vm1453_vm2, %v10560_v16 }
 0x2ae   : > { %v9292_v61 = vpop.eup %9291  ;;  %6979 = vst [vmem:[%s11342_s16 + $0xda0] sm:$0xff] %v6379_v7  ;;  %v6381_v9 = vadd.f32 0.5, %v5781_v4  ;;  %9307 = vtanh.f32 %v4702_v17  ;;  %v15852_v47 = vld [vmem:[#allocation8_spill] sm:$0xff]  ;;  %v15853_v52 = vld [vmem:[#allocation9_spill] sm:$0xff]  ;;  %v12526_v63 = vpop.f32.mrb[127].mxu1  ;;  %8570 = vmatmul.mubr.msk.bf16.gmra.mrb[232].mxu1 %vm1453_vm2, %v10560_v16  ;;  %3551 = vmatprep.mubr.bf16.mxu0 %v15772_v11 }
 0x2af   : > { %v2603_v38 = vadd.f32 %v15852_v47, %v11266_v31  ;;  %v2522_v34 = vadd.f32 %v15853_v52, %v11251_v44  ;;  %15854 = vst [vmem:[#allocation8_spill] sm:$0xff] %v12526_v63  ;;  %v9294_v39 = vpop.eup %9293  ;;  %v6380_v51 = vadd.f32 0.5, %v5780_v1  ;;  %v5782_v15 = vmul.f32 0.5, %v9292_v61  ;;  %3634 = vmatprep.mubr.bf16.mxu1 %v15772_v11 }
 0x2b0   : > { %9309 = vtanh.f32 %v4163_v37  ;;  %v4164_v50 = vmul.f32 0.5, %v2520_v19  ;;  %v9296_v7 = vpop.eup %9295  ;;  %6981 = vst [vmem:[%s11342_s16 + $0xdb0] sm:$0xff] %v6381_v9  ;;  %v5839_v4 = vmul.f32 0.5, %v9294_v39  ;;  %v2605_v19 = vadd.f32 %v12266_v13, %v11251_v44 }
 0x2b1   : > { %9311 = vtanh.f32 %v4165_v32  ;;  %v4166_v17 = vmul.f32 0.5, %v2603_v38  ;;  %v4223_v47 = vmul.f32 0.5, %v2522_v34  ;;  %v9298_v52 = vpop.eup %9297  ;;  %6980 = vst [vmem:[%s11342_s16 + $0xda8] sm:$0xff] %v6380_v51  ;;  %v6382_v1 = vadd.f32 0.5, %v5782_v15  ;;  %v12540_v34 = vpop.f32.mrb[128].mxu0 }
 0x2b2   : > { %v5841_v37 = vmul.f32 0.5, %v9296_v7  ;;  %9313 = vtanh.f32 %v4164_v50  ;;  %v9300_v32 = vpop.eup %9299  ;;  %v6439_v61 = vadd.f32 0.5, %v5839_v4  ;;  %v5840_v9 = vmul.f32 0.5, %v9298_v52  ;;  %15855 = vst [vmem:[#allocation9_spill] sm:$0xff] %v12540_v34  ;;  %v12543_v13 = vpop.f32.mrb[128].mxu1 }
 0x2b3   : > { %9315 = vtanh.f32 %v4166_v17  ;;  %v2524_v38 = vadd.f32 %v12268_v28, %v11251_v44  ;;  %v9302_v39 = vpop.eup %9301  ;;  %6982 = vst [vmem:[%s11342_s16 + $0xdb8] sm:$0xff] %v6382_v1  ;;  %v5842_v50 = vmul.f32 0.5, %v9300_v32  ;;  %v4225_v15 = vmul.f32 0.5, %v2605_v19  ;;  %v12545_v7 = vpop.f32.mrb[129].mxu0 }
 0x2b4   : > { %v6441_v51 = vadd.f32 0.5, %v5841_v37  ;;  %9317 = vtanh.f32 %v4223_v47  ;;  %7039 = vst [vmem:[%s11342_s16 + $0xf80] sm:$0xff] %v6439_v61  ;;  %v6440_v4 = vadd.f32 0.5, %v5840_v9  ;;  %v5899_v17 = vmul.f32 0.5, %v9302_v39  ;;  %v12550_v34 = vpop.f32.mrb[129].mxu1  ;;  %v12552_v63 = vpop.f32.mrb[130].mxu0 }
 0x2b5   : > { %v4224_v52 = vmul.f32 0.5, %v2524_v38  ;;  %v2607_v28 = vadd.f32 %v12271_v5, %v11251_v44  ;;  %15856 = vst [vmem:[#allocation34_spill] sm:$0xff] %v12552_v63  ;;  %v9304_v1 = vpop.eup %9303  ;;  %v6442_v47 = vadd.f32 0.5, %v5842_v50  ;;  %9319 = vtanh.f32 %v4225_v15  ;;  %v12559_v32 = vpop.f32.mrb[130].mxu1  ;;  %v15858_v63 = vld [vmem:[#allocation10_spill] sm:$0xff]  ;;  %8566 = vmatmul.mubr.msk.bf16.gmra.mrb[236].mxu0 %vm1453_vm2, %v10574_v36 }
 0x2b6   : > { %7041 = vst [vmem:[%s11342_s16 + $0xf90] sm:$0xff] %v6441_v51  ;;  %v2528_v37 = vadd.f32 %v12288_v14, %v15817_v42  ;;  %v2611_v19 = vadd.f32 %v12295_v48, %v15817_v42  ;;  %v12561_v61 = vpop.f32.mrb[131].mxu0  ;;  %v9306_v5 = vpop.eup %9305  ;;  %7040 = vst [vmem:[%s11342_s16 + $0xf88] sm:$0xff] %v6440_v4  ;;  %v6499_v9 = vadd.f32 0.5, %v5899_v17  ;;  %v5901_v38 = vmul.f32 0.5, %v9304_v1  ;;  %8571 = vmatmul.mubr.msk.bf16.gmra.mrb[236].mxu1 %vm1453_vm2, %v10574_v36 }
 0x2b7   : > { %15857 = vst [vmem:[#allocation35_spill] sm:$0xff] %v12561_v61  ;;  %9321 = vtanh.f32 %v4224_v52  ;;  %v4226_v39 = vmul.f32 0.5, %v2607_v28  ;;  %v12564_v51 = vpop.f32.mrb[131].mxu1  ;;  %7042 = vst [vmem:[%s11342_s16 + $0xf98] sm:$0xff] %v6442_v47  ;;  %v5900_v50 = vmul.f32 0.5, %v9306_v5  ;;  %v2530_v48 = vadd.f32 %v15858_v63, %v15817_v42  ;;  %3677 = vmatprep.mubr.bf16.mxu0 %v15772_v11  ;;  %3760 = vmatprep.mubr.bf16.mxu1 %v15772_v11 }
 0x2b8   : > { %v4283_v15 = vmul.f32 0.5, %v2528_v37  ;;  %v4285_v14 = vmul.f32 0.5, %v2611_v19  ;;  %v9308_v61 = vpop.eup %9307  ;;  %7099 = vst [vmem:[%s11342_s16 + $0x1160] sm:$0x3f] %v6499_v9  ;;  %v6501_v4 = vadd.f32 0.5, %v5901_v38  ;;  %v2613_v17 = vadd.f32 %v12300_v49, %v15817_v42 }
 0x2b9   : > { %9323 = vtanh.f32 %v4226_v39  ;;  %v2532_v52 = vadd.f32 %v12302_v24, %v11294_v54  ;;  %v6500_v28 = vadd.f32 0.5, %v5900_v50  ;;  %v5902_v1 = vmul.f32 0.5, %v9308_v61  ;;  %v12581_v24 = vpop.f32.mrb[132].mxu0  ;;  %v12586_v50 = vpop.f32.mrb[132].mxu1 }
 0x2ba   : > { %v9310_v63 = vpop.eup %9309  ;;  %9325 = vtanh.f32 %v4283_v15  ;;  %v4284_v47 = vmul.f32 0.5, %v2530_v48  ;;  %7101 = vst [vmem:[%s11342_s16 + $0x1170] sm:$0x3f] %v6501_v4  ;;  %v4286_v49 = vmul.f32 0.5, %v2613_v17  ;;  %v2615_v61 = vadd.f32 %v12307_v12, %v11294_v54  ;;  %v12588_v15 = vpop.f32.mrb[133].mxu0 }
 0x2bb   : > { %v9312_v37 = vpop.eup %9311  ;;  %v5363_v19 = vmul.f32 0.5, %v9310_v63  ;;  %9327 = vtanh.f32 %v4285_v14  ;;  %v4343_v5 = vmul.f32 0.5, %v2532_v52  ;;  %7100 = vst [vmem:[%s11342_s16 + $0x1168] sm:$0x3f] %v6500_v28  ;;  %v6502_v38 = vadd.f32 0.5, %v5902_v1  ;;  %v12592_v52 = vpop.f32.mrb[133].mxu1 }
 0x2bc   : > { %v9314_v9 = vpop.eup %9313  ;;  %v5365_v39 = vmul.f32 0.5, %v9312_v37  ;;  %9329 = vtanh.f32 %v4284_v47  ;;  %v2534_v17 = vadd.f32 %v12309_v0, %v11294_v54  ;;  %15859 = vst [vmem:[#allocation10_spill] sm:$0xff] %v12592_v52  ;;  %v12594_v63 = vpop.f32.mrb[134].mxu0  ;;  %v4345_v47 = vmul.f32 0.5, %v2615_v61 }
 0x2bd   : > { %v9316_v48 = vpop.eup %9315  ;;  %v5963_v14 = vadd.f32 0.5, %v5363_v19  ;;  %v5364_v4 = vmul.f32 0.5, %v9314_v9  ;;  %9331 = vtanh.f32 %v4286_v49  ;;  %15860 = vst [vmem:[#allocation36_spill] sm:$0xff] %v12594_v63  ;;  %7102 = vst [vmem:[%s11342_s16 + $0x1178] sm:$0x3f] %v6502_v38  ;;  %v12597_v37 = vpop.f32.mrb[134].mxu1  ;;  %v2617_v52 = vadd.f32 %v12316_v56, %v11294_v54  ;;  %8572 = vmatmul.mubr.msk.bf16.vlgmr.msra.gmra.mrb[240].mxu0 %vm1453_vm2, %v10487_v53 }
 0x2be   : > { %v9318_v28 = vpop.eup %9317  ;;  %v5965_v12 = vadd.f32 0.5, %v5365_v39  ;;  %v5366_v1 = vmul.f32 0.5, %v9316_v48  ;;  %9333 = vtanh.f32 %v4343_v5  ;;  %v12599_v19 = vpop.f32.mrb[135].mxu0  ;;  %v4344_v0 = vmul.f32 0.5, %v2534_v17  ;;  %v15862_v5 = vld [vmem:[#allocation16_spill] sm:$0xff]  ;;  %8577 = vmatmul.mubr.msk.bf16.vlgmr.msra.gmra.mrb[240].mxu1 %vm1453_vm2, %v10487_v53  ;;  %3687 = vmatprep.mubr.bf16.mxu0 %v15772_v11 }
 0x2bf   : > { %6563 = vst [vmem:[%s11342_s16 + $0xa0] sm:$0xff] %v5963_v14  ;;  %v5964_v49 = vadd.f32 0.5, %v5364_v4  ;;  %v5423_v9 = vmul.f32 0.5, %v9318_v28  ;;  %v12604_v63 = vpop.f32.mrb[135].mxu1  ;;  %v9320_v38 = vpop.eup %9319  ;;  %9335 = vtanh.f32 %v4345_v47  ;;  %v2538_v61 = vadd.f32 %v15862_v5, %v11330_v22  ;;  %v15863_v28 = vld [vmem:[#allocation15_spill] sm:$0xff]  ;;  %v15864_v5 = vld [vmem:[#allocation17_spill] sm:$0xff]  ;;  %3770 = vmatprep.mubr.bf16.mxu1 %v15772_v11 }
 0x2c0   : > { %15861 = vst [vmem:[#allocation37_spill] sm:$0xff] %v12604_v63  ;;  %6565 = vst [vmem:[%s11342_s16 + $0xb0] sm:$0xff] %v5965_v12  ;;  %v5966_v39 = vadd.f32 0.5, %v5366_v1  ;;  %v2621_v48 = vadd.f32 %v12333_v3, %v11330_v22  ;;  %v5425_v4 = vmul.f32 0.5, %v9320_v38  ;;  %9337 = vtanh.f32 %v4344_v0  ;;  %3812 = vmatpush1.bf16.msra.mxu0 %v15863_v28  ;;  %3895 = vmatpush1.bf16.msra.mxu1 %v15864_v5  ;;  %v15865_v63 = vld [vmem:[#allocation18_spill] sm:$0xff] }
 0x2c1   : > { %v9322_v14 = vpop.eup %9321  ;;  %6564 = vst [vmem:[%s11342_s16 + $0xa8] sm:$0xff] %v5964_v49  ;;  %v6023_v56 = vadd.f32 0.5, %v5423_v9  ;;  %v4346_v17 = vmul.f32 0.5, %v2617_v52  ;;  %v4403_v1 = vmul.f32 0.5, %v2538_v61  ;;  %v2540_v3 = vadd.f32 %v12335_v23, %v11330_v22  ;;  %3977 = vmatprep.subr.bf16.mxu0 %v15865_v63  ;;  %v15866_v0 = vld [vmem:[#allocation30_spill] sm:$0xff]  ;;  %v12628_v61 = vpop.f32.mrb[136].mxu0 }
 0x2c2   : > { %6566 = vst [vmem:[%s11342_s16 + $0xb8] sm:$0xff] %v5966_v39  ;;  %v5424_v12 = vmul.f32 0.5, %v9322_v14  ;;  %v4405_v47 = vmul.f32 0.5, %v2621_v48  ;;  %v6025_v9 = vadd.f32 0.5, %v5425_v4  ;;  %v2623_v52 = vadd.f32 %v12340_v40, %v11330_v22  ;;  %v15867_v39 = vld [vmem:[#allocation19_spill] sm:$0xff]  ;;  %v12633_v4 = vpop.f32.mrb[137].mxu0 }
 0x2c3   : > { %v9324_v49 = vpop.eup %9323  ;;  %6623 = vst [vmem:[%s11342_s16 + $0x280] sm:$0xff] %v6023_v56  ;;  %9339 = vtanh.f32 %v4346_v17  ;;  %v2542_v38 = vadd.f32 %v15866_v0, %v11349_v58  ;;  %4060 = vmatprep.subr.bf16.mxu1 %v15867_v39  ;;  %v4404_v14 = vmul.f32 0.5, %v2540_v3  ;;  %v12631_v56 = vpop.f32.mrb[136].mxu1  ;;  %15868 = vst [vmem:[#allocation16_spill] sm:$0xff] %v12633_v4 }
 0x2c4   : > { %v9326_v23 = vpop.eup %9325  ;;  %v6024_v48 = vadd.f32 0.5, %v5424_v12  ;;  %v5426_v63 = vmul.f32 0.5, %v9324_v49  ;;  %9341 = vtanh.f32 %v4403_v1  ;;  %6625 = vst [vmem:[%s11342_s16 + $0x290] sm:$0xff] %v6025_v9  ;;  %v4406_v28 = vmul.f32 0.5, %v2623_v52  ;;  %v12637_v0 = vpop.f32.mrb[137].mxu1 }
 0x2c5   : > { %v9328_v40 = vpop.eup %9327  ;;  %v5483_v17 = vmul.f32 0.5, %v9326_v23  ;;  %9343 = vtanh.f32 %v4405_v47  ;;  %v4463_v5 = vmul.f32 0.5, %v2542_v38  ;;  %15869 = vst [vmem:[#allocation15_spill] sm:$0xff] %v12637_v0  ;;  %v12639_v39 = vpop.f32.mrb[138].mxu0  ;;  %v2625_v49 = vadd.f32 %v12349_v21, %v11349_v58  ;;  %v15873_v23 = vld [vmem:[#allocation6_spill] sm:$0xff]  ;;  %8573 = vmatmul.mubr.msk.bf16.gmra.mrb[244].mxu0 %vm1453_vm2, %v10515_v43 }
 0x2c6   : > { %15870 = vst [vmem:[#allocation17_spill] sm:$0xff] %v12639_v39  ;;  %v9330_v12 = vpop.eup %9329  ;;  %6624 = vst [vmem:[%s11342_s16 + $0x288] sm:$0xff] %v6024_v48  ;;  %v6026_v1 = vadd.f32 0.5, %v5426_v63  ;;  %v5485_v3 = vmul.f32 0.5, %v9328_v40  ;;  %9345 = vtanh.f32 %v4404_v14  ;;  %v12644_v4 = vpop.f32.mrb[138].mxu1  ;;  %v2544_v39 = vadd.f32 %v15873_v23, %v11349_v58  ;;  %8578 = vmatmul.mubr.msk.bf16.gmra.mrb[244].mxu1 %vm1453_vm2, %v10515_v43  ;;  %3697 = vmatprep.mubr.bf16.mxu0 %v15772_v11 }
 0x2c7   : > { %15871 = vst [vmem:[#allocation18_spill] sm:$0xff] %v12644_v4  ;;  %v12646_v9 = vpop.f32.mrb[139].mxu0  ;;  %v9332_v47 = vpop.eup %9331  ;;  %v6083_v52 = vadd.f32 0.5, %v5483_v17  ;;  %v5484_v38 = vmul.f32 0.5, %v9330_v12  ;;  %9347 = vtanh.f32 %v4406_v28  ;;  %v4465_v21 = vmul.f32 0.5, %v2625_v49  ;;  %v15875_v12 = vld [vmem:[#allocation31_spill] sm:$0xff]  ;;  %3780 = vmatprep.mubr.bf16.mxu1 %v15772_v11 }
 0x2c8   : > { %15872 = vst [vmem:[#allocation30_spill] sm:$0xff] %v12646_v9  ;;  %v12650_v0 = vpop.f32.mrb[139].mxu1  ;;  %v9334_v48 = vpop.eup %9333  ;;  %6626 = vst [vmem:[%s11342_s16 + $0x298] sm:$0xff] %v6026_v1  ;;  %v6085_v63 = vadd.f32 0.5, %v5485_v3  ;;  %v5486_v14 = vmul.f32 0.5, %v9332_v47  ;;  %9349 = vtanh.f32 %v4463_v5  ;;  %v4464_v28 = vmul.f32 0.5, %v2544_v39 }
 0x2c9   : > { %15874 = vst [vmem:[#allocation19_spill] sm:$0xff] %v12650_v0  ;;  %6683 = vst [vmem:[%s11342_s16 + $0x460] sm:$0xff] %v6083_v52  ;;  %v6084_v40 = vadd.f32 0.5, %v5484_v38  ;;  %v5543_v17 = vmul.f32 0.5, %v9334_v48  ;;  %v2627_v23 = vadd.f32 %v15875_v12, %v11349_v58  ;;  %v9336_v1 = vpop.eup %9335  ;;  %9351 = vtanh.f32 %v4465_v21  ;;  %v15876_v49 = vld [vmem:[#allocation26_spill] sm:$0xff]  ;;  %v12668_v12 = vpop.f32.mrb[140].mxu0 }
 0x2ca   : > { %6685 = vst [vmem:[%s11342_s16 + $0x470] sm:$0xff] %v6085_v63  ;;  %v6086_v5 = vadd.f32 0.5, %v5486_v14  ;;  %v2548_v3 = vadd.f32 %v12371_v46, %v15832_v35  ;;  %v2631_v47 = vadd.f32 %v15876_v49, %v15832_v35  ;;  %v9338_v39 = vpop.eup %9337  ;;  %v5545_v38 = vmul.f32 0.5, %v9336_v1  ;;  %15877 = vst [vmem:[#allocation6_spill] sm:$0xff] %v12668_v12  ;;  %v15878_v46 = vld [vmem:[#allocation32_spill] sm:$0xff]  ;;  %v12673_v9 = vpop.f32.mrb[140].mxu1 }
 0x2cb   : > { %6684 = vst [vmem:[%s11342_s16 + $0x468] sm:$0xff] %v6084_v40  ;;  %v6143_v52 = vadd.f32 0.5, %v5543_v17  ;;  %9353 = vtanh.f32 %v4464_v28  ;;  %v4466_v48 = vmul.f32 0.5, %v2627_v23  ;;  %v5544_v63 = vmul.f32 0.5, %v9338_v39  ;;  %15879 = vst [vmem:[#allocation31_spill] sm:$0xff] %v12673_v9  ;;  %v12675_v49 = vpop.f32.mrb[141].mxu0 }
 0x2cc   : > { %6686 = vst [vmem:[%s11342_s16 + $0x478] sm:$0xff] %v6086_v5  ;;  %v4523_v14 = vmul.f32 0.5, %v2548_v3  ;;  %v4525_v21 = vmul.f32 0.5, %v2631_v47  ;;  %v2550_v0 = vadd.f32 %v15878_v46, %v15832_v35  ;;  %15880 = vst [vmem:[#allocation26_spill] sm:$0xff] %v12675_v49  ;;  %v6145_v40 = vadd.f32 0.5, %v5545_v38  ;;  %v15881_v17 = vld [vmem:[#allocation27_spill] sm:$0xff] }
 0x2cd   : > { %v9340_v4 = vpop.eup %9339  ;;  %6743 = vst [vmem:[%s11342_s16 + $0x640] sm:$0xff] %v6143_v52  ;;  %9355 = vtanh.f32 %v4466_v48  ;;  %v2633_v28 = vadd.f32 %v15881_v17, %v15832_v35  ;;  %v15882_v23 = vld [vmem:[#allocation33_spill] sm:$0xff]  ;;  %v12682_v5 = vpop.f32.mrb[141].mxu1  ;;  %v6144_v39 = vadd.f32 0.5, %v5544_v63  ;;  %8574 = vmatmul.mubr.msk.bf16.gmra.mrb[248].mxu0 %vm1453_vm2, %v10546_v10 }
 0x2ce   : > { %v2552_v1 = vadd.f32 %v15882_v23, %v15803_v26  ;;  %15883 = vst [vmem:[#allocation32_spill] sm:$0xff] %v12682_v5  ;;  %v12684_v3 = vpop.f32.mrb[142].mxu0  ;;  %v9342_v47 = vpop.eup %9341  ;;  %v5546_v46 = vmul.f32 0.5, %v9340_v4  ;;  %9357 = vtanh.f32 %v4523_v14  ;;  %v4524_v49 = vmul.f32 0.5, %v2550_v0  ;;  %6745 = vst [vmem:[%s11342_s16 + $0x650] sm:$0xff] %v6145_v40  ;;  %8579 = vmatmul.mubr.msk.bf16.gmra.mrb[248].mxu1 %vm1453_vm2, %v10546_v10  ;;  %3707 = vmatprep.mubr.bf16.mxu0 %v15772_v11 }
 0x2cf   : > { %15884 = vst [vmem:[#allocation27_spill] sm:$0xff] %v12684_v3  ;;  %v12686_v9 = vpop.f32.mrb[142].mxu1  ;;  %v12688_v52 = vpop.f32.mrb[143].mxu0  ;;  %v5603_v48 = vmul.f32 0.5, %v9342_v47  ;;  %9359 = vtanh.f32 %v4525_v21  ;;  %v4526_v17 = vmul.f32 0.5, %v2633_v28  ;;  %6744 = vst [vmem:[%s11342_s16 + $0x648] sm:$0xff] %v6144_v39  ;;  %v2635_v4 = vadd.f32 %v12387_v57, %v15803_v26  ;;  %3790 = vmatprep.mubr.bf16.mxu1 %v15772_v11 }
 0x2d0   : > { %v9344_v38 = vpop.eup %9343  ;;  %v4583_v23 = vmul.f32 0.5, %v2552_v1  ;;  %v12691_v12 = vpop.f32.mrb[143].mxu1  ;;  %v6146_v5 = vadd.f32 0.5, %v5546_v46  ;;  %9361 = vtanh.f32 %v4524_v49  ;;  %v2554_v40 = vadd.f32 %v12389_v18, %v15803_v26  ;;  %v15885_v18 = vld [vmem:[#allocation28_spill] sm:$0xff] }
 0x2d1   : > { %v9346_v3 = vpop.eup %9345  ;;  %v5605_v63 = vmul.f32 0.5, %v9344_v38  ;;  %v6203_v14 = vadd.f32 0.5, %v5603_v48  ;;  %9363 = vtanh.f32 %v4526_v17  ;;  %v4585_v1 = vmul.f32 0.5, %v2635_v4  ;;  %v12708_v38 = vpop.f32.mrb[144].mxu0  ;;  %v15887_v17 = vld [vmem:[#allocation22_spill] sm:$0xff] }
 0x2d2   : > { %v9348_v0 = vpop.eup %9347  ;;  %v5604_v21 = vmul.f32 0.5, %v9346_v3  ;;  %6746 = vst [vmem:[%s11342_s16 + $0x658] sm:$0xff] %v6146_v5  ;;  %9365 = vtanh.f32 %v4583_v23  ;;  %v4584_v39 = vmul.f32 0.5, %v2554_v40  ;;  %v2637_v46 = vadd.f32 %v15885_v18, %v15803_v26  ;;  %15886 = vst [vmem:[#allocation33_spill] sm:$0xff] %v12708_v38  ;;  %v12715_v4 = vpop.f32.mrb[144].mxu1 }
 0x2d3   : > { %v9350_v49 = vpop.eup %9349  ;;  %v6205_v57 = vadd.f32 0.5, %v5605_v63  ;;  %v5606_v28 = vmul.f32 0.5, %v9348_v0  ;;  %6803 = vst [vmem:[%s11342_s16 + $0x820] sm:$0xff] %v6203_v14  ;;  %9367 = vtanh.f32 %v4585_v1  ;;  %v2558_v23 = vadd.f32 %v15887_v17, %v15808_v8  ;;  %15888 = vst [vmem:[#allocation28_spill] sm:$0xff] %v12715_v4  ;;  %v12717_v0 = vpop.f32.mrb[145].mxu0 }
 0x2d4   : > { %v6204_v3 = vadd.f32 0.5, %v5604_v21  ;;  %v5663_v47 = vmul.f32 0.5, %v9350_v49  ;;  %v9352_v48 = vpop.eup %9351  ;;  %v2641_v63 = vadd.f32 %v12421_v41, %v15808_v8  ;;  %15889 = vst [vmem:[#allocation22_spill] sm:$0xff] %v12717_v0  ;;  %9369 = vtanh.f32 %v4584_v39  ;;  %v15890_v41 = vld [vmem:[#allocation11_spill] sm:$0xff] }
 0x2d5   : > { %6805 = vst [vmem:[%s11342_s16 + $0x830] sm:$0xff] %v6205_v57  ;;  %v6206_v5 = vadd.f32 0.5, %v5606_v28  ;;  %v9354_v14 = vpop.eup %9353  ;;  %v5665_v40 = vmul.f32 0.5, %v9352_v48  ;;  %v4586_v49 = vmul.f32 0.5, %v2637_v46  ;;  %v12720_v57 = vpop.f32.mrb[145].mxu1  ;;  %v4643_v18 = vmul.f32 0.5, %v2558_v23  ;;  %8575 = vmatmul.mubr.msk.bf16.gmra.mrb[252].mxu0 %vm1453_vm2, %v10560_v16 }
 0x2d6   : > { %6804 = vst [vmem:[%s11342_s16 + $0x828] sm:$0xff] %v6204_v3  ;;  %v6263_v21 = vadd.f32 0.5, %v5663_v47  ;;  %v12722_v28 = vpop.f32.mrb[146].mxu0  ;;  %v5664_v1 = vmul.f32 0.5, %v9354_v14  ;;  %v4645_v17 = vmul.f32 0.5, %v2641_v63  ;;  %v2560_v4 = vadd.f32 %v15890_v41, %v15808_v8  ;;  %v12727_v38 = vpop.f32.mrb[146].mxu1  ;;  %8580 = vmatmul.mubr.msk.bf16.gmra.mrb[252].mxu1 %vm1453_vm2, %v10560_v16  ;;  %3717 = vmatprep.mubr.bf16.mxu0 %v15772_v11 }
 0x2d7   : > { %6806 = vst [vmem:[%s11342_s16 + $0x838] sm:$0xff] %v6206_v5  ;;  %v12729_v0 = vpop.f32.mrb[147].mxu0  ;;  %v9356_v3 = vpop.eup %9355  ;;  %v6265_v47 = vadd.f32 0.5, %v5665_v40  ;;  %9371 = vtanh.f32 %v4586_v49  ;;  %v2643_v39 = vadd.f32 %v12427_v6, %v15808_v8  ;;  %v15892_v46 = vld [vmem:[#allocation12_spill] sm:$0xff]  ;;  %3800 = vmatprep.mubr.bf16.mxu1 %v15772_v11 }
 0x2d8   : > { %15891 = vst [vmem:[#allocation11_spill] sm:$0xff] %v12729_v0  ;;  %6863 = vst [vmem:[%s11342_s16 + $0xa00] sm:$0xff] %v6263_v21  ;;  %v2562_v48 = vadd.f32 %v15892_v46, %v11415_v30  ;;  %v12736_v5 = vpop.f32.mrb[147].mxu1  ;;  %v9358_v23 = vpop.eup %9357  ;;  %v6264_v63 = vadd.f32 0.5, %v5664_v1  ;;  %v5666_v14 = vmul.f32 0.5, %v9356_v3  ;;  %9373 = vtanh.f32 %v4643_v18 }
 0x2d9   : > { %15893 = vst [vmem:[#allocation12_spill] sm:$0xff] %v12736_v5  ;;  %v4644_v41 = vmul.f32 0.5, %v2560_v4  ;;  %v9360_v21 = vpop.eup %9359  ;;  %6865 = vst [vmem:[%s11342_s16 + $0xa10] sm:$0xff] %v6265_v47  ;;  %v5723_v40 = vmul.f32 0.5, %v9358_v23  ;;  %9375 = vtanh.f32 %v4645_v17  ;;  %v4646_v49 = vmul.f32 0.5, %v2643_v39 }
 0x2da   : > { %v4703_v6 = vmul.f32 0.5, %v2562_v48  ;;  %v9362_v46 = vpop.eup %9361  ;;  %6864 = vst [vmem:[%s11342_s16 + $0xa08] sm:$0xff] %v6264_v63  ;;  %v6266_v1 = vadd.f32 0.5, %v5666_v14  ;;  %v5725_v18 = vmul.f32 0.5, %v9360_v21  ;;  %v2645_v4 = vadd.f32 %v12434_v55, %v11415_v30  ;;  %v12750_v48 = vpop.f32.mrb[148].mxu0 }
 0x2db   : > { %9377 = vtanh.f32 %v4644_v41  ;;  %v9364_v17 = vpop.eup %9363  ;;  %v6323_v3 = vadd.f32 0.5, %v5723_v40  ;;  %v5724_v47 = vmul.f32 0.5, %v9362_v46  ;;  %v2564_v39 = vadd.f32 %v12436_v2, %v11415_v30  ;;  %15894 = vst [vmem:[#allocation38_spill] sm:$0xff] %v12750_v48  ;;  %v12753_v55 = vpop.f32.mrb[148].mxu1  ;;  %v15895_v2 = vld [vmem:[#allocation13_spill] sm:$0xff] }
 0x2dc   : > { %9379 = vtanh.f32 %v4646_v49  ;;  %v9366_v23 = vpop.eup %9365  ;;  %6866 = vst [vmem:[%s11342_s16 + $0xa18] sm:$0xff] %v6266_v1  ;;  %v6325_v63 = vadd.f32 0.5, %v5725_v18  ;;  %v5726_v14 = vmul.f32 0.5, %v9364_v17  ;;  %v4705_v41 = vmul.f32 0.5, %v2645_v4  ;;  %v12755_v21 = vpop.f32.mrb[149].mxu0  ;;  %v15898_v4 = vld [vmem:[#allocation23_spill] sm:$0xff] }
 0x2dd   : > { %9381 = vtanh.f32 %v4703_v6  ;;  %6923 = vst [vmem:[%s11342_s16 + $0xbe0] sm:$0xff] %v6323_v3  ;;  %v6324_v40 = vadd.f32 0.5, %v5724_v47  ;;  %v5783_v49 = vmul.f32 0.5, %v9366_v23  ;;  %v4704_v46 = vmul.f32 0.5, %v2564_v39  ;;  %v12760_v48 = vpop.f32.mrb[149].mxu1  ;;  %v12762_v0 = vpop.f32.mrb[150].mxu0  ;;  %8576 = vmatmul.mubr.msk.bf16.gmra.mrb[0].mxu0 %vm1453_vm2, %v10574_v36 }
 0x2de   : > { %v2647_v5 = vadd.f32 %v15895_v2, %v11415_v30  ;;  %15896 = vst [vmem:[#allocation13_spill] sm:$0xff] %v12760_v48  ;;  %15897 = vst [vmem:[#allocation39_spill] sm:$0xff] %v12762_v0  ;;  %v9368_v1 = vpop.eup %9367  ;;  %v6326_v6 = vadd.f32 0.5, %v5726_v14  ;;  %9383 = vtanh.f32 %v4705_v41  ;;  %v2684_v18 = vadd.f32 %v12458_v27, %v11266_v31  ;;  %v12769_v3 = vpop.f32.mrb[150].mxu1  ;;  %v15902_v48 = vld [vmem:[#allocation25_spill] sm:$0xff]  ;;  %8581 = vmatmul.mubr.msk.bf16.gmra.mrb[0].mxu1 %vm1453_vm2, %v10574_v36 }
 0x2df   : > { %6925 = vst [vmem:[%s11342_s16 + $0xbf0] sm:$0xff] %v6325_v63  ;;  %v2767_v17 = vadd.f32 %v15898_v4, %v11266_v31  ;;  %15899 = vst [vmem:[#allocation23_spill] sm:$0xff] %v12769_v3  ;;  %v12771_v47 = vpop.f32.mrb[151].mxu0  ;;  %v9370_v39 = vpop.eup %9369  ;;  %v6383_v23 = vadd.f32 0.5, %v5783_v49  ;;  %v5785_v2 = vmul.f32 0.5, %v9368_v1  ;;  %9385 = vtanh.f32 %v4704_v46  ;;  %v15903_v49 = vld [vmem:[#allocation14_spill] sm:$0xff]  ;;  %3843 = vmatprep.mubr.bf16.mxu0 %v15772_v11  ;;  %3926 = vmatprep.mubr.bf16.mxu1 %v15772_v11 }
 0x2e0   : > { %15900 = vst [vmem:[#allocation40_spill] sm:$0xff] %v12771_v47  ;;  %6924 = vst [vmem:[%s11342_s16 + $0xbe8] sm:$0xff] %v6324_v40  ;;  %v4706_v0 = vmul.f32 0.5, %v2647_v5  ;;  %v12774_v63 = vpop.f32.mrb[151].mxu1  ;;  %v5784_v14 = vmul.f32 0.5, %v9370_v39  ;;  %v4167_v41 = vmul.f32 0.5, %v2684_v18  ;;  %v2686_v4 = vadd.f32 %v15902_v48, %v11266_v31 }
 0x2e1   : > { %15901 = vst [vmem:[#allocation41_spill] sm:$0xff] %v12774_v63  ;;  %6926 = vst [vmem:[%s11342_s16 + $0xbf8] sm:$0xff] %v6326_v6  ;;  %v4169_v27 = vmul.f32 0.5, %v2767_v17  ;;  %v9372_v47 = vpop.eup %9371  ;;  %v6385_v40 = vadd.f32 0.5, %v5785_v2  ;;  %v2769_v5 = vadd.f32 %v15903_v49, %v11266_v31  ;;  %v15904_v46 = vld [vmem:[#allocation29_spill] sm:$0xff]  ;;  %v12791_v49 = vpop.f32.mrb[152].mxu0 }
 0x2e2   : > { %6983 = vst [vmem:[%s11342_s16 + $0xdc0] sm:$0xff] %v6383_v23  ;;  %9387 = vtanh.f32 %v4706_v0  ;;  %v2688_v1 = vadd.f32 %v15904_v46, %v11251_v44  ;;  %v9374_v48 = vpop.eup %9373  ;;  %v6384_v6 = vadd.f32 0.5, %v5784_v14  ;;  %v5786_v18 = vmul.f32 0.5, %v9372_v47  ;;  %v12796_v14 = vpop.f32.mrb[152].mxu1 }
 0x2e3   : > { %9389 = vtanh.f32 %v4167_v41  ;;  %v4168_v17 = vmul.f32 0.5, %v2686_v4  ;;  %v9376_v0 = vpop.eup %9375  ;;  %6985 = vst [vmem:[%s11342_s16 + $0xdd0] sm:$0xff] %v6385_v40  ;;  %v5843_v39 = vmul.f32 0.5, %v9374_v48  ;;  %v4170_v23 = vmul.f32 0.5, %v2769_v5  ;;  %v12798_v41 = vpop.f32.mrb[153].mxu0 }
 0x2e4   : > { %9391 = vtanh.f32 %v4169_v27  ;;  %v4227_v2 = vmul.f32 0.5, %v2688_v1  ;;  %6984 = vst [vmem:[%s11342_s16 + $0xdc8] sm:$0xff] %v6384_v6  ;;  %v6386_v63 = vadd.f32 0.5, %v5786_v18  ;;  %v5845_v3 = vmul.f32 0.5, %v9376_v0  ;;  %v12802_v1 = vpop.f32.mrb[153].mxu1  ;;  %v12804_v48 = vpop.f32.mrb[154].mxu0 }
 0x2e5   : > { %v9378_v46 = vpop.eup %9377  ;;  %9393 = vtanh.f32 %v4168_v17  ;;  %v2771_v47 = vadd.f32 %v12476_v20, %v11251_v44  ;;  %v6443_v27 = vadd.f32 0.5, %v5843_v39  ;;  %v2690_v5 = vadd.f32 %v12478_v33, %v11251_v44  ;;  %15905 = vst [vmem:[#allocation25_spill] sm:$0xff] %v12802_v1  ;;  %15906 = vst [vmem:[#allocation14_spill] sm:$0xff] %v12804_v48  ;;  %v12807_v0 = vpop.f32.mrb[154].mxu1  ;;  %8582 = vmatmul.mubr.msk.bf16.vlgmr.msra.gmra.mrb[4].mxu0 %vm1453_vm2, %v10487_v53 }
 0x2e6   : > { %v9380_v4 = vpop.eup %9379  ;;  %v5844_v40 = vmul.f32 0.5, %v9378_v46  ;;  %9395 = vtanh.f32 %v4170_v23  ;;  %6986 = vst [vmem:[%s11342_s16 + $0xdd8] sm:$0xff] %v6386_v63  ;;  %v6445_v20 = vadd.f32 0.5, %v5845_v3  ;;  %v12809_v39 = vpop.f32.mrb[155].mxu0  ;;  %v2773_v1 = vadd.f32 %v12481_v60, %v11251_v44  ;;  %8587 = vmatmul.mubr.msk.bf16.vlgmr.msra.gmra.mrb[4].mxu1 %vm1453_vm2, %v10487_v53  ;;  %3853 = vmatprep.mubr.bf16.mxu0 %v15772_v11 }
 0x2e7   : > { %v9382_v6 = vpop.eup %9381  ;;  %v5846_v18 = vmul.f32 0.5, %v9380_v4  ;;  %9397 = vtanh.f32 %v4227_v2  ;;  %v4229_v17 = vmul.f32 0.5, %v2771_v47  ;;  %7043 = vst [vmem:[%s11342_s16 + $0xfa0] sm:$0xff] %v6443_v27  ;;  %v4228_v33 = vmul.f32 0.5, %v2690_v5  ;;  %v12814_v48 = vpop.f32.mrb[155].mxu1  ;;  %v15907_v5 = vld [vmem:[#allocation20_spill] sm:$0xff]  ;;  %3936 = vmatprep.mubr.bf16.mxu1 %v15772_v11 }
 0x2e8   : > { %v6444_v23 = vadd.f32 0.5, %v5844_v40  ;;  %v5903_v46 = vmul.f32 0.5, %v9382_v6  ;;  %v9384_v63 = vpop.eup %9383  ;;  %7045 = vst [vmem:[%s11342_s16 + $0xfb0] sm:$0xff] %v6445_v20  ;;  %v2694_v2 = vadd.f32 %v12498_v62, %v15817_v42  ;;  %v2777_v47 = vadd.f32 %v12505_v29, %v15817_v42  ;;  %3978 = vmatpush1.bf16.msra.mxu0 %v15907_v5  ;;  %v15908_v29 = vld [vmem:[#allocation24_spill] sm:$0xff] }
 0x2e9   : > { %v6446_v3 = vadd.f32 0.5, %v5846_v18  ;;  %9399 = vtanh.f32 %v4229_v17  ;;  %v9386_v4 = vpop.eup %9385  ;;  %v5905_v27 = vmul.f32 0.5, %v9384_v63  ;;  %v4230_v40 = vmul.f32 0.5, %v2773_v1  ;;  %v15909_v17 = vld [vmem:[#allocation21_spill] sm:$0xff]  ;;  %v12837_v63 = vpop.f32.mrb[156].mxu0 }
 0x2ea   : > { %7044 = vst [vmem:[%s11342_s16 + $0xfa8] sm:$0xff] %v6444_v23  ;;  %v6503_v60 = vadd.f32 0.5, %v5903_v46  ;;  %9401 = vtanh.f32 %v4228_v33  ;;  %v5904_v62 = vmul.f32 0.5, %v9386_v4  ;;  %v4287_v6 = vmul.f32 0.5, %v2694_v2  ;;  %4061 = vmatpush1.bf16.msra.mxu1 %v15909_v17  ;;  %15910 = vst [vmem:[#allocation29_spill] sm:$0xff] %v12837_v63  ;;  %v12840_v5 = vpop.f32.mrb[156].mxu1 }
 0x2eb   : > { %7046 = vst [vmem:[%s11342_s16 + $0xfb8] sm:$0xff] %v6446_v3  ;;  %v4289_v20 = vmul.f32 0.5, %v2777_v47  ;;  %v2696_v18 = vadd.f32 %v15908_v29, %v15817_v42  ;;  %v6505_v1 = vadd.f32 0.5, %v5905_v27  ;;  %9403 = vtanh.f32 %v4230_v40  ;;  %v12845_v29 = vpop.f32.mrb[157].mxu1 }
 0x2ec   : > { %v9388_v23 = vpop.eup %9387  ;;  %7103 = vst [vmem:[%s11342_s16 + $0x1180] sm:$0x3f] %v6503_v60  ;;  %v2779_v46 = vadd.f32 %v12510_v25, %v15817_v42  ;;  %v2698_v33 = vadd.f32 %v12512_v45, %v11294_v54  ;;  %v6504_v2 = vadd.f32 0.5, %v5904_v62  ;;  %9405 = vtanh.f32 %v4287_v6  ;;  %v12842_v60 = vpop.f32.mrb[157].mxu0 }
 0x2ed   : > { %v9390_v3 = vpop.eup %9389  ;;  %v5906_v47 = vmul.f32 0.5, %v9388_v23  ;;  %v4288_v4 = vmul.f32 0.5, %v2696_v18  ;;  %15911 = vst [vmem:[#allocation20_spill] sm:$0xff] %v12842_v60  ;;  %7105 = vst [vmem:[%s11342_s16 + $0x1190] sm:$0x3f] %v6505_v1  ;;  %9407 = vtanh.f32 %v4289_v20  ;;  %v12847_v17 = vpop.f32.mrb[158].mxu0  ;;  %8583 = vmatmul.mubr.msk.bf16.gmra.mrb[8].mxu0 %vm1453_vm2, %v10515_v43 }
 0x2ee   : > { %v9392_v27 = vpop.eup %9391  ;;  %v5367_v25 = vmul.f32 0.5, %v9390_v3  ;;  %v4290_v40 = vmul.f32 0.5, %v2779_v46  ;;  %v4347_v45 = vmul.f32 0.5, %v2698_v33  ;;  %15912 = vst [vmem:[#allocation24_spill] sm:$0xff] %v12847_v17  ;;  %7104 = vst [vmem:[%s11342_s16 + $0x1188] sm:$0x3f] %v6504_v2  ;;  %v2700_v3 = vadd.f32 %v12519_v59, %v11294_v54  ;;  %8588 = vmatmul.mubr.msk.bf16.gmra.mrb[8].mxu1 %vm1453_vm2, %v10515_v43  ;;  %3863 = vmatprep.mubr.bf16.mxu0 %v15772_v11 }
 0x2ef   : > { %v9394_v63 = vpop.eup %9393  ;;  %v6506_v62 = vadd.f32 0.5, %v5906_v47  ;;  %v5369_v6 = vmul.f32 0.5, %v9392_v27  ;;  %9409 = vtanh.f32 %v4288_v4  ;;  %v15913_v18 = vld [vmem:[#allocation7_spill] sm:$0xff]  ;;  %v12852_v60 = vpop.f32.mrb[158].mxu1  ;;  %3946 = vmatprep.mubr.bf16.mxu1 %v15772_v11 }
 0x2f0   : > { %v2781_v23 = vadd.f32 %v15913_v18, %v11294_v54  ;;  %v12854_v1 = vpop.f32.mrb[159].mxu0  ;;  %v9396_v20 = vpop.eup %9395  ;;  %v5967_v46 = vadd.f32 0.5, %v5367_v25  ;;  %v5368_v33 = vmul.f32 0.5, %v9394_v63  ;;  %9411 = vtanh.f32 %v4290_v40  ;;  %v15916_v18 = vld [vmem:[#allocation8_spill] sm:$0xff] }
 0x2f1   : > { %15914 = vst [vmem:[#allocation21_spill] sm:$0xff] %v12854_v1  ;;  %v12858_v17 = vpop.f32.mrb[159].mxu1  ;;  %v9398_v2 = vpop.eup %9397  ;;  %7106 = vst [vmem:[%s11342_s16 + $0x1198] sm:$0x3f] %v6506_v62  ;;  %v5969_v47 = vadd.f32 0.5, %v5369_v6  ;;  %v5370_v4 = vmul.f32 0.5, %v9396_v20  ;;  %9413 = vtanh.f32 %v4347_v45  ;;  %v2783_v59 = vadd.f32 %v15916_v18, %v11294_v54 }
 0x2f2   : > { %15915 = vst [vmem:[#allocation7_spill] sm:$0xff] %v12858_v17  ;;  %v4349_v27 = vmul.f32 0.5, %v2781_v23  ;;  %6567 = vst [vmem:[%s11342_s16 + $0xc0] sm:$0xff] %v5967_v46  ;;  %v5968_v25 = vadd.f32 0.5, %v5368_v33  ;;  %v5427_v63 = vmul.f32 0.5, %v9398_v2  ;;  %v4348_v40 = vmul.f32 0.5, %v2700_v3 }
 0x2f3   : > { %v9400_v62 = vpop.eup %9399  ;;  %6569 = vst [vmem:[%s11342_s16 + $0xd0] sm:$0xff] %v5969_v47  ;;  %v5970_v45 = vadd.f32 0.5, %v5370_v4  ;;  %v15917_v6 = vld [vmem:[#allocation9_spill] sm:$0xff]  ;;  %v2787_v20 = vadd.f32 %v12543_v13, %v11330_v22  ;;  %v4350_v2 = vmul.f32 0.5, %v2783_v59  ;;  %v12876_v18 = vpop.f32.mrb[160].mxu0 }
 0x2f4   : > { %9415 = vtanh.f32 %v4349_v27  ;;  %v2704_v23 = vadd.f32 %v15917_v6, %v11330_v22  ;;  %v9402_v46 = vpop.eup %9401  ;;  %6568 = vst [vmem:[%s11342_s16 + $0xc8] sm:$0xff] %v5968_v25  ;;  %v6027_v33 = vadd.f32 0.5, %v5427_v63  ;;  %v5429_v3 = vmul.f32 0.5, %v9400_v62  ;;  %v12881_v17 = vpop.f32.mrb[160].mxu1 }
 0x2f5   : > { %9417 = vtanh.f32 %v4348_v40  ;;  %6570 = vst [vmem:[%s11342_s16 + $0xd8] sm:$0xff] %v5970_v45  ;;  %v5428_v47 = vmul.f32 0.5, %v9402_v46  ;;  %v4409_v27 = vmul.f32 0.5, %v2787_v20  ;;  %v2706_v6 = vadd.f32 %v12545_v7, %v11330_v22  ;;  %15918 = vst [vmem:[#allocation8_spill] sm:$0xff] %v12881_v17  ;;  %v12883_v13 = vpop.f32.mrb[161].mxu0  ;;  %v9404_v1 = vpop.eup %9403  ;;  %v15920_v40 = vld [vmem:[#allocation34_spill] sm:$0xff]  ;;  %8584 = vmatmul.mubr.msk.bf16.gmra.mrb[12].mxu0 %vm1453_vm2, %v10546_v10 }
 0x2f6   : > { %v4407_v4 = vmul.f32 0.5, %v2704_v23  ;;  %15919 = vst [vmem:[#allocation9_spill] sm:$0xff] %v12883_v13  ;;  %6627 = vst [vmem:[%s11342_s16 + $0x2a0] sm:$0xff] %v6027_v33  ;;  %v6029_v25 = vadd.f32 0.5, %v5429_v3  ;;  %9419 = vtanh.f32 %v4350_v2  ;;  %v2789_v63 = vadd.f32 %v12550_v34, %v11330_v22  ;;  %v12890_v62 = vpop.f32.mrb[161].mxu1  ;;  %v12892_v45 = vpop.f32.mrb[162].mxu0  ;;  %8589 = vmatmul.mubr.msk.bf16.gmra.mrb[12].mxu1 %vm1453_vm2, %v10546_v10  ;;  %3873 = vmatprep.mubr.bf16.mxu0 %v15772_v11 }
 0x2f7   : > { %v2708_v59 = vadd.f32 %v15920_v40, %v11349_v58  ;;  %15921 = vst [vmem:[#allocation34_spill] sm:$0xff] %v12890_v62  ;;  %15922 = vst [vmem:[#allocation42_spill] sm:$0xff] %v12892_v45  ;;  %v9406_v7 = vpop.eup %9405  ;;  %v6028_v23 = vadd.f32 0.5, %v5428_v47  ;;  %v5430_v20 = vmul.f32 0.5, %v9404_v1  ;;  %v4408_v46 = vmul.f32 0.5, %v2706_v6  ;;  %v12894_v13 = vpop.f32.mrb[162].mxu1  ;;  %3956 = vmatprep.mubr.bf16.mxu1 %v15772_v11 }
 0x2f8   : > { %9421 = vtanh.f32 %v4407_v4  ;;  %v12896_v33 = vpop.f32.mrb[163].mxu0  ;;  %v9408_v3 = vpop.eup %9407  ;;  %6629 = vst [vmem:[%s11342_s16 + $0x2b0] sm:$0xff] %v6029_v25  ;;  %v5487_v34 = vmul.f32 0.5, %v9406_v7  ;;  %v4410_v2 = vmul.f32 0.5, %v2789_v63  ;;  %v2791_v1 = vadd.f32 %v12559_v32, %v11349_v58  ;;  %v15923_v25 = vld [vmem:[#allocation35_spill] sm:$0xff] }
 0x2f9   : > { %9423 = vtanh.f32 %v4409_v27  ;;  %v4467_v40 = vmul.f32 0.5, %v2708_v59  ;;  %v12899_v17 = vpop.f32.mrb[163].mxu1  ;;  %v9410_v45 = vpop.eup %9409  ;;  %6628 = vst [vmem:[%s11342_s16 + $0x2a8] sm:$0xff] %v6028_v23  ;;  %v6030_v62 = vadd.f32 0.5, %v5430_v20  ;;  %v5489_v47 = vmul.f32 0.5, %v9408_v3 }
 0x2fa   : > { %9425 = vtanh.f32 %v4408_v46  ;;  %v9412_v4 = vpop.eup %9411  ;;  %v6087_v6 = vadd.f32 0.5, %v5487_v34  ;;  %v5488_v27 = vmul.f32 0.5, %v9410_v45  ;;  %v2710_v63 = vadd.f32 %v15923_v25, %v11349_v58  ;;  %v12916_v34 = vpop.f32.mrb[164].mxu0 }
 0x2fb   : > { %9427 = vtanh.f32 %v4410_v2  ;;  %v9414_v59 = vpop.eup %9413  ;;  %6630 = vst [vmem:[%s11342_s16 + $0x2b8] sm:$0xff] %v6030_v62  ;;  %v6089_v32 = vadd.f32 0.5, %v5489_v47  ;;  %v5490_v7 = vmul.f32 0.5, %v9412_v4  ;;  %v4469_v23 = vmul.f32 0.5, %v2791_v1  ;;  %v12923_v1 = vpop.f32.mrb[164].mxu1 }
 0x2fc   : > { %9429 = vtanh.f32 %v4467_v40  ;;  %6687 = vst [vmem:[%s11342_s16 + $0x480] sm:$0xff] %v6087_v6  ;;  %v6088_v45 = vadd.f32 0.5, %v5488_v27  ;;  %v5547_v20 = vmul.f32 0.5, %v9414_v59  ;;  %v4468_v46 = vmul.f32 0.5, %v2710_v63  ;;  %v12925_v4 = vpop.f32.mrb[165].mxu0  ;;  %v12928_v63 = vpop.f32.mrb[165].mxu1 }
 0x2fd   : > { %v2793_v3 = vadd.f32 %v12564_v51, %v11349_v58  ;;  %6689 = vst [vmem:[%s11342_s16 + $0x490] sm:$0xff] %v6089_v32  ;;  %v6090_v62 = vadd.f32 0.5, %v5490_v7  ;;  %9431 = vtanh.f32 %v4469_v23  ;;  %v2714_v40 = vadd.f32 %v12581_v24, %v15832_v35  ;;  %15924 = vst [vmem:[#allocation35_spill] sm:$0xff] %v12925_v4  ;;  %v12930_v59 = vpop.f32.mrb[166].mxu0  ;;  %v12935_v23 = vpop.f32.mrb[166].mxu1  ;;  %8585 = vmatmul.mubr.msk.bf16.gmra.mrb[16].mxu0 %vm1453_vm2, %v10560_v16 }
 0x2fe   : > { %v9416_v2 = vpop.eup %9415  ;;  %v2797_v47 = vadd.f32 %v12586_v50, %v15832_v35  ;;  %6688 = vst [vmem:[%s11342_s16 + $0x488] sm:$0xff] %v6088_v45  ;;  %v6147_v51 = vadd.f32 0.5, %v5547_v20  ;;  %9433 = vtanh.f32 %v4468_v46  ;;  %v2716_v50 = vadd.f32 %v12588_v15, %v15832_v35  ;;  %15925 = vst [vmem:[#allocation43_spill] sm:$0xff] %v12935_v23  ;;  %v12937_v4 = vpop.f32.mrb[167].mxu0  ;;  %v15927_v46 = vld [vmem:[#allocation10_spill] sm:$0xff]  ;;  %8590 = vmatmul.mubr.msk.bf16.gmra.mrb[16].mxu1 %vm1453_vm2, %v10560_v16 }
 0x2ff   : > { %v9418_v6 = vpop.eup %9417  ;;  %v5549_v27 = vmul.f32 0.5, %v9416_v2  ;;  %v4470_v25 = vmul.f32 0.5, %v2793_v3  ;;  %6690 = vst [vmem:[%s11342_s16 + $0x498] sm:$0xff] %v6090_v62  ;;  %v4527_v32 = vmul.f32 0.5, %v2714_v40  ;;  %15926 = vst [vmem:[#allocation44_spill] sm:$0xff] %v12937_v4  ;;  %v2799_v3 = vadd.f32 %v15927_v46, %v15832_v35  ;;  %v15928_v2 = vld [vmem:[#allocation36_spill] sm:$0xff]  ;;  %3883 = vmatprep.mubr.bf16.mxu0 %v15772_v11  ;;  %3966 = vmatprep.mubr.bf16.mxu1 %v15772_v11 }
 0x300   : > { %v5548_v24 = vmul.f32 0.5, %v9418_v6  ;;  %v4529_v7 = vmul.f32 0.5, %v2797_v47  ;;  %v9420_v45 = vpop.eup %9419  ;;  %6747 = vst [vmem:[%s11342_s16 + $0x660] sm:$0xff] %v6147_v51  ;;  %v2718_v62 = vadd.f32 %v15928_v2, %v15803_v26  ;;  %v12944_v40 = vpop.f32.mrb[167].mxu1  ;;  %v4528_v23 = vmul.f32 0.5, %v2716_v50 }
 0x301   : > { %v6149_v20 = vadd.f32 0.5, %v5549_v27  ;;  %9435 = vtanh.f32 %v4470_v25  ;;  %15929 = vst [vmem:[#allocation10_spill] sm:$0xff] %v12944_v40  ;;  %v5550_v6 = vmul.f32 0.5, %v9420_v45  ;;  %v4530_v25 = vmul.f32 0.5, %v2799_v3 }
 0x302   : > { %v9422_v47 = vpop.eup %9421  ;;  %v6148_v15 = vadd.f32 0.5, %v5548_v24  ;;  %9437 = vtanh.f32 %v4527_v32  ;;  %v4587_v46 = vmul.f32 0.5, %v2718_v62  ;;  %v2801_v50 = vadd.f32 %v12597_v37, %v15803_v26  ;;  %v12958_v62 = vpop.f32.mrb[168].mxu0 }
 0x303   : > { %v9424_v51 = vpop.eup %9423  ;;  %6749 = vst [vmem:[%s11342_s16 + $0x670] sm:$0xff] %v6149_v20  ;;  %v5607_v27 = vmul.f32 0.5, %v9422_v47  ;;  %9439 = vtanh.f32 %v4529_v7  ;;  %v6150_v24 = vadd.f32 0.5, %v5550_v6  ;;  %v2720_v3 = vadd.f32 %v12599_v19, %v15803_v26  ;;  %15930 = vst [vmem:[#allocation36_spill] sm:$0xff] %v12958_v62  ;;  %v12961_v37 = vpop.f32.mrb[168].mxu1  ;;  %v15931_v19 = vld [vmem:[#allocation37_spill] sm:$0xff] }
 0x304   : > { %v9426_v2 = vpop.eup %9425  ;;  %6748 = vst [vmem:[%s11342_s16 + $0x668] sm:$0xff] %v6148_v15  ;;  %v5609_v32 = vmul.f32 0.5, %v9424_v51  ;;  %9441 = vtanh.f32 %v4528_v23  ;;  %v4589_v6 = vmul.f32 0.5, %v2801_v50  ;;  %v12963_v51 = vpop.f32.mrb[169].mxu0  ;;  %v2803_v40 = vadd.f32 %v15931_v19, %v15803_v26 }
 0x305   : > { %v9428_v7 = vpop.eup %9427  ;;  %v6207_v45 = vadd.f32 0.5, %v5607_v27  ;;  %v5608_v20 = vmul.f32 0.5, %v9426_v2  ;;  %9443 = vtanh.f32 %v4530_v25  ;;  %6750 = vst [vmem:[%s11342_s16 + $0x678] sm:$0xff] %v6150_v24  ;;  %v4588_v2 = vmul.f32 0.5, %v2720_v3  ;;  %v12968_v62 = vpop.f32.mrb[169].mxu1  ;;  %8586 = vmatmul.mubr.msk.bf16.gmra.mrb[20].mxu0 %vm1453_vm2, %v10574_v36 }
 0x306   : > { %v9430_v47 = vpop.eup %9429  ;;  %v6209_v15 = vadd.f32 0.5, %v5609_v32  ;;  %v5610_v23 = vmul.f32 0.5, %v9428_v7  ;;  %9445 = vtanh.f32 %v4587_v46  ;;  %v12970_v4 = vpop.f32.mrb[170].mxu0  ;;  %v2724_v32 = vadd.f32 %v12628_v61, %v15808_v8  ;;  %8591 = vmatmul.mubr.msk.bf16.gmra.mrb[20].mxu1 %vm1453_vm2, %v10574_v36  ;;  %4009 = vmatprep.mubr.bf16.mxu0 %v15772_v11 }
 0x307   : > { %6807 = vst [vmem:[%s11342_s16 + $0x840] sm:$0xff] %v6207_v45  ;;  %v6208_v27 = vadd.f32 0.5, %v5608_v20  ;;  %v5667_v25 = vmul.f32 0.5, %v9430_v47  ;;  %15932 = vst [vmem:[#allocation37_spill] sm:$0xff] %v12970_v4  ;;  %v9432_v24 = vpop.eup %9431  ;;  %9447 = vtanh.f32 %v4589_v6  ;;  %v2807_v50 = vadd.f32 %v12631_v56, %v15808_v8  ;;  %v12977_v7 = vpop.f32.mrb[170].mxu1  ;;  %v15936_v4 = vld [vmem:[#allocation16_spill] sm:$0xff]  ;;  %4092 = vmatprep.mubr.bf16.mxu1 %v15772_v11 }
 0x308   : > { %6809 = vst [vmem:[%s11342_s16 + $0x850] sm:$0xff] %v6209_v15  ;;  %v6210_v46 = vadd.f32 0.5, %v5610_v23  ;;  %15933 = vst [vmem:[#allocation45_spill] sm:$0xff] %v12977_v7  ;;  %v12979_v45 = vpop.f32.mrb[171].mxu0  ;;  %v9434_v20 = vpop.eup %9433  ;;  %v5669_v47 = vmul.f32 0.5, %v9432_v24  ;;  %9449 = vtanh.f32 %v4588_v2  ;;  %v4590_v19 = vmul.f32 0.5, %v2803_v40 }
 0x309   : > { %15934 = vst [vmem:[#allocation46_spill] sm:$0xff] %v12979_v45  ;;  %6808 = vst [vmem:[%s11342_s16 + $0x848] sm:$0xff] %v6208_v27  ;;  %v6267_v3 = vadd.f32 0.5, %v5667_v25  ;;  %v12982_v15 = vpop.f32.mrb[171].mxu1  ;;  %v5668_v23 = vmul.f32 0.5, %v9434_v20  ;;  %v4647_v6 = vmul.f32 0.5, %v2724_v32  ;;  %v2726_v56 = vadd.f32 %v15936_v4, %v15808_v8 }
 0x30a   : > { %15935 = vst [vmem:[#allocation47_spill] sm:$0xff] %v12982_v15  ;;  %6810 = vst [vmem:[%s11342_s16 + $0x858] sm:$0xff] %v6210_v46  ;;  %v4649_v61 = vmul.f32 0.5, %v2807_v50  ;;  %v6269_v27 = vadd.f32 0.5, %v5669_v47  ;;  %9451 = vtanh.f32 %v4590_v19  ;;  %v15937_v25 = vld [vmem:[#allocation15_spill] sm:$0xff]  ;;  %v15938_v2 = vld [vmem:[#allocation17_spill] sm:$0xff] }
 0x30b   : > { %v9436_v45 = vpop.eup %9435  ;;  %6867 = vst [vmem:[%s11342_s16 + $0xa20] sm:$0xff] %v6267_v3  ;;  %v2809_v40 = vadd.f32 %v15937_v25, %v15808_v8  ;;  %v2728_v24 = vadd.f32 %v15938_v2, %v11415_v30  ;;  %v6268_v46 = vadd.f32 0.5, %v5668_v23  ;;  %9453 = vtanh.f32 %v4647_v6  ;;  %v12999_v25 = vpop.f32.mrb[172].mxu0 }
 0x30c   : > { %v9438_v4 = vpop.eup %9437  ;;  %v5670_v32 = vmul.f32 0.5, %v9436_v45  ;;  %v4648_v50 = vmul.f32 0.5, %v2726_v56  ;;  %6869 = vst [vmem:[%s11342_s16 + $0xa30] sm:$0xff] %v6269_v27  ;;  %9455 = vtanh.f32 %v4649_v61  ;;  %15939 = vst [vmem:[#allocation16_spill] sm:$0xff] %v12999_v25  ;;  %v15940_v45 = vld [vmem:[#allocation18_spill] sm:$0xff]  ;;  %v13004_v6 = vpop.f32.mrb[172].mxu1 }
 0x30d   : > { %v9440_v20 = vpop.eup %9439  ;;  %v5727_v3 = vmul.f32 0.5, %v9438_v4  ;;  %v4650_v47 = vmul.f32 0.5, %v2809_v40  ;;  %v4707_v19 = vmul.f32 0.5, %v2728_v24  ;;  %6868 = vst [vmem:[%s11342_s16 + $0xa28] sm:$0xff] %v6268_v46  ;;  %v2811_v23 = vadd.f32 %v15940_v45, %v11415_v30  ;;  %15941 = vst [vmem:[#allocation15_spill] sm:$0xff] %v13004_v6  ;;  %v13006_v56 = vpop.f32.mrb[173].mxu0  ;;  %8592 = vmatmul.mubr.msk.bf16.vlgmr.msra.gmra.mrb[24].mxu0 %vm1453_vm2, %v10487_v53 }
 0x30e   : > { %v9442_v2 = vpop.eup %9441  ;;  %v6270_v15 = vadd.f32 0.5, %v5670_v32  ;;  %v5729_v7 = vmul.f32 0.5, %v9440_v20  ;;  %9457 = vtanh.f32 %v4648_v50  ;;  %15942 = vst [vmem:[#allocation17_spill] sm:$0xff] %v13006_v56  ;;  %v15943_v24 = vld [vmem:[#allocation30_spill] sm:$0xff]  ;;  %v13010_v25 = vpop.f32.mrb[173].mxu1  ;;  %8597 = vmatmul.mubr.msk.bf16.vlgmr.msra.gmra.mrb[24].mxu1 %vm1453_vm2, %v10487_v53  ;;  %4019 = vmatprep.mubr.bf16.mxu0 %v15772_v11  ;;  %v15954_v53 = vld [vmem:[#allocation27_spill] sm:$0xff] }
 0x30f   : > { %v9444_v27 = vpop.eup %9443  ;;  %v6327_v61 = vadd.f32 0.5, %v5727_v3  ;;  %v5728_v40 = vmul.f32 0.5, %v9442_v2  ;;  %9459 = vtanh.f32 %v4650_v47  ;;  %v2730_v4 = vadd.f32 %v15943_v24, %v11415_v30  ;;  %15944 = vst [vmem:[#allocation18_spill] sm:$0xff] %v13010_v25  ;;  %v13012_v46 = vpop.f32.mrb[174].mxu0  ;;  %v15948_v25 = vld [vmem:[#allocation19_spill] sm:$0xff]  ;;  %4102 = vmatprep.mubr.bf16.mxu1 %v15772_v11 }
 0x310   : > { %15945 = vst [vmem:[#allocation30_spill] sm:$0xff] %v13012_v46  ;;  %v9446_v32 = vpop.eup %9445  ;;  %6870 = vst [vmem:[%s11342_s16 + $0xa38] sm:$0xff] %v6270_v15  ;;  %v6329_v50 = vadd.f32 0.5, %v5729_v7  ;;  %v5730_v20 = vmul.f32 0.5, %v9444_v27  ;;  %9461 = vtanh.f32 %v4707_v19  ;;  %v4709_v45 = vmul.f32 0.5, %v2811_v23  ;;  %v13015_v56 = vpop.f32.mrb[174].mxu1 }
 0x311   : > { %15946 = vst [vmem:[#allocation48_spill] sm:$0xff] %v13015_v56  ;;  %v13017_v3 = vpop.f32.mrb[175].mxu0  ;;  %6927 = vst [vmem:[%s11342_s16 + $0xc00] sm:$0xff] %v6327_v61  ;;  %v6328_v47 = vadd.f32 0.5, %v5728_v40  ;;  %v5787_v2 = vmul.f32 0.5, %v9446_v32  ;;  %v4708_v24 = vmul.f32 0.5, %v2730_v4  ;;  %v2813_v6 = vadd.f32 %v15948_v25, %v11415_v30  ;;  %v9448_v15 = vpop.eup %9447 }
 0x312   : > { %15947 = vst [vmem:[#allocation49_spill] sm:$0xff] %v13017_v3  ;;  %v13022_v46 = vpop.f32.mrb[175].mxu1  ;;  %6929 = vst [vmem:[%s11342_s16 + $0xc10] sm:$0xff] %v6329_v50  ;;  %v6330_v7 = vadd.f32 0.5, %v5730_v20  ;;  %9463 = vtanh.f32 %v4709_v45  ;;  %v15950_v19 = vld [vmem:[#allocation6_spill] sm:$0xff]  ;;  %v15951_v27 = vld [vmem:[#allocation31_spill] sm:$0xff]  ;;  %v9450_v61 = vpop.eup %9449 }
 0x313   : > { %15949 = vst [vmem:[#allocation19_spill] sm:$0xff] %v13022_v46  ;;  %v2850_v23 = vadd.f32 %v15950_v19, %v11266_v31  ;;  %v2933_v3 = vadd.f32 %v15951_v27, %v11266_v31  ;;  %6928 = vst [vmem:[%s11342_s16 + $0xc08] sm:$0xff] %v6328_v47  ;;  %v6387_v25 = vadd.f32 0.5, %v5787_v2  ;;  %v5789_v40 = vmul.f32 0.5, %v9448_v15  ;;  %v15952_v45 = vld [vmem:[#allocation26_spill] sm:$0xff] }
 0x314   : > { %9465 = vtanh.f32 %v4708_v24  ;;  %v4710_v4 = vmul.f32 0.5, %v2813_v6  ;;  %6930 = vst [vmem:[%s11342_s16 + $0xc18] sm:$0xff] %v6330_v7  ;;  %v5788_v32 = vmul.f32 0.5, %v9450_v61  ;;  %v2852_v19 = vadd.f32 %v15952_v45, %v11266_v31  ;;  %v9452_v47 = vpop.eup %9451  ;;  %v15953_v6 = vld [vmem:[#allocation32_spill] sm:$0xff]  ;;  %v13044_v7 = vpop.f32.mrb[176].mxu0 }
 0x315   : > { %v4171_v50 = vmul.f32 0.5, %v2850_v23  ;;  %v4173_v20 = vmul.f32 0.5, %v2933_v3  ;;  %6987 = vst [vmem:[%s11342_s16 + $0xde0] sm:$0xff] %v6387_v25  ;;  %v6389_v2 = vadd.f32 0.5, %v5789_v40  ;;  %v2935_v24 = vadd.f32 %v15953_v6, %v11266_v31  ;;  %15955 = vst [vmem:[#allocation6_spill] sm:$0xff] %v13044_v7  ;;  %v9454_v23 = vpop.eup %9453  ;;  %v13046_v45 = vpop.f32.mrb[176].mxu1  ;;  %8593 = vmatmul.mubr.msk.bf16.gmra.mrb[28].mxu0 %vm1453_vm2, %v10515_v43 }
 0x316   : > { %9467 = vtanh.f32 %v4710_v4  ;;  %v2854_v15 = vadd.f32 %v15954_v53, %v11251_v44  ;;  %v6388_v3 = vadd.f32 0.5, %v5788_v32  ;;  %v5790_v27 = vmul.f32 0.5, %v9452_v47  ;;  %v13048_v46 = vpop.f32.mrb[177].mxu0  ;;  %v9456_v25 = vpop.eup %9455  ;;  %8598 = vmatmul.mubr.msk.bf16.gmra.mrb[28].mxu1 %vm1453_vm2, %v10515_v43  ;;  %4029 = vmatprep.mubr.bf16.mxu0 %v15772_v11 }
 0x317   : > { %9469 = vtanh.f32 %v4171_v50  ;;  %v4172_v61 = vmul.f32 0.5, %v2852_v19  ;;  %6989 = vst [vmem:[%s11342_s16 + $0xdf0] sm:$0xff] %v6389_v2  ;;  %v5847_v40 = vmul.f32 0.5, %v9454_v23  ;;  %v4174_v4 = vmul.f32 0.5, %v2935_v24  ;;  %v13051_v56 = vpop.f32.mrb[177].mxu1  ;;  %v13053_v53 = vpop.f32.mrb[178].mxu0  ;;  %4112 = vmatprep.mubr.bf16.mxu1 %v15772_v11 }
 0x318   : > { %9471 = vtanh.f32 %v4173_v20  ;;  %v4231_v6 = vmul.f32 0.5, %v2854_v15  ;;  %15956 = vst [vmem:[#allocation31_spill] sm:$0xff] %v13053_v53  ;;  %v9458_v7 = vpop.eup %9457  ;;  %6988 = vst [vmem:[%s11342_s16 + $0xde8] sm:$0xff] %v6388_v3  ;;  %v6390_v32 = vadd.f32 0.5, %v5790_v27  ;;  %v5849_v50 = vmul.f32 0.5, %v9456_v25  ;;  %v13058_v47 = vpop.f32.mrb[178].mxu1 }
 0x319   : > { %9473 = vtanh.f32 %v4172_v61  ;;  %v2937_v19 = vadd.f32 %v12686_v9, %v11251_v44  ;;  %v13060_v2 = vpop.f32.mrb[179].mxu0  ;;  %v9460_v20 = vpop.eup %9459  ;;  %v6447_v24 = vadd.f32 0.5, %v5847_v40  ;;  %v5848_v15 = vmul.f32 0.5, %v9458_v7 }
 0x31a   : > { %15957 = vst [vmem:[#allocation26_spill] sm:$0xff] %v13060_v2  ;;  %9475 = vtanh.f32 %v4174_v4  ;;  %v2856_v23 = vadd.f32 %v12688_v52, %v11251_v44  ;;  %v13064_v53 = vpop.f32.mrb[179].mxu1  ;;  %v9462_v3 = vpop.eup %9461  ;;  %6990 = vst [vmem:[%s11342_s16 + $0xdf8] sm:$0xff] %v6390_v32  ;;  %v6449_v27 = vadd.f32 0.5, %v5849_v50  ;;  %v5850_v61 = vmul.f32 0.5, %v9460_v20  ;;  %v15959_v32 = vld [vmem:[#allocation33_spill] sm:$0xff] }
 0x31b   : > { %15958 = vst [vmem:[#allocation32_spill] sm:$0xff] %v13064_v53  ;;  %9477 = vtanh.f32 %v4231_v6  ;;  %v4233_v9 = vmul.f32 0.5, %v2937_v19  ;;  %7047 = vst [vmem:[%s11342_s16 + $0xfc0] sm:$0xff] %v6447_v24  ;;  %v6448_v25 = vadd.f32 0.5, %v5848_v15  ;;  %v5907_v7 = vmul.f32 0.5, %v9462_v3  ;;  %v15960_v19 = vld [vmem:[#allocation28_spill] sm:$0xff] }
 0x31c   : > { %v4232_v40 = vmul.f32 0.5, %v2856_v23  ;;  %v2939_v52 = vadd.f32 %v12691_v12, %v11251_v44  ;;  %v9464_v4 = vpop.eup %9463  ;;  %7049 = vst [vmem:[%s11342_s16 + $0xfd0] sm:$0xff] %v6449_v27  ;;  %v6450_v6 = vadd.f32 0.5, %v5850_v61  ;;  %v2860_v50 = vadd.f32 %v15959_v32, %v15817_v42  ;;  %v13082_v23 = vpop.f32.mrb[180].mxu0 }
 0x31d   : > { %9479 = vtanh.f32 %v4233_v9  ;;  %v2943_v20 = vadd.f32 %v15960_v19, %v15817_v42  ;;  %7048 = vst [vmem:[%s11342_s16 + $0xfc8] sm:$0xff] %v6448_v25  ;;  %v6507_v24 = vadd.f32 0.5, %v5907_v7  ;;  %v5909_v43 = vmul.f32 0.5, %v9464_v4  ;;  %v15961_v9 = vld [vmem:[#allocation22_spill] sm:$0xff]  ;;  %v13087_v53 = vpop.f32.mrb[180].mxu1  ;;  %v13089_v19 = vpop.f32.mrb[181].mxu0  ;;  %8594 = vmatmul.mubr.msk.bf16.gmra.mrb[32].mxu0 %vm1453_vm2, %v10546_v10 }
 0x31e   : > { %v9466_v12 = vpop.eup %9465  ;;  %9481 = vtanh.f32 %v4232_v40  ;;  %v4234_v15 = vmul.f32 0.5, %v2939_v52  ;;  %7050 = vst [vmem:[%s11342_s16 + $0xfd8] sm:$0xff] %v6450_v6  ;;  %v4291_v27 = vmul.f32 0.5, %v2860_v50  ;;  %v2862_v32 = vadd.f32 %v15961_v9, %v15817_v42  ;;  %15962 = vst [vmem:[#allocation27_spill] sm:$0xff] %v13089_v19  ;;  %v13096_v52 = vpop.f32.mrb[181].mxu1  ;;  %8599 = vmatmul.mubr.msk.bf16.gmra.mrb[32].mxu1 %vm1453_vm2, %v10546_v10  ;;  %4039 = vmatprep.mubr.bf16.mxu0 %v15772_v11 }
 0x31f   : > { %v5908_v3 = vmul.f32 0.5, %v9466_v12  ;;  %v4293_v61 = vmul.f32 0.5, %v2943_v20  ;;  %7107 = vst [vmem:[%s11342_s16 + $0x11a0] sm:$0x3f] %v6507_v24  ;;  %v6509_v25 = vadd.f32 0.5, %v5909_v43  ;;  %v2945_v7 = vadd.f32 %v12720_v57, %v15817_v42  ;;  %15963 = vst [vmem:[#allocation33_spill] sm:$0xff] %v13096_v52  ;;  %4122 = vmatprep.mubr.bf16.mxu1 %v15772_v11 }
 0x320   : > { %v9468_v2 = vpop.eup %9467  ;;  %9483 = vtanh.f32 %v4234_v15  ;;  %v2864_v40 = vadd.f32 %v12722_v28, %v11294_v54  ;;  %v13098_v4 = vpop.f32.mrb[182].mxu0  ;;  %v4292_v12 = vmul.f32 0.5, %v2862_v32 }
 0x321   : > { %15964 = vst [vmem:[#allocation28_spill] sm:$0xff] %v13098_v4  ;;  %v9470_v6 = vpop.eup %9469  ;;  %v6508_v50 = vadd.f32 0.5, %v5908_v3  ;;  %v5910_v20 = vmul.f32 0.5, %v9468_v2  ;;  %9485 = vtanh.f32 %v4291_v27  ;;  %v13100_v9 = vpop.f32.mrb[182].mxu1  ;;  %7109 = vst [vmem:[%s11342_s16 + $0x11b0] sm:$0x3f] %v6509_v25  ;;  %v2947_v2 = vadd.f32 %v12727_v38, %v11294_v54 }
 0x322   : > { %v13102_v24 = vpop.f32.mrb[183].mxu0  ;;  %v9472_v43 = vpop.eup %9471  ;;  %v5371_v57 = vmul.f32 0.5, %v9470_v6  ;;  %9487 = vtanh.f32 %v4293_v61  ;;  %v4294_v15 = vmul.f32 0.5, %v2945_v7  ;;  %v4351_v28 = vmul.f32 0.5, %v2864_v40  ;;  %v15965_v25 = vld [vmem:[#allocation11_spill] sm:$0xff] }
 0x323   : > { %v13105_v19 = vpop.f32.mrb[183].mxu1  ;;  %v9474_v4 = vpop.eup %9473  ;;  %7108 = vst [vmem:[%s11342_s16 + $0x11a8] sm:$0x3f] %v6508_v50  ;;  %v6510_v52 = vadd.f32 0.5, %v5910_v20  ;;  %v5373_v3 = vmul.f32 0.5, %v9472_v43  ;;  %9489 = vtanh.f32 %v4292_v12  ;;  %v2866_v7 = vadd.f32 %v15965_v25, %v11294_v54  ;;  %v15966_v43 = vld [vmem:[#allocation12_spill] sm:$0xff] }
 0x324   : > { %v9476_v27 = vpop.eup %9475  ;;  %v5971_v32 = vadd.f32 0.5, %v5371_v57  ;;  %v5372_v61 = vmul.f32 0.5, %v9474_v4  ;;  %9491 = vtanh.f32 %v4294_v15  ;;  %v4353_v50 = vmul.f32 0.5, %v2947_v2  ;;  %v13122_v10 = vpop.f32.mrb[184].mxu0 }
 0x325   : > { %v9478_v40 = vpop.eup %9477  ;;  %7110 = vst [vmem:[%s11342_s16 + $0x11b8] sm:$0x3f] %v6510_v52  ;;  %v5973_v38 = vadd.f32 0.5, %v5373_v3  ;;  %v5374_v6 = vmul.f32 0.5, %v9476_v27  ;;  %9493 = vtanh.f32 %v4351_v28  ;;  %v4352_v12 = vmul.f32 0.5, %v2866_v7  ;;  %v15967_v28 = vld [vmem:[#allocation38_spill] sm:$0xff]  ;;  %8595 = vmatmul.mubr.msk.bf16.gmra.mrb[36].mxu0 %vm1453_vm2, %v10560_v16 }
 0x326   : > { %6571 = vst [vmem:[%s11342_s16 + $0xe0] sm:$0xff] %v5971_v32  ;;  %v5972_v4 = vadd.f32 0.5, %v5372_v61  ;;  %v5431_v20 = vmul.f32 0.5, %v9478_v40  ;;  %v2949_v57 = vadd.f32 %v15966_v43, %v11294_v54  ;;  %9495 = vtanh.f32 %v4353_v50  ;;  %v13129_v27 = vpop.f32.mrb[184].mxu1  ;;  %v13131_v32 = vpop.f32.mrb[185].mxu0  ;;  %8600 = vmatmul.mubr.msk.bf16.gmra.mrb[36].mxu1 %vm1453_vm2, %v10560_v16  ;;  %4049 = vmatprep.mubr.bf16.mxu0 %v15772_v11  ;;  %v15976_v16 = vld [vmem:[#allocation40_spill] sm:$0xff] }
 0x327   : > { %v9480_v15 = vpop.eup %9479  ;;  %6573 = vst [vmem:[%s11342_s16 + $0xf0] sm:$0xff] %v5973_v38  ;;  %v5974_v52 = vadd.f32 0.5, %v5374_v6  ;;  %v2870_v3 = vadd.f32 %v15967_v28, %v11330_v22  ;;  %v2953_v2 = vadd.f32 %v12753_v55, %v11330_v22  ;;  %15968 = vst [vmem:[#allocation22_spill] sm:$0xff] %v13129_v27  ;;  %9497 = vtanh.f32 %v4352_v12  ;;  %v13134_v38 = vpop.f32.mrb[185].mxu1  ;;  %v15972_v12 = vld [vmem:[#allocation13_spill] sm:$0xff]  ;;  %4132 = vmatprep.mubr.bf16.mxu1 %v15772_v11 }
 0x328   : > { %15969 = vst [vmem:[#allocation11_spill] sm:$0xff] %v13131_v32  ;;  %v9482_v61 = vpop.eup %9481  ;;  %6572 = vst [vmem:[%s11342_s16 + $0xe8] sm:$0xff] %v5972_v4  ;;  %v6031_v25 = vadd.f32 0.5, %v5431_v20  ;;  %v5433_v7 = vmul.f32 0.5, %v9480_v15  ;;  %v4354_v40 = vmul.f32 0.5, %v2949_v57  ;;  %v13136_v6 = vpop.f32.mrb[186].mxu0  ;;  %v2872_v55 = vadd.f32 %v12755_v21, %v11330_v22 }
 0x329   : > { %6574 = vst [vmem:[%s11342_s16 + $0xf8] sm:$0xff] %v5974_v52  ;;  %v5432_v50 = vmul.f32 0.5, %v9482_v61  ;;  %v4411_v43 = vmul.f32 0.5, %v2870_v3  ;;  %v4413_v28 = vmul.f32 0.5, %v2953_v2  ;;  %v13141_v27 = vpop.f32.mrb[186].mxu1  ;;  %v13143_v32 = vpop.f32.mrb[187].mxu0  ;;  %v2955_v57 = vadd.f32 %v15972_v12, %v11330_v22 }
 0x32a   : > { %15970 = vst [vmem:[#allocation12_spill] sm:$0xff] %v13141_v27  ;;  %15971 = vst [vmem:[#allocation38_spill] sm:$0xff] %v13143_v32  ;;  %v9484_v4 = vpop.eup %9483  ;;  %v6033_v20 = vadd.f32 0.5, %v5433_v7  ;;  %9499 = vtanh.f32 %v4354_v40  ;;  %v15973_v15 = vld [vmem:[#allocation39_spill] sm:$0xff]  ;;  %v13150_v3 = vpop.f32.mrb[187].mxu1  ;;  %v4412_v27 = vmul.f32 0.5, %v2872_v55 }
 0x32b   : > { %6631 = vst [vmem:[%s11342_s16 + $0x2c0] sm:$0xff] %v6031_v25  ;;  %v2874_v52 = vadd.f32 %v15973_v15, %v11349_v58  ;;  %15974 = vst [vmem:[#allocation13_spill] sm:$0xff] %v13150_v3  ;;  %v9486_v2 = vpop.eup %9485  ;;  %v6032_v21 = vadd.f32 0.5, %v5432_v50  ;;  %v5434_v61 = vmul.f32 0.5, %v9484_v4  ;;  %9501 = vtanh.f32 %v4411_v43  ;;  %v15975_v55 = vld [vmem:[#allocation23_spill] sm:$0xff] }
 0x32c   : > { %v9488_v25 = vpop.eup %9487  ;;  %6633 = vst [vmem:[%s11342_s16 + $0x2d0] sm:$0xff] %v6033_v20  ;;  %v5491_v7 = vmul.f32 0.5, %v9486_v2  ;;  %9503 = vtanh.f32 %v4413_v28  ;;  %v4414_v40 = vmul.f32 0.5, %v2955_v57  ;;  %v2957_v4 = vadd.f32 %v15975_v55, %v11349_v58  ;;  %v13164_v2 = vpop.f32.mrb[188].mxu0 }
 0x32d   : > { %v4471_v12 = vmul.f32 0.5, %v2874_v52  ;;  %v9490_v15 = vpop.eup %9489  ;;  %6632 = vst [vmem:[%s11342_s16 + $0x2c8] sm:$0xff] %v6032_v21  ;;  %v6034_v50 = vadd.f32 0.5, %v5434_v61  ;;  %v5493_v43 = vmul.f32 0.5, %v9488_v25  ;;  %9505 = vtanh.f32 %v4412_v27  ;;  %15977 = vst [vmem:[#allocation39_spill] sm:$0xff] %v13164_v2  ;;  %v13167_v25 = vpop.f32.mrb[188].mxu1  ;;  %8596 = vmatmul.mubr.msk.bf16.gmra.mrb[40].mxu0 %vm1453_vm2, %v10574_v36 }
 0x32e   : > { %v9492_v28 = vpop.eup %9491  ;;  %v6091_v20 = vadd.f32 0.5, %v5491_v7  ;;  %v5492_v57 = vmul.f32 0.5, %v9490_v15  ;;  %9507 = vtanh.f32 %v4414_v40  ;;  %v2876_v52 = vadd.f32 %v15976_v16, %v11349_v58  ;;  %v13169_v55 = vpop.f32.mrb[189].mxu0  ;;  %v15978_v15 = vld [vmem:[#allocation41_spill] sm:$0xff]  ;;  %8601 = vmatmul.mubr.msk.bf16.gmra.mrb[40].mxu1 %vm1453_vm2, %v10574_v36 }
 0x32f   : > { %v9494_v3 = vpop.eup %9493  ;;  %6634 = vst [vmem:[%s11342_s16 + $0x2d8] sm:$0xff] %v6034_v50  ;;  %v6093_v21 = vadd.f32 0.5, %v5493_v43  ;;  %v5494_v27 = vmul.f32 0.5, %v9492_v28  ;;  %9509 = vtanh.f32 %v4471_v12  ;;  %v4473_v61 = vmul.f32 0.5, %v2957_v4  ;;  %v13174_v2 = vpop.f32.mrb[189].mxu1 }
 0x330   : > { %6691 = vst [vmem:[%s11342_s16 + $0x4a0] sm:$0xff] %v6091_v20  ;;  %v6092_v11 = vadd.f32 0.5, %v5492_v57  ;;  %v5551_v7 = vmul.f32 0.5, %v9494_v3  ;;  %v4472_v40 = vmul.f32 0.5, %v2876_v52  ;;  %v2959_v16 = vadd.f32 %v15978_v15, %v11349_v58  ;;  %v13176_v32 = vpop.f32.mrb[190].mxu0  ;;  %v9496_v50 = vpop.eup %9495 }
 0x331   : > { %6693 = vst [vmem:[%s11342_s16 + $0x4b0] sm:$0xff] %v6093_v21  ;;  %v6094_v12 = vadd.f32 0.5, %v5494_v27  ;;  %9511 = vtanh.f32 %v4473_v61  ;;  %v2880_v43 = vadd.f32 %v12791_v49, %v15832_v35  ;;  %v2963_v4 = vadd.f32 %v12796_v14, %v15832_v35  ;;  %v13183_v3 = vpop.f32.mrb[190].mxu1  ;;  %v13185_v28 = vpop.f32.mrb[191].mxu0 }
 0x332   : > { %15979 = vst [vmem:[#allocation23_spill] sm:$0xff] %v13183_v3  ;;  %15980 = vst [vmem:[#allocation40_spill] sm:$0xff] %v13185_v28  ;;  %v9498_v20 = vpop.eup %9497  ;;  %v6151_v57 = vadd.f32 0.5, %v5551_v7  ;;  %v5553_v52 = vmul.f32 0.5, %v9496_v50  ;;  %9513 = vtanh.f32 %v4472_v40  ;;  %v4474_v15 = vmul.f32 0.5, %v2959_v16  ;;  %v13188_v21 = vpop.f32.mrb[191].mxu1 }
 0x333   : > { %6692 = vst [vmem:[%s11342_s16 + $0x4a8] sm:$0xff] %v6092_v11  ;;  %15981 = vst [vmem:[#allocation41_spill] sm:$0xff] %v13188_v21  ;;  %v5552_v27 = vmul.f32 0.5, %v9498_v20  ;;  %v4531_v61 = vmul.f32 0.5, %v2880_v43  ;;  %v4533_v49 = vmul.f32 0.5, %v2963_v4  ;;  %v2882_v14 = vadd.f32 %v12798_v41, %v15832_v35  ;;  %v15982_v7 = vld [vmem:[#allocation25_spill] sm:$0xff] }
 0x334   : > { %6694 = vst [vmem:[%s11342_s16 + $0x4b8] sm:$0xff] %v6094_v12  ;;  %v9500_v28 = vpop.eup %9499  ;;  %6751 = vst [vmem:[%s11342_s16 + $0x680] sm:$0xff] %v6151_v57  ;;  %v6153_v11 = vadd.f32 0.5, %v5553_v52  ;;  %9515 = vtanh.f32 %v4474_v15  ;;  %v2965_v40 = vadd.f32 %v15982_v7, %v15832_v35  ;;  %v15983_v16 = vld [vmem:[#allocation14_spill] sm:$0xff]  ;;  %v13203_v21 = vpop.f32.mrb[192].mxu0  ;;  %v2967_v36 = vadd.f32 %v12807_v0, %v15803_v26 }
 0x335   : > { %v2884_v50 = vadd.f32 %v15983_v16, %v15803_v26  ;;  %v9502_v12 = vpop.eup %9501  ;;  %v6152_v43 = vadd.f32 0.5, %v5552_v27  ;;  %v5554_v41 = vmul.f32 0.5, %v9500_v28  ;;  %9517 = vtanh.f32 %v4531_v61  ;;  %v13208_v28 = vpop.f32.mrb[192].mxu1 }
 0x336   : > { %v4532_v4 = vmul.f32 0.5, %v2882_v14  ;;  %v9504_v20 = vpop.eup %9503  ;;  %6753 = vst [vmem:[%s11342_s16 + $0x690] sm:$0xff] %v6153_v11  ;;  %v5611_v57 = vmul.f32 0.5, %v9502_v12  ;;  %9519 = vtanh.f32 %v4533_v49  ;;  %v4534_v52 = vmul.f32 0.5, %v2965_v40  ;;  %v13210_v27 = vpop.f32.mrb[193].mxu0 }
 0x337   : > { %v4591_v15 = vmul.f32 0.5, %v2884_v50  ;;  %v9506_v7 = vpop.eup %9505  ;;  %6752 = vst [vmem:[%s11342_s16 + $0x688] sm:$0xff] %v6152_v43  ;;  %v6154_v16 = vadd.f32 0.5, %v5554_v41  ;;  %v5613_v3 = vmul.f32 0.5, %v9504_v20  ;;  %v2886_v11 = vadd.f32 %v12809_v39, %v15803_v26  ;;  %v13214_v40 = vpop.f32.mrb[193].mxu1 }
 0x338   : > { %9521 = vtanh.f32 %v4532_v4  ;;  %v9508_v61 = vpop.eup %9507  ;;  %v6211_v49 = vadd.f32 0.5, %v5611_v57  ;;  %v5612_v14 = vmul.f32 0.5, %v9506_v7  ;;  %v13216_v50 = vpop.f32.mrb[194].mxu0  ;;  %v4593_v41 = vmul.f32 0.5, %v2967_v36 }
 0x339   : > { %9523 = vtanh.f32 %v4534_v52  ;;  %15984 = vst [vmem:[#allocation25_spill] sm:$0xff] %v13216_v50  ;;  %v9510_v12 = vpop.eup %9509  ;;  %6754 = vst [vmem:[%s11342_s16 + $0x698] sm:$0xff] %v6154_v16  ;;  %v6213_v0 = vadd.f32 0.5, %v5613_v3  ;;  %v5614_v43 = vmul.f32 0.5, %v9508_v61  ;;  %v13219_v4 = vpop.f32.mrb[194].mxu1  ;;  %v4592_v39 = vmul.f32 0.5, %v2886_v11 }
 0x33a   : > { %9525 = vtanh.f32 %v4591_v15  ;;  %v13221_v20 = vpop.f32.mrb[195].mxu0  ;;  %6811 = vst [vmem:[%s11342_s16 + $0x860] sm:$0xff] %v6211_v49  ;;  %v6212_v57 = vadd.f32 0.5, %v5612_v14  ;;  %v5671_v52 = vmul.f32 0.5, %v9510_v12  ;;  %v2969_v7 = vadd.f32 %v12814_v48, %v15803_v26  ;;  %v13226_v50 = vpop.f32.mrb[195].mxu1  ;;  %v15987_v15 = vld [vmem:[#allocation29_spill] sm:$0xff] }
 0x33b   : > { %15985 = vst [vmem:[#allocation14_spill] sm:$0xff] %v13221_v20  ;;  %15986 = vst [vmem:[#allocation50_spill] sm:$0xff] %v13226_v50  ;;  %v9512_v16 = vpop.eup %9511  ;;  %v6214_v3 = vadd.f32 0.5, %v5614_v43  ;;  %9527 = vtanh.f32 %v4593_v41  ;;  %v2890_v36 = vadd.f32 %v15987_v15, %v15808_v8  ;;  %v2973_v61 = vadd.f32 %v12840_v5, %v15808_v8 }
 0x33c   : > { %6813 = vst [vmem:[%s11342_s16 + $0x870] sm:$0xff] %v6213_v0  ;;  %v9514_v49 = vpop.eup %9513  ;;  %6812 = vst [vmem:[%s11342_s16 + $0x868] sm:$0xff] %v6212_v57  ;;  %v6271_v14 = vadd.f32 0.5, %v5671_v52  ;;  %v5673_v11 = vmul.f32 0.5, %v9512_v16  ;;  %9529 = vtanh.f32 %v4592_v39  ;;  %v4594_v12 = vmul.f32 0.5, %v2969_v7  ;;  %v15988_v0 = vld [vmem:[#allocation20_spill] sm:$0xff] }
 0x33d   : > { %6814 = vst [vmem:[%s11342_s16 + $0x878] sm:$0xff] %v6214_v3  ;;  %v5672_v48 = vmul.f32 0.5, %v9514_v49  ;;  %v4651_v50 = vmul.f32 0.5, %v2890_v36  ;;  %v4653_v20 = vmul.f32 0.5, %v2973_v61  ;;  %v2892_v43 = vadd.f32 %v15988_v0, %v15808_v8  ;;  %v15989_v57 = vld [vmem:[#allocation24_spill] sm:$0xff]  ;;  %v13242_v39 = vpop.f32.mrb[196].mxu0 }
 0x33e   : > { %v9516_v41 = vpop.eup %9515  ;;  %6871 = vst [vmem:[%s11342_s16 + $0xa40] sm:$0xff] %v6271_v14  ;;  %v6273_v15 = vadd.f32 0.5, %v5673_v11  ;;  %9531 = vtanh.f32 %v4594_v12  ;;  %v2975_v5 = vadd.f32 %v12845_v29, %v15808_v8  ;;  %v2894_v52 = vadd.f32 %v15989_v57, %v11415_v30  ;;  %15990 = vst [vmem:[#allocation29_spill] sm:$0xff] %v13242_v39  ;;  %v13244_v61 = vpop.f32.mrb[196].mxu1 }
 0x33f   : > { %v9518_v7 = vpop.eup %9517  ;;  %v6272_v16 = vadd.f32 0.5, %v5672_v48  ;;  %v5674_v3 = vmul.f32 0.5, %v9516_v41  ;;  %9533 = vtanh.f32 %v4651_v50  ;;  %v4652_v36 = vmul.f32 0.5, %v2892_v43  ;;  %v13246_v49 = vpop.f32.mrb[197].mxu0 }
 0x340   : > { %v9520_v14 = vpop.eup %9519  ;;  %6873 = vst [vmem:[%s11342_s16 + $0xa50] sm:$0xff] %v6273_v15  ;;  %v5731_v11 = vmul.f32 0.5, %v9518_v7  ;;  %9535 = vtanh.f32 %v4653_v20  ;;  %v4654_v29 = vmul.f32 0.5, %v2975_v5  ;;  %v4711_v12 = vmul.f32 0.5, %v2894_v52  ;;  %v13249_v0 = vpop.f32.mrb[197].mxu1  ;;  %v15995_v7 = vld [vmem:[#allocation21_spill] sm:$0xff] }
 0x341   : > { %15991 = vst [vmem:[#allocation20_spill] sm:$0xff] %v13249_v0  ;;  %v13251_v57 = vpop.f32.mrb[198].mxu0  ;;  %6872 = vst [vmem:[%s11342_s16 + $0xa48] sm:$0xff] %v6272_v16  ;;  %v6274_v48 = vadd.f32 0.5, %v5674_v3  ;;  %v5733_v50 = vmul.f32 0.5, %v9520_v14  ;;  %9537 = vtanh.f32 %v4652_v36  ;;  %v2977_v43 = vadd.f32 %v12852_v60, %v11415_v30  ;;  %v13256_v41 = vpop.f32.mrb[198].mxu1 }
 0x342   : > { %15992 = vst [vmem:[#allocation24_spill] sm:$0xff] %v13251_v57  ;;  %v9522_v39 = vpop.eup %9521  ;;  %15993 = vst [vmem:[#allocation51_spill] sm:$0xff] %v13256_v41  ;;  %v13258_v15 = vpop.f32.mrb[199].mxu0  ;;  %v6331_v5 = vadd.f32 0.5, %v5731_v11  ;;  %9539 = vtanh.f32 %v4654_v29  ;;  %v2896_v57 = vadd.f32 %v15995_v7, %v11415_v30 }
 0x343   : > { %15994 = vst [vmem:[#allocation52_spill] sm:$0xff] %v13258_v15  ;;  %v9524_v20 = vpop.eup %9523  ;;  %v5732_v52 = vmul.f32 0.5, %v9522_v39  ;;  %v13262_v16 = vpop.f32.mrb[199].mxu1  ;;  %6874 = vst [vmem:[%s11342_s16 + $0xa58] sm:$0xff] %v6274_v48  ;;  %v6333_v36 = vadd.f32 0.5, %v5733_v50  ;;  %9541 = vtanh.f32 %v4711_v12  ;;  %v4713_v60 = vmul.f32 0.5, %v2977_v43 }
 0x344   : > { %15996 = vst [vmem:[#allocation21_spill] sm:$0xff] %v13262_v16  ;;  %v9526_v3 = vpop.eup %9525  ;;  %v5734_v14 = vmul.f32 0.5, %v9524_v20  ;;  %6931 = vst [vmem:[%s11342_s16 + $0xc20] sm:$0xff] %v6331_v5  ;;  %v4712_v11 = vmul.f32 0.5, %v2896_v57  ;;  %v15997_v39 = vld [vmem:[#allocation7_spill] sm:$0xff]  ;;  %v3016_v48 = vadd.f32 %v12876_v18, %v11266_v31  ;;  %v15998_v50 = vld [vmem:[#allocation8_spill] sm:$0xff] }
 0x345   : > { %v6332_v41 = vadd.f32 0.5, %v5732_v52  ;;  %v5791_v15 = vmul.f32 0.5, %v9526_v3  ;;  %v2979_v29 = vadd.f32 %v15997_v39, %v11415_v30  ;;  %v9528_v0 = vpop.eup %9527  ;;  %6933 = vst [vmem:[%s11342_s16 + $0xc30] sm:$0xff] %v6333_v36  ;;  %9543 = vtanh.f32 %v4713_v60  ;;  %v13274_v52 = vpop.f32.mrb[200].mxu0  ;;  %v15999_v60 = vld [vmem:[#allocation9_spill] sm:$0xff] }
 0x346   : > { %v6334_v7 = vadd.f32 0.5, %v5734_v14  ;;  %v3099_v20 = vadd.f32 %v15998_v50, %v11266_v31  ;;  %v9530_v12 = vpop.eup %9529  ;;  %v5793_v5 = vmul.f32 0.5, %v9528_v0  ;;  %9545 = vtanh.f32 %v4712_v11  ;;  %v13279_v18 = vpop.f32.mrb[200].mxu1  ;;  %v16002_v0 = vld [vmem:[#allocation34_spill] sm:$0xff] }
 0x347   : > { %6932 = vst [vmem:[%s11342_s16 + $0xc28] sm:$0xff] %v6332_v41  ;;  %v6391_v43 = vadd.f32 0.5, %v5791_v15  ;;  %v4714_v57 = vmul.f32 0.5, %v2979_v29  ;;  %v5792_v3 = vmul.f32 0.5, %v9530_v12  ;;  %v4175_v36 = vmul.f32 0.5, %v3016_v48  ;;  %16000 = vst [vmem:[#allocation7_spill] sm:$0xff] %v13279_v18 }
 0x348   : > { %6934 = vst [vmem:[%s11342_s16 + $0xc38] sm:$0xff] %v6334_v7  ;;  %v4177_v14 = vmul.f32 0.5, %v3099_v20  ;;  %v3018_v39 = vadd.f32 %v15999_v60, %v11266_v31  ;;  %v13281_v16 = vpop.f32.mrb[201].mxu0  ;;  %v9532_v50 = vpop.eup %9531  ;;  %v6393_v41 = vadd.f32 0.5, %v5793_v5  ;;  %v3101_v15 = vadd.f32 %v16002_v0, %v11266_v31  ;;  %v16003_v11 = vld [vmem:[#allocation42_spill] sm:$0xff] }
 0x349   : > { %16001 = vst [vmem:[#allocation8_spill] sm:$0xff] %v13281_v16  ;;  %6991 = vst [vmem:[%s11342_s16 + $0xe00] sm:$0xff] %v6391_v43  ;;  %9547 = vtanh.f32 %v4714_v57  ;;  %v3020_v29 = vadd.f32 %v16003_v11, %v11251_v44  ;;  %v13288_v7 = vpop.f32.mrb[201].mxu1  ;;  %v13290_v48 = vpop.f32.mrb[202].mxu0  ;;  %v6392_v12 = vadd.f32 0.5, %v5792_v3  ;;  %v5794_v60 = vmul.f32 0.5, %v9532_v50 }
 0x34a   : > { %16004 = vst [vmem:[#allocation9_spill] sm:$0xff] %v13288_v7  ;;  %16005 = vst [vmem:[#allocation34_spill] sm:$0xff] %v13290_v48  ;;  %v9534_v20 = vpop.eup %9533  ;;  %9549 = vtanh.f32 %v4175_v36  ;;  %v4176_v16 = vmul.f32 0.5, %v3018_v39  ;;  %v13292_v18 = vpop.f32.mrb[202].mxu1  ;;  %v4178_v0 = vmul.f32 0.5, %v3101_v15  ;;  %v3103_v36 = vadd.f32 %v12894_v13, %v11251_v44 }
 0x34b   : > { %16006 = vst [vmem:[#allocation42_spill] sm:$0xff] %v13292_v18  ;;  %v13294_v43 = vpop.f32.mrb[203].mxu0  ;;  %v9536_v5 = vpop.eup %9535  ;;  %6993 = vst [vmem:[%s11342_s16 + $0xe10] sm:$0xff] %v6393_v41  ;;  %v5851_v57 = vmul.f32 0.5, %v9534_v20  ;;  %9551 = vtanh.f32 %v4177_v14  ;;  %v4235_v11 = vmul.f32 0.5, %v3020_v29  ;;  %v6394_v3 = vadd.f32 0.5, %v5794_v60 }
 0x34c   : > { %16007 = vst [vmem:[#allocation53_spill] sm:$0xff] %v13294_v43  ;;  %v13297_v7 = vpop.f32.mrb[203].mxu1  ;;  %v9538_v48 = vpop.eup %9537  ;;  %6992 = vst [vmem:[%s11342_s16 + $0xe08] sm:$0xff] %v6392_v12  ;;  %v5853_v50 = vmul.f32 0.5, %v9536_v5  ;;  %9553 = vtanh.f32 %v4176_v16  ;;  %v3022_v14 = vadd.f32 %v12896_v33, %v11251_v44  ;;  %v4237_v20 = vmul.f32 0.5, %v3103_v36 }
 0x34d   : > { %v9540_v39 = vpop.eup %9539  ;;  %v6451_v43 = vadd.f32 0.5, %v5851_v57  ;;  %v5852_v18 = vmul.f32 0.5, %v9538_v48  ;;  %9555 = vtanh.f32 %v4178_v0  ;;  %6994 = vst [vmem:[%s11342_s16 + $0xe18] sm:$0xff] %v6394_v3  ;;  %v3105_v13 = vadd.f32 %v12899_v17, %v11251_v44  ;;  %v13308_v48 = vpop.f32.mrb[204].mxu0 }
 0x34e   : > { %v9542_v41 = vpop.eup %9541  ;;  %v6453_v15 = vadd.f32 0.5, %v5853_v50  ;;  %v5854_v29 = vmul.f32 0.5, %v9540_v39  ;;  %9557 = vtanh.f32 %v4235_v11  ;;  %v4236_v60 = vmul.f32 0.5, %v3022_v14 }
 0x34f   : > { %7051 = vst [vmem:[%s11342_s16 + $0xfe0] sm:$0xff] %v6451_v43  ;;  %v6452_v16 = vadd.f32 0.5, %v5852_v18  ;;  %v5911_v12 = vmul.f32 0.5, %v9542_v41  ;;  %v9544_v5 = vpop.eup %9543  ;;  %9559 = vtanh.f32 %v4237_v20  ;;  %v3026_v57 = vadd.f32 %v12916_v34, %v15817_v42  ;;  %v13315_v43 = vpop.f32.mrb[204].mxu1 }
 0x350   : > { %7053 = vst [vmem:[%s11342_s16 + $0xff0] sm:$0xff] %v6453_v15  ;;  %v6454_v33 = vadd.f32 0.5, %v5854_v29  ;;  %v3109_v0 = vadd.f32 %v12923_v1, %v15817_v42  ;;  %v13317_v18 = vpop.f32.mrb[205].mxu0  ;;  %v9546_v11 = vpop.eup %9545  ;;  %v5913_v3 = vmul.f32 0.5, %v9544_v5  ;;  %9561 = vtanh.f32 %v4236_v60  ;;  %v16008_v1 = vld [vmem:[#allocation35_spill] sm:$0xff] }
 0x351   : > { %7052 = vst [vmem:[%s11342_s16 + $0xfe8] sm:$0xff] %v6452_v16  ;;  %v6511_v17 = vadd.f32 0.5, %v5911_v12  ;;  %v4238_v50 = vmul.f32 0.5, %v3105_v13  ;;  %v13320_v36 = vpop.f32.mrb[205].mxu1  ;;  %v13322_v39 = vpop.f32.mrb[206].mxu0  ;;  %v5912_v34 = vmul.f32 0.5, %v9546_v11  ;;  %v3028_v15 = vadd.f32 %v16008_v1, %v15817_v42 }
 0x352   : > { %7054 = vst [vmem:[%s11342_s16 + $0xff8] sm:$0xff] %v6454_v33  ;;  %v4295_v14 = vmul.f32 0.5, %v3026_v57  ;;  %v4297_v41 = vmul.f32 0.5, %v3109_v0  ;;  %v13327_v29 = vpop.f32.mrb[206].mxu1  ;;  %v13329_v20 = vpop.f32.mrb[207].mxu0  ;;  %v6513_v12 = vadd.f32 0.5, %v5913_v3  ;;  %v3111_v60 = vadd.f32 %v12928_v63, %v15817_v42 }
 0x353   : > { %16009 = vst [vmem:[#allocation35_spill] sm:$0xff] %v13327_v29  ;;  %16010 = vst [vmem:[#allocation54_spill] sm:$0xff] %v13329_v20  ;;  %v9548_v16 = vpop.eup %9547  ;;  %9563 = vtanh.f32 %v4238_v50  ;;  %v3030_v13 = vadd.f32 %v12930_v59, %v11294_v54  ;;  %v13336_v5 = vpop.f32.mrb[207].mxu1  ;;  %v6512_v57 = vadd.f32 0.5, %v5912_v34  ;;  %v4296_v11 = vmul.f32 0.5, %v3028_v15  ;;  %v16012_v59 = vld [vmem:[#allocation43_spill] sm:$0xff] }
 0x354   : > { %7111 = vst [vmem:[%s11342_s16 + $0x11c0] sm:$0x3f] %v6511_v17  ;;  %16011 = vst [vmem:[#allocation55_spill] sm:$0xff] %v13336_v5  ;;  %v9550_v33 = vpop.eup %9549  ;;  %v5914_v0 = vmul.f32 0.5, %v9548_v16  ;;  %9565 = vtanh.f32 %v4295_v14  ;;  %v4298_v17 = vmul.f32 0.5, %v3111_v60  ;;  %v3113_v5 = vadd.f32 %v16012_v59, %v11294_v54  ;;  %v16013_v15 = vld [vmem:[#allocation44_spill] sm:$0xff] }
 0x355   : > { %v9552_v1 = vpop.eup %9551  ;;  %7113 = vst [vmem:[%s11342_s16 + $0x11d0] sm:$0x3f] %v6513_v12  ;;  %v5375_v20 = vmul.f32 0.5, %v9550_v33  ;;  %9567 = vtanh.f32 %v4297_v41  ;;  %v4355_v3 = vmul.f32 0.5, %v3030_v13  ;;  %7112 = vst [vmem:[%s11342_s16 + $0x11c8] sm:$0x3f] %v6512_v57  ;;  %v3032_v12 = vadd.f32 %v16013_v15, %v11294_v54 }
 0x356   : > { %v9554_v50 = vpop.eup %9553  ;;  %v6514_v63 = vadd.f32 0.5, %v5914_v0  ;;  %v5377_v29 = vmul.f32 0.5, %v9552_v1  ;;  %9569 = vtanh.f32 %v4296_v11  ;;  %v13344_v41 = vpop.f32.mrb[208].mxu0  ;;  %v4357_v57 = vmul.f32 0.5, %v3113_v5 }
 0x357   : > { %v9556_v34 = vpop.eup %9555  ;;  %v5975_v16 = vadd.f32 0.5, %v5375_v20  ;;  %v5376_v14 = vmul.f32 0.5, %v9554_v50  ;;  %9571 = vtanh.f32 %v4298_v17  ;;  %16014 = vst [vmem:[#allocation43_spill] sm:$0xff] %v13344_v41  ;;  %v13347_v0 = vpop.f32.mrb[208].mxu1  ;;  %v4356_v17 = vmul.f32 0.5, %v3032_v12  ;;  %v16015_v50 = vld [vmem:[#allocation10_spill] sm:$0xff] }
 0x358   : > { %v9558_v60 = vpop.eup %9557  ;;  %7114 = vst [vmem:[%s11342_s16 + $0x11d8] sm:$0x3f] %v6514_v63  ;;  %v5977_v13 = vadd.f32 0.5, %v5377_v29  ;;  %v5378_v33 = vmul.f32 0.5, %v9556_v34  ;;  %9573 = vtanh.f32 %v4355_v3  ;;  %v13349_v11 = vpop.f32.mrb[209].mxu0  ;;  %v3115_v59 = vadd.f32 %v16015_v50, %v11294_v54  ;;  %v16018_v3 = vld [vmem:[#allocation36_spill] sm:$0xff] }
 0x359   : > { %6575 = vst [vmem:[%s11342_s16 + $0x100] sm:$0xff] %v5975_v16  ;;  %v5976_v20 = vadd.f32 0.5, %v5376_v14  ;;  %v5435_v1 = vmul.f32 0.5, %v9558_v60  ;;  %v13354_v15 = vpop.f32.mrb[209].mxu1  ;;  %v13356_v41 = vpop.f32.mrb[210].mxu0  ;;  %9575 = vtanh.f32 %v4357_v57  ;;  %v3036_v63 = vadd.f32 %v16018_v3, %v11330_v22 }
 0x35a   : > { %16016 = vst [vmem:[#allocation44_spill] sm:$0xff] %v13354_v15  ;;  %16017 = vst [vmem:[#allocation10_spill] sm:$0xff] %v13356_v41  ;;  %v9560_v29 = vpop.eup %9559  ;;  %v5978_v5 = vadd.f32 0.5, %v5378_v33  ;;  %v3119_v34 = vadd.f32 %v12961_v37, %v11330_v22  ;;  %v13363_v16 = vpop.f32.mrb[210].mxu1  ;;  %9577 = vtanh.f32 %v4356_v17  ;;  %v4358_v41 = vmul.f32 0.5, %v3115_v59 }
 0x35b   : > { %6577 = vst [vmem:[%s11342_s16 + $0x110] sm:$0xff] %v5977_v13  ;;  %16019 = vst [vmem:[#allocation36_spill] sm:$0xff] %v13363_v16  ;;  %v13365_v14 = vpop.f32.mrb[211].mxu0  ;;  %v9562_v12 = vpop.eup %9561  ;;  %v6035_v60 = vadd.f32 0.5, %v5435_v1  ;;  %v5437_v50 = vmul.f32 0.5, %v9560_v29  ;;  %v4415_v57 = vmul.f32 0.5, %v3036_v63  ;;  %v3038_v37 = vadd.f32 %v12963_v51, %v11330_v22 }
 0x35c   : > { %6576 = vst [vmem:[%s11342_s16 + $0x108] sm:$0xff] %v5976_v20  ;;  %v13368_v13 = vpop.f32.mrb[211].mxu1  ;;  %6578 = vst [vmem:[%s11342_s16 + $0x118] sm:$0xff] %v5978_v5  ;;  %v5436_v33 = vmul.f32 0.5, %v9562_v12  ;;  %v4417_v3 = vmul.f32 0.5, %v3119_v34  ;;  %9579 = vtanh.f32 %v4358_v41  ;;  %v3121_v20 = vadd.f32 %v12968_v62, %v11330_v22  ;;  %v16021_v1 = vld [vmem:[#allocation37_spill] sm:$0xff] }
 0x35d   : > { %16020 = vst [vmem:[#allocation56_spill] sm:$0xff] %v13368_v13  ;;  %v9564_v15 = vpop.eup %9563  ;;  %6635 = vst [vmem:[%s11342_s16 + $0x2e0] sm:$0xff] %v6035_v60  ;;  %v6037_v16 = vadd.f32 0.5, %v5437_v50  ;;  %v3040_v17 = vadd.f32 %v16021_v1, %v11349_v58  ;;  %9581 = vtanh.f32 %v4415_v57  ;;  %v4416_v63 = vmul.f32 0.5, %v3038_v37  ;;  %v13379_v50 = vpop.f32.mrb[212].mxu0  ;;  %v16023_v1 = vld [vmem:[#allocation45_spill] sm:$0xff] }
 0x35e   : > { %v9566_v59 = vpop.eup %9565  ;;  %v6036_v29 = vadd.f32 0.5, %v5436_v33  ;;  %v5438_v5 = vmul.f32 0.5, %v9564_v15  ;;  %9583 = vtanh.f32 %v4417_v3  ;;  %v4418_v51 = vmul.f32 0.5, %v3121_v20  ;;  %16022 = vst [vmem:[#allocation37_spill] sm:$0xff] %v13379_v50  ;;  %v13384_v15 = vpop.f32.mrb[212].mxu1  ;;  %v16026_v20 = vld [vmem:[#allocation46_spill] sm:$0xff] }
 0x35f   : > { %v9568_v34 = vpop.eup %9567  ;;  %6637 = vst [vmem:[%s11342_s16 + $0x2f0] sm:$0xff] %v6037_v16  ;;  %v5495_v12 = vmul.f32 0.5, %v9566_v59  ;;  %v4475_v60 = vmul.f32 0.5, %v3040_v17  ;;  %9585 = vtanh.f32 %v4416_v63  ;;  %v3123_v33 = vadd.f32 %v16023_v1, %v11349_v58  ;;  %16024 = vst [vmem:[#allocation45_spill] sm:$0xff] %v13384_v15  ;;  %v13386_v57 = vpop.f32.mrb[213].mxu0 }
 0x360   : > { %v9570_v41 = vpop.eup %9569  ;;  %6636 = vst [vmem:[%s11342_s16 + $0x2e8] sm:$0xff] %v6036_v29  ;;  %v6038_v62 = vadd.f32 0.5, %v5438_v5  ;;  %v5497_v13 = vmul.f32 0.5, %v9568_v34  ;;  %16025 = vst [vmem:[#allocation57_spill] sm:$0xff] %v13386_v57  ;;  %9587 = vtanh.f32 %v4418_v51  ;;  %v3042_v17 = vadd.f32 %v16026_v20, %v11349_v58  ;;  %v13390_v59 = vpop.f32.mrb[213].mxu1 }
 0x361   : > { %v9572_v16 = vpop.eup %9571  ;;  %v6095_v3 = vadd.f32 0.5, %v5495_v12  ;;  %v5496_v37 = vmul.f32 0.5, %v9570_v41  ;;  %16027 = vst [vmem:[#allocation46_spill] sm:$0xff] %v13390_v59  ;;  %v13392_v29 = vpop.f32.mrb[214].mxu0  ;;  %9589 = vtanh.f32 %v4475_v60  ;;  %v4477_v1 = vmul.f32 0.5, %v3123_v33  ;;  %v16031_v59 = vld [vmem:[#allocation47_spill] sm:$0xff] }
 0x362   : > { %16028 = vst [vmem:[#allocation58_spill] sm:$0xff] %v13392_v29  ;;  %v9574_v5 = vpop.eup %9573  ;;  %6638 = vst [vmem:[%s11342_s16 + $0x2f8] sm:$0xff] %v6038_v62  ;;  %v6097_v63 = vadd.f32 0.5, %v5497_v13  ;;  %v5498_v34 = vmul.f32 0.5, %v9572_v16  ;;  %v13395_v57 = vpop.f32.mrb[214].mxu1  ;;  %v4476_v20 = vmul.f32 0.5, %v3042_v17  ;;  %v3125_v29 = vadd.f32 %v16031_v59, %v11349_v58 }
 0x363   : > { %16029 = vst [vmem:[#allocation59_spill] sm:$0xff] %v13395_v57  ;;  %v13397_v12 = vpop.f32.mrb[215].mxu0  ;;  %6695 = vst [vmem:[%s11342_s16 + $0x4c0] sm:$0xff] %v6095_v3  ;;  %v6096_v51 = vadd.f32 0.5, %v5496_v37  ;;  %v5555_v41 = vmul.f32 0.5, %v9574_v5  ;;  %v13402_v15 = vpop.f32.mrb[215].mxu1  ;;  %9591 = vtanh.f32 %v4477_v1 }
 0x364   : > { %16030 = vst [vmem:[#allocation60_spill] sm:$0xff] %v13397_v12  ;;  %16032 = vst [vmem:[#allocation47_spill] sm:$0xff] %v13402_v15  ;;  %v9576_v62 = vpop.eup %9575  ;;  %v6098_v13 = vadd.f32 0.5, %v5498_v34  ;;  %v16033_v60 = vld [vmem:[#allocation16_spill] sm:$0xff]  ;;  %v16034_v16 = vld [vmem:[#allocation15_spill] sm:$0xff]  ;;  %9593 = vtanh.f32 %v4476_v20  ;;  %v4478_v12 = vmul.f32 0.5, %v3125_v29 }
 0x365   : > { %6697 = vst [vmem:[%s11342_s16 + $0x4d0] sm:$0xff] %v6097_v63  ;;  %v3046_v33 = vadd.f32 %v16033_v60, %v15832_v35  ;;  %v3129_v3 = vadd.f32 %v16034_v16, %v15832_v35  ;;  %v9578_v37 = vpop.eup %9577  ;;  %6696 = vst [vmem:[%s11342_s16 + $0x4c8] sm:$0xff] %v6096_v51  ;;  %v6155_v5 = vadd.f32 0.5, %v5555_v41  ;;  %v5557_v17 = vmul.f32 0.5, %v9576_v62  ;;  %v16035_v63 = vld [vmem:[#allocation17_spill] sm:$0xff]  ;;  %v16036_v16 = vld [vmem:[#allocation18_spill] sm:$0xff] }
 0x366   : > { %6698 = vst [vmem:[%s11342_s16 + $0x4d8] sm:$0xff] %v6098_v13  ;;  %v5556_v59 = vmul.f32 0.5, %v9578_v37  ;;  %v3048_v34 = vadd.f32 %v16035_v63, %v15832_v35  ;;  %v9580_v1 = vpop.eup %9579  ;;  %9595 = vtanh.f32 %v4478_v12  ;;  %v3131_v50 = vadd.f32 %v16036_v16, %v15832_v35  ;;  %v16037_v51 = vld [vmem:[#allocation30_spill] sm:$0xff]  ;;  %v13418_v20 = vpop.f32.mrb[216].mxu0 }
 0x367   : > { %v4535_v15 = vmul.f32 0.5, %v3046_v33  ;;  %v4537_v57 = vmul.f32 0.5, %v3129_v3  ;;  %6755 = vst [vmem:[%s11342_s16 + $0x6a0] sm:$0xff] %v6155_v5  ;;  %v6157_v60 = vadd.f32 0.5, %v5557_v17  ;;  %v3050_v41 = vadd.f32 %v16037_v51, %v15803_v26  ;;  %16038 = vst [vmem:[#allocation16_spill] sm:$0xff] %v13418_v20  ;;  %v9582_v29 = vpop.eup %9581  ;;  %v13420_v3 = vpop.f32.mrb[216].mxu1 }
 0x368   : > { %v6156_v62 = vadd.f32 0.5, %v5556_v59  ;;  %v5558_v13 = vmul.f32 0.5, %v9580_v1  ;;  %v4536_v33 = vmul.f32 0.5, %v3048_v34  ;;  %v13422_v37 = vpop.f32.mrb[217].mxu0  ;;  %v9584_v5 = vpop.eup %9583  ;;  %v5615_v12 = vmul.f32 0.5, %v9582_v29  ;;  %v16042_v34 = vld [vmem:[#allocation48_spill] sm:$0xff] }
 0x369   : > { %9597 = vtanh.f32 %v4535_v15  ;;  %16039 = vst [vmem:[#allocation15_spill] sm:$0xff] %v13422_v37  ;;  %6757 = vst [vmem:[%s11342_s16 + $0x6b0] sm:$0xff] %v6157_v60  ;;  %v4538_v17 = vmul.f32 0.5, %v3131_v50  ;;  %v4595_v63 = vmul.f32 0.5, %v3050_v41  ;;  %v13425_v16 = vpop.f32.mrb[217].mxu1  ;;  %v13427_v51 = vpop.f32.mrb[218].mxu0  ;;  %v3133_v1 = vadd.f32 %v16042_v34, %v15803_v26 }
 0x36a   : > { %9599 = vtanh.f32 %v4537_v57  ;;  %16040 = vst [vmem:[#allocation17_spill] sm:$0xff] %v13425_v16  ;;  %16041 = vst [vmem:[#allocation18_spill] sm:$0xff] %v13427_v51  ;;  %v9586_v20 = vpop.eup %9585  ;;  %v6158_v59 = vadd.f32 0.5, %v5558_v13  ;;  %v5617_v15 = vmul.f32 0.5, %v9584_v5  ;;  %v13432_v37 = vpop.f32.mrb[218].mxu1  ;;  %v6215_v57 = vadd.f32 0.5, %v5615_v12 }
 0x36b   : > { %6756 = vst [vmem:[%s11342_s16 + $0x6a8] sm:$0xff] %v6156_v62  ;;  %9601 = vtanh.f32 %v4536_v33  ;;  %16043 = vst [vmem:[#allocation30_spill] sm:$0xff] %v13432_v37  ;;  %v9588_v60 = vpop.eup %9587  ;;  %v5616_v50 = vmul.f32 0.5, %v9586_v20  ;;  %v16044_v41 = vld [vmem:[#allocation49_spill] sm:$0xff]  ;;  %v13436_v51 = vpop.f32.mrb[219].mxu0  ;;  %v4597_v5 = vmul.f32 0.5, %v3133_v1 }
 0x36c   : > { %9603 = vtanh.f32 %v4538_v17  ;;  %v3052_v29 = vadd.f32 %v16044_v41, %v15803_v26  ;;  %16045 = vst [vmem:[#allocation48_spill] sm:$0xff] %v13436_v51  ;;  %v9590_v62 = vpop.eup %9589  ;;  %6758 = vst [vmem:[%s11342_s16 + $0x6b8] sm:$0xff] %v6158_v59  ;;  %v6217_v13 = vadd.f32 0.5, %v5617_v15  ;;  %v5618_v33 = vmul.f32 0.5, %v9588_v60  ;;  %v13439_v34 = vpop.f32.mrb[219].mxu1  ;;  %v16046_v17 = vld [vmem:[#allocation19_spill] sm:$0xff] }
 0x36d   : > { %9605 = vtanh.f32 %v4595_v63  ;;  %6815 = vst [vmem:[%s11342_s16 + $0x880] sm:$0xff] %v6215_v57  ;;  %v6216_v37 = vadd.f32 0.5, %v5616_v50  ;;  %v5675_v12 = vmul.f32 0.5, %v9590_v62  ;;  %v3135_v16 = vadd.f32 %v16046_v17, %v15803_v26  ;;  %v9592_v41 = vpop.eup %9591  ;;  %v16047_v59 = vld [vmem:[#allocation6_spill] sm:$0xff]  ;;  %v13455_v17 = vpop.f32.mrb[220].mxu1 }
 0x36e   : > { %v4596_v20 = vmul.f32 0.5, %v3052_v29  ;;  %6817 = vst [vmem:[%s11342_s16 + $0x890] sm:$0xff] %v6217_v13  ;;  %v6218_v51 = vadd.f32 0.5, %v5618_v33  ;;  %9607 = vtanh.f32 %v4597_v5  ;;  %v3056_v15 = vadd.f32 %v16047_v59, %v15808_v8  ;;  %v9594_v1 = vpop.eup %9593  ;;  %v13450_v29 = vpop.f32.mrb[220].mxu0  ;;  %16048 = vst [vmem:[#allocation49_spill] sm:$0xff] %v13455_v17 }
 0x36f   : > { %v3139_v63 = vadd.f32 %v13046_v45, %v15808_v8  ;;  %6816 = vst [vmem:[%s11342_s16 + $0x888] sm:$0xff] %v6216_v37  ;;  %v6275_v60 = vadd.f32 0.5, %v5675_v12  ;;  %v5677_v57 = vmul.f32 0.5, %v9592_v41  ;;  %v4598_v50 = vmul.f32 0.5, %v3135_v16  ;;  %v13457_v45 = vpop.f32.mrb[221].mxu0 }
 0x370   : > { %9609 = vtanh.f32 %v4596_v20  ;;  %6818 = vst [vmem:[%s11342_s16 + $0x898] sm:$0xff] %v6218_v51  ;;  %v5676_v62 = vmul.f32 0.5, %v9594_v1  ;;  %v4655_v13 = vmul.f32 0.5, %v3056_v15  ;;  %v3058_v5 = vadd.f32 %v13048_v46, %v15808_v8  ;;  %16049 = vst [vmem:[#allocation19_spill] sm:$0xff] %v13457_v45  ;;  %v9596_v59 = vpop.eup %9595  ;;  %v16050_v51 = vld [vmem:[#allocation31_spill] sm:$0xff]  ;;  %v13464_v20 = vpop.f32.mrb[221].mxu1 }
 0x371   : > { %v4657_v33 = vmul.f32 0.5, %v3139_v63  ;;  %6875 = vst [vmem:[%s11342_s16 + $0xa60] sm:$0xff] %v6275_v60  ;;  %v6277_v37 = vadd.f32 0.5, %v5677_v57  ;;  %9611 = vtanh.f32 %v4598_v50  ;;  %v3141_v16 = vadd.f32 %v13051_v56, %v15808_v8  ;;  %16051 = vst [vmem:[#allocation6_spill] sm:$0xff] %v13464_v20  ;;  %v13466_v1 = vpop.f32.mrb[222].mxu0  ;;  %v13469_v50 = vpop.f32.mrb[222].mxu1 }
 0x372   : > { %v3060_v12 = vadd.f32 %v16050_v51, %v11415_v30  ;;  %v6276_v46 = vadd.f32 0.5, %v5676_v62  ;;  %v5678_v15 = vmul.f32 0.5, %v9596_v59  ;;  %9613 = vtanh.f32 %v4655_v13 }
 0x373   : > { %v9598_v41 = vpop.eup %9597  ;;  %v4656_v63 = vmul.f32 0.5, %v3058_v5  ;;  %6877 = vst [vmem:[%s11342_s16 + $0xa70] sm:$0xff] %v6277_v37  ;;  %9615 = vtanh.f32 %v4657_v33  ;;  %v4658_v57 = vmul.f32 0.5, %v3141_v16  ;;  %v3143_v62 = vadd.f32 %v13058_v47, %v11415_v30  ;;  %v16052_v33 = vld [vmem:[#allocation26_spill] sm:$0xff]  ;;  %v13476_v16 = vpop.f32.mrb[223].mxu0 }
 0x374   : > { %v9600_v45 = vpop.eup %9599  ;;  %v5735_v60 = vmul.f32 0.5, %v9598_v41  ;;  %v4715_v56 = vmul.f32 0.5, %v3060_v12  ;;  %6876 = vst [vmem:[%s11342_s16 + $0xa68] sm:$0xff] %v6276_v46  ;;  %v6278_v17 = vadd.f32 0.5, %v5678_v15  ;;  %v3062_v37 = vadd.f32 %v16052_v33, %v11415_v30  ;;  %16053 = vst [vmem:[#allocation31_spill] sm:$0xff] %v13476_v16  ;;  %v13479_v15 = vpop.f32.mrb[223].mxu1 }
 0x375   : > { %v9602_v51 = vpop.eup %9601  ;;  %v5737_v20 = vmul.f32 0.5, %v9600_v45  ;;  %9617 = vtanh.f32 %v4656_v63  ;;  %v4717_v45 = vmul.f32 0.5, %v3143_v62 }
 0x376   : > { %v9604_v13 = vpop.eup %9603  ;;  %v6335_v5 = vadd.f32 0.5, %v5735_v60  ;;  %v5736_v59 = vmul.f32 0.5, %v9602_v51  ;;  %9619 = vtanh.f32 %v4658_v57  ;;  %6878 = vst [vmem:[%s11342_s16 + $0xa78] sm:$0xff] %v6278_v17  ;;  %v4716_v60 = vmul.f32 0.5, %v3062_v37  ;;  %v16054_v57 = vld [vmem:[#allocation32_spill] sm:$0xff]  ;;  %v13492_v37 = vpop.f32.mrb[224].mxu1 }
 0x377   : > { %v9606_v12 = vpop.eup %9605  ;;  %v6337_v41 = vadd.f32 0.5, %v5737_v20  ;;  %v5738_v46 = vmul.f32 0.5, %v9604_v13  ;;  %9621 = vtanh.f32 %v4715_v56  ;;  %v3145_v51 = vadd.f32 %v16054_v57, %v11415_v30  ;;  %v13489_v56 = vpop.f32.mrb[224].mxu0  ;;  %16056 = vst [vmem:[#allocation32_spill] sm:$0xff] %v13492_v37 }
 0x378   : > { %6935 = vst [vmem:[%s11342_s16 + $0xc40] sm:$0xff] %v6335_v5  ;;  %v6336_v47 = vadd.f32 0.5, %v5736_v59  ;;  %v5795_v63 = vmul.f32 0.5, %v9606_v12  ;;  %v9608_v33 = vpop.eup %9607  ;;  %9623 = vtanh.f32 %v4717_v45  ;;  %v3182_v17 = vadd.f32 %v13082_v23, %v11266_v31  ;;  %16055 = vst [vmem:[#allocation26_spill] sm:$0xff] %v13489_v56  ;;  %v16057_v23 = vld [vmem:[#allocation27_spill] sm:$0xff] }
 0x379   : > { %6937 = vst [vmem:[%s11342_s16 + $0xc50] sm:$0xff] %v6337_v41  ;;  %v6338_v16 = vadd.f32 0.5, %v5738_v46  ;;  %v3265_v20 = vadd.f32 %v13087_v53, %v11266_v31  ;;  %v5797_v5 = vmul.f32 0.5, %v9608_v33  ;;  %9625 = vtanh.f32 %v4716_v60  ;;  %v13497_v53 = vpop.f32.mrb[225].mxu0  ;;  %v16060_v60 = vld [vmem:[#allocation28_spill] sm:$0xff] }
 0x37a   : > { %v9610_v62 = vpop.eup %9609  ;;  %6936 = vst [vmem:[%s11342_s16 + $0xc48] sm:$0xff] %v6336_v47  ;;  %v6395_v13 = vadd.f32 0.5, %v5795_v63  ;;  %v4718_v59 = vmul.f32 0.5, %v3145_v51  ;;  %v4179_v41 = vmul.f32 0.5, %v3182_v17  ;;  %v3184_v45 = vadd.f32 %v16057_v23, %v11266_v31  ;;  %16058 = vst [vmem:[#allocation27_spill] sm:$0xff] %v13497_v53  ;;  %v16059_v47 = vld [vmem:[#allocation33_spill] sm:$0xff] }
 0x37b   : > { %6938 = vst [vmem:[%s11342_s16 + $0xc58] sm:$0xff] %v6338_v16  ;;  %v5796_v12 = vmul.f32 0.5, %v9610_v62  ;;  %v4181_v46 = vmul.f32 0.5, %v3265_v20  ;;  %v9612_v57 = vpop.eup %9611  ;;  %v6397_v56 = vadd.f32 0.5, %v5797_v5  ;;  %v3267_v63 = vadd.f32 %v16059_v47, %v11266_v31  ;;  %v13504_v16 = vpop.f32.mrb[225].mxu1 }
 0x37c   : > { %6995 = vst [vmem:[%s11342_s16 + $0xe20] sm:$0xff] %v6395_v13  ;;  %9627 = vtanh.f32 %v4718_v59  ;;  %v3186_v51 = vadd.f32 %v16060_v60, %v11251_v44  ;;  %16061 = vst [vmem:[#allocation33_spill] sm:$0xff] %v13504_v16  ;;  %v9614_v33 = vpop.eup %9613  ;;  %v5798_v20 = vmul.f32 0.5, %v9612_v57  ;;  %v4180_v62 = vmul.f32 0.5, %v3184_v45  ;;  %v13506_v23 = vpop.f32.mrb[226].mxu0 }
 0x37d   : > { %v6396_v17 = vadd.f32 0.5, %v5796_v12  ;;  %9629 = vtanh.f32 %v4179_v41  ;;  %v9616_v53 = vpop.eup %9615  ;;  %6997 = vst [vmem:[%s11342_s16 + $0xe30] sm:$0xff] %v6397_v56  ;;  %v5855_v13 = vmul.f32 0.5, %v9614_v33  ;;  %v4182_v5 = vmul.f32 0.5, %v3267_v63  ;;  %v13509_v47 = vpop.f32.mrb[226].mxu1 }
 0x37e   : > { %9631 = vtanh.f32 %v4181_v46  ;;  %v4239_v59 = vmul.f32 0.5, %v3186_v51  ;;  %v6398_v37 = vadd.f32 0.5, %v5798_v20  ;;  %v5857_v16 = vmul.f32 0.5, %v9616_v53  ;;  %v13516_v46 = vpop.f32.mrb[227].mxu0 }
 0x37f   : > { %v9618_v60 = vpop.eup %9617  ;;  %6996 = vst [vmem:[%s11342_s16 + $0xe28] sm:$0xff] %v6396_v17  ;;  %9633 = vtanh.f32 %v4180_v62  ;;  %v3269_v12 = vadd.f32 %v13100_v9, %v11251_v44  ;;  %v6455_v45 = vadd.f32 0.5, %v5855_v13  ;;  %v3188_v56 = vadd.f32 %v13102_v24, %v11251_v44  ;;  %v13519_v17 = vpop.f32.mrb[227].mxu1 }
 0x380   : > { %v9620_v41 = vpop.eup %9619  ;;  %v5856_v57 = vmul.f32 0.5, %v9618_v60  ;;  %9635 = vtanh.f32 %v4182_v5  ;;  %6998 = vst [vmem:[%s11342_s16 + $0xe38] sm:$0xff] %v6398_v37  ;;  %v6457_v51 = vadd.f32 0.5, %v5857_v16  ;;  %v3271_v13 = vadd.f32 %v13105_v19, %v11251_v44  ;;  %v16062_v16 = vld [vmem:[#allocation22_spill] sm:$0xff]  ;;  %v13529_v60 = vpop.f32.mrb[228].mxu0 }
 0x381   : > { %v9622_v63 = vpop.eup %9621  ;;  %v5858_v33 = vmul.f32 0.5, %v9620_v41  ;;  %9637 = vtanh.f32 %v4239_v59  ;;  %v4241_v53 = vmul.f32 0.5, %v3269_v12  ;;  %7055 = vst [vmem:[%s11342_s16 + $0x1000] sm:$0xff] %v6455_v45  ;;  %v4240_v62 = vmul.f32 0.5, %v3188_v56  ;;  %16063 = vst [vmem:[#allocation28_spill] sm:$0xff] %v13529_v60  ;;  %v13532_v19 = vpop.f32.mrb[228].mxu1 }
 0x382   : > { %v6456_v9 = vadd.f32 0.5, %v5856_v57  ;;  %v5915_v20 = vmul.f32 0.5, %v9622_v63  ;;  %v9624_v24 = vpop.eup %9623  ;;  %7057 = vst [vmem:[%s11342_s16 + $0x1010] sm:$0xff] %v6457_v51  ;;  %v3192_v37 = vadd.f32 %v13122_v10, %v15817_v42  ;;  %v3275_v59 = vadd.f32 %v16062_v16, %v15817_v42  ;;  %v16064_v10 = vld [vmem:[#allocation11_spill] sm:$0xff] }
 0x383   : > { %v6458_v5 = vadd.f32 0.5, %v5858_v33  ;;  %9639 = vtanh.f32 %v4241_v53  ;;  %v9626_v12 = vpop.eup %9625  ;;  %v5917_v45 = vmul.f32 0.5, %v9624_v24  ;;  %v4242_v57 = vmul.f32 0.5, %v3271_v13  ;;  %v13537_v53 = vpop.f32.mrb[229].mxu0 }
 0x384   : > { %7056 = vst [vmem:[%s11342_s16 + $0x1008] sm:$0xff] %v6456_v9  ;;  %v6515_v41 = vadd.f32 0.5, %v5915_v20  ;;  %9641 = vtanh.f32 %v4240_v62  ;;  %v5916_v56 = vmul.f32 0.5, %v9626_v12  ;;  %v4299_v63 = vmul.f32 0.5, %v3192_v37  ;;  %v13544_v62 = vpop.f32.mrb[229].mxu1 }
 0x385   : > { %7058 = vst [vmem:[%s11342_s16 + $0x1018] sm:$0xff] %v6458_v5  ;;  %v4301_v51 = vmul.f32 0.5, %v3275_v59  ;;  %v3194_v33 = vadd.f32 %v16064_v10, %v15817_v42  ;;  %v6517_v60 = vadd.f32 0.5, %v5917_v45  ;;  %9643 = vtanh.f32 %v4242_v57  ;;  %16065 = vst [vmem:[#allocation22_spill] sm:$0xff] %v13544_v62  ;;  %v13546_v59 = vpop.f32.mrb[230].mxu0  ;;  %v13549_v57 = vpop.f32.mrb[230].mxu1 }
 0x386   : > { %v9628_v16 = vpop.eup %9627  ;;  %7115 = vst [vmem:[%s11342_s16 + $0x11e0] sm:$0x3f] %v6515_v41  ;;  %v3277_v9 = vadd.f32 %v13134_v38, %v15817_v42  ;;  %v3196_v20 = vadd.f32 %v13136_v6, %v11294_v54  ;;  %v6516_v24 = vadd.f32 0.5, %v5916_v56  ;;  %9645 = vtanh.f32 %v4299_v63  ;;  %16066 = vst [vmem:[#allocation11_spill] sm:$0xff] %v13546_v59  ;;  %v16067_v56 = vld [vmem:[#allocation12_spill] sm:$0xff] }
 0x387   : > { %v9630_v13 = vpop.eup %9629  ;;  %v5918_v5 = vmul.f32 0.5, %v9628_v16  ;;  %v4300_v37 = vmul.f32 0.5, %v3194_v33  ;;  %7117 = vst [vmem:[%s11342_s16 + $0x11f0] sm:$0x3f] %v6517_v60  ;;  %9647 = vtanh.f32 %v4301_v51  ;;  %v3279_v63 = vadd.f32 %v16067_v56, %v11294_v54  ;;  %v16068_v60 = vld [vmem:[#allocation38_spill] sm:$0xff] }
 0x388   : > { %v9632_v12 = vpop.eup %9631  ;;  %v5379_v41 = vmul.f32 0.5, %v9630_v13  ;;  %v4302_v45 = vmul.f32 0.5, %v3277_v9  ;;  %v4359_v38 = vmul.f32 0.5, %v3196_v20  ;;  %7116 = vst [vmem:[%s11342_s16 + $0x11e8] sm:$0x3f] %v6516_v24  ;;  %v3198_v51 = vadd.f32 %v16068_v60, %v11294_v54  ;;  %v13556_v9 = vpop.f32.mrb[231].mxu0 }
 0x389   : > { %v9634_v6 = vpop.eup %9633  ;;  %v6518_v10 = vadd.f32 0.5, %v5918_v5  ;;  %v5381_v62 = vmul.f32 0.5, %v9632_v12  ;;  %9649 = vtanh.f32 %v4300_v37  ;;  %16069 = vst [vmem:[#allocation12_spill] sm:$0xff] %v13556_v9  ;;  %v4361_v5 = vmul.f32 0.5, %v3279_v63  ;;  %v13559_v37 = vpop.f32.mrb[231].mxu1 }
 0x38a   : > { %v9636_v33 = vpop.eup %9635  ;;  %v5979_v16 = vadd.f32 0.5, %v5379_v41  ;;  %v5380_v59 = vmul.f32 0.5, %v9634_v6  ;;  %9651 = vtanh.f32 %v4302_v45  ;;  %v4360_v6 = vmul.f32 0.5, %v3198_v51  ;;  %v16070_v45 = vld [vmem:[#allocation13_spill] sm:$0xff]  ;;  %v13569_v63 = vpop.f32.mrb[232].mxu0 }
 0x38b   : > { %v9638_v20 = vpop.eup %9637  ;;  %7118 = vst [vmem:[%s11342_s16 + $0x11f8] sm:$0x3f] %v6518_v10  ;;  %v5981_v13 = vadd.f32 0.5, %v5381_v62  ;;  %v5382_v24 = vmul.f32 0.5, %v9636_v33  ;;  %9653 = vtanh.f32 %v4359_v38  ;;  %v3281_v56 = vadd.f32 %v16070_v45, %v11294_v54  ;;  %v16071_v62 = vld [vmem:[#allocation39_spill] sm:$0xff]  ;;  %16072 = vst [vmem:[#allocation38_spill] sm:$0xff] %v13569_v63 }
 0x38c   : > { %6579 = vst [vmem:[%s11342_s16 + $0x120] sm:$0xff] %v5979_v16  ;;  %v5980_v12 = vadd.f32 0.5, %v5380_v59  ;;  %v5439_v41 = vmul.f32 0.5, %v9638_v20  ;;  %9655 = vtanh.f32 %v4361_v5  ;;  %v3202_v10 = vadd.f32 %v16071_v62, %v11330_v22  ;;  %v13572_v20 = vpop.f32.mrb[232].mxu1 }
 0x38d   : > { %v9640_v60 = vpop.eup %9639  ;;  %6581 = vst [vmem:[%s11342_s16 + $0x130] sm:$0xff] %v5981_v13  ;;  %v5982_v9 = vadd.f32 0.5, %v5382_v24  ;;  %v3285_v38 = vadd.f32 %v13167_v25, %v11330_v22  ;;  %9657 = vtanh.f32 %v4360_v6  ;;  %v4362_v51 = vmul.f32 0.5, %v3281_v56  ;;  %v13577_v25 = vpop.f32.mrb[233].mxu0 }
 0x38e   : > { %v9642_v59 = vpop.eup %9641  ;;  %6580 = vst [vmem:[%s11342_s16 + $0x128] sm:$0xff] %v5980_v12  ;;  %v6039_v33 = vadd.f32 0.5, %v5439_v41  ;;  %v5441_v16 = vmul.f32 0.5, %v9640_v60  ;;  %v4419_v24 = vmul.f32 0.5, %v3202_v10  ;;  %v3204_v45 = vadd.f32 %v13169_v55, %v11330_v22  ;;  %v13586_v10 = vpop.f32.mrb[234].mxu0 }
 0x38f   : > { %6582 = vst [vmem:[%s11342_s16 + $0x138] sm:$0xff] %v5982_v9  ;;  %v5440_v13 = vmul.f32 0.5, %v9642_v59  ;;  %v4421_v5 = vmul.f32 0.5, %v3285_v38  ;;  %v9644_v62 = vpop.eup %9643  ;;  %9659 = vtanh.f32 %v4362_v51  ;;  %v3287_v12 = vadd.f32 %v13174_v2, %v11330_v22  ;;  %v13584_v9 = vpop.f32.mrb[233].mxu1  ;;  %16074 = vst [vmem:[#allocation39_spill] sm:$0xff] %v13586_v10 }
 0x390   : > { %6639 = vst [vmem:[%s11342_s16 + $0x300] sm:$0xff] %v6039_v33  ;;  %v6041_v63 = vadd.f32 0.5, %v5441_v16  ;;  %v3206_v41 = vadd.f32 %v13176_v32, %v11349_v58  ;;  %16073 = vst [vmem:[#allocation13_spill] sm:$0xff] %v13584_v9  ;;  %v9646_v6 = vpop.eup %9645  ;;  %v5442_v60 = vmul.f32 0.5, %v9644_v62  ;;  %9661 = vtanh.f32 %v4419_v24  ;;  %v13589_v16 = vpop.f32.mrb[234].mxu1 }
 0x391   : > { %v6040_v56 = vadd.f32 0.5, %v5440_v13  ;;  %v4420_v55 = vmul.f32 0.5, %v3204_v45  ;;  %v9648_v38 = vpop.eup %9647  ;;  %v5499_v59 = vmul.f32 0.5, %v9646_v6  ;;  %9663 = vtanh.f32 %v4421_v5  ;;  %v16075_v13 = vld [vmem:[#allocation23_spill] sm:$0xff] }
 0x392   : > { %6641 = vst [vmem:[%s11342_s16 + $0x310] sm:$0xff] %v6041_v63  ;;  %v4422_v33 = vmul.f32 0.5, %v3287_v12  ;;  %v4479_v2 = vmul.f32 0.5, %v3206_v41  ;;  %v6042_v51 = vadd.f32 0.5, %v5442_v60  ;;  %v5501_v9 = vmul.f32 0.5, %v9648_v38  ;;  %v16076_v63 = vld [vmem:[#allocation40_spill] sm:$0xff] }
 0x393   : > { %v9650_v32 = vpop.eup %9649  ;;  %6640 = vst [vmem:[%s11342_s16 + $0x308] sm:$0xff] %v6040_v56  ;;  %9665 = vtanh.f32 %v4420_v55  ;;  %v3289_v24 = vadd.f32 %v16075_v13, %v11349_v58  ;;  %v6099_v62 = vadd.f32 0.5, %v5499_v59  ;;  %v3208_v5 = vadd.f32 %v16076_v63, %v11349_v58  ;;  %v13596_v12 = vpop.f32.mrb[235].mxu0 }
 0x394   : > { %v9652_v45 = vpop.eup %9651  ;;  %v5500_v10 = vmul.f32 0.5, %v9650_v32  ;;  %9667 = vtanh.f32 %v4422_v33  ;;  %16077 = vst [vmem:[#allocation23_spill] sm:$0xff] %v13596_v12  ;;  %6642 = vst [vmem:[%s11342_s16 + $0x318] sm:$0xff] %v6042_v51  ;;  %v6101_v6 = vadd.f32 0.5, %v5501_v9  ;;  %v13599_v55 = vpop.f32.mrb[235].mxu1  ;;  %v16078_v33 = vld [vmem:[#allocation41_spill] sm:$0xff]  ;;  %v3212_v9 = vadd.f32 %v13203_v21, %v15832_v35 }
 0x395   : > { %v9654_v41 = vpop.eup %9653  ;;  %v5502_v56 = vmul.f32 0.5, %v9652_v45  ;;  %9669 = vtanh.f32 %v4479_v2  ;;  %v4481_v60 = vmul.f32 0.5, %v3289_v24  ;;  %6699 = vst [vmem:[%s11342_s16 + $0x4e0] sm:$0xff] %v6099_v62  ;;  %v4480_v32 = vmul.f32 0.5, %v3208_v5  ;;  %v13609_v51 = vpop.f32.mrb[236].mxu0 }
 0x396   : > { %v6100_v38 = vadd.f32 0.5, %v5500_v10  ;;  %v5559_v59 = vmul.f32 0.5, %v9654_v41  ;;  %v3291_v13 = vadd.f32 %v16078_v33, %v11349_v58  ;;  %v9656_v63 = vpop.eup %9655  ;;  %6701 = vst [vmem:[%s11342_s16 + $0x4f0] sm:$0xff] %v6101_v6  ;;  %v3295_v2 = vadd.f32 %v13208_v28, %v15832_v35  ;;  %v13612_v5 = vpop.f32.mrb[236].mxu1 }
 0x397   : > { %v6102_v12 = vadd.f32 0.5, %v5502_v56  ;;  %9671 = vtanh.f32 %v4481_v60  ;;  %v9658_v10 = vpop.eup %9657  ;;  %v5561_v45 = vmul.f32 0.5, %v9656_v63  ;;  %v4539_v6 = vmul.f32 0.5, %v3212_v9  ;;  %v13617_v28 = vpop.f32.mrb[237].mxu0 }
 0x398   : > { %6700 = vst [vmem:[%s11342_s16 + $0x4e8] sm:$0xff] %v6100_v38  ;;  %v6159_v24 = vadd.f32 0.5, %v5559_v59  ;;  %9673 = vtanh.f32 %v4480_v32  ;;  %v4482_v62 = vmul.f32 0.5, %v3291_v13  ;;  %v5560_v41 = vmul.f32 0.5, %v9658_v10  ;;  %16079 = vst [vmem:[#allocation40_spill] sm:$0xff] %v13617_v28  ;;  %v16080_v59 = vld [vmem:[#allocation25_spill] sm:$0xff] }
 0x399   : > { %6702 = vst [vmem:[%s11342_s16 + $0x4f8] sm:$0xff] %v6102_v12  ;;  %v4541_v56 = vmul.f32 0.5, %v3295_v2  ;;  %v3214_v21 = vadd.f32 %v13210_v27, %v15832_v35  ;;  %v9660_v60 = vpop.eup %9659  ;;  %v6161_v33 = vadd.f32 0.5, %v5561_v45  ;;  %v3297_v38 = vadd.f32 %v13214_v40, %v15832_v35  ;;  %v13624_v12 = vpop.f32.mrb[237].mxu1 }
 0x39a   : > { %6759 = vst [vmem:[%s11342_s16 + $0x6c0] sm:$0xff] %v6159_v24  ;;  %9675 = vtanh.f32 %v4482_v62  ;;  %v3216_v32 = vadd.f32 %v16080_v59, %v15803_v26  ;;  %16081 = vst [vmem:[#allocation41_spill] sm:$0xff] %v13624_v12  ;;  %v9662_v13 = vpop.eup %9661  ;;  %v6160_v63 = vadd.f32 0.5, %v5560_v41  ;;  %v5562_v9 = vmul.f32 0.5, %v9660_v60  ;;  %v13626_v2 = vpop.f32.mrb[238].mxu0 }
 0x39b   : > { %9677 = vtanh.f32 %v4539_v6  ;;  %v4540_v27 = vmul.f32 0.5, %v3214_v21  ;;  %v9664_v10 = vpop.eup %9663  ;;  %6761 = vst [vmem:[%s11342_s16 + $0x6d0] sm:$0xff] %v6161_v33  ;;  %v5619_v24 = vmul.f32 0.5, %v9662_v13  ;;  %v4542_v45 = vmul.f32 0.5, %v3297_v38  ;;  %v13629_v62 = vpop.f32.mrb[238].mxu1 }
 0x39c   : > { %9679 = vtanh.f32 %v4541_v56  ;;  %v4599_v40 = vmul.f32 0.5, %v3216_v32  ;;  %6760 = vst [vmem:[%s11342_s16 + $0x6c8] sm:$0xff] %v6160_v63  ;;  %v6162_v28 = vadd.f32 0.5, %v5562_v9  ;;  %v5621_v12 = vmul.f32 0.5, %v9664_v10  ;;  %v16082_v56 = vld [vmem:[#allocation14_spill] sm:$0xff]  ;;  %v13636_v38 = vpop.f32.mrb[239].mxu0 }
 0x39d   : > { %v9666_v59 = vpop.eup %9665  ;;  %9681 = vtanh.f32 %v4540_v27  ;;  %v3299_v41 = vadd.f32 %v13219_v4, %v15803_v26  ;;  %v6219_v21 = vadd.f32 0.5, %v5619_v24  ;;  %v3218_v33 = vadd.f32 %v16082_v56, %v15803_v26  ;;  %16083 = vst [vmem:[#allocation25_spill] sm:$0xff] %v13636_v38  ;;  %v13639_v27 = vpop.f32.mrb[239].mxu1 }
 0x39e   : > { %v9668_v6 = vpop.eup %9667  ;;  %v5620_v60 = vmul.f32 0.5, %v9666_v59  ;;  %9683 = vtanh.f32 %v4542_v45  ;;  %6762 = vst [vmem:[%s11342_s16 + $0x6d8] sm:$0xff] %v6162_v28  ;;  %v6221_v13 = vadd.f32 0.5, %v5621_v12  ;;  %v16084_v45 = vld [vmem:[#allocation50_spill] sm:$0xff]  ;;  %v16085_v28 = vld [vmem:[#allocation29_spill] sm:$0xff] }
 0x39f   : > { %v9670_v32 = vpop.eup %9669  ;;  %v5622_v63 = vmul.f32 0.5, %v9668_v6  ;;  %9685 = vtanh.f32 %v4599_v40  ;;  %v4601_v9 = vmul.f32 0.5, %v3299_v41  ;;  %6819 = vst [vmem:[%s11342_s16 + $0x8a0] sm:$0xff] %v6219_v21  ;;  %v4600_v24 = vmul.f32 0.5, %v3218_v33  ;;  %v13649_v41 = vpop.f32.mrb[240].mxu0 }
 0x3a0   : > { %v6220_v4 = vadd.f32 0.5, %v5620_v60  ;;  %v5679_v10 = vmul.f32 0.5, %v9670_v32  ;;  %v3301_v59 = vadd.f32 %v16084_v45, %v15803_v26  ;;  %6821 = vst [vmem:[%s11342_s16 + $0x8b0] sm:$0xff] %v6221_v13  ;;  %v3222_v12 = vadd.f32 %v16085_v28, %v15808_v8  ;;  %16086 = vst [vmem:[#allocation14_spill] sm:$0xff] %v13649_v41  ;;  %v13652_v32 = vpop.f32.mrb[240].mxu1 }
 0x3a1   : > { %v9672_v56 = vpop.eup %9671  ;;  %v6222_v38 = vadd.f32 0.5, %v5622_v63  ;;  %9687 = vtanh.f32 %v4601_v9  ;;  %v3305_v40 = vadd.f32 %v13244_v61, %v15808_v8  ;;  %16087 = vst [vmem:[#allocation50_spill] sm:$0xff] %v13652_v32  ;;  %v3224_v45 = vadd.f32 %v13246_v49, %v15808_v8  ;;  %v13657_v61 = vpop.f32.mrb[241].mxu0 }
 0x3a2   : > { %v9674_v6 = vpop.eup %9673  ;;  %6820 = vst [vmem:[%s11342_s16 + $0x8a8] sm:$0xff] %v6220_v4  ;;  %v6279_v21 = vadd.f32 0.5, %v5679_v10  ;;  %v5681_v60 = vmul.f32 0.5, %v9672_v56  ;;  %9689 = vtanh.f32 %v4600_v24  ;;  %v4602_v33 = vmul.f32 0.5, %v3301_v59  ;;  %16088 = vst [vmem:[#allocation29_spill] sm:$0xff] %v13657_v61  ;;  %v16089_v4 = vld [vmem:[#allocation20_spill] sm:$0xff] }
 0x3a3   : > { %6822 = vst [vmem:[%s11342_s16 + $0x8b8] sm:$0xff] %v6222_v38  ;;  %v5680_v13 = vmul.f32 0.5, %v9674_v6  ;;  %v4659_v63 = vmul.f32 0.5, %v3222_v12  ;;  %v4661_v9 = vmul.f32 0.5, %v3305_v40  ;;  %v3307_v10 = vadd.f32 %v16089_v4, %v15808_v8  ;;  %v16090_v24 = vld [vmem:[#allocation24_spill] sm:$0xff]  ;;  %v13664_v38 = vpop.f32.mrb[241].mxu1 }
 0x3a4   : > { %v9676_v28 = vpop.eup %9675  ;;  %6879 = vst [vmem:[%s11342_s16 + $0xa80] sm:$0xff] %v6279_v21  ;;  %v6281_v41 = vadd.f32 0.5, %v5681_v60  ;;  %9691 = vtanh.f32 %v4602_v33  ;;  %v3226_v59 = vadd.f32 %v16090_v24, %v11415_v30  ;;  %16091 = vst [vmem:[#allocation20_spill] sm:$0xff] %v13664_v38  ;;  %v4660_v49 = vmul.f32 0.5, %v3224_v45  ;;  %v13666_v6 = vpop.f32.mrb[242].mxu0 }
 0x3a5   : > { %v9678_v56 = vpop.eup %9677  ;;  %v6280_v12 = vadd.f32 0.5, %v5680_v13  ;;  %v5682_v40 = vmul.f32 0.5, %v9676_v28  ;;  %9693 = vtanh.f32 %v4659_v63  ;;  %16092 = vst [vmem:[#allocation24_spill] sm:$0xff] %v13666_v6  ;;  %v4662_v60 = vmul.f32 0.5, %v3307_v10  ;;  %v13669_v4 = vpop.f32.mrb[242].mxu1  ;;  %v16093_v13 = vld [vmem:[#allocation51_spill] sm:$0xff] }
 0x3a6   : > { %v9680_v61 = vpop.eup %9679  ;;  %6881 = vst [vmem:[%s11342_s16 + $0xa90] sm:$0xff] %v6281_v41  ;;  %v5739_v21 = vmul.f32 0.5, %v9678_v56  ;;  %9695 = vtanh.f32 %v4661_v9  ;;  %v4719_v33 = vmul.f32 0.5, %v3226_v59  ;;  %v3309_v63 = vadd.f32 %v16093_v13, %v11415_v30  ;;  %v16094_v41 = vld [vmem:[#allocation52_spill] sm:$0xff]  ;;  %v13676_v10 = vpop.f32.mrb[243].mxu0 }
 0x3a7   : > { %v9682_v24 = vpop.eup %9681  ;;  %6880 = vst [vmem:[%s11342_s16 + $0xa88] sm:$0xff] %v6280_v12  ;;  %v6282_v32 = vadd.f32 0.5, %v5682_v40  ;;  %v5741_v38 = vmul.f32 0.5, %v9680_v61  ;;  %9697 = vtanh.f32 %v4660_v49  ;;  %v3228_v9 = vadd.f32 %v16094_v41, %v11415_v30  ;;  %16095 = vst [vmem:[#allocation51_spill] sm:$0xff] %v13676_v10  ;;  %v13679_v40 = vpop.f32.mrb[243].mxu1 }
 0x3a8   : > { %v9684_v45 = vpop.eup %9683  ;;  %v6339_v28 = vadd.f32 0.5, %v5739_v21  ;;  %v5740_v6 = vmul.f32 0.5, %v9682_v24  ;;  %9699 = vtanh.f32 %v4662_v60  ;;  %v4721_v61 = vmul.f32 0.5, %v3309_v63  ;;  %16096 = vst [vmem:[#allocation52_spill] sm:$0xff] %v13679_v40  ;;  %v16097_v60 = vld [vmem:[#allocation21_spill] sm:$0xff]  ;;  %v13689_v63 = vpop.f32.mrb[244].mxu0 }
 0x3a9   : > { %v9686_v59 = vpop.eup %9685  ;;  %6882 = vst [vmem:[%s11342_s16 + $0xa98] sm:$0xff] %v6282_v32  ;;  %v6341_v56 = vadd.f32 0.5, %v5741_v38  ;;  %v5742_v12 = vmul.f32 0.5, %v9684_v45  ;;  %9701 = vtanh.f32 %v4719_v33  ;;  %v4720_v24 = vmul.f32 0.5, %v3228_v9  ;;  %v16098_v38 = vld [vmem:[#allocation7_spill] sm:$0xff]  ;;  %16099 = vst [vmem:[#allocation21_spill] sm:$0xff] %v13689_v63 }
 0x3aa   : > { %6939 = vst [vmem:[%s11342_s16 + $0xc60] sm:$0xff] %v6339_v28  ;;  %v6340_v49 = vadd.f32 0.5, %v5740_v6  ;;  %v5799_v21 = vmul.f32 0.5, %v9686_v59  ;;  %v3311_v13 = vadd.f32 %v16097_v60, %v11415_v30  ;;  %9703 = vtanh.f32 %v4721_v61  ;;  %v13692_v59 = vpop.f32.mrb[244].mxu1 }
 0x3ab   : > { %v9688_v41 = vpop.eup %9687  ;;  %6941 = vst [vmem:[%s11342_s16 + $0xc70] sm:$0xff] %v6341_v56  ;;  %v6342_v10 = vadd.f32 0.5, %v5742_v12  ;;  %v3348_v32 = vadd.f32 %v13274_v52, %v11266_v31  ;;  %v3431_v33 = vadd.f32 %v16098_v38, %v11266_v31  ;;  %9705 = vtanh.f32 %v4720_v24  ;;  %16100 = vst [vmem:[#allocation7_spill] sm:$0xff] %v13692_v59  ;;  %v16101_v52 = vld [vmem:[#allocation8_spill] sm:$0xff]  ;;  %v13697_v38 = vpop.f32.mrb[245].mxu0  ;;  %v16104_v24 = vld [vmem:[#allocation34_spill] sm:$0xff] }
 0x3ac   : > { %v9690_v6 = vpop.eup %9689  ;;  %6940 = vst [vmem:[%s11342_s16 + $0xc68] sm:$0xff] %v6340_v49  ;;  %v6399_v45 = vadd.f32 0.5, %v5799_v21  ;;  %v5801_v28 = vmul.f32 0.5, %v9688_v41  ;;  %v4722_v9 = vmul.f32 0.5, %v3311_v13  ;;  %v3350_v60 = vadd.f32 %v16101_v52, %v11266_v31  ;;  %16102 = vst [vmem:[#allocation8_spill] sm:$0xff] %v13697_v38  ;;  %v16103_v49 = vld [vmem:[#allocation9_spill] sm:$0xff] }
 0x3ad   : > { %6942 = vst [vmem:[%s11342_s16 + $0xc78] sm:$0xff] %v6342_v10  ;;  %v5800_v56 = vmul.f32 0.5, %v9690_v6  ;;  %v4183_v12 = vmul.f32 0.5, %v3348_v32  ;;  %v4185_v61 = vmul.f32 0.5, %v3431_v33  ;;  %v3433_v21 = vadd.f32 %v16103_v49, %v11266_v31  ;;  %v13704_v10 = vpop.f32.mrb[245].mxu1  ;;  %v13706_v52 = vpop.f32.mrb[246].mxu0 }
 0x3ae   : > { %v9692_v40 = vpop.eup %9691  ;;  %6999 = vst [vmem:[%s11342_s16 + $0xe40] sm:$0xff] %v6399_v45  ;;  %v6401_v63 = vadd.f32 0.5, %v5801_v28  ;;  %9707 = vtanh.f32 %v4722_v9  ;;  %v3352_v13 = vadd.f32 %v16104_v24, %v11251_v44  ;;  %16105 = vst [vmem:[#allocation9_spill] sm:$0xff] %v13704_v10  ;;  %v4184_v6 = vmul.f32 0.5, %v3350_v60  ;;  %v13709_v49 = vpop.f32.mrb[246].mxu1 }
 0x3af   : > { %v9694_v41 = vpop.eup %9693  ;;  %v6400_v32 = vadd.f32 0.5, %v5800_v56  ;;  %v5802_v33 = vmul.f32 0.5, %v9692_v40  ;;  %9709 = vtanh.f32 %v4183_v12  ;;  %16106 = vst [vmem:[#allocation34_spill] sm:$0xff] %v13706_v52  ;;  %v4186_v28 = vmul.f32 0.5, %v3433_v21  ;;  %v16107_v40 = vld [vmem:[#allocation42_spill] sm:$0xff]  ;;  %v13716_v21 = vpop.f32.mrb[247].mxu0 }
 0x3b0   : > { %v9696_v38 = vpop.eup %9695  ;;  %7001 = vst [vmem:[%s11342_s16 + $0xe50] sm:$0xff] %v6401_v63  ;;  %v5859_v45 = vmul.f32 0.5, %v9694_v41  ;;  %9711 = vtanh.f32 %v4185_v61  ;;  %v4243_v9 = vmul.f32 0.5, %v3352_v13  ;;  %v3435_v56 = vadd.f32 %v16107_v40, %v11251_v44  ;;  %v16108_v63 = vld [vmem:[#allocation53_spill] sm:$0xff] }
 0x3b1   : > { %v9698_v24 = vpop.eup %9697  ;;  %7000 = vst [vmem:[%s11342_s16 + $0xe48] sm:$0xff] %v6400_v32  ;;  %v6402_v59 = vadd.f32 0.5, %v5802_v33  ;;  %v5861_v10 = vmul.f32 0.5, %v9696_v38  ;;  %9713 = vtanh.f32 %v4184_v6  ;;  %v3354_v61 = vadd.f32 %v16108_v63, %v11251_v44  ;;  %v13719_v33 = vpop.f32.mrb[247].mxu1 }
 0x3b2   : > { %v9700_v12 = vpop.eup %9699  ;;  %v6459_v60 = vadd.f32 0.5, %v5859_v45  ;;  %v5860_v52 = vmul.f32 0.5, %v9698_v24  ;;  %9715 = vtanh.f32 %v4186_v28  ;;  %v4245_v38 = vmul.f32 0.5, %v3435_v56 }
 0x3b3   : > { %v9702_v13 = vpop.eup %9701  ;;  %7002 = vst [vmem:[%s11342_s16 + $0xe58] sm:$0xff] %v6402_v59  ;;  %v6461_v41 = vadd.f32 0.5, %v5861_v10  ;;  %v5862_v32 = vmul.f32 0.5, %v9700_v12  ;;  %9717 = vtanh.f32 %v4243_v9  ;;  %v4244_v24 = vmul.f32 0.5, %v3354_v61  ;;  %v13729_v9 = vpop.f32.mrb[248].mxu0 }
 0x3b4   : > { %7059 = vst [vmem:[%s11342_s16 + $0x1020] sm:$0xff] %v6459_v60  ;;  %v6460_v6 = vadd.f32 0.5, %v5860_v52  ;;  %v5919_v45 = vmul.f32 0.5, %v9702_v13  ;;  %v3437_v28 = vadd.f32 %v13297_v7, %v11251_v44  ;;  %v9704_v40 = vpop.eup %9703  ;;  %9719 = vtanh.f32 %v4245_v38  ;;  %v13732_v7 = vpop.f32.mrb[248].mxu1 }
 0x3b5   : > { %7061 = vst [vmem:[%s11342_s16 + $0x1030] sm:$0xff] %v6461_v41  ;;  %v6462_v63 = vadd.f32 0.5, %v5862_v32  ;;  %v3358_v59 = vadd.f32 %v13308_v48, %v15817_v42  ;;  %v3441_v10 = vadd.f32 %v13315_v43, %v15817_v42  ;;  %v9706_v52 = vpop.eup %9705  ;;  %v5921_v12 = vmul.f32 0.5, %v9704_v40  ;;  %v13737_v43 = vpop.f32.mrb[249].mxu0 }
 0x3b6   : > { %7060 = vst [vmem:[%s11342_s16 + $0x1028] sm:$0xff] %v6460_v6  ;;  %v6519_v56 = vadd.f32 0.5, %v5919_v45  ;;  %9721 = vtanh.f32 %v4244_v24  ;;  %v4246_v60 = vmul.f32 0.5, %v3437_v28  ;;  %v5920_v61 = vmul.f32 0.5, %v9706_v52  ;;  %v13744_v24 = vpop.f32.mrb[249].mxu1 }
 0x3b7   : > { %7062 = vst [vmem:[%s11342_s16 + $0x1038] sm:$0xff] %v6462_v63  ;;  %v4303_v13 = vmul.f32 0.5, %v3358_v59  ;;  %v4305_v41 = vmul.f32 0.5, %v3441_v10  ;;  %v3360_v48 = vadd.f32 %v13317_v18, %v15817_v42  ;;  %v6521_v38 = vadd.f32 0.5, %v5921_v12  ;;  %16109 = vst [vmem:[#allocation42_spill] sm:$0xff] %v13744_v24  ;;  %v13746_v59 = vpop.f32.mrb[250].mxu0 }
 0x3b8   : > { %v9708_v32 = vpop.eup %9707  ;;  %7119 = vst [vmem:[%s11342_s16 + $0x1200] sm:$0x3f] %v6519_v56  ;;  %9723 = vtanh.f32 %v4246_v60  ;;  %v3443_v6 = vadd.f32 %v13320_v36, %v15817_v42  ;;  %v3362_v45 = vadd.f32 %v13322_v39, %v11294_v54  ;;  %v6520_v40 = vadd.f32 0.5, %v5920_v61  ;;  %16110 = vst [vmem:[#allocation53_spill] sm:$0xff] %v13746_v59  ;;  %v13749_v12 = vpop.f32.mrb[250].mxu1  ;;  %v16111_v61 = vld [vmem:[#allocation35_spill] sm:$0xff] }
 0x3b9   : > { %v9710_v28 = vpop.eup %9709  ;;  %v5922_v63 = vmul.f32 0.5, %v9708_v32  ;;  %9725 = vtanh.f32 %v4303_v13  ;;  %v4304_v18 = vmul.f32 0.5, %v3360_v48  ;;  %7121 = vst [vmem:[%s11342_s16 + $0x1210] sm:$0x3f] %v6521_v38  ;;  %v3445_v13 = vadd.f32 %v16111_v61, %v11294_v54 }
 0x3ba   : > { %v9712_v10 = vpop.eup %9711  ;;  %v5383_v52 = vmul.f32 0.5, %v9710_v28  ;;  %9727 = vtanh.f32 %v4305_v41  ;;  %v4306_v56 = vmul.f32 0.5, %v3443_v6  ;;  %v4363_v36 = vmul.f32 0.5, %v3362_v45  ;;  %7120 = vst [vmem:[%s11342_s16 + $0x1208] sm:$0x3f] %v6520_v40  ;;  %v16112_v41 = vld [vmem:[#allocation54_spill] sm:$0xff] }
 0x3bb   : > { %v9714_v39 = vpop.eup %9713  ;;  %v6522_v60 = vadd.f32 0.5, %v5922_v63  ;;  %v5385_v24 = vmul.f32 0.5, %v9712_v10  ;;  %9729 = vtanh.f32 %v4304_v18  ;;  %v3364_v38 = vadd.f32 %v16112_v41, %v11294_v54  ;;  %v13756_v6 = vpop.f32.mrb[251].mxu0 }
 0x3bc   : > { %v9716_v48 = vpop.eup %9715  ;;  %v5983_v32 = vadd.f32 0.5, %v5383_v52  ;;  %v5384_v59 = vmul.f32 0.5, %v9714_v39  ;;  %9731 = vtanh.f32 %v4306_v56  ;;  %16113 = vst [vmem:[#allocation35_spill] sm:$0xff] %v13756_v6  ;;  %v4365_v63 = vmul.f32 0.5, %v3445_v13  ;;  %v13759_v18 = vpop.f32.mrb[251].mxu1  ;;  %v16114_v56 = vld [vmem:[#allocation55_spill] sm:$0xff] }
 0x3bd   : > { %v9718_v45 = vpop.eup %9717  ;;  %7122 = vst [vmem:[%s11342_s16 + $0x1218] sm:$0x3f] %v6522_v60  ;;  %v5985_v28 = vadd.f32 0.5, %v5385_v24  ;;  %v5386_v40 = vmul.f32 0.5, %v9716_v48  ;;  %9733 = vtanh.f32 %v4363_v36  ;;  %v4364_v39 = vmul.f32 0.5, %v3364_v38  ;;  %v16115_v24 = vld [vmem:[#allocation43_spill] sm:$0xff] }
 0x3be   : > { %6583 = vst [vmem:[%s11342_s16 + $0x140] sm:$0xff] %v5983_v32  ;;  %v5984_v10 = vadd.f32 0.5, %v5384_v59  ;;  %v5443_v52 = vmul.f32 0.5, %v9718_v45  ;;  %v3447_v61 = vadd.f32 %v16114_v56, %v11294_v54  ;;  %v9720_v41 = vpop.eup %9719  ;;  %9735 = vtanh.f32 %v4365_v63  ;;  %v13769_v13 = vpop.f32.mrb[252].mxu0 }
 0x3bf   : > { %6585 = vst [vmem:[%s11342_s16 + $0x150] sm:$0xff] %v5985_v28  ;;  %v5986_v6 = vadd.f32 0.5, %v5386_v40  ;;  %v3368_v60 = vadd.f32 %v16115_v24, %v11330_v22  ;;  %v3451_v36 = vadd.f32 %v13347_v0, %v11330_v22  ;;  %16116 = vst [vmem:[#allocation54_spill] sm:$0xff] %v13769_v13  ;;  %v5445_v32 = vmul.f32 0.5, %v9720_v41  ;;  %v13772_v45 = vpop.f32.mrb[252].mxu1  ;;  %v13777_v0 = vpop.f32.mrb[253].mxu0 }
 0x3c0   : > { %v9722_v59 = vpop.eup %9721  ;;  %6584 = vst [vmem:[%s11342_s16 + $0x148] sm:$0xff] %v5984_v10  ;;  %v6043_v48 = vadd.f32 0.5, %v5443_v52  ;;  %9737 = vtanh.f32 %v4364_v39  ;;  %v4366_v38 = vmul.f32 0.5, %v3447_v61  ;;  %16117 = vst [vmem:[#allocation55_spill] sm:$0xff] %v13772_v45  ;;  %v3370_v56 = vadd.f32 %v13349_v11, %v11330_v22  ;;  %v16119_v10 = vld [vmem:[#allocation44_spill] sm:$0xff]  ;;  %v16120_v39 = vld [vmem:[#allocation10_spill] sm:$0xff] }
 0x3c1   : > { %6586 = vst [vmem:[%s11342_s16 + $0x158] sm:$0xff] %v5986_v6  ;;  %v5444_v28 = vmul.f32 0.5, %v9722_v59  ;;  %v4423_v40 = vmul.f32 0.5, %v3368_v60  ;;  %v4425_v63 = vmul.f32 0.5, %v3451_v36  ;;  %16118 = vst [vmem:[#allocation43_spill] sm:$0xff] %v13777_v0  ;;  %v6045_v13 = vadd.f32 0.5, %v5445_v32 }
 0x3c2   : > { %v9724_v24 = vpop.eup %9723  ;;  %6643 = vst [vmem:[%s11342_s16 + $0x320] sm:$0xff] %v6043_v48  ;;  %9739 = vtanh.f32 %v4366_v38  ;;  %v3453_v52 = vadd.f32 %v16119_v10, %v11330_v22  ;;  %v3372_v61 = vadd.f32 %v16120_v39, %v11349_v58  ;;  %v13784_v6 = vpop.f32.mrb[253].mxu1  ;;  %v4424_v11 = vmul.f32 0.5, %v3370_v56 }
 0x3c3   : > { %16121 = vst [vmem:[#allocation44_spill] sm:$0xff] %v13784_v6  ;;  %v9726_v41 = vpop.eup %9725  ;;  %v6044_v60 = vadd.f32 0.5, %v5444_v28  ;;  %v5446_v36 = vmul.f32 0.5, %v9724_v24  ;;  %9741 = vtanh.f32 %v4423_v40  ;;  %v13786_v59 = vpop.f32.mrb[254].mxu0  ;;  %6645 = vst [vmem:[%s11342_s16 + $0x330] sm:$0xff] %v6045_v13  ;;  %v16123_v28 = vld [vmem:[#allocation36_spill] sm:$0xff]  ;;  %v3374_v13 = vadd.f32 %v13365_v14, %v11349_v58 }
 0x3c4   : > { %16122 = vst [vmem:[#allocation10_spill] sm:$0xff] %v13786_v59  ;;  %v9728_v0 = vpop.eup %9727  ;;  %v5503_v48 = vmul.f32 0.5, %v9726_v41  ;;  %9743 = vtanh.f32 %v4425_v63  ;;  %v4426_v32 = vmul.f32 0.5, %v3453_v52  ;;  %v4483_v38 = vmul.f32 0.5, %v3372_v61  ;;  %v13789_v10 = vpop.f32.mrb[254].mxu1 }
 0x3c5   : > { %v9730_v39 = vpop.eup %9729  ;;  %6644 = vst [vmem:[%s11342_s16 + $0x328] sm:$0xff] %v6044_v60  ;;  %v6046_v45 = vadd.f32 0.5, %v5446_v36  ;;  %v5505_v6 = vmul.f32 0.5, %v9728_v0  ;;  %9745 = vtanh.f32 %v4424_v11  ;;  %v3455_v40 = vadd.f32 %v16123_v28, %v11349_v58  ;;  %v13796_v63 = vpop.f32.mrb[255].mxu0 }
 0x3c6   : > { %v9732_v56 = vpop.eup %9731  ;;  %v6103_v24 = vadd.f32 0.5, %v5503_v48  ;;  %v5504_v59 = vmul.f32 0.5, %v9730_v39  ;;  %9747 = vtanh.f32 %v4426_v32  ;;  %16124 = vst [vmem:[#allocation36_spill] sm:$0xff] %v13796_v63  ;;  %v13799_v60 = vpop.f32.mrb[255].mxu1  ;;  %v4484_v48 = vmul.f32 0.5, %v3374_v13  ;;  %v16126_v32 = vld [vmem:[#allocation56_spill] sm:$0xff] }
 0x3c7   : > { %v9734_v52 = vpop.eup %9733  ;;  %6646 = vst [vmem:[%s11342_s16 + $0x338] sm:$0xff] %v6046_v45  ;;  %v6105_v61 = vadd.f32 0.5, %v5505_v6  ;;  %v5506_v41 = vmul.f32 0.5, %v9732_v56  ;;  %9749 = vtanh.f32 %v4483_v38  ;;  %v4485_v0 = vmul.f32 0.5, %v3455_v40  ;;  %16125 = vst [vmem:[#allocation61_spill] sm:$0xff] %v13799_v60  ;;  %v16127_v45 = vld [vmem:[#allocation37_spill] sm:$0xff] }
 0x3c8   : > { %6703 = vst [vmem:[%s11342_s16 + $0x500] sm:$0xff] %v6103_v24  ;;  %v6104_v36 = vadd.f32 0.5, %v5504_v59  ;;  %v5563_v11 = vmul.f32 0.5, %v9734_v52  ;;  %v3457_v39 = vadd.f32 %v16126_v32, %v11349_v58  ;;  %v9736_v14 = vpop.eup %9735  ;;  %v3378_v6 = vadd.f32 %v16127_v45, %v15832_v35  ;;  %v16128_v38 = vld [vmem:[#allocation45_spill] sm:$0xff]  ;;  %v13809_v56 = vpop.f32.mrb[0].mxu0 }
 0x3c9   : > { %6705 = vst [vmem:[%s11342_s16 + $0x510] sm:$0xff] %v6105_v61  ;;  %v6106_v28 = vadd.f32 0.5, %v5506_v41  ;;  %9751 = vtanh.f32 %v4485_v0  ;;  %v3461_v40 = vadd.f32 %v16128_v38, %v15832_v35  ;;  %16129 = vst [vmem:[#allocation56_spill] sm:$0xff] %v13809_v56  ;;  %v5565_v13 = vmul.f32 0.5, %v9736_v14  ;;  %v13812_v32 = vpop.f32.mrb[0].mxu1  ;;  %v16131_v45 = vld [vmem:[#allocation57_spill] sm:$0xff] }
 0x3ca   : > { %v9738_v59 = vpop.eup %9737  ;;  %6704 = vst [vmem:[%s11342_s16 + $0x508] sm:$0xff] %v6104_v36  ;;  %v6163_v24 = vadd.f32 0.5, %v5563_v11  ;;  %9753 = vtanh.f32 %v4484_v48  ;;  %v4486_v52 = vmul.f32 0.5, %v3457_v39  ;;  %16130 = vst [vmem:[#allocation37_spill] sm:$0xff] %v13812_v32  ;;  %v4543_v41 = vmul.f32 0.5, %v3378_v6  ;;  %v13817_v38 = vpop.f32.mrb[1].mxu0 }
 0x3cb   : > { %6706 = vst [vmem:[%s11342_s16 + $0x518] sm:$0xff] %v6106_v28  ;;  %v5564_v61 = vmul.f32 0.5, %v9738_v59  ;;  %v4545_v0 = vmul.f32 0.5, %v3461_v40  ;;  %v3380_v60 = vadd.f32 %v16131_v45, %v15832_v35  ;;  %16132 = vst [vmem:[#allocation45_spill] sm:$0xff] %v13817_v38  ;;  %v6165_v56 = vadd.f32 0.5, %v5565_v13  ;;  %v16133_v36 = vld [vmem:[#allocation46_spill] sm:$0xff] }
 0x3cc   : > { %v9740_v63 = vpop.eup %9739  ;;  %6763 = vst [vmem:[%s11342_s16 + $0x6e0] sm:$0xff] %v6163_v24  ;;  %9755 = vtanh.f32 %v4486_v52  ;;  %v3463_v11 = vadd.f32 %v16133_v36, %v15832_v35  ;;  %v16134_v48 = vld [vmem:[#allocation58_spill] sm:$0xff]  ;;  %v13824_v14 = vpop.f32.mrb[1].mxu1 }
 0x3cd   : > { %v3382_v39 = vadd.f32 %v16134_v48, %v15803_v26  ;;  %16135 = vst [vmem:[#allocation57_spill] sm:$0xff] %v13824_v14  ;;  %v9742_v28 = vpop.eup %9741  ;;  %v6164_v6 = vadd.f32 0.5, %v5564_v61  ;;  %v5566_v40 = vmul.f32 0.5, %v9740_v63  ;;  %9757 = vtanh.f32 %v4543_v41  ;;  %v13826_v45 = vpop.f32.mrb[2].mxu0  ;;  %6765 = vst [vmem:[%s11342_s16 + $0x6f0] sm:$0xff] %v6165_v56  ;;  %v16137_v63 = vld [vmem:[#allocation59_spill] sm:$0xff] }
 0x3ce   : > { %v4544_v59 = vmul.f32 0.5, %v3380_v60  ;;  %16136 = vst [vmem:[#allocation46_spill] sm:$0xff] %v13826_v45  ;;  %v9744_v38 = vpop.eup %9743  ;;  %v5623_v24 = vmul.f32 0.5, %v9742_v28  ;;  %9759 = vtanh.f32 %v4545_v0  ;;  %v4546_v13 = vmul.f32 0.5, %v3463_v11  ;;  %v13829_v36 = vpop.f32.mrb[2].mxu1  ;;  %v16138_v56 = vld [vmem:[#allocation60_spill] sm:$0xff] }
 0x3cf   : > { %v4603_v52 = vmul.f32 0.5, %v3382_v39  ;;  %v9746_v48 = vpop.eup %9745  ;;  %6764 = vst [vmem:[%s11342_s16 + $0x6e8] sm:$0xff] %v6164_v6  ;;  %v6166_v32 = vadd.f32 0.5, %v5566_v40  ;;  %v5625_v14 = vmul.f32 0.5, %v9744_v38  ;;  %v3465_v60 = vadd.f32 %v16137_v63, %v15803_v26  ;;  %v13836_v11 = vpop.f32.mrb[3].mxu0 }
 0x3d0   : > { %9761 = vtanh.f32 %v4544_v59  ;;  %v9748_v61 = vpop.eup %9747  ;;  %v6223_v41 = vadd.f32 0.5, %v5623_v24  ;;  %v5624_v45 = vmul.f32 0.5, %v9746_v48  ;;  %v3384_v0 = vadd.f32 %v16138_v56, %v15803_v26  ;;  %16139 = vst [vmem:[#allocation58_spill] sm:$0xff] %v13836_v11  ;;  %v13839_v40 = vpop.f32.mrb[3].mxu1 }
 0x3d1   : > { %9763 = vtanh.f32 %v4546_v13  ;;  %v9750_v39 = vpop.eup %9749  ;;  %6766 = vst [vmem:[%s11342_s16 + $0x6f8] sm:$0xff] %v6166_v32  ;;  %v6225_v28 = vadd.f32 0.5, %v5625_v14  ;;  %v5626_v6 = vmul.f32 0.5, %v9748_v61  ;;  %v4605_v38 = vmul.f32 0.5, %v3465_v60  ;;  %16140 = vst [vmem:[#allocation59_spill] sm:$0xff] %v13839_v40  ;;  %v16141_v13 = vld [vmem:[#allocation47_spill] sm:$0xff] }
 0x3d2   : > { %9765 = vtanh.f32 %v4603_v52  ;;  %6823 = vst [vmem:[%s11342_s16 + $0x8c0] sm:$0xff] %v6223_v41  ;;  %v6224_v59 = vadd.f32 0.5, %v5624_v45  ;;  %v5683_v24 = vmul.f32 0.5, %v9750_v39  ;;  %v4604_v48 = vmul.f32 0.5, %v3384_v0  ;;  %v16142_v32 = vld [vmem:[#allocation16_spill] sm:$0xff]  ;;  %v13849_v60 = vpop.f32.mrb[4].mxu0 }
 0x3d3   : > { %v3467_v63 = vadd.f32 %v16141_v13, %v15803_v26  ;;  %v9752_v56 = vpop.eup %9751  ;;  %6825 = vst [vmem:[%s11342_s16 + $0x8d0] sm:$0xff] %v6225_v28  ;;  %v6226_v11 = vadd.f32 0.5, %v5626_v6  ;;  %9767 = vtanh.f32 %v4605_v38  ;;  %v3388_v14 = vadd.f32 %v16142_v32, %v15808_v8  ;;  %16143 = vst [vmem:[#allocation60_spill] sm:$0xff] %v13849_v60  ;;  %v13852_v39 = vpop.f32.mrb[4].mxu1  ;;  %v16145_v13 = vld [vmem:[#allocation15_spill] sm:$0xff] }
 0x3d4   : > { %v3471_v52 = vadd.f32 %v13420_v3, %v15808_v8  ;;  %v9754_v45 = vpop.eup %9753  ;;  %6824 = vst [vmem:[%s11342_s16 + $0x8c8] sm:$0xff] %v6224_v59  ;;  %v6283_v61 = vadd.f32 0.5, %v5683_v24  ;;  %v5685_v41 = vmul.f32 0.5, %v9752_v56  ;;  %9769 = vtanh.f32 %v4604_v48  ;;  %16144 = vst [vmem:[#allocation47_spill] sm:$0xff] %v13852_v39  ;;  %v13857_v3 = vpop.f32.mrb[5].mxu0  ;;  %v16147_v59 = vld [vmem:[#allocation17_spill] sm:$0xff] }
 0x3d5   : > { %v4606_v0 = vmul.f32 0.5, %v3467_v63  ;;  %6826 = vst [vmem:[%s11342_s16 + $0x8d8] sm:$0xff] %v6226_v11  ;;  %v5684_v28 = vmul.f32 0.5, %v9754_v45  ;;  %v4663_v6 = vmul.f32 0.5, %v3388_v14  ;;  %v3390_v32 = vadd.f32 %v16145_v13, %v15808_v8  ;;  %16146 = vst [vmem:[#allocation16_spill] sm:$0xff] %v13857_v3  ;;  %v16148_v48 = vld [vmem:[#allocation18_spill] sm:$0xff] }
 0x3d6   : > { %v4665_v38 = vmul.f32 0.5, %v3471_v52  ;;  %v9756_v40 = vpop.eup %9755  ;;  %6883 = vst [vmem:[%s11342_s16 + $0xaa0] sm:$0xff] %v6283_v61  ;;  %v6285_v60 = vadd.f32 0.5, %v5685_v41  ;;  %v3473_v24 = vadd.f32 %v16147_v59, %v15808_v8  ;;  %v3392_v63 = vadd.f32 %v16148_v48, %v11415_v30  ;;  %v13864_v11 = vpop.f32.mrb[5].mxu1 }
 0x3d7   : > { %9771 = vtanh.f32 %v4606_v0  ;;  %16149 = vst [vmem:[#allocation15_spill] sm:$0xff] %v13864_v11  ;;  %v9758_v56 = vpop.eup %9757  ;;  %v6284_v14 = vadd.f32 0.5, %v5684_v28  ;;  %v5686_v52 = vmul.f32 0.5, %v9756_v40  ;;  %v4664_v45 = vmul.f32 0.5, %v3390_v32  ;;  %v13866_v13 = vpop.f32.mrb[6].mxu0  ;;  %v16151_v40 = vld [vmem:[#allocation30_spill] sm:$0xff] }
 0x3d8   : > { %9773 = vtanh.f32 %v4663_v6  ;;  %16150 = vst [vmem:[#allocation17_spill] sm:$0xff] %v13866_v13  ;;  %v9760_v3 = vpop.eup %9759  ;;  %6885 = vst [vmem:[%s11342_s16 + $0xab0] sm:$0xff] %v6285_v60  ;;  %v5743_v61 = vmul.f32 0.5, %v9758_v56  ;;  %v4666_v41 = vmul.f32 0.5, %v3473_v24  ;;  %v4723_v0 = vmul.f32 0.5, %v3392_v63  ;;  %v13869_v59 = vpop.f32.mrb[6].mxu1 }
 0x3d9   : > { %9775 = vtanh.f32 %v4665_v38  ;;  %6884 = vst [vmem:[%s11342_s16 + $0xaa8] sm:$0xff] %v6284_v14  ;;  %v6286_v39 = vadd.f32 0.5, %v5686_v52  ;;  %v5745_v11 = vmul.f32 0.5, %v9760_v3  ;;  %v3475_v28 = vadd.f32 %v16151_v40, %v11415_v30  ;;  %v16152_v60 = vld [vmem:[#allocation48_spill] sm:$0xff]  ;;  %v13876_v24 = vpop.f32.mrb[7].mxu0  ;;  %v13879_v52 = vpop.f32.mrb[7].mxu1 }
 0x3da   : > { %v9762_v48 = vpop.eup %9761  ;;  %9777 = vtanh.f32 %v4664_v45  ;;  %v6343_v32 = vadd.f32 0.5, %v5743_v61  ;;  %v3394_v38 = vadd.f32 %v16152_v60, %v11415_v30  ;;  %16153 = vst [vmem:[#allocation18_spill] sm:$0xff] %v13879_v52 }
 0x3db   : > { %v9764_v6 = vpop.eup %9763  ;;  %v5744_v13 = vmul.f32 0.5, %v9762_v48  ;;  %9779 = vtanh.f32 %v4666_v41  ;;  %6886 = vst [vmem:[%s11342_s16 + $0xab8] sm:$0xff] %v6286_v39  ;;  %v6345_v56 = vadd.f32 0.5, %v5745_v11  ;;  %v4725_v3 = vmul.f32 0.5, %v3475_v28  ;;  %v16154_v11 = vld [vmem:[#allocation49_spill] sm:$0xff]  ;;  %v13889_v28 = vpop.f32.mrb[8].mxu0 }
 0x3dc   : > { %v9766_v63 = vpop.eup %9765  ;;  %v5746_v14 = vmul.f32 0.5, %v9764_v6  ;;  %9781 = vtanh.f32 %v4723_v0  ;;  %6943 = vst [vmem:[%s11342_s16 + $0xc80] sm:$0xff] %v6343_v32  ;;  %v4724_v48 = vmul.f32 0.5, %v3394_v38  ;;  %v3477_v41 = vadd.f32 %v13439_v34, %v11415_v30  ;;  %16155 = vst [vmem:[#allocation30_spill] sm:$0xff] %v13889_v28  ;;  %v13892_v34 = vpop.f32.mrb[8].mxu1 }
 0x3dd   : > { %v6344_v45 = vadd.f32 0.5, %v5744_v13  ;;  %v5803_v61 = vmul.f32 0.5, %v9766_v63  ;;  %v9768_v40 = vpop.eup %9767  ;;  %6945 = vst [vmem:[%s11342_s16 + $0xc90] sm:$0xff] %v6345_v56  ;;  %9783 = vtanh.f32 %v4725_v3  ;;  %v3514_v39 = vadd.f32 %v13450_v29, %v11266_v31  ;;  %v16156_v29 = vld [vmem:[#allocation19_spill] sm:$0xff] }
 0x3de   : > { %v6346_v60 = vadd.f32 0.5, %v5746_v14  ;;  %v3597_v0 = vadd.f32 %v16154_v11, %v11266_v31  ;;  %v9770_v13 = vpop.eup %9769  ;;  %v5805_v32 = vmul.f32 0.5, %v9768_v40  ;;  %9785 = vtanh.f32 %v4724_v48  ;;  %v13897_v11 = vpop.f32.mrb[9].mxu0 }
 0x3df   : > { %6944 = vst [vmem:[%s11342_s16 + $0xc88] sm:$0xff] %v6344_v45  ;;  %v6403_v6 = vadd.f32 0.5, %v5803_v61  ;;  %v4726_v38 = vmul.f32 0.5, %v3477_v41  ;;  %v5804_v63 = vmul.f32 0.5, %v9770_v13  ;;  %v4187_v56 = vmul.f32 0.5, %v3514_v39  ;;  %16157 = vst [vmem:[#allocation48_spill] sm:$0xff] %v13897_v11 }
 0x3e0   : > { %6946 = vst [vmem:[%s11342_s16 + $0xc98] sm:$0xff] %v6346_v60  ;;  %v4189_v14 = vmul.f32 0.5, %v3597_v0  ;;  %v3516_v3 = vadd.f32 %v16156_v29, %v11266_v31  ;;  %v6405_v28 = vadd.f32 0.5, %v5805_v32  ;;  %v16158_v45 = vld [vmem:[#allocation6_spill] sm:$0xff]  ;;  %v3518_v48 = vadd.f32 %v13466_v1, %v11251_v44  ;;  %v13904_v41 = vpop.f32.mrb[9].mxu1  ;;  %v13906_v13 = vpop.f32.mrb[10].mxu0 }
 0x3e1   : > { %v9772_v52 = vpop.eup %9771  ;;  %7003 = vst [vmem:[%s11342_s16 + $0xe60] sm:$0xff] %v6403_v6  ;;  %9787 = vtanh.f32 %v4726_v38  ;;  %v3599_v61 = vadd.f32 %v16158_v45, %v11266_v31  ;;  %16159 = vst [vmem:[#allocation49_spill] sm:$0xff] %v13904_v41  ;;  %v6404_v60 = vadd.f32 0.5, %v5804_v63  ;;  %v13909_v45 = vpop.f32.mrb[10].mxu1 }
 0x3e2   : > { %v9774_v40 = vpop.eup %9773  ;;  %v5806_v39 = vmul.f32 0.5, %v9772_v52  ;;  %9789 = vtanh.f32 %v4187_v56  ;;  %v4188_v0 = vmul.f32 0.5, %v3516_v3  ;;  %7005 = vst [vmem:[%s11342_s16 + $0xe70] sm:$0xff] %v6405_v28  ;;  %v4247_v38 = vmul.f32 0.5, %v3518_v48  ;;  %v16160_v28 = vld [vmem:[#allocation31_spill] sm:$0xff] }
 0x3e3   : > { %v9776_v29 = vpop.eup %9775  ;;  %v5863_v6 = vmul.f32 0.5, %v9774_v40  ;;  %9791 = vtanh.f32 %v4189_v14  ;;  %v4190_v32 = vmul.f32 0.5, %v3599_v61  ;;  %7004 = vst [vmem:[%s11342_s16 + $0xe68] sm:$0xff] %v6404_v60  ;;  %v3601_v52 = vadd.f32 %v13469_v50, %v11251_v44  ;;  %v13916_v61 = vpop.f32.mrb[11].mxu0 }
 0x3e4   : > { %v9778_v1 = vpop.eup %9777  ;;  %v6406_v11 = vadd.f32 0.5, %v5806_v39  ;;  %v5865_v41 = vmul.f32 0.5, %v9776_v29  ;;  %9793 = vtanh.f32 %v4188_v0  ;;  %v3520_v14 = vadd.f32 %v16160_v28, %v11251_v44  ;;  %16161 = vst [vmem:[#allocation19_spill] sm:$0xff] %v13916_v61  ;;  %v13919_v0 = vpop.f32.mrb[11].mxu1 }
 0x3e5   : > { %v9780_v63 = vpop.eup %9779  ;;  %v6463_v56 = vadd.f32 0.5, %v5863_v6  ;;  %v5864_v3 = vmul.f32 0.5, %v9778_v1  ;;  %9795 = vtanh.f32 %v4190_v32  ;;  %v4249_v39 = vmul.f32 0.5, %v3601_v52  ;;  %16162 = vst [vmem:[#allocation6_spill] sm:$0xff] %v13919_v0 }
 0x3e6   : > { %v9782_v48 = vpop.eup %9781  ;;  %7006 = vst [vmem:[%s11342_s16 + $0xe78] sm:$0xff] %v6406_v11  ;;  %v6465_v40 = vadd.f32 0.5, %v5865_v41  ;;  %v5866_v60 = vmul.f32 0.5, %v9780_v63  ;;  %9797 = vtanh.f32 %v4247_v38  ;;  %v4248_v6 = vmul.f32 0.5, %v3520_v14  ;;  %v16163_v11 = vld [vmem:[#allocation26_spill] sm:$0xff]  ;;  %v16164_v38 = vld [vmem:[#allocation32_spill] sm:$0xff] }
 0x3e7   : > { %7063 = vst [vmem:[%s11342_s16 + $0x1040] sm:$0xff] %v6463_v56  ;;  %v6464_v50 = vadd.f32 0.5, %v5864_v3  ;;  %v5923_v29 = vmul.f32 0.5, %v9782_v48  ;;  %v3603_v32 = vadd.f32 %v13479_v15, %v11251_v44  ;;  %v9784_v1 = vpop.eup %9783  ;;  %9799 = vtanh.f32 %v4249_v39  ;;  %v13929_v63 = vpop.f32.mrb[12].mxu0 }
 0x3e8   : > { %7065 = vst [vmem:[%s11342_s16 + $0x1050] sm:$0xff] %v6465_v40  ;;  %v6466_v28 = vadd.f32 0.5, %v5866_v60  ;;  %v3524_v41 = vadd.f32 %v16163_v11, %v15817_v42  ;;  %v3607_v52 = vadd.f32 %v16164_v38, %v15817_v42  ;;  %16165 = vst [vmem:[#allocation31_spill] sm:$0xff] %v13929_v63  ;;  %v9786_v56 = vpop.eup %9785  ;;  %v5925_v14 = vmul.f32 0.5, %v9784_v1  ;;  %v13932_v15 = vpop.f32.mrb[12].mxu1  ;;  %v16166_v11 = vld [vmem:[#allocation27_spill] sm:$0xff] }
 0x3e9   : > { %7064 = vst [vmem:[%s11342_s16 + $0x1048] sm:$0xff] %v6464_v50  ;;  %v6523_v3 = vadd.f32 0.5, %v5923_v29  ;;  %9801 = vtanh.f32 %v4248_v6  ;;  %v4250_v48 = vmul.f32 0.5, %v3603_v32  ;;  %v5924_v40 = vmul.f32 0.5, %v9786_v56  ;;  %v13937_v38 = vpop.f32.mrb[13].mxu0  ;;  %v16168_v50 = vld [vmem:[#allocation33_spill] sm:$0xff] }
 0x3ea   : > { %7066 = vst [vmem:[%s11342_s16 + $0x1058] sm:$0xff] %v6466_v28  ;;  %v4307_v60 = vmul.f32 0.5, %v3524_v41  ;;  %v4309_v39 = vmul.f32 0.5, %v3607_v52  ;;  %v3526_v0 = vadd.f32 %v16166_v11, %v15817_v42  ;;  %16167 = vst [vmem:[#allocation26_spill] sm:$0xff] %v13937_v38  ;;  %v6525_v63 = vadd.f32 0.5, %v5925_v14  ;;  %v13944_v32 = vpop.f32.mrb[13].mxu1 }
 0x3eb   : > { %v9788_v61 = vpop.eup %9787  ;;  %7123 = vst [vmem:[%s11342_s16 + $0x1220] sm:$0x3f] %v6523_v3  ;;  %9803 = vtanh.f32 %v4250_v48  ;;  %v3609_v29 = vadd.f32 %v16168_v50, %v15817_v42  ;;  %v3528_v6 = vadd.f32 %v13506_v23, %v11294_v54  ;;  %16169 = vst [vmem:[#allocation32_spill] sm:$0xff] %v13944_v32  ;;  %v6524_v28 = vadd.f32 0.5, %v5924_v40  ;;  %v13946_v56 = vpop.f32.mrb[14].mxu0 }
 0x3ec   : > { %v9790_v1 = vpop.eup %9789  ;;  %v5926_v41 = vmul.f32 0.5, %v9788_v61  ;;  %9805 = vtanh.f32 %v4307_v60  ;;  %v4308_v52 = vmul.f32 0.5, %v3526_v0  ;;  %7125 = vst [vmem:[%s11342_s16 + $0x1230] sm:$0x3f] %v6525_v63  ;;  %v13949_v50 = vpop.f32.mrb[14].mxu1  ;;  %v3611_v61 = vadd.f32 %v13509_v47, %v11294_v54 }
 0x3ed   : > { %v9792_v11 = vpop.eup %9791  ;;  %v5387_v3 = vmul.f32 0.5, %v9790_v1  ;;  %9807 = vtanh.f32 %v4309_v39  ;;  %v4310_v14 = vmul.f32 0.5, %v3609_v29  ;;  %v4367_v48 = vmul.f32 0.5, %v3528_v6  ;;  %7124 = vst [vmem:[%s11342_s16 + $0x1228] sm:$0x3f] %v6524_v28  ;;  %v13956_v39 = vpop.f32.mrb[15].mxu0 }
 0x3ee   : > { %v9794_v23 = vpop.eup %9793  ;;  %v6526_v38 = vadd.f32 0.5, %v5926_v41  ;;  %v5389_v32 = vmul.f32 0.5, %v9792_v11  ;;  %9809 = vtanh.f32 %v4308_v52  ;;  %v3530_v63 = vadd.f32 %v13516_v46, %v11294_v54  ;;  %v13959_v41 = vpop.f32.mrb[15].mxu1 }
 0x3ef   : > { %v9796_v0 = vpop.eup %9795  ;;  %v5987_v40 = vadd.f32 0.5, %v5387_v3  ;;  %v5388_v60 = vmul.f32 0.5, %v9794_v23  ;;  %9811 = vtanh.f32 %v4310_v14  ;;  %v4369_v28 = vmul.f32 0.5, %v3611_v61  ;;  %v13969_v23 = vpop.f32.mrb[16].mxu0 }
 0x3f0   : > { %v9798_v29 = vpop.eup %9797  ;;  %7126 = vst [vmem:[%s11342_s16 + $0x1238] sm:$0x3f] %v6526_v38  ;;  %v5989_v6 = vadd.f32 0.5, %v5389_v32  ;;  %v5390_v1 = vmul.f32 0.5, %v9796_v0  ;;  %9813 = vtanh.f32 %v4367_v48  ;;  %v4368_v11 = vmul.f32 0.5, %v3530_v63  ;;  %v16170_v38 = vld [vmem:[#allocation28_spill] sm:$0xff] }
 0x3f1   : > { %6587 = vst [vmem:[%s11342_s16 + $0x160] sm:$0xff] %v5987_v40  ;;  %v5988_v47 = vadd.f32 0.5, %v5388_v60  ;;  %v5447_v52 = vmul.f32 0.5, %v9798_v29  ;;  %v3613_v3 = vadd.f32 %v13519_v17, %v11294_v54  ;;  %v9800_v46 = vpop.eup %9799  ;;  %9815 = vtanh.f32 %v4369_v28  ;;  %v13972_v17 = vpop.f32.mrb[16].mxu1 }
 0x3f2   : > { %6589 = vst [vmem:[%s11342_s16 + $0x170] sm:$0xff] %v5989_v6  ;;  %v5990_v14 = vadd.f32 0.5, %v5390_v1  ;;  %v3534_v32 = vadd.f32 %v16170_v38, %v11330_v22  ;;  %v3617_v48 = vadd.f32 %v13532_v19, %v11330_v22  ;;  %v5449_v40 = vmul.f32 0.5, %v9800_v46  ;;  %16171 = vst [vmem:[#allocation27_spill] sm:$0xff] %v13972_v17  ;;  %v13977_v19 = vpop.f32.mrb[17].mxu0  ;;  %v13984_v46 = vpop.f32.mrb[17].mxu1 }
 0x3f3   : > { %v9802_v61 = vpop.eup %9801  ;;  %6588 = vst [vmem:[%s11342_s16 + $0x168] sm:$0xff] %v5988_v47  ;;  %v6047_v0 = vadd.f32 0.5, %v5447_v52  ;;  %9817 = vtanh.f32 %v4368_v11  ;;  %v4370_v60 = vmul.f32 0.5, %v3613_v3  ;;  %v3536_v1 = vadd.f32 %v13537_v53, %v11330_v22  ;;  %16172 = vst [vmem:[#allocation33_spill] sm:$0xff] %v13977_v19  ;;  %v16173_v47 = vld [vmem:[#allocation22_spill] sm:$0xff]  ;;  %v16174_v11 = vld [vmem:[#allocation11_spill] sm:$0xff] }
 0x3f4   : > { %6590 = vst [vmem:[%s11342_s16 + $0x178] sm:$0xff] %v5990_v14  ;;  %v5448_v63 = vmul.f32 0.5, %v9802_v61  ;;  %v4427_v29 = vmul.f32 0.5, %v3534_v32  ;;  %v4429_v6 = vmul.f32 0.5, %v3617_v48  ;;  %v6049_v38 = vadd.f32 0.5, %v5449_v40  ;;  %16175 = vst [vmem:[#allocation28_spill] sm:$0xff] %v13984_v46 }
 0x3f5   : > { %v9804_v28 = vpop.eup %9803  ;;  %6647 = vst [vmem:[%s11342_s16 + $0x340] sm:$0xff] %v6047_v0  ;;  %9819 = vtanh.f32 %v4370_v60  ;;  %v3619_v52 = vadd.f32 %v16173_v47, %v11330_v22  ;;  %v3538_v3 = vadd.f32 %v16174_v11, %v11349_v58  ;;  %v4428_v53 = vmul.f32 0.5, %v3536_v1  ;;  %v13986_v61 = vpop.f32.mrb[18].mxu0 }
 0x3f6   : > { %v9806_v14 = vpop.eup %9805  ;;  %v6048_v32 = vadd.f32 0.5, %v5448_v63  ;;  %v5450_v48 = vmul.f32 0.5, %v9804_v28  ;;  %9821 = vtanh.f32 %v4427_v29  ;;  %6649 = vst [vmem:[%s11342_s16 + $0x350] sm:$0xff] %v6049_v38  ;;  %v13989_v47 = vpop.f32.mrb[18].mxu1  ;;  %v3621_v63 = vadd.f32 %v13549_v57, %v11349_v58 }
 0x3f7   : > { %v9808_v19 = vpop.eup %9807  ;;  %v5507_v0 = vmul.f32 0.5, %v9806_v14  ;;  %9823 = vtanh.f32 %v4429_v6  ;;  %v4430_v40 = vmul.f32 0.5, %v3619_v52  ;;  %v4487_v60 = vmul.f32 0.5, %v3538_v3  ;;  %v16176_v6 = vld [vmem:[#allocation12_spill] sm:$0xff]  ;;  %v13996_v52 = vpop.f32.mrb[19].mxu0 }
 0x3f8   : > { %v9810_v11 = vpop.eup %9809  ;;  %6648 = vst [vmem:[%s11342_s16 + $0x348] sm:$0xff] %v6048_v32  ;;  %v6050_v17 = vadd.f32 0.5, %v5450_v48  ;;  %v5509_v46 = vmul.f32 0.5, %v9808_v19  ;;  %9825 = vtanh.f32 %v4428_v53  ;;  %v3540_v38 = vadd.f32 %v16176_v6, %v11349_v58  ;;  %v13999_v48 = vpop.f32.mrb[19].mxu1 }
 0x3f9   : > { %v9812_v29 = vpop.eup %9811  ;;  %v6107_v1 = vadd.f32 0.5, %v5507_v0  ;;  %v5508_v28 = vmul.f32 0.5, %v9810_v11  ;;  %9827 = vtanh.f32 %v4430_v40  ;;  %v4489_v19 = vmul.f32 0.5, %v3621_v63  ;;  %v14009_v63 = vpop.f32.mrb[20].mxu0 }
 0x3fa   : > { %v9814_v3 = vpop.eup %9813  ;;  %6650 = vst [vmem:[%s11342_s16 + $0x358] sm:$0xff] %v6050_v17  ;;  %v6109_v14 = vadd.f32 0.5, %v5509_v46  ;;  %v5510_v32 = vmul.f32 0.5, %v9812_v29  ;;  %9829 = vtanh.f32 %v4487_v60  ;;  %v4488_v0 = vmul.f32 0.5, %v3540_v38  ;;  %v16177_v17 = vld [vmem:[#allocation38_spill] sm:$0xff]  ;;  %16178 = vst [vmem:[#allocation22_spill] sm:$0xff] %v14009_v63 }
 0x3fb   : > { %6707 = vst [vmem:[%s11342_s16 + $0x520] sm:$0xff] %v6107_v1  ;;  %v6108_v57 = vadd.f32 0.5, %v5508_v28  ;;  %v5567_v53 = vmul.f32 0.5, %v9814_v3  ;;  %v3623_v40 = vadd.f32 %v13559_v37, %v11349_v58  ;;  %v9816_v11 = vpop.eup %9815  ;;  %9831 = vtanh.f32 %v4489_v19  ;;  %v14012_v37 = vpop.f32.mrb[20].mxu1 }
 0x3fc   : > { %6709 = vst [vmem:[%s11342_s16 + $0x530] sm:$0xff] %v6109_v14  ;;  %v6110_v6 = vadd.f32 0.5, %v5510_v32  ;;  %v3544_v46 = vadd.f32 %v16177_v17, %v15832_v35  ;;  %v3627_v60 = vadd.f32 %v13572_v20, %v15832_v35  ;;  %v5569_v28 = vmul.f32 0.5, %v9816_v11  ;;  %16179 = vst [vmem:[#allocation11_spill] sm:$0xff] %v14012_v37  ;;  %v14017_v20 = vpop.f32.mrb[21].mxu0  ;;  %v14024_v11 = vpop.f32.mrb[21].mxu1 }
 0x3fd   : > { %v9818_v29 = vpop.eup %9817  ;;  %6708 = vst [vmem:[%s11342_s16 + $0x528] sm:$0xff] %v6108_v57  ;;  %v6167_v1 = vadd.f32 0.5, %v5567_v53  ;;  %9833 = vtanh.f32 %v4488_v0  ;;  %v4490_v38 = vmul.f32 0.5, %v3623_v40  ;;  %v3546_v19 = vadd.f32 %v13577_v25, %v15832_v35  ;;  %16180 = vst [vmem:[#allocation12_spill] sm:$0xff] %v14017_v20  ;;  %v16181_v57 = vld [vmem:[#allocation13_spill] sm:$0xff]  ;;  %v16182_v0 = vld [vmem:[#allocation39_spill] sm:$0xff] }
 0x3fe   : > { %6710 = vst [vmem:[%s11342_s16 + $0x538] sm:$0xff] %v6110_v6  ;;  %v5568_v3 = vmul.f32 0.5, %v9818_v29  ;;  %v4547_v14 = vmul.f32 0.5, %v3544_v46  ;;  %v4549_v32 = vmul.f32 0.5, %v3627_v60  ;;  %v6169_v63 = vadd.f32 0.5, %v5569_v28  ;;  %16183 = vst [vmem:[#allocation38_spill] sm:$0xff] %v14024_v11 }
 0x3ff   : > { %v9820_v17 = vpop.eup %9819  ;;  %6767 = vst [vmem:[%s11342_s16 + $0x700] sm:$0xff] %v6167_v1  ;;  %9835 = vtanh.f32 %v4490_v38  ;;  %v3629_v53 = vadd.f32 %v16181_v57, %v15832_v35  ;;  %v3548_v40 = vadd.f32 %v16182_v0, %v15803_v26  ;;  %v4548_v25 = vmul.f32 0.5, %v3546_v19  ;;  %v14026_v29 = vpop.f32.mrb[22].mxu0 }
 0x400   : > { %v9822_v6 = vpop.eup %9821  ;;  %v6168_v46 = vadd.f32 0.5, %v5568_v3  ;;  %v5570_v60 = vmul.f32 0.5, %v9820_v17  ;;  %9837 = vtanh.f32 %v4547_v14  ;;  %6769 = vst [vmem:[%s11342_s16 + $0x710] sm:$0xff] %v6169_v63  ;;  %v14029_v57 = vpop.f32.mrb[22].mxu1  ;;  %v3631_v3 = vadd.f32 %v13589_v16, %v15803_v26  ;;  %v16184_v63 = vld [vmem:[#allocation23_spill] sm:$0xff] }
 0x401   : > { %v9824_v20 = vpop.eup %9823  ;;  %v5627_v1 = vmul.f32 0.5, %v9822_v6  ;;  %9839 = vtanh.f32 %v4549_v32  ;;  %v4550_v28 = vmul.f32 0.5, %v3629_v53  ;;  %v4607_v38 = vmul.f32 0.5, %v3548_v40  ;;  %v14036_v53 = vpop.f32.mrb[23].mxu0 }
 0x402   : > { %v9826_v0 = vpop.eup %9825  ;;  %6768 = vst [vmem:[%s11342_s16 + $0x708] sm:$0xff] %v6168_v46  ;;  %v6170_v37 = vadd.f32 0.5, %v5570_v60  ;;  %v5629_v11 = vmul.f32 0.5, %v9824_v20  ;;  %9841 = vtanh.f32 %v4548_v25  ;;  %v3550_v32 = vadd.f32 %v16184_v63, %v15803_v26  ;;  %v14039_v60 = vpop.f32.mrb[23].mxu1 }
 0x403   : > { %v9828_v14 = vpop.eup %9827  ;;  %v6227_v19 = vadd.f32 0.5, %v5627_v1  ;;  %v5628_v17 = vmul.f32 0.5, %v9826_v0  ;;  %9843 = vtanh.f32 %v4550_v28  ;;  %v4609_v20 = vmul.f32 0.5, %v3631_v3 }
 0x404   : > { %v9830_v40 = vpop.eup %9829  ;;  %6770 = vst [vmem:[%s11342_s16 + $0x718] sm:$0xff] %v6170_v37  ;;  %v6229_v6 = vadd.f32 0.5, %v5629_v11  ;;  %v5630_v46 = vmul.f32 0.5, %v9828_v14  ;;  %9845 = vtanh.f32 %v4607_v38  ;;  %v4608_v1 = vmul.f32 0.5, %v3550_v32  ;;  %v14049_v38 = vpop.f32.mrb[24].mxu0 }
 0x405   : > { %6827 = vst [vmem:[%s11342_s16 + $0x8e0] sm:$0xff] %v6227_v19  ;;  %v6228_v16 = vadd.f32 0.5, %v5628_v17  ;;  %v5687_v25 = vmul.f32 0.5, %v9830_v40  ;;  %v3633_v28 = vadd.f32 %v13599_v55, %v15803_v26  ;;  %v9832_v0 = vpop.eup %9831  ;;  %9847 = vtanh.f32 %v4609_v20  ;;  %16185 = vst [vmem:[#allocation13_spill] sm:$0xff] %v14049_v38  ;;  %v14052_v55 = vpop.f32.mrb[24].mxu1 }
 0x406   : > { %6829 = vst [vmem:[%s11342_s16 + $0x8f0] sm:$0xff] %v6229_v6  ;;  %v6230_v63 = vadd.f32 0.5, %v5630_v46  ;;  %v3554_v37 = vadd.f32 %v13609_v51, %v15808_v8  ;;  %v3637_v11 = vadd.f32 %v13612_v5, %v15808_v8  ;;  %v5689_v19 = vmul.f32 0.5, %v9832_v0  ;;  %v16186_v51 = vld [vmem:[#allocation40_spill] sm:$0xff]  ;;  %v14057_v5 = vpop.f32.mrb[25].mxu0 }
 0x407   : > { %v9834_v3 = vpop.eup %9833  ;;  %6828 = vst [vmem:[%s11342_s16 + $0x8e8] sm:$0xff] %v6228_v16  ;;  %v6287_v14 = vadd.f32 0.5, %v5687_v25  ;;  %9849 = vtanh.f32 %v4608_v1  ;;  %v4610_v17 = vmul.f32 0.5, %v3633_v28  ;;  %v3556_v46 = vadd.f32 %v16186_v51, %v15808_v8  ;;  %16187 = vst [vmem:[#allocation39_spill] sm:$0xff] %v14057_v5  ;;  %v16188_v16 = vld [vmem:[#allocation41_spill] sm:$0xff]  ;;  %v14064_v28 = vpop.f32.mrb[25].mxu1 }
 0x408   : > { %6830 = vst [vmem:[%s11342_s16 + $0x8f8] sm:$0xff] %v6230_v63  ;;  %v5688_v32 = vmul.f32 0.5, %v9834_v3  ;;  %v4667_v40 = vmul.f32 0.5, %v3554_v37  ;;  %v4669_v6 = vmul.f32 0.5, %v3637_v11  ;;  %v6289_v38 = vadd.f32 0.5, %v5689_v19  ;;  %16189 = vst [vmem:[#allocation23_spill] sm:$0xff] %v14064_v28 }
 0x409   : > { %v9836_v20 = vpop.eup %9835  ;;  %6887 = vst [vmem:[%s11342_s16 + $0xac0] sm:$0xff] %v6287_v14  ;;  %9851 = vtanh.f32 %v4610_v17  ;;  %v3639_v25 = vadd.f32 %v16188_v16, %v15808_v8  ;;  %v3558_v1 = vadd.f32 %v13626_v2, %v11415_v30  ;;  %v4668_v11 = vmul.f32 0.5, %v3556_v46  ;;  %v14066_v3 = vpop.f32.mrb[26].mxu0 }
 0x40a   : > { %v9838_v0 = vpop.eup %9837  ;;  %v6288_v63 = vadd.f32 0.5, %v5688_v32  ;;  %v5690_v37 = vmul.f32 0.5, %v9836_v20  ;;  %9853 = vtanh.f32 %v4667_v40  ;;  %6889 = vst [vmem:[%s11342_s16 + $0xad0] sm:$0xff] %v6289_v38  ;;  %v14069_v16 = vpop.f32.mrb[26].mxu1  ;;  %v3641_v32 = vadd.f32 %v13629_v62, %v11415_v30  ;;  %v16190_v38 = vld [vmem:[#allocation25_spill] sm:$0xff] }
 0x40b   : > { %v9840_v51 = vpop.eup %9839  ;;  %v5747_v14 = vmul.f32 0.5, %v9838_v0  ;;  %9855 = vtanh.f32 %v4669_v6  ;;  %v4670_v19 = vmul.f32 0.5, %v3639_v25  ;;  %v4727_v17 = vmul.f32 0.5, %v3558_v1  ;;  %v14076_v25 = vpop.f32.mrb[27].mxu0 }
 0x40c   : > { %v9842_v2 = vpop.eup %9841  ;;  %6888 = vst [vmem:[%s11342_s16 + $0xac8] sm:$0xff] %v6288_v63  ;;  %v6290_v5 = vadd.f32 0.5, %v5690_v37  ;;  %v5749_v28 = vmul.f32 0.5, %v9840_v51  ;;  %9857 = vtanh.f32 %v4668_v11  ;;  %v3560_v6 = vadd.f32 %v16190_v38, %v11415_v30  ;;  %16191 = vst [vmem:[#allocation40_spill] sm:$0xff] %v14076_v25  ;;  %v14079_v11 = vpop.f32.mrb[27].mxu1 }
 0x40d   : > { %v9844_v40 = vpop.eup %9843  ;;  %v6347_v46 = vadd.f32 0.5, %v5747_v14  ;;  %v5748_v20 = vmul.f32 0.5, %v9842_v2  ;;  %9859 = vtanh.f32 %v4670_v19  ;;  %v4729_v37 = vmul.f32 0.5, %v3641_v32  ;;  %16192 = vst [vmem:[#allocation41_spill] sm:$0xff] %v14079_v11 }
 0x40e   : > { %v9846_v1 = vpop.eup %9845  ;;  %6890 = vst [vmem:[%s11342_s16 + $0xad8] sm:$0xff] %v6290_v5  ;;  %v6349_v0 = vadd.f32 0.5, %v5749_v28  ;;  %v5750_v63 = vmul.f32 0.5, %v9844_v40  ;;  %9861 = vtanh.f32 %v4727_v17  ;;  %v4728_v14 = vmul.f32 0.5, %v3560_v6  ;;  %v16193_v5 = vld [vmem:[#allocation14_spill] sm:$0xff]  ;;  %v14089_v40 = vpop.f32.mrb[28].mxu0 }
 0x40f   : > { %6947 = vst [vmem:[%s11342_s16 + $0xca0] sm:$0xff] %v6347_v46  ;;  %v6348_v62 = vadd.f32 0.5, %v5748_v20  ;;  %v5807_v51 = vmul.f32 0.5, %v9846_v1  ;;  %v3643_v19 = vadd.f32 %v13639_v27, %v11415_v30  ;;  %v9848_v2 = vpop.eup %9847  ;;  %9863 = vtanh.f32 %v4729_v37  ;;  %v16194_v17 = vld [vmem:[#allocation50_spill] sm:$0xff]  ;;  %16195 = vst [vmem:[#allocation25_spill] sm:$0xff] %v14089_v40  ;;  %v14092_v27 = vpop.f32.mrb[28].mxu1 }
 0x410   : > { %6949 = vst [vmem:[%s11342_s16 + $0xcb0] sm:$0xff] %v6349_v0  ;;  %v6350_v38 = vadd.f32 0.5, %v5750_v63  ;;  %v3680_v28 = vadd.f32 %v16193_v5, %v11266_v31  ;;  %v3763_v32 = vadd.f32 %v16194_v17, %v11266_v31  ;;  %v5809_v6 = vmul.f32 0.5, %v9848_v2  ;;  %16196 = vst [vmem:[#allocation14_spill] sm:$0xff] %v14092_v27  ;;  %v16197_v5 = vld [vmem:[#allocation29_spill] sm:$0xff]  ;;  %v14097_v17 = vpop.f32.mrb[29].mxu0 }
 0x411   : > { %v9850_v46 = vpop.eup %9849  ;;  %6948 = vst [vmem:[%s11342_s16 + $0xca8] sm:$0xff] %v6348_v62  ;;  %v6407_v20 = vadd.f32 0.5, %v5807_v51  ;;  %9865 = vtanh.f32 %v4728_v14  ;;  %v4730_v1 = vmul.f32 0.5, %v3643_v19  ;;  %v3682_v11 = vadd.f32 %v16197_v5, %v11266_v31  ;;  %16198 = vst [vmem:[#allocation50_spill] sm:$0xff] %v14097_v17  ;;  %v16199_v62 = vld [vmem:[#allocation20_spill] sm:$0xff]  ;;  %v14104_v2 = vpop.f32.mrb[29].mxu1 }
 0x412   : > { %6950 = vst [vmem:[%s11342_s16 + $0xcb8] sm:$0xff] %v6350_v38  ;;  %v5808_v0 = vmul.f32 0.5, %v9850_v46  ;;  %v4191_v63 = vmul.f32 0.5, %v3680_v28  ;;  %v4193_v37 = vmul.f32 0.5, %v3763_v32  ;;  %v6409_v40 = vadd.f32 0.5, %v5809_v6  ;;  %v16200_v14 = vld [vmem:[#allocation24_spill] sm:$0xff] }
 0x413   : > { %v9852_v25 = vpop.eup %9851  ;;  %7007 = vst [vmem:[%s11342_s16 + $0xe80] sm:$0xff] %v6407_v20  ;;  %9867 = vtanh.f32 %v4730_v1  ;;  %v3765_v51 = vadd.f32 %v16199_v62, %v11266_v31  ;;  %v3684_v19 = vadd.f32 %v16200_v14, %v11251_v44  ;;  %16201 = vst [vmem:[#allocation29_spill] sm:$0xff] %v14104_v2  ;;  %v4192_v46 = vmul.f32 0.5, %v3682_v11  ;;  %v14106_v5 = vpop.f32.mrb[30].mxu0 }
 0x414   : > { %v9854_v38 = vpop.eup %9853  ;;  %v6408_v28 = vadd.f32 0.5, %v5808_v0  ;;  %v5810_v32 = vmul.f32 0.5, %v9852_v25  ;;  %9869 = vtanh.f32 %v4191_v63  ;;  %7009 = vst [vmem:[%s11342_s16 + $0xe90] sm:$0xff] %v6409_v40  ;;  %v14109_v62 = vpop.f32.mrb[30].mxu1  ;;  %v3767_v25 = vadd.f32 %v13669_v4, %v11251_v44  ;;  %v16203_v40 = vld [vmem:[#allocation51_spill] sm:$0xff] }
 0x415   : > { %v9856_v17 = vpop.eup %9855  ;;  %v5867_v20 = vmul.f32 0.5, %v9854_v38  ;;  %9871 = vtanh.f32 %v4193_v37  ;;  %v4194_v6 = vmul.f32 0.5, %v3765_v51  ;;  %v4251_v1 = vmul.f32 0.5, %v3684_v19  ;;  %16202 = vst [vmem:[#allocation20_spill] sm:$0xff] %v14109_v62  ;;  %v14116_v51 = vpop.f32.mrb[31].mxu0 }
 0x416   : > { %v9858_v14 = vpop.eup %9857  ;;  %7008 = vst [vmem:[%s11342_s16 + $0xe88] sm:$0xff] %v6408_v28  ;;  %v6410_v27 = vadd.f32 0.5, %v5810_v32  ;;  %v5869_v2 = vmul.f32 0.5, %v9856_v17  ;;  %9873 = vtanh.f32 %v4192_v46  ;;  %v3686_v37 = vadd.f32 %v16203_v40, %v11251_v44  ;;  %16204 = vst [vmem:[#allocation24_spill] sm:$0xff] %v14116_v51  ;;  %v14119_v32 = vpop.f32.mrb[31].mxu1 }
 0x417   : > { %v9860_v11 = vpop.eup %9859  ;;  %v6467_v0 = vadd.f32 0.5, %v5867_v20  ;;  %v5868_v63 = vmul.f32 0.5, %v9858_v14  ;;  %9875 = vtanh.f32 %v4194_v6  ;;  %v4253_v17 = vmul.f32 0.5, %v3767_v25  ;;  %16205 = vst [vmem:[#allocation51_spill] sm:$0xff] %v14119_v32  ;;  %v16206_v6 = vld [vmem:[#allocation52_spill] sm:$0xff] }
 0x418   : > { %v9862_v19 = vpop.eup %9861  ;;  %7010 = vst [vmem:[%s11342_s16 + $0xe98] sm:$0xff] %v6410_v27  ;;  %v6469_v38 = vadd.f32 0.5, %v5869_v2  ;;  %v5870_v28 = vmul.f32 0.5, %v9860_v11  ;;  %9877 = vtanh.f32 %v4251_v1  ;;  %v4252_v20 = vmul.f32 0.5, %v3686_v37  ;;  %v16207_v27 = vld [vmem:[#allocation21_spill] sm:$0xff]  ;;  %v16208_v1 = vld [vmem:[#allocation7_spill] sm:$0xff] }
 0x419   : > { %7067 = vst [vmem:[%s11342_s16 + $0x1060] sm:$0xff] %v6467_v0  ;;  %v6468_v4 = vadd.f32 0.5, %v5868_v63  ;;  %v5927_v46 = vmul.f32 0.5, %v9862_v19  ;;  %v3769_v14 = vadd.f32 %v16206_v6, %v11251_v44  ;;  %v9864_v40 = vpop.eup %9863  ;;  %9879 = vtanh.f32 %v4253_v17  ;;  %v14129_v11 = vpop.f32.mrb[32].mxu0 }
 0x41a   : > { %7069 = vst [vmem:[%s11342_s16 + $0x1070] sm:$0xff] %v6469_v38  ;;  %v6470_v51 = vadd.f32 0.5, %v5870_v28  ;;  %v3690_v2 = vadd.f32 %v16207_v27, %v15817_v42  ;;  %v3773_v25 = vadd.f32 %v16208_v1, %v15817_v42  ;;  %16209 = vst [vmem:[#allocation52_spill] sm:$0xff] %v14129_v11  ;;  %v5929_v37 = vmul.f32 0.5, %v9864_v40  ;;  %v14132_v6 = vpop.f32.mrb[32].mxu1  ;;  %v16211_v27 = vld [vmem:[#allocation8_spill] sm:$0xff] }
 0x41b   : > { %v9866_v0 = vpop.eup %9865  ;;  %7068 = vst [vmem:[%s11342_s16 + $0x1068] sm:$0xff] %v6468_v4  ;;  %v6527_v63 = vadd.f32 0.5, %v5927_v46  ;;  %9881 = vtanh.f32 %v4252_v20  ;;  %v4254_v19 = vmul.f32 0.5, %v3769_v14  ;;  %16210 = vst [vmem:[#allocation21_spill] sm:$0xff] %v14132_v6  ;;  %v3692_v32 = vadd.f32 %v16211_v27, %v15817_v42  ;;  %v14137_v1 = vpop.f32.mrb[33].mxu0  ;;  %v16213_v4 = vld [vmem:[#allocation9_spill] sm:$0xff] }
 0x41c   : > { %7070 = vst [vmem:[%s11342_s16 + $0x1078] sm:$0xff] %v6470_v51  ;;  %v5928_v38 = vmul.f32 0.5, %v9866_v0  ;;  %v4311_v28 = vmul.f32 0.5, %v3690_v2  ;;  %v4313_v17 = vmul.f32 0.5, %v3773_v25  ;;  %16212 = vst [vmem:[#allocation7_spill] sm:$0xff] %v14137_v1  ;;  %v6529_v11 = vadd.f32 0.5, %v5929_v37 }
 0x41d   : > { %v9868_v62 = vpop.eup %9867  ;;  %7127 = vst [vmem:[%s11342_s16 + $0x1240] sm:$0x3f] %v6527_v63  ;;  %9883 = vtanh.f32 %v4254_v19  ;;  %v3775_v46 = vadd.f32 %v16213_v4, %v15817_v42  ;;  %v16214_v20 = vld [vmem:[#allocation34_spill] sm:$0xff]  ;;  %v14144_v51 = vpop.f32.mrb[33].mxu1  ;;  %v4312_v0 = vmul.f32 0.5, %v3692_v32 }
 0x41e   : > { %v3694_v14 = vadd.f32 %v16214_v20, %v11294_v54  ;;  %16215 = vst [vmem:[#allocation8_spill] sm:$0xff] %v14144_v51  ;;  %v9870_v40 = vpop.eup %9869  ;;  %v6528_v2 = vadd.f32 0.5, %v5928_v38  ;;  %v5930_v25 = vmul.f32 0.5, %v9868_v62  ;;  %9885 = vtanh.f32 %v4311_v28  ;;  %v14146_v27 = vpop.f32.mrb[34].mxu0  ;;  %7129 = vst [vmem:[%s11342_s16 + $0x1250] sm:$0x3f] %v6529_v11 }
 0x41f   : > { %v9872_v1 = vpop.eup %9871  ;;  %v5391_v63 = vmul.f32 0.5, %v9870_v40  ;;  %9887 = vtanh.f32 %v4313_v17  ;;  %v4314_v37 = vmul.f32 0.5, %v3775_v46  ;;  %v14149_v4 = vpop.f32.mrb[34].mxu1  ;;  %v3777_v62 = vadd.f32 %v13709_v49, %v11294_v54 }
 0x420   : > { %v4371_v19 = vmul.f32 0.5, %v3694_v14  ;;  %v9874_v20 = vpop.eup %9873  ;;  %7128 = vst [vmem:[%s11342_s16 + $0x1248] sm:$0x3f] %v6528_v2  ;;  %v6530_v6 = vadd.f32 0.5, %v5930_v25  ;;  %v5393_v51 = vmul.f32 0.5, %v9872_v1  ;;  %9889 = vtanh.f32 %v4312_v0  ;;  %v14156_v17 = vpop.f32.mrb[35].mxu0 }
 0x421   : > { %v9876_v32 = vpop.eup %9875  ;;  %v5991_v38 = vadd.f32 0.5, %v5391_v63  ;;  %v5392_v28 = vmul.f32 0.5, %v9874_v20  ;;  %9891 = vtanh.f32 %v4314_v37  ;;  %v3696_v11 = vadd.f32 %v13716_v21, %v11294_v54  ;;  %v14159_v2 = vpop.f32.mrb[35].mxu1 }
 0x422   : > { %v9878_v46 = vpop.eup %9877  ;;  %7130 = vst [vmem:[%s11342_s16 + $0x1258] sm:$0x3f] %v6530_v6  ;;  %v5993_v14 = vadd.f32 0.5, %v5393_v51  ;;  %v5394_v40 = vmul.f32 0.5, %v9876_v32  ;;  %9893 = vtanh.f32 %v4371_v19  ;;  %v4373_v1 = vmul.f32 0.5, %v3777_v62  ;;  %v14169_v19 = vpop.f32.mrb[36].mxu0 }
 0x423   : > { %6591 = vst [vmem:[%s11342_s16 + $0x180] sm:$0xff] %v5991_v38  ;;  %v5992_v49 = vadd.f32 0.5, %v5392_v28  ;;  %v5451_v25 = vmul.f32 0.5, %v9878_v46  ;;  %v4372_v0 = vmul.f32 0.5, %v3696_v11  ;;  %v3779_v63 = vadd.f32 %v13719_v33, %v11294_v54  ;;  %v9880_v21 = vpop.eup %9879  ;;  %v14172_v33 = vpop.f32.mrb[36].mxu1 }
 0x424   : > { %6593 = vst [vmem:[%s11342_s16 + $0x190] sm:$0xff] %v5993_v14  ;;  %v5994_v37 = vadd.f32 0.5, %v5394_v40  ;;  %9895 = vtanh.f32 %v4373_v1  ;;  %v3700_v6 = vadd.f32 %v13729_v9, %v11330_v22  ;;  %v3783_v51 = vadd.f32 %v13732_v7, %v11330_v22  ;;  %v14177_v7 = vpop.f32.mrb[37].mxu0  ;;  %v16217_v1 = vld [vmem:[#allocation42_spill] sm:$0xff] }
 0x425   : > { %v9882_v20 = vpop.eup %9881  ;;  %6592 = vst [vmem:[%s11342_s16 + $0x188] sm:$0xff] %v5992_v49  ;;  %v6051_v62 = vadd.f32 0.5, %v5451_v25  ;;  %v5453_v32 = vmul.f32 0.5, %v9880_v21  ;;  %9897 = vtanh.f32 %v4372_v0  ;;  %v4374_v38 = vmul.f32 0.5, %v3779_v63  ;;  %16216 = vst [vmem:[#allocation9_spill] sm:$0xff] %v14177_v7  ;;  %v16218_v25 = vld [vmem:[#allocation53_spill] sm:$0xff] }
 0x426   : > { %6594 = vst [vmem:[%s11342_s16 + $0x198] sm:$0xff] %v5994_v37  ;;  %v5452_v28 = vmul.f32 0.5, %v9882_v20  ;;  %v4431_v11 = vmul.f32 0.5, %v3700_v6  ;;  %v4433_v46 = vmul.f32 0.5, %v3783_v51  ;;  %v3702_v9 = vadd.f32 %v13737_v43, %v11330_v22  ;;  %v14184_v63 = vpop.f32.mrb[37].mxu1  ;;  %v14186_v51 = vpop.f32.mrb[38].mxu0 }
 0x427   : > { %v9884_v14 = vpop.eup %9883  ;;  %6651 = vst [vmem:[%s11342_s16 + $0x360] sm:$0xff] %v6051_v62  ;;  %v6053_v40 = vadd.f32 0.5, %v5453_v32  ;;  %9899 = vtanh.f32 %v4374_v38  ;;  %v3785_v49 = vadd.f32 %v16217_v1, %v11330_v22  ;;  %v3704_v0 = vadd.f32 %v16218_v25, %v11349_v58  ;;  %16219 = vst [vmem:[#allocation34_spill] sm:$0xff] %v14184_v63  ;;  %v14189_v1 = vpop.f32.mrb[38].mxu1 }
 0x428   : > { %v9886_v21 = vpop.eup %9885  ;;  %v6052_v37 = vadd.f32 0.5, %v5452_v28  ;;  %v5454_v6 = vmul.f32 0.5, %v9884_v14  ;;  %9901 = vtanh.f32 %v4431_v11  ;;  %v4432_v43 = vmul.f32 0.5, %v3702_v9 }
 0x429   : > { %v9888_v20 = vpop.eup %9887  ;;  %6653 = vst [vmem:[%s11342_s16 + $0x370] sm:$0xff] %v6053_v40  ;;  %v5511_v62 = vmul.f32 0.5, %v9886_v21  ;;  %9903 = vtanh.f32 %v4433_v46  ;;  %v4434_v32 = vmul.f32 0.5, %v3785_v49  ;;  %v4491_v38 = vmul.f32 0.5, %v3704_v0  ;;  %v16220_v46 = vld [vmem:[#allocation35_spill] sm:$0xff]  ;;  %v14196_v49 = vpop.f32.mrb[39].mxu0 }
 0x42a   : > { %v9890_v25 = vpop.eup %9889  ;;  %6652 = vst [vmem:[%s11342_s16 + $0x368] sm:$0xff] %v6052_v37  ;;  %v6054_v7 = vadd.f32 0.5, %v5454_v6  ;;  %v5513_v63 = vmul.f32 0.5, %v9888_v20  ;;  %9905 = vtanh.f32 %v4432_v43  ;;  %v3787_v28 = vadd.f32 %v13749_v12, %v11349_v58  ;;  %16221 = vst [vmem:[#allocation42_spill] sm:$0xff] %v14196_v49  ;;  %v14199_v43 = vpop.f32.mrb[39].mxu1 }
 0x42b   : > { %v9892_v11 = vpop.eup %9891  ;;  %v6111_v9 = vadd.f32 0.5, %v5511_v62  ;;  %v5512_v14 = vmul.f32 0.5, %v9890_v25  ;;  %9907 = vtanh.f32 %v4434_v32  ;;  %v3706_v40 = vadd.f32 %v16220_v46, %v11349_v58  ;;  %16222 = vst [vmem:[#allocation53_spill] sm:$0xff] %v14199_v43 }
 0x42c   : > { %v9894_v0 = vpop.eup %9893  ;;  %6654 = vst [vmem:[%s11342_s16 + $0x378] sm:$0xff] %v6054_v7  ;;  %v6113_v21 = vadd.f32 0.5, %v5513_v63  ;;  %v5514_v37 = vmul.f32 0.5, %v9892_v11  ;;  %9909 = vtanh.f32 %v4491_v38  ;;  %v4493_v6 = vmul.f32 0.5, %v3787_v28  ;;  %v16223_v7 = vld [vmem:[#allocation54_spill] sm:$0xff]  ;;  %v16224_v38 = vld [vmem:[#allocation55_spill] sm:$0xff] }
 0x42d   : > { %6711 = vst [vmem:[%s11342_s16 + $0x540] sm:$0xff] %v6111_v9  ;;  %v6112_v12 = vadd.f32 0.5, %v5512_v14  ;;  %v5571_v20 = vmul.f32 0.5, %v9894_v0  ;;  %v4492_v62 = vmul.f32 0.5, %v3706_v40  ;;  %v3789_v32 = vadd.f32 %v13759_v18, %v11349_v58  ;;  %v14209_v11 = vpop.f32.mrb[40].mxu0  ;;  %v14212_v18 = vpop.f32.mrb[40].mxu1 }
 0x42e   : > { %v9896_v25 = vpop.eup %9895  ;;  %6713 = vst [vmem:[%s11342_s16 + $0x550] sm:$0xff] %v6113_v21  ;;  %v6114_v46 = vadd.f32 0.5, %v5514_v37  ;;  %9911 = vtanh.f32 %v4493_v6  ;;  %v3710_v63 = vadd.f32 %v16223_v7, %v15832_v35  ;;  %v3793_v28 = vadd.f32 %v16224_v38, %v15832_v35  ;;  %16225 = vst [vmem:[#allocation35_spill] sm:$0xff] %v14209_v11  ;;  %v16227_v7 = vld [vmem:[#allocation43_spill] sm:$0xff]  ;;  %v14217_v38 = vpop.f32.mrb[41].mxu0 }
 0x42f   : > { %v9898_v9 = vpop.eup %9897  ;;  %6712 = vst [vmem:[%s11342_s16 + $0x548] sm:$0xff] %v6112_v12  ;;  %v6171_v14 = vadd.f32 0.5, %v5571_v20  ;;  %v5573_v40 = vmul.f32 0.5, %v9896_v25  ;;  %9913 = vtanh.f32 %v4492_v62  ;;  %v4494_v0 = vmul.f32 0.5, %v3789_v32  ;;  %16226 = vst [vmem:[#allocation54_spill] sm:$0xff] %v14212_v18  ;;  %v16229_v12 = vld [vmem:[#allocation44_spill] sm:$0xff] }
 0x430   : > { %6714 = vst [vmem:[%s11342_s16 + $0x558] sm:$0xff] %v6114_v46  ;;  %v5572_v21 = vmul.f32 0.5, %v9898_v9  ;;  %v4551_v37 = vmul.f32 0.5, %v3710_v63  ;;  %v4553_v6 = vmul.f32 0.5, %v3793_v28  ;;  %v3712_v43 = vadd.f32 %v16227_v7, %v15832_v35  ;;  %16228 = vst [vmem:[#allocation55_spill] sm:$0xff] %v14217_v38  ;;  %v16230_v62 = vld [vmem:[#allocation10_spill] sm:$0xff] }
 0x431   : > { %v9900_v49 = vpop.eup %9899  ;;  %6771 = vst [vmem:[%s11342_s16 + $0x720] sm:$0xff] %v6171_v14  ;;  %v6173_v11 = vadd.f32 0.5, %v5573_v40  ;;  %9915 = vtanh.f32 %v4494_v0  ;;  %v3795_v20 = vadd.f32 %v16229_v12, %v15832_v35  ;;  %v3714_v32 = vadd.f32 %v16230_v62, %v15803_v26  ;;  %v14224_v25 = vpop.f32.mrb[41].mxu1 }
 0x432   : > { %16231 = vst [vmem:[#allocation43_spill] sm:$0xff] %v14224_v25  ;;  %v9902_v46 = vpop.eup %9901  ;;  %v6172_v63 = vadd.f32 0.5, %v5572_v21  ;;  %v5574_v28 = vmul.f32 0.5, %v9900_v49  ;;  %9917 = vtanh.f32 %v4551_v37  ;;  %v4552_v9 = vmul.f32 0.5, %v3712_v43  ;;  %v14226_v7 = vpop.f32.mrb[42].mxu0 }
 0x433   : > { %v9904_v38 = vpop.eup %9903  ;;  %6773 = vst [vmem:[%s11342_s16 + $0x730] sm:$0xff] %v6173_v11  ;;  %v5631_v14 = vmul.f32 0.5, %v9902_v46  ;;  %9919 = vtanh.f32 %v4553_v6  ;;  %v4554_v40 = vmul.f32 0.5, %v3795_v20  ;;  %v4611_v0 = vmul.f32 0.5, %v3714_v32  ;;  %v14229_v12 = vpop.f32.mrb[42].mxu1  ;;  %v16232_v11 = vld [vmem:[#allocation36_spill] sm:$0xff] }
 0x434   : > { %v9906_v62 = vpop.eup %9905  ;;  %6772 = vst [vmem:[%s11342_s16 + $0x728] sm:$0xff] %v6172_v63  ;;  %v6174_v18 = vadd.f32 0.5, %v5574_v28  ;;  %v5633_v25 = vmul.f32 0.5, %v9904_v38  ;;  %9921 = vtanh.f32 %v4552_v9  ;;  %v3797_v49 = vadd.f32 %v13789_v10, %v15803_v26  ;;  %v14236_v20 = vpop.f32.mrb[43].mxu0 }
 0x435   : > { %v9908_v43 = vpop.eup %9907  ;;  %v6231_v21 = vadd.f32 0.5, %v5631_v14  ;;  %v5632_v37 = vmul.f32 0.5, %v9906_v62  ;;  %9923 = vtanh.f32 %v4554_v40  ;;  %v3716_v6 = vadd.f32 %v16232_v11, %v15803_v26  ;;  %16233 = vst [vmem:[#allocation44_spill] sm:$0xff] %v14236_v20  ;;  %v14239_v28 = vpop.f32.mrb[43].mxu1  ;;  %v16235_v40 = vld [vmem:[#allocation61_spill] sm:$0xff] }
 0x436   : > { %v9910_v32 = vpop.eup %9909  ;;  %6774 = vst [vmem:[%s11342_s16 + $0x738] sm:$0xff] %v6174_v18  ;;  %v6233_v46 = vadd.f32 0.5, %v5633_v25  ;;  %v5634_v63 = vmul.f32 0.5, %v9908_v43  ;;  %9925 = vtanh.f32 %v4611_v0  ;;  %v4613_v38 = vmul.f32 0.5, %v3797_v49  ;;  %16234 = vst [vmem:[#allocation10_spill] sm:$0xff] %v14239_v28  ;;  %v16236_v18 = vld [vmem:[#allocation56_spill] sm:$0xff] }
 0x437   : > { %6831 = vst [vmem:[%s11342_s16 + $0x900] sm:$0xff] %v6231_v21  ;;  %v6232_v10 = vadd.f32 0.5, %v5632_v37  ;;  %v5691_v9 = vmul.f32 0.5, %v9910_v32  ;;  %v4612_v14 = vmul.f32 0.5, %v3716_v6  ;;  %v3799_v62 = vadd.f32 %v16235_v40, %v15803_v26  ;;  %v16237_v0 = vld [vmem:[#allocation37_spill] sm:$0xff] }
 0x438   : > { %v9912_v11 = vpop.eup %9911  ;;  %6833 = vst [vmem:[%s11342_s16 + $0x910] sm:$0xff] %v6233_v46  ;;  %v6234_v20 = vadd.f32 0.5, %v5634_v63  ;;  %9927 = vtanh.f32 %v4613_v38  ;;  %v3720_v25 = vadd.f32 %v16236_v18, %v15808_v8  ;;  %v3803_v49 = vadd.f32 %v16237_v0, %v15808_v8  ;;  %v16238_v63 = vld [vmem:[#allocation45_spill] sm:$0xff] }
 0x439   : > { %v9914_v43 = vpop.eup %9913  ;;  %6832 = vst [vmem:[%s11342_s16 + $0x908] sm:$0xff] %v6232_v10  ;;  %v6291_v21 = vadd.f32 0.5, %v5691_v9  ;;  %v5693_v37 = vmul.f32 0.5, %v9912_v11  ;;  %9929 = vtanh.f32 %v4612_v14  ;;  %v4614_v6 = vmul.f32 0.5, %v3799_v62  ;;  %v16239_v0 = vld [vmem:[#allocation57_spill] sm:$0xff]  ;;  %v16240_v9 = vld [vmem:[#allocation46_spill] sm:$0xff] }
 0x43a   : > { %6834 = vst [vmem:[%s11342_s16 + $0x918] sm:$0xff] %v6234_v20  ;;  %v5692_v32 = vmul.f32 0.5, %v9914_v43  ;;  %v4671_v40 = vmul.f32 0.5, %v3720_v25  ;;  %v4673_v46 = vmul.f32 0.5, %v3803_v49  ;;  %v3722_v38 = vadd.f32 %v16238_v63, %v15808_v8 }
 0x43b   : > { %v9916_v28 = vpop.eup %9915  ;;  %6891 = vst [vmem:[%s11342_s16 + $0xae0] sm:$0xff] %v6291_v21  ;;  %v6293_v18 = vadd.f32 0.5, %v5693_v37  ;;  %9931 = vtanh.f32 %v4614_v6  ;;  %v3805_v10 = vadd.f32 %v16239_v0, %v15808_v8  ;;  %v3724_v14 = vadd.f32 %v16240_v9, %v11415_v30 }
 0x43c   : > { %v9918_v62 = vpop.eup %9917  ;;  %v6292_v20 = vadd.f32 0.5, %v5692_v32  ;;  %v5694_v11 = vmul.f32 0.5, %v9916_v28  ;;  %9933 = vtanh.f32 %v4671_v40  ;;  %v4672_v25 = vmul.f32 0.5, %v3722_v38  ;;  %v16241_v38 = vld [vmem:[#allocation58_spill] sm:$0xff] }
 0x43d   : > { %v9920_v49 = vpop.eup %9919  ;;  %6893 = vst [vmem:[%s11342_s16 + $0xaf0] sm:$0xff] %v6293_v18  ;;  %v5751_v43 = vmul.f32 0.5, %v9918_v62  ;;  %9935 = vtanh.f32 %v4673_v46  ;;  %v4674_v21 = vmul.f32 0.5, %v3805_v10  ;;  %v4731_v37 = vmul.f32 0.5, %v3724_v14 }
 0x43e   : > { %v9922_v63 = vpop.eup %9921  ;;  %6892 = vst [vmem:[%s11342_s16 + $0xae8] sm:$0xff] %v6292_v20  ;;  %v6294_v6 = vadd.f32 0.5, %v5694_v11  ;;  %v5753_v0 = vmul.f32 0.5, %v9920_v49  ;;  %9937 = vtanh.f32 %v4672_v25  ;;  %v3807_v9 = vadd.f32 %v13829_v36, %v11415_v30  ;;  %v16242_v25 = vld [vmem:[#allocation59_spill] sm:$0xff] }
 0x43f   : > { %v9924_v32 = vpop.eup %9923  ;;  %v6351_v28 = vadd.f32 0.5, %v5751_v43  ;;  %v5752_v40 = vmul.f32 0.5, %v9922_v63  ;;  %9939 = vtanh.f32 %v4674_v21  ;;  %v3726_v18 = vadd.f32 %v16241_v38, %v11415_v30  ;;  %v16243_v63 = vld [vmem:[#allocation60_spill] sm:$0xff] }
 0x440   : > { %v9926_v46 = vpop.eup %9925  ;;  %6894 = vst [vmem:[%s11342_s16 + $0xaf8] sm:$0xff] %v6294_v6  ;;  %v6353_v10 = vadd.f32 0.5, %v5753_v0  ;;  %v5754_v14 = vmul.f32 0.5, %v9924_v32  ;;  %9941 = vtanh.f32 %v4731_v37  ;;  %v4733_v62 = vmul.f32 0.5, %v3807_v9  ;;  %v16244_v0 = vld [vmem:[#allocation47_spill] sm:$0xff] }
 0x441   : > { %6951 = vst [vmem:[%s11342_s16 + $0xcc0] sm:$0xff] %v6351_v28  ;;  %v6352_v20 = vadd.f32 0.5, %v5752_v40  ;;  %v5811_v11 = vmul.f32 0.5, %v9926_v46  ;;  %v4732_v36 = vmul.f32 0.5, %v3726_v18  ;;  %v3809_v49 = vadd.f32 %v16242_v25, %v11415_v30 }
 0x442   : > { %v9928_v43 = vpop.eup %9927  ;;  %6953 = vst [vmem:[%s11342_s16 + $0xcd0] sm:$0xff] %v6353_v10  ;;  %v6354_v21 = vadd.f32 0.5, %v5754_v14  ;;  %9943 = vtanh.f32 %v4733_v62  ;;  %v3846_v6 = vadd.f32 %v16243_v63, %v11266_v31  ;;  %v3929_v37 = vadd.f32 %v16244_v0, %v11266_v31  ;;  %v16245_v10 = vld [vmem:[#allocation16_spill] sm:$0xff]  ;;  %v16246_v63 = vld [vmem:[#allocation15_spill] sm:$0xff] }
 0x443   : > { %v9930_v9 = vpop.eup %9929  ;;  %6952 = vst [vmem:[%s11342_s16 + $0xcc8] sm:$0xff] %v6352_v20  ;;  %v6411_v32 = vadd.f32 0.5, %v5811_v11  ;;  %v5813_v28 = vmul.f32 0.5, %v9928_v43  ;;  %9945 = vtanh.f32 %v4732_v36  ;;  %v4734_v40 = vmul.f32 0.5, %v3809_v49  ;;  %v16247_v11 = vld [vmem:[#allocation17_spill] sm:$0xff] }
 0x444   : > { %6954 = vst [vmem:[%s11342_s16 + $0xcd8] sm:$0xff] %v6354_v21  ;;  %v5812_v38 = vmul.f32 0.5, %v9930_v9  ;;  %v4195_v18 = vmul.f32 0.5, %v3846_v6  ;;  %v4197_v46 = vmul.f32 0.5, %v3929_v37  ;;  %v3848_v14 = vadd.f32 %v16245_v10, %v11266_v31 }
 0x445   : > { %v9932_v62 = vpop.eup %9931  ;;  %7011 = vst [vmem:[%s11342_s16 + $0xea0] sm:$0xff] %v6411_v32  ;;  %v6413_v25 = vadd.f32 0.5, %v5813_v28  ;;  %9947 = vtanh.f32 %v4734_v40  ;;  %v3931_v20 = vadd.f32 %v16246_v63, %v11266_v31  ;;  %v3850_v36 = vadd.f32 %v16247_v11, %v11251_v44 }
 0x446   : > { %v9934_v49 = vpop.eup %9933  ;;  %v6412_v43 = vadd.f32 0.5, %v5812_v38  ;;  %v5814_v21 = vmul.f32 0.5, %v9932_v62  ;;  %9949 = vtanh.f32 %v4195_v18  ;;  %v4196_v6 = vmul.f32 0.5, %v3848_v14 }
 0x447   : > { %v9936_v0 = vpop.eup %9935  ;;  %7013 = vst [vmem:[%s11342_s16 + $0xeb0] sm:$0xff] %v6413_v25  ;;  %v5871_v37 = vmul.f32 0.5, %v9934_v49  ;;  %9951 = vtanh.f32 %v4197_v46  ;;  %v4198_v9 = vmul.f32 0.5, %v3931_v20  ;;  %v4255_v32 = vmul.f32 0.5, %v3850_v36 }
 0x448   : > { %v9938_v28 = vpop.eup %9937  ;;  %7012 = vst [vmem:[%s11342_s16 + $0xea8] sm:$0xff] %v6412_v43  ;;  %v6414_v40 = vadd.f32 0.5, %v5814_v21  ;;  %v5873_v10 = vmul.f32 0.5, %v9936_v0  ;;  %9953 = vtanh.f32 %v4196_v6  ;;  %v3933_v63 = vadd.f32 %v13869_v59, %v11251_v44  ;;  %v16248_v43 = vld [vmem:[#allocation18_spill] sm:$0xff] }
 0x449   : > { %v9940_v38 = vpop.eup %9939  ;;  %v6471_v62 = vadd.f32 0.5, %v5871_v37  ;;  %v5872_v18 = vmul.f32 0.5, %v9938_v28  ;;  %9955 = vtanh.f32 %v4198_v9  ;;  %v3852_v14 = vadd.f32 %v13876_v24, %v11251_v44  ;;  %v16249_v24 = vld [vmem:[#allocation30_spill] sm:$0xff] }
 0x44a   : > { %v9942_v46 = vpop.eup %9941  ;;  %7014 = vst [vmem:[%s11342_s16 + $0xeb8] sm:$0xff] %v6414_v40  ;;  %v6473_v25 = vadd.f32 0.5, %v5873_v10  ;;  %v5874_v20 = vmul.f32 0.5, %v9940_v38  ;;  %9957 = vtanh.f32 %v4255_v32  ;;  %v4257_v11 = vmul.f32 0.5, %v3933_v63 }
 0x44b   : > { %7071 = vst [vmem:[%s11342_s16 + $0x1080] sm:$0xff] %v6471_v62  ;;  %v6472_v36 = vadd.f32 0.5, %v5872_v18  ;;  %v5931_v49 = vmul.f32 0.5, %v9942_v46  ;;  %v4256_v59 = vmul.f32 0.5, %v3852_v14  ;;  %v3935_v21 = vadd.f32 %v16248_v43, %v11251_v44  ;;  %v16250_v18 = vld [vmem:[#allocation48_spill] sm:$0xff] }
 0x44c   : > { %v9944_v6 = vpop.eup %9943  ;;  %7073 = vst [vmem:[%s11342_s16 + $0x1090] sm:$0xff] %v6473_v25  ;;  %v6474_v0 = vadd.f32 0.5, %v5874_v20  ;;  %9959 = vtanh.f32 %v4257_v11  ;;  %v3856_v37 = vadd.f32 %v16249_v24, %v15817_v42  ;;  %v3939_v9 = vadd.f32 %v13892_v34, %v15817_v42  ;;  %v16251_v34 = vld [vmem:[#allocation49_spill] sm:$0xff] }
 0x44d   : > { %v9946_v32 = vpop.eup %9945  ;;  %7072 = vst [vmem:[%s11342_s16 + $0x1088] sm:$0xff] %v6472_v36  ;;  %v6531_v28 = vadd.f32 0.5, %v5931_v49  ;;  %v5933_v40 = vmul.f32 0.5, %v9944_v6  ;;  %9961 = vtanh.f32 %v4256_v59  ;;  %v4258_v10 = vmul.f32 0.5, %v3935_v21 }
 0x44e   : > { %7074 = vst [vmem:[%s11342_s16 + $0x1098] sm:$0xff] %v6474_v0  ;;  %v5932_v63 = vmul.f32 0.5, %v9946_v32  ;;  %v4315_v38 = vmul.f32 0.5, %v3856_v37  ;;  %v4317_v62 = vmul.f32 0.5, %v3939_v9  ;;  %v3858_v14 = vadd.f32 %v16250_v18, %v15817_v42 }
 0x44f   : > { %v9948_v46 = vpop.eup %9947  ;;  %7131 = vst [vmem:[%s11342_s16 + $0x1260] sm:$0x3f] %v6531_v28  ;;  %v6533_v25 = vadd.f32 0.5, %v5933_v40  ;;  %9963 = vtanh.f32 %v4258_v10  ;;  %v3941_v20 = vadd.f32 %v16251_v34, %v15817_v42  ;;  %v3860_v11 = vadd.f32 %v13906_v13, %v11294_v54 }
 0x450   : > { %v9950_v36 = vpop.eup %9949  ;;  %v6532_v49 = vadd.f32 0.5, %v5932_v63  ;;  %v5934_v59 = vmul.f32 0.5, %v9948_v46  ;;  %9965 = vtanh.f32 %v4315_v38  ;;  %v4316_v43 = vmul.f32 0.5, %v3858_v14  ;;  %v16252_v63 = vld [vmem:[#allocation19_spill] sm:$0xff] }
 0x451   : > { %v9952_v21 = vpop.eup %9951  ;;  %7133 = vst [vmem:[%s11342_s16 + $0x1270] sm:$0x3f] %v6533_v25  ;;  %v5395_v6 = vmul.f32 0.5, %v9950_v36  ;;  %9967 = vtanh.f32 %v4317_v62  ;;  %v4318_v0 = vmul.f32 0.5, %v3941_v20  ;;  %v4375_v24 = vmul.f32 0.5, %v3860_v11  ;;  %v16253_v20 = vld [vmem:[#allocation6_spill] sm:$0xff] }
 0x452   : > { %v9954_v37 = vpop.eup %9953  ;;  %7132 = vst [vmem:[%s11342_s16 + $0x1268] sm:$0x3f] %v6532_v49  ;;  %v6534_v9 = vadd.f32 0.5, %v5934_v59  ;;  %v5397_v32 = vmul.f32 0.5, %v9952_v21  ;;  %9969 = vtanh.f32 %v4316_v43  ;;  %v3943_v13 = vadd.f32 %v13909_v45, %v11294_v54  ;;  %v16254_v59 = vld [vmem:[#allocation31_spill] sm:$0xff] }
 0x453   : > { %v9956_v28 = vpop.eup %9955  ;;  %v5995_v40 = vadd.f32 0.5, %v5395_v6  ;;  %v5396_v10 = vmul.f32 0.5, %v9954_v37  ;;  %9971 = vtanh.f32 %v4318_v0  ;;  %v3862_v38 = vadd.f32 %v16252_v63, %v11294_v54 }
 0x454   : > { %v9958_v62 = vpop.eup %9957  ;;  %7134 = vst [vmem:[%s11342_s16 + $0x1278] sm:$0x3f] %v6534_v9  ;;  %v5997_v18 = vadd.f32 0.5, %v5397_v32  ;;  %v5398_v14 = vmul.f32 0.5, %v9956_v28  ;;  %9973 = vtanh.f32 %v4375_v24  ;;  %v4377_v46 = vmul.f32 0.5, %v3943_v13  ;;  %v16255_v28 = vld [vmem:[#allocation26_spill] sm:$0xff] }
 0x455   : > { %6595 = vst [vmem:[%s11342_s16 + $0x1a0] sm:$0xff] %v5995_v40  ;;  %v5996_v25 = vadd.f32 0.5, %v5396_v10  ;;  %v5455_v34 = vmul.f32 0.5, %v9958_v62  ;;  %v4376_v45 = vmul.f32 0.5, %v3862_v38  ;;  %v3945_v11 = vadd.f32 %v16253_v20, %v11294_v54 }
 0x456   : > { %v9960_v36 = vpop.eup %9959  ;;  %6597 = vst [vmem:[%s11342_s16 + $0x1b0] sm:$0xff] %v5997_v18  ;;  %v5998_v49 = vadd.f32 0.5, %v5398_v14  ;;  %9975 = vtanh.f32 %v4377_v46  ;;  %v3866_v43 = vadd.f32 %v16254_v59, %v11330_v22  ;;  %v3949_v21 = vadd.f32 %v13932_v15, %v11330_v22  ;;  %v16256_v15 = vld [vmem:[#allocation32_spill] sm:$0xff] }
 0x457   : > { %v9962_v6 = vpop.eup %9961  ;;  %6596 = vst [vmem:[%s11342_s16 + $0x1a8] sm:$0xff] %v5996_v25  ;;  %v6055_v0 = vadd.f32 0.5, %v5455_v34  ;;  %v5457_v24 = vmul.f32 0.5, %v9960_v36  ;;  %9977 = vtanh.f32 %v4376_v45  ;;  %v4378_v37 = vmul.f32 0.5, %v3945_v11 }
 0x458   : > { %6598 = vst [vmem:[%s11342_s16 + $0x1b8] sm:$0xff] %v5998_v49  ;;  %v5456_v9 = vmul.f32 0.5, %v9962_v6  ;;  %v4435_v32 = vmul.f32 0.5, %v3866_v43  ;;  %v4437_v13 = vmul.f32 0.5, %v3949_v21  ;;  %v3868_v40 = vadd.f32 %v16255_v28, %v11330_v22 }
 0x459   : > { %v9964_v10 = vpop.eup %9963  ;;  %6655 = vst [vmem:[%s11342_s16 + $0x380] sm:$0xff] %v6055_v0  ;;  %v6057_v63 = vadd.f32 0.5, %v5457_v24  ;;  %9979 = vtanh.f32 %v4378_v37  ;;  %v3951_v38 = vadd.f32 %v16256_v15, %v11330_v22  ;;  %v3870_v62 = vadd.f32 %v13946_v56, %v11349_v58  ;;  %v16257_v15 = vld [vmem:[#allocation27_spill] sm:$0xff] }
 0x45a   : > { %v9966_v18 = vpop.eup %9965  ;;  %v6056_v14 = vadd.f32 0.5, %v5456_v9  ;;  %v5458_v46 = vmul.f32 0.5, %v9964_v10  ;;  %9981 = vtanh.f32 %v4435_v32  ;;  %v4436_v25 = vmul.f32 0.5, %v3868_v40 }
 0x45b   : > { %v9968_v34 = vpop.eup %9967  ;;  %6657 = vst [vmem:[%s11342_s16 + $0x390] sm:$0xff] %v6057_v63  ;;  %v5515_v45 = vmul.f32 0.5, %v9966_v18  ;;  %9983 = vtanh.f32 %v4437_v13  ;;  %v4438_v20 = vmul.f32 0.5, %v3951_v38  ;;  %v4495_v11 = vmul.f32 0.5, %v3870_v62 }
 0x45c   : > { %v9970_v36 = vpop.eup %9969  ;;  %6656 = vst [vmem:[%s11342_s16 + $0x388] sm:$0xff] %v6056_v14  ;;  %v6058_v49 = vadd.f32 0.5, %v5458_v46  ;;  %v5517_v59 = vmul.f32 0.5, %v9968_v34  ;;  %9985 = vtanh.f32 %v4436_v25  ;;  %v3953_v56 = vadd.f32 %v13949_v50, %v11349_v58 }
 0x45d   : > { %v9972_v43 = vpop.eup %9971  ;;  %v6115_v21 = vadd.f32 0.5, %v5515_v45  ;;  %v5516_v6 = vmul.f32 0.5, %v9970_v36  ;;  %9987 = vtanh.f32 %v4438_v20  ;;  %v3872_v0 = vadd.f32 %v13956_v39, %v11349_v58  ;;  %v16258_v45 = vld [vmem:[#allocation33_spill] sm:$0xff]  ;;  %v16259_v36 = vld [vmem:[#allocation28_spill] sm:$0xff] }
 0x45e   : > { %v9974_v24 = vpop.eup %9973  ;;  %6658 = vst [vmem:[%s11342_s16 + $0x398] sm:$0xff] %v6058_v49  ;;  %v6117_v37 = vadd.f32 0.5, %v5517_v59  ;;  %v5518_v9 = vmul.f32 0.5, %v9972_v43  ;;  %9989 = vtanh.f32 %v4495_v11  ;;  %v4497_v32 = vmul.f32 0.5, %v3953_v56 }
 0x45f   : > { %6715 = vst [vmem:[%s11342_s16 + $0x560] sm:$0xff] %v6115_v21  ;;  %v6116_v13 = vadd.f32 0.5, %v5516_v6  ;;  %v5575_v28 = vmul.f32 0.5, %v9974_v24  ;;  %v4496_v50 = vmul.f32 0.5, %v3872_v0  ;;  %v3955_v40 = vadd.f32 %v13959_v41, %v11349_v58 }
 0x460   : > { %v9976_v10 = vpop.eup %9975  ;;  %6717 = vst [vmem:[%s11342_s16 + $0x570] sm:$0xff] %v6117_v37  ;;  %v6118_v63 = vadd.f32 0.5, %v5518_v9  ;;  %9991 = vtanh.f32 %v4497_v32  ;;  %v3876_v39 = vadd.f32 %v13969_v23, %v15832_v35  ;;  %v3959_v38 = vadd.f32 %v16257_v15, %v15832_v35 }
 0x461   : > { %v9978_v62 = vpop.eup %9977  ;;  %6716 = vst [vmem:[%s11342_s16 + $0x568] sm:$0xff] %v6116_v13  ;;  %v6175_v18 = vadd.f32 0.5, %v5575_v28  ;;  %v5577_v14 = vmul.f32 0.5, %v9976_v10  ;;  %9993 = vtanh.f32 %v4496_v50  ;;  %v4498_v46 = vmul.f32 0.5, %v3955_v40 }
 0x462   : > { %6718 = vst [vmem:[%s11342_s16 + $0x578] sm:$0xff] %v6118_v63  ;;  %v5576_v25 = vmul.f32 0.5, %v9978_v62  ;;  %v4555_v41 = vmul.f32 0.5, %v3876_v39  ;;  %v4557_v34 = vmul.f32 0.5, %v3959_v38  ;;  %v3878_v20 = vadd.f32 %v16258_v45, %v15832_v35  ;;  %v16261_v45 = vld [vmem:[#allocation11_spill] sm:$0xff] }
 0x463   : > { %v9980_v11 = vpop.eup %9979  ;;  %6775 = vst [vmem:[%s11342_s16 + $0x740] sm:$0xff] %v6175_v18  ;;  %v6177_v23 = vadd.f32 0.5, %v5577_v14  ;;  %9995 = vtanh.f32 %v4498_v46  ;;  %v3961_v49 = vadd.f32 %v16259_v36, %v15832_v35  ;;  %v3880_v59 = vadd.f32 %v13986_v61, %v15803_v26 }
 0x464   : > { %v9982_v56 = vpop.eup %9981  ;;  %v6176_v43 = vadd.f32 0.5, %v5576_v25  ;;  %v5578_v21 = vmul.f32 0.5, %v9980_v11  ;;  %9997 = vtanh.f32 %v4555_v41  ;;  %v4556_v6 = vmul.f32 0.5, %v3878_v20 }
 0x465   : > { %v9984_v0 = vpop.eup %9983  ;;  %6777 = vst [vmem:[%s11342_s16 + $0x750] sm:$0xff] %v6177_v23  ;;  %v5635_v24 = vmul.f32 0.5, %v9982_v56  ;;  %9999 = vtanh.f32 %v4557_v34  ;;  %v4558_v37 = vmul.f32 0.5, %v3961_v49  ;;  %v4615_v9 = vmul.f32 0.5, %v3880_v59 }
 0x466   : > { %v9986_v32 = vpop.eup %9985  ;;  %6776 = vst [vmem:[%s11342_s16 + $0x748] sm:$0xff] %v6176_v43  ;;  %v6178_v13 = vadd.f32 0.5, %v5578_v21  ;;  %v5637_v28 = vmul.f32 0.5, %v9984_v0  ;;  %10001 = vtanh.f32 %v4556_v6  ;;  %v3963_v61 = vadd.f32 %v13989_v47, %v15803_v26  ;;  %v16262_v43 = vld [vmem:[#allocation12_spill] sm:$0xff] }
 0x467   : > { %v9988_v50 = vpop.eup %9987  ;;  %v6235_v40 = vadd.f32 0.5, %v5635_v24  ;;  %v5636_v10 = vmul.f32 0.5, %v9986_v32  ;;  %10003 = vtanh.f32 %v4558_v37  ;;  %v3882_v63 = vadd.f32 %v13996_v52, %v15803_v26  ;;  %v16260_v52 = vld [vmem:[#allocation22_spill] sm:$0xff] }
 0x468   : > { %v9990_v39 = vpop.eup %9989  ;;  %6778 = vst [vmem:[%s11342_s16 + $0x758] sm:$0xff] %v6178_v13  ;;  %v6237_v15 = vadd.f32 0.5, %v5637_v28  ;;  %v5638_v38 = vmul.f32 0.5, %v9988_v50  ;;  %10005 = vtanh.f32 %v4615_v9  ;;  %v4617_v62 = vmul.f32 0.5, %v3963_v61  ;;  %v16263_v24 = vld [vmem:[#allocation38_spill] sm:$0xff] }
 0x469   : > { %6835 = vst [vmem:[%s11342_s16 + $0x920] sm:$0xff] %v6235_v40  ;;  %v6236_v18 = vadd.f32 0.5, %v5636_v10  ;;  %v5695_v14 = vmul.f32 0.5, %v9990_v39  ;;  %v4616_v47 = vmul.f32 0.5, %v3882_v63  ;;  %v3965_v46 = vadd.f32 %v13999_v48, %v15803_v26 }
 0x46a   : > { %v9992_v25 = vpop.eup %9991  ;;  %6837 = vst [vmem:[%s11342_s16 + $0x930] sm:$0xff] %v6237_v15  ;;  %v6238_v41 = vadd.f32 0.5, %v5638_v38  ;;  %10007 = vtanh.f32 %v4617_v62  ;;  %v3886_v34 = vadd.f32 %v16260_v52, %v15808_v8  ;;  %v3969_v20 = vadd.f32 %v16261_v45, %v15808_v8 }
 0x46b   : > { %v9994_v11 = vpop.eup %9993  ;;  %6836 = vst [vmem:[%s11342_s16 + $0x928] sm:$0xff] %v6236_v18  ;;  %v6295_v23 = vadd.f32 0.5, %v5695_v14  ;;  %v5697_v36 = vmul.f32 0.5, %v9992_v25  ;;  %10009 = vtanh.f32 %v4616_v47  ;;  %v4618_v49 = vmul.f32 0.5, %v3965_v46 }
 0x46c   : > { %6838 = vst [vmem:[%s11342_s16 + $0x938] sm:$0xff] %v6238_v41  ;;  %v5696_v59 = vmul.f32 0.5, %v9994_v11  ;;  %v4675_v48 = vmul.f32 0.5, %v3886_v34  ;;  %v4677_v56 = vmul.f32 0.5, %v3969_v20  ;;  %v3888_v21 = vadd.f32 %v16262_v43, %v15808_v8 }
 0x46d   : > { %v9996_v6 = vpop.eup %9995  ;;  %6895 = vst [vmem:[%s11342_s16 + $0xb00] sm:$0xff] %v6295_v23  ;;  %v6297_v0 = vadd.f32 0.5, %v5697_v36  ;;  %10011 = vtanh.f32 %v4618_v49  ;;  %v3971_v37 = vadd.f32 %v16263_v24, %v15808_v8  ;;  %v3890_v9 = vadd.f32 %v14026_v29, %v11415_v30 }
 0x46e   : > { %v9998_v32 = vpop.eup %9997  ;;  %v6296_v13 = vadd.f32 0.5, %v5696_v59  ;;  %v5698_v28 = vmul.f32 0.5, %v9996_v6  ;;  %10013 = vtanh.f32 %v4675_v48  ;;  %v4676_v61 = vmul.f32 0.5, %v3888_v21 }
 0x46f   : > { %v10000_v50 = vpop.eup %9999  ;;  %6897 = vst [vmem:[%s11342_s16 + $0xb10] sm:$0xff] %v6297_v0  ;;  %v5755_v40 = vmul.f32 0.5, %v9998_v32  ;;  %10015 = vtanh.f32 %v4677_v56  ;;  %v4678_v10 = vmul.f32 0.5, %v3971_v37  ;;  %v4735_v63 = vmul.f32 0.5, %v3890_v9  ;;  %v16265_v0 = vld [vmem:[#allocation39_spill] sm:$0xff] }
 0x470   : > { %v10002_v39 = vpop.eup %10001  ;;  %6896 = vst [vmem:[%s11342_s16 + $0xb08] sm:$0xff] %v6296_v13  ;;  %v6298_v15 = vadd.f32 0.5, %v5698_v28  ;;  %v5757_v38 = vmul.f32 0.5, %v10000_v50  ;;  %10017 = vtanh.f32 %v4676_v61  ;;  %v3973_v29 = vadd.f32 %v14029_v57, %v11415_v30 }
 0x471   : > { %v10004_v62 = vpop.eup %10003  ;;  %v6355_v18 = vadd.f32 0.5, %v5755_v40  ;;  %v5756_v14 = vmul.f32 0.5, %v10002_v39  ;;  %10019 = vtanh.f32 %v4678_v10  ;;  %v3892_v47 = vadd.f32 %v14036_v53, %v11415_v30  ;;  %v16264_v53 = vld [vmem:[#allocation13_spill] sm:$0xff] }
 0x472   : > { %v10006_v46 = vpop.eup %10005  ;;  %6898 = vst [vmem:[%s11342_s16 + $0xb18] sm:$0xff] %v6298_v15  ;;  %v6357_v25 = vadd.f32 0.5, %v5757_v38  ;;  %v5758_v41 = vmul.f32 0.5, %v10004_v62  ;;  %10021 = vtanh.f32 %v4735_v63  ;;  %v4737_v52 = vmul.f32 0.5, %v3973_v29 }
 0x473   : > { %6955 = vst [vmem:[%s11342_s16 + $0xce0] sm:$0xff] %v6355_v18  ;;  %v6356_v34 = vadd.f32 0.5, %v5756_v14  ;;  %v5815_v45 = vmul.f32 0.5, %v10006_v46  ;;  %v4736_v57 = vmul.f32 0.5, %v3892_v47  ;;  %v3975_v20 = vadd.f32 %v14039_v60, %v11415_v30  ;;  %v16267_v47 = vld [vmem:[#allocation40_spill] sm:$0xff] }
 0x474   : > { %v10008_v11 = vpop.eup %10007  ;;  %6957 = vst [vmem:[%s11342_s16 + $0xcf0] sm:$0xff] %v6357_v25  ;;  %v6358_v23 = vadd.f32 0.5, %v5758_v41  ;;  %10023 = vtanh.f32 %v4737_v52  ;;  %v4012_v36 = vadd.f32 %v16264_v53, %v11266_v31  ;;  %v4095_v49 = vadd.f32 %v14052_v55, %v11266_v31  ;;  %v16266_v55 = vld [vmem:[#allocation23_spill] sm:$0xff] }
 0x475   : > { %v10010_v59 = vpop.eup %10009  ;;  %6956 = vst [vmem:[%s11342_s16 + $0xce8] sm:$0xff] %v6356_v34  ;;  %v6415_v48 = vadd.f32 0.5, %v5815_v45  ;;  %v5817_v56 = vmul.f32 0.5, %v10008_v11  ;;  %10025 = vtanh.f32 %v4736_v57  ;;  %v4738_v43 = vmul.f32 0.5, %v3975_v20  ;;  %v16268_v20 = vld [vmem:[#allocation41_spill] sm:$0xff] }
 0x476   : > { %6958 = vst [vmem:[%s11342_s16 + $0xcf8] sm:$0xff] %v6358_v23  ;;  %v5816_v21 = vmul.f32 0.5, %v10010_v59  ;;  %v4199_v60 = vmul.f32 0.5, %v4012_v36  ;;  %v4201_v6 = vmul.f32 0.5, %v4095_v49  ;;  %v4014_v24 = vadd.f32 %v16265_v0, %v11266_v31  ;;  %v16269_v36 = vld [vmem:[#allocation25_spill] sm:$0xff]  ;;  %v16270_v59 = vld [vmem:[#allocation14_spill] sm:$0xff] }
 0x477   : > { %v10012_v37 = vpop.eup %10011  ;;  %7015 = vst [vmem:[%s11342_s16 + $0xec0] sm:$0xff] %v6415_v48  ;;  %v6417_v9 = vadd.f32 0.5, %v5817_v56  ;;  %10027 = vtanh.f32 %v4738_v43  ;;  %v4097_v32 = vadd.f32 %v16266_v55, %v11266_v31  ;;  %v4016_v13 = vadd.f32 %v14066_v3, %v11251_v44 }
 0x478   : > { %v10014_v28 = vpop.eup %10013  ;;  %v6416_v61 = vadd.f32 0.5, %v5816_v21  ;;  %v5818_v50 = vmul.f32 0.5, %v10012_v37  ;;  %10029 = vtanh.f32 %v4199_v60  ;;  %v4200_v40 = vmul.f32 0.5, %v4014_v24  ;;  %v16271_v24 = vld [vmem:[#allocation50_spill] sm:$0xff] }
 0x479   : > { %v10016_v10 = vpop.eup %10015  ;;  %7017 = vst [vmem:[%s11342_s16 + $0xed0] sm:$0xff] %v6417_v9  ;;  %v5875_v63 = vmul.f32 0.5, %v10014_v28  ;;  %10031 = vtanh.f32 %v4201_v6  ;;  %v4202_v39 = vmul.f32 0.5, %v4097_v32  ;;  %v4259_v15 = vmul.f32 0.5, %v4016_v13  ;;  %v16272_v32 = vld [vmem:[#allocation29_spill] sm:$0xff] }
 0x47a   : > { %v10018_v38 = vpop.eup %10017  ;;  %7016 = vst [vmem:[%s11342_s16 + $0xec8] sm:$0xff] %v6416_v61  ;;  %v6418_v29 = vadd.f32 0.5, %v5818_v50  ;;  %v5877_v31 = vmul.f32 0.5, %v10016_v10  ;;  %10033 = vtanh.f32 %v4200_v40  ;;  %v4099_v3 = vadd.f32 %v14069_v16, %v11251_v44 }
 0x47b   : > { %v10020_v62 = vpop.eup %10019  ;;  %v6475_v18 = vadd.f32 0.5, %v5875_v63  ;;  %v5876_v14 = vmul.f32 0.5, %v10018_v38  ;;  %10035 = vtanh.f32 %v4202_v39  ;;  %v4018_v46 = vadd.f32 %v16267_v47, %v11251_v44  ;;  %v16274_v47 = vld [vmem:[#allocation24_spill] sm:$0xff] }
 0x47c   : > { %v10022_v25 = vpop.eup %10021  ;;  %7018 = vst [vmem:[%s11342_s16 + $0xed8] sm:$0xff] %v6418_v29  ;;  %v6477_v41 = vadd.f32 0.5, %v5877_v31  ;;  %v5878_v52 = vmul.f32 0.5, %v10020_v62  ;;  %10037 = vtanh.f32 %v4259_v15  ;;  %v4261_v34 = vmul.f32 0.5, %v4099_v3 }
 0x47d   : > { %7075 = vst [vmem:[%s11342_s16 + $0x10a0] sm:$0xff] %v6475_v18  ;;  %v6476_v45 = vadd.f32 0.5, %v5876_v14  ;;  %v5935_v57 = vmul.f32 0.5, %v10022_v25  ;;  %v4260_v16 = vmul.f32 0.5, %v4018_v46  ;;  %v4101_v11 = vadd.f32 %v16268_v20, %v11251_v44  ;;  %v16275_v20 = vld [vmem:[#allocation51_spill] sm:$0xff] }
 0x47e   : > { %v10024_v23 = vpop.eup %10023  ;;  %7077 = vst [vmem:[%s11342_s16 + $0x10b0] sm:$0xff] %v6477_v41  ;;  %v6478_v53 = vadd.f32 0.5, %v5878_v52  ;;  %10039 = vtanh.f32 %v4261_v34  ;;  %v4022_v49 = vadd.f32 %v16269_v36, %v15817_v42  ;;  %v4105_v48 = vadd.f32 %v16270_v59, %v15817_v42  ;;  %v16276_v36 = vld [vmem:[#allocation52_spill] sm:$0xff]  ;;  %v16277_v59 = vld [vmem:[#allocation21_spill] sm:$0xff] }
 0x47f   : > { %v10026_v56 = vpop.eup %10025  ;;  %7076 = vst [vmem:[%s11342_s16 + $0x10a8] sm:$0xff] %v6476_v45  ;;  %v6535_v43 = vadd.f32 0.5, %v5935_v57  ;;  %v5937_v21 = vmul.f32 0.5, %v10024_v23  ;;  %10041 = vtanh.f32 %v4260_v16  ;;  %v4262_v60 = vmul.f32 0.5, %v4101_v11 }
 0x480   : > { %7078 = vst [vmem:[%s11342_s16 + $0x10b8] sm:$0xff] %v6478_v53  ;;  %v5936_v6 = vmul.f32 0.5, %v10026_v56  ;;  %v4319_v44 = vmul.f32 0.5, %v4022_v49  ;;  %v4321_v0 = vmul.f32 0.5, %v4105_v48  ;;  %v4024_v37 = vadd.f32 %v16271_v24, %v15817_v42 }
 0x481   : > { %v10028_v9 = vpop.eup %10027  ;;  %7135 = vst [vmem:[%s11342_s16 + $0x1280] sm:$0x3f] %v6535_v43  ;;  %v6537_v55 = vadd.f32 0.5, %v5937_v21  ;;  %10043 = vtanh.f32 %v4262_v60  ;;  %v4107_v13 = vadd.f32 %v16272_v32, %v15817_v42  ;;  %v4026_v28 = vadd.f32 %v14106_v5, %v11294_v54  ;;  %v16273_v5 = vld [vmem:[#allocation20_spill] sm:$0xff] }
 0x482   : > { %v10030_v61 = vpop.eup %10029  ;;  %v6536_v50 = vadd.f32 0.5, %v5936_v6  ;;  %v5938_v40 = vmul.f32 0.5, %v10028_v9  ;;  %10045 = vtanh.f32 %v4319_v44  ;;  %v4320_v10 = vmul.f32 0.5, %v4024_v37 }
 0x483   : > { %v10032_v63 = vpop.eup %10031  ;;  %7137 = vst [vmem:[%s11342_s16 + $0x1290] sm:$0x3f] %v6537_v55  ;;  %v5399_v39 = vmul.f32 0.5, %v10030_v61  ;;  %10047 = vtanh.f32 %v4321_v0  ;;  %v4322_v15 = vmul.f32 0.5, %v4107_v13  ;;  %v4379_v38 = vmul.f32 0.5, %v4026_v28  ;;  %v16278_v0 = vld [vmem:[#allocation7_spill] sm:$0xff] }
 0x484   : > { %v10034_v29 = vpop.eup %10033  ;;  %7136 = vst [vmem:[%s11342_s16 + $0x1288] sm:$0x3f] %v6536_v50  ;;  %v6538_v31 = vadd.f32 0.5, %v5938_v40  ;;  %v5401_v42 = vmul.f32 0.5, %v10032_v63  ;;  %10049 = vtanh.f32 %v4320_v10  ;;  %v4109_v3 = vadd.f32 %v16273_v5, %v11294_v54  ;;  %v16279_v55 = vld [vmem:[#allocation8_spill] sm:$0xff] }
 0x485   : > { %v10036_v62 = vpop.eup %10035  ;;  %v5999_v18 = vadd.f32 0.5, %v5399_v39  ;;  %v5400_v14 = vmul.f32 0.5, %v10034_v29  ;;  %10051 = vtanh.f32 %v4322_v15  ;;  %v4028_v46 = vadd.f32 %v16274_v47, %v11294_v54 }
 0x486   : > { %v10038_v25 = vpop.eup %10037  ;;  %7138 = vst [vmem:[%s11342_s16 + $0x1298] sm:$0x3f] %v6538_v31  ;;  %v6001_v41 = vadd.f32 0.5, %v5401_v42  ;;  %v5402_v52 = vmul.f32 0.5, %v10036_v62  ;;  %10053 = vtanh.f32 %v4379_v38  ;;  %v4381_v34 = vmul.f32 0.5, %v4109_v3 }
 0x487   : > { %6599 = vst [vmem:[%s11342_s16 + $0x1c0] sm:$0xff] %v5999_v18  ;;  %v6000_v45 = vadd.f32 0.5, %v5400_v14  ;;  %v5459_v57 = vmul.f32 0.5, %v10038_v25  ;;  %v4380_v16 = vmul.f32 0.5, %v4028_v46  ;;  %v4111_v11 = vadd.f32 %v16275_v20, %v11294_v54 }
 0x488   : > { %v10040_v23 = vpop.eup %10039  ;;  %6601 = vst [vmem:[%s11342_s16 + $0x1d0] sm:$0xff] %v6001_v41  ;;  %v6002_v53 = vadd.f32 0.5, %v5402_v52  ;;  %10055 = vtanh.f32 %v4381_v34  ;;  %v4032_v49 = vadd.f32 %v16276_v36, %v11330_v22  ;;  %v4115_v48 = vadd.f32 %v16277_v59, %v11330_v22 }
 0x489   : > { %v10042_v56 = vpop.eup %10041  ;;  %6600 = vst [vmem:[%s11342_s16 + $0x1c8] sm:$0xff] %v6000_v45  ;;  %v6059_v43 = vadd.f32 0.5, %v5459_v57  ;;  %v5461_v21 = vmul.f32 0.5, %v10040_v23  ;;  %10057 = vtanh.f32 %v4380_v16  ;;  %v4382_v60 = vmul.f32 0.5, %v4111_v11 }
 0x48a   : > { %6602 = vst [vmem:[%s11342_s16 + $0x1d8] sm:$0xff] %v6002_v53  ;;  %v5460_v6 = vmul.f32 0.5, %v10042_v56  ;;  %v4439_v54 = vmul.f32 0.5, %v4032_v49  ;;  %v4441_v44 = vmul.f32 0.5, %v4115_v48  ;;  %v4034_v24 = vadd.f32 %v16278_v0, %v11330_v22  ;;  %v16280_v53 = vld [vmem:[#allocation9_spill] sm:$0xff] }
 0x48b   : > { %v10044_v37 = vpop.eup %10043  ;;  %6659 = vst [vmem:[%s11342_s16 + $0x3a0] sm:$0xff] %v6059_v43  ;;  %v6061_v9 = vadd.f32 0.5, %v5461_v21  ;;  %10059 = vtanh.f32 %v4382_v60  ;;  %v4117_v32 = vadd.f32 %v16279_v55, %v11330_v22  ;;  %v4036_v13 = vadd.f32 %v14146_v27, %v11349_v58 }
 0x48c   : > { %v10046_v28 = vpop.eup %10045  ;;  %v6060_v61 = vadd.f32 0.5, %v5460_v6  ;;  %v5462_v50 = vmul.f32 0.5, %v10044_v37  ;;  %10061 = vtanh.f32 %v4439_v54  ;;  %v4440_v40 = vmul.f32 0.5, %v4034_v24 }
 0x48d   : > { %v10048_v10 = vpop.eup %10047  ;;  %6661 = vst [vmem:[%s11342_s16 + $0x3b0] sm:$0xff] %v6061_v9  ;;  %v5519_v63 = vmul.f32 0.5, %v10046_v28  ;;  %10063 = vtanh.f32 %v4441_v44  ;;  %v4442_v39 = vmul.f32 0.5, %v4117_v32  ;;  %v4499_v15 = vmul.f32 0.5, %v4036_v13  ;;  %v16282_v13 = vld [vmem:[#allocation42_spill] sm:$0xff] }
 0x48e   : > { %v10050_v38 = vpop.eup %10049  ;;  %6660 = vst [vmem:[%s11342_s16 + $0x3a8] sm:$0xff] %v6060_v61  ;;  %v6062_v29 = vadd.f32 0.5, %v5462_v50  ;;  %v5521_v22 = vmul.f32 0.5, %v10048_v10  ;;  %10065 = vtanh.f32 %v4440_v40  ;;  %v4119_v27 = vadd.f32 %v14149_v4, %v11349_v58 }
 0x48f   : > { %v10052_v31 = vpop.eup %10051  ;;  %v6119_v42 = vadd.f32 0.5, %v5519_v63  ;;  %v5520_v5 = vmul.f32 0.5, %v10050_v38  ;;  %10067 = vtanh.f32 %v4442_v39  ;;  %v4038_v3 = vadd.f32 %v14156_v17, %v11349_v58 }
 0x490   : > { %v10054_v62 = vpop.eup %10053  ;;  %6662 = vst [vmem:[%s11342_s16 + $0x3b8] sm:$0xff] %v6062_v29  ;;  %v6121_v18 = vadd.f32 0.5, %v5521_v22  ;;  %v5522_v14 = vmul.f32 0.5, %v10052_v31  ;;  %10069 = vtanh.f32 %v4499_v15  ;;  %v4501_v47 = vmul.f32 0.5, %v4119_v27  ;;  %v16283_v15 = vld [vmem:[#allocation53_spill] sm:$0xff]  ;;  %v16284_v27 = vld [vmem:[#allocation35_spill] sm:$0xff] }
 0x491   : > { %6719 = vst [vmem:[%s11342_s16 + $0x580] sm:$0xff] %v6119_v42  ;;  %v6120_v46 = vadd.f32 0.5, %v5520_v5  ;;  %v5579_v25 = vmul.f32 0.5, %v10054_v62  ;;  %v4500_v4 = vmul.f32 0.5, %v4038_v3  ;;  %v4121_v41 = vadd.f32 %v14159_v2, %v11349_v58  ;;  %v16285_v42 = vld [vmem:[#allocation54_spill] sm:$0xff] }
 0x492   : > { %v10056_v52 = vpop.eup %10055  ;;  %6721 = vst [vmem:[%s11342_s16 + $0x590] sm:$0xff] %v6121_v18  ;;  %v6122_v34 = vadd.f32 0.5, %v5522_v14  ;;  %10071 = vtanh.f32 %v4501_v47  ;;  %v4042_v17 = vadd.f32 %v14169_v19, %v15832_v35  ;;  %v4125_v45 = vadd.f32 %v14172_v33, %v15832_v35  ;;  %v16281_v33 = vld [vmem:[#allocation34_spill] sm:$0xff] }
 0x493   : > { %v10058_v57 = vpop.eup %10057  ;;  %6720 = vst [vmem:[%s11342_s16 + $0x588] sm:$0xff] %v6120_v46  ;;  %v6179_v16 = vadd.f32 0.5, %v5579_v25  ;;  %v5581_v20 = vmul.f32 0.5, %v10056_v52  ;;  %10073 = vtanh.f32 %v4500_v4  ;;  %v4502_v11 = vmul.f32 0.5, %v4121_v41  ;;  %v16286_v25 = vld [vmem:[#allocation55_spill] sm:$0xff] }
 0x494   : > { %6722 = vst [vmem:[%s11342_s16 + $0x598] sm:$0xff] %v6122_v34  ;;  %v5580_v23 = vmul.f32 0.5, %v10058_v57  ;;  %v4559_v58 = vmul.f32 0.5, %v4042_v17  ;;  %v4561_v2 = vmul.f32 0.5, %v4125_v45  ;;  %v4044_v36 = vadd.f32 %v16280_v53, %v15832_v35  ;;  %v16287_v34 = vld [vmem:[#allocation43_spill] sm:$0xff] }
 0x495   : > { %v10060_v49 = vpop.eup %10059  ;;  %6779 = vst [vmem:[%s11342_s16 + $0x760] sm:$0xff] %v6179_v16  ;;  %v6181_v19 = vadd.f32 0.5, %v5581_v20  ;;  %10075 = vtanh.f32 %v4502_v11  ;;  %v4127_v59 = vadd.f32 %v16281_v33, %v15832_v35  ;;  %v4046_v48 = vadd.f32 %v14186_v51, %v15803_v26 }
 0x496   : > { %v10062_v56 = vpop.eup %10061  ;;  %v6180_v43 = vadd.f32 0.5, %v5580_v23  ;;  %v5582_v21 = vmul.f32 0.5, %v10060_v49  ;;  %10077 = vtanh.f32 %v4559_v58  ;;  %v4560_v60 = vmul.f32 0.5, %v4044_v36 }
 0x497   : > { %v10064_v6 = vpop.eup %10063  ;;  %6781 = vst [vmem:[%s11342_s16 + $0x770] sm:$0xff] %v6181_v19  ;;  %v5639_v54 = vmul.f32 0.5, %v10062_v56  ;;  %10079 = vtanh.f32 %v4561_v2  ;;  %v4562_v44 = vmul.f32 0.5, %v4127_v59  ;;  %v4619_v0 = vmul.f32 0.5, %v4046_v48  ;;  %v16288_v48 = vld [vmem:[#allocation44_spill] sm:$0xff] }
 0x498   : > { %v10066_v24 = vpop.eup %10065  ;;  %6780 = vst [vmem:[%s11342_s16 + $0x768] sm:$0xff] %v6180_v43  ;;  %v6182_v37 = vadd.f32 0.5, %v5582_v21  ;;  %v5641_v35 = vmul.f32 0.5, %v10064_v6  ;;  %10081 = vtanh.f32 %v4560_v60  ;;  %v4129_v51 = vadd.f32 %v14189_v1, %v15803_v26 }
 0x499   : > { %v10068_v9 = vpop.eup %10067  ;;  %v6239_v55 = vadd.f32 0.5, %v5639_v54  ;;  %v5640_v32 = vmul.f32 0.5, %v10066_v24  ;;  %10083 = vtanh.f32 %v4562_v44  ;;  %v4048_v28 = vadd.f32 %v16282_v13, %v15803_v26 }
 0x49a   : > { %v10070_v61 = vpop.eup %10069  ;;  %6782 = vst [vmem:[%s11342_s16 + $0x778] sm:$0xff] %v6182_v37  ;;  %v6241_v50 = vadd.f32 0.5, %v5641_v35  ;;  %v5642_v40 = vmul.f32 0.5, %v10068_v9  ;;  %10085 = vtanh.f32 %v4619_v0  ;;  %v4621_v10 = vmul.f32 0.5, %v4129_v51  ;;  %v16289_v0 = vld [vmem:[#allocation10_spill] sm:$0xff] }
 0x49b   : > { %6839 = vst [vmem:[%s11342_s16 + $0x940] sm:$0xff] %v6239_v55  ;;  %v6240_v63 = vadd.f32 0.5, %v5640_v32  ;;  %v5699_v39 = vmul.f32 0.5, %v10070_v61  ;;  %v4620_v1 = vmul.f32 0.5, %v4048_v28  ;;  %v4131_v38 = vadd.f32 %v16283_v15, %v15803_v26 }
 0x49c   : > { %v10072_v29 = vpop.eup %10071  ;;  %6841 = vst [vmem:[%s11342_s16 + $0x950] sm:$0xff] %v6241_v50  ;;  %v6242_v22 = vadd.f32 0.5, %v5642_v40  ;;  %10087 = vtanh.f32 %v4621_v10  ;;  %v4052_v31 = vadd.f32 %v16284_v27, %v15808_v8  ;;  %v4135_v5 = vadd.f32 %v16285_v42, %v15808_v8 }
 0x49d   : > { %v10074_v3 = vpop.eup %10073  ;;  %6840 = vst [vmem:[%s11342_s16 + $0x948] sm:$0xff] %v6240_v63  ;;  %v6299_v62 = vadd.f32 0.5, %v5699_v39  ;;  %v5701_v18 = vmul.f32 0.5, %v10072_v29  ;;  %10089 = vtanh.f32 %v4620_v1  ;;  %v4622_v14 = vmul.f32 0.5, %v4131_v38 }
 0x49e   : > { %6842 = vst [vmem:[%s11342_s16 + $0x958] sm:$0xff] %v6242_v22  ;;  %v5700_v47 = vmul.f32 0.5, %v10074_v3  ;;  %v4679_v26 = vmul.f32 0.5, %v4052_v31  ;;  %v4681_v46 = vmul.f32 0.5, %v4135_v5  ;;  %v4054_v4 = vadd.f32 %v16286_v25, %v15808_v8 }
 0x49f   : > { %v10076_v41 = vpop.eup %10075  ;;  %6899 = vst [vmem:[%s11342_s16 + $0xb20] sm:$0xff] %v6299_v62  ;;  %v6301_v52 = vadd.f32 0.5, %v5701_v18  ;;  %10091 = vtanh.f32 %v4622_v14  ;;  %v4137_v17 = vadd.f32 %v16287_v34, %v15808_v8  ;;  %v4056_v45 = vadd.f32 %v14226_v7, %v11415_v30 }
 0x4a0   : > { %v10078_v57 = vpop.eup %10077  ;;  %v6300_v16 = vadd.f32 0.5, %v5700_v47  ;;  %v5702_v20 = vmul.f32 0.5, %v10076_v41  ;;  %10093 = vtanh.f32 %v4679_v26  ;;  %v4680_v11 = vmul.f32 0.5, %v4054_v4 }
 0x4a1   : > { %v10080_v23 = vpop.eup %10079  ;;  %6901 = vst [vmem:[%s11342_s16 + $0xb30] sm:$0xff] %v6301_v52  ;;  %v5759_v58 = vmul.f32 0.5, %v10078_v57  ;;  %10095 = vtanh.f32 %v4681_v46  ;;  %v4682_v2 = vmul.f32 0.5, %v4137_v17  ;;  %v4739_v53 = vmul.f32 0.5, %v4056_v45  ;;  %v7167_v17 = vld [vmem:[%s11342_s16] sm:$0xff] (%p16290_p8)  ;;  %v7169_v45 = vld [vmem:[%s11342_s16 + $0x8] sm:$0xff] (%p16290_p8) }
 0x4a2   : > { %v10082_v36 = vpop.eup %10081  ;;  %6900 = vst [vmem:[%s11342_s16 + $0xb28] sm:$0xff] %v6300_v16  ;;  %v6302_v49 = vadd.f32 0.5, %v5702_v20  ;;  %v5761_v8 = vmul.f32 0.5, %v10080_v23  ;;  %10097 = vtanh.f32 %v4680_v11  ;;  %v4139_v7 = vadd.f32 %v14229_v12, %v11415_v30  ;;  %v7171_v57 = vld [vmem:[%s11342_s16 + $0x10] sm:$0xff] (%p16290_p8)  ;;  %v7173_v16 = vld [vmem:[%s11342_s16 + $0x18] sm:$0xff] (%p16290_p8)  ;;  %v7175_v20 = vld [vmem:[%s11342_s16 + $0x20] sm:$0xff] (%p16290_p8) }
 0x4a3   : > { %v10084_v19 = vpop.eup %10083  ;;  %v6359_v33 = vadd.f32 0.5, %v5759_v58  ;;  %v5760_v59 = vmul.f32 0.5, %v10082_v36  ;;  %10099 = vtanh.f32 %v4682_v2  ;;  %v4058_v56 = vadd.f32 %v16288_v48, %v11415_v30  ;;  %v7177_v11 = vld [vmem:[%s11342_s16 + $0x28] sm:$0xff] (%p16290_p8)  ;;  %v7179_v23 = vld [vmem:[%s11342_s16 + $0x30] sm:$0xff] (%p16290_p8)  ;;  %v7181_v58 = vld [vmem:[%s11342_s16 + $0x38] sm:$0xff] (%p16290_p8)  ;;  %7168 = vst [vmem:[%s14535_s24] sm:$0xff] (%p16290_p8), %v7167_v17 }
 0x4a4   : > { %v10086_v43 = vpop.eup %10085  ;;  %6902 = vst [vmem:[%s11342_s16 + $0xb38] sm:$0xff] %v6302_v49  ;;  %v6361_v21 = vadd.f32 0.5, %v5761_v8  ;;  %v5762_v60 = vmul.f32 0.5, %v10084_v19  ;;  %10101 = vtanh.f32 %v4739_v53  ;;  %v4741_v6 = vmul.f32 0.5, %v4139_v7  ;;  %v7183_v2 = vld [vmem:[%s11342_s16 + $0x40] sm:$0xff] (%p16290_p8)  ;;  %7170 = vst [vmem:[%s14535_s24 + $0x8] sm:$0xff] (%p16290_p8), %v7169_v45 }
 0x4a5   : > { %6959 = vst [vmem:[%s11342_s16 + $0xd00] sm:$0xff] %v6359_v33  ;;  %v6360_v54 = vadd.f32 0.5, %v5760_v59  ;;  %v5819_v44 = vmul.f32 0.5, %v10086_v43  ;;  %v4740_v12 = vmul.f32 0.5, %v4058_v56  ;;  %v4141_v24 = vadd.f32 %v16289_v0, %v11415_v30  ;;  %7172 = vst [vmem:[%s14535_s24 + $0x10] sm:$0xff] (%p16290_p8), %v7171_v57  ;;  %v7185_v53 = vld [vmem:[%s11342_s16 + $0x48] sm:$0xff] (%p16290_p8) }
 0x4a6   : > { %v10088_v37 = vpop.eup %10087  ;;  %6961 = vst [vmem:[%s11342_s16 + $0xd10] sm:$0xff] %v6361_v21  ;;  %v6362_v35 = vadd.f32 0.5, %v5762_v60  ;;  %10103 = vtanh.f32 %v4741_v6  ;;  %7174 = vst [vmem:[%s14535_s24 + $0x18] sm:$0xff] (%p16290_p8), %v7173_v16  ;;  %v7187_v36 = vld [vmem:[%s11342_s16 + $0x50] sm:$0xff] (%p16290_p8)  ;;  %v7189_v49 = vld [vmem:[%s11342_s16 + $0x58] sm:$0xff] (%p16290_p8) }
 0x4a7   : > { %v10090_v51 = vpop.eup %10089  ;;  %6960 = vst [vmem:[%s11342_s16 + $0xd08] sm:$0xff] %v6360_v54  ;;  %v6419_v9 = vadd.f32 0.5, %v5819_v44  ;;  %v5821_v55 = vmul.f32 0.5, %v10088_v37  ;;  %10105 = vtanh.f32 %v4740_v12  ;;  %v4742_v32 = vmul.f32 0.5, %v4141_v24  ;;  %7176 = vst [vmem:[%s14535_s24 + $0x20] sm:$0xff] (%p16290_p8), %v7175_v20  ;;  %v7191_v8 = vld [vmem:[%s11342_s16 + $0x60] sm:$0xff] (%p16290_p8) }
 0x4a8   : > { %6962 = vst [vmem:[%s11342_s16 + $0xd18] sm:$0xff] %v6362_v35  ;;  %v5820_v13 = vmul.f32 0.5, %v10090_v51  ;;  %7178 = vst [vmem:[%s14535_s24 + $0x28] sm:$0xff] (%p16290_p8), %v7177_v11  ;;  %v7193_v7 = vld [vmem:[%s11342_s16 + $0x68] sm:$0xff] (%p16290_p8)  ;;  %v7195_v19 = vld [vmem:[%s11342_s16 + $0x70] sm:$0xff] (%p16290_p8) }
 0x4a9   : > { %v10092_v28 = vpop.eup %10091  ;;  %7019 = vst [vmem:[%s11342_s16 + $0xee0] sm:$0xff] %v6419_v9  ;;  %v6421_v61 = vadd.f32 0.5, %v5821_v55  ;;  %10107 = vtanh.f32 %v4742_v32  ;;  %7180 = vst [vmem:[%s14535_s24 + $0x30] sm:$0xff] (%p16290_p8), %v7179_v23  ;;  %v7197_v33 = vld [vmem:[%s11342_s16 + $0x78] sm:$0xff] (%p16290_p8)  ;;  %v7199_v59 = vld [vmem:[%s11342_s16 + $0x80] sm:$0xff] (%p16290_p8) }
 0x4aa   : > { %v10094_v30 = vpop.eup %10093  ;;  %v6420_v50 = vadd.f32 0.5, %v5820_v13  ;;  %v5822_v40 = vmul.f32 0.5, %v10092_v28  ;;  %7182 = vst [vmem:[%s14535_s24 + $0x38] sm:$0xff] (%p16290_p8), %v7181_v58  ;;  %7184 = vst [vmem:[%s14535_s24 + $0x40] sm:$0xff] (%p16290_p8), %v7183_v2  ;;  %v7201_v48 = vld [vmem:[%s11342_s16 + $0x88] sm:$0xff] (%p16290_p8)  ;;  %v7203_v56 = vld [vmem:[%s11342_s16 + $0x90] sm:$0xff] (%p16290_p8) }
 0x4ab   : > { %v10096_v10 = vpop.eup %10095  ;;  %7021 = vst [vmem:[%s11342_s16 + $0xef0] sm:$0xff] %v6421_v61  ;;  %v5879_v63 = vmul.f32 0.5, %v10094_v30  ;;  %7186 = vst [vmem:[%s14535_s24 + $0x48] sm:$0xff] (%p16290_p8), %v7185_v53  ;;  %v7205_v43 = vld [vmem:[%s11342_s16 + $0x98] sm:$0xff] (%p16290_p8)  ;;  %v7207_v21 = vld [vmem:[%s11342_s16 + $0xa0] sm:$0xff] (%p16290_p8) }
 0x4ac   : > { %v10098_v39 = vpop.eup %10097  ;;  %7020 = vst [vmem:[%s11342_s16 + $0xee8] sm:$0xff] %v6420_v50  ;;  %v6422_v1 = vadd.f32 0.5, %v5822_v40  ;;  %v5881_v15 = vmul.f32 0.5, %v10096_v10  ;;  %7188 = vst [vmem:[%s14535_s24 + $0x50] sm:$0xff] (%p16290_p8), %v7187_v36  ;;  %v7209_v60 = vld [vmem:[%s11342_s16 + $0xa8] sm:$0xff] (%p16290_p8)  ;;  %v7211_v6 = vld [vmem:[%s11342_s16 + $0xb0] sm:$0xff] (%p16290_p8) }
 0x4ad   : > { %v10100_v38 = vpop.eup %10099  ;;  %v6479_v29 = vadd.f32 0.5, %v5879_v63  ;;  %v5880_v22 = vmul.f32 0.5, %v10098_v39  ;;  %7190 = vst [vmem:[%s14535_s24 + $0x58] sm:$0xff] (%p16290_p8), %v7189_v49  ;;  %7192 = vst [vmem:[%s14535_s24 + $0x60] sm:$0xff] (%p16290_p8), %v7191_v8  ;;  %v7213_v54 = vld [vmem:[%s11342_s16 + $0xb8] sm:$0xff] (%p16290_p8)  ;;  %v7215_v44 = vld [vmem:[%s11342_s16 + $0xc0] sm:$0xff] (%p16290_p8) }
 0x4ae   : > { %v10102_v27 = vpop.eup %10101  ;;  %7022 = vst [vmem:[%s11342_s16 + $0xef8] sm:$0xff] %v6422_v1  ;;  %v6481_v31 = vadd.f32 0.5, %v5881_v15  ;;  %v5882_v42 = vmul.f32 0.5, %v10100_v38  ;;  %7194 = vst [vmem:[%s14535_s24 + $0x68] sm:$0xff] (%p16290_p8), %v7193_v7  ;;  %v7217_v12 = vld [vmem:[%s11342_s16 + $0xc8] sm:$0xff] (%p16290_p8)  ;;  %v7219_v0 = vld [vmem:[%s11342_s16 + $0xd0] sm:$0xff] (%p16290_p8) }
 0x4af   : > { %7079 = vst [vmem:[%s11342_s16 + $0x10c0] sm:$0xff] %v6479_v29  ;;  %v6480_v5 = vadd.f32 0.5, %v5880_v22  ;;  %v5939_v3 = vmul.f32 0.5, %v10102_v27  ;;  %7196 = vst [vmem:[%s14535_s24 + $0x70] sm:$0xff] (%p16290_p8), %v7195_v19  ;;  %v7221_v24 = vld [vmem:[%s11342_s16 + $0xd8] sm:$0xff] (%p16290_p8)  ;;  %v7223_v37 = vld [vmem:[%s11342_s16 + $0xe0] sm:$0xff] (%p16290_p8) }
 0x4b0   : > { %v10104_v62 = vpop.eup %10103  ;;  %7081 = vst [vmem:[%s11342_s16 + $0x10d0] sm:$0xff] %v6481_v31  ;;  %v6482_v18 = vadd.f32 0.5, %v5882_v42  ;;  %7198 = vst [vmem:[%s14535_s24 + $0x78] sm:$0xff] (%p16290_p8), %v7197_v33  ;;  %v7225_v35 = vld [vmem:[%s11342_s16 + $0xe8] sm:$0xff] (%p16290_p8)  ;;  %v7227_v51 = vld [vmem:[%s11342_s16 + $0xf0] sm:$0xff] (%p16290_p8) }
 0x4b1   : > { %v10106_v14 = vpop.eup %10105  ;;  %7080 = vst [vmem:[%s11342_s16 + $0x10c8] sm:$0xff] %v6480_v5  ;;  %v6539_v47 = vadd.f32 0.5, %v5939_v3  ;;  %v5941_v26 = vmul.f32 0.5, %v10104_v62  ;;  %7200 = vst [vmem:[%s14535_s24 + $0x80] sm:$0xff] (%p16290_p8), %v7199_v59  ;;  %v7229_v9 = vld [vmem:[%s11342_s16 + $0xf8] sm:$0xff] (%p16290_p8)  ;;  %v7231_v55 = vld [vmem:[%s11342_s16 + $0x100] sm:$0xff] (%p16290_p8) }
 0x4b2   : > { %7082 = vst [vmem:[%s11342_s16 + $0x10d8] sm:$0xff] %v6482_v18  ;;  %v5940_v46 = vmul.f32 0.5, %v10106_v14  ;;  %7149 = sbr.rel (!%p16290_p8) target bundleno = 1496 (0x5d8), region = 48  ;;  %7202 = vst [vmem:[%s14535_s24 + $0x88] sm:$0xff] (%p16290_p8), %v7201_v48  ;;  %v7233_v32 = vld [vmem:[%s11342_s16 + $0x108] sm:$0xff] (%p16290_p8)  ;;  %v7235_v13 = vld [vmem:[%s11342_s16 + $0x110] sm:$0xff] (%p16290_p8) }
 0x4b3   : > { %v10108_v25 = vpop.eup %10107  ;;  %7139 = vst [vmem:[%s11342_s16 + $0x12a0] sm:$0x3f] %v6539_v47  ;;  %v6541_v4 = vadd.f32 0.5, %v5941_v26  ;;  %7204 = vst [vmem:[%s14535_s24 + $0x90] sm:$0xff] (%p16290_p8), %v7203_v56  ;;  %v7237_v28 = vld [vmem:[%s11342_s16 + $0x118] sm:$0xff] (%p16290_p8)  ;;  %v7239_v61 = vld [vmem:[%s11342_s16 + $0x120] sm:$0xff] (%p16290_p8) }
 0x4b4   : > { %v6540_v41 = vadd.f32 0.5, %v5940_v46  ;;  %v5942_v52 = vmul.f32 0.5, %v10108_v25  ;;  %7206 = vst [vmem:[%s14535_s24 + $0x98] sm:$0xff] (%p16290_p8), %v7205_v43  ;;  %7208 = vst [vmem:[%s14535_s24 + $0xa0] sm:$0xff] (%p16290_p8), %v7207_v21  ;;  %v7241_v30 = vld [vmem:[%s11342_s16 + $0x128] sm:$0xff] (%p16290_p8)  ;;  %v7243_v50 = vld [vmem:[%s11342_s16 + $0x130] sm:$0xff] (%p16290_p8) }
 0x4b5   : > { %7141 = vst [vmem:[%s11342_s16 + $0x12b0] sm:$0x3f] %v6541_v4  ;;  %7210 = vst [vmem:[%s14535_s24 + $0xa8] sm:$0xff] (%p16290_p8), %v7209_v60  ;;  %v7245_v40 = vld [vmem:[%s11342_s16 + $0x138] sm:$0xff] (%p16290_p8)  ;;  %v7247_v10 = vld [vmem:[%s11342_s16 + $0x140] sm:$0xff] (%p16290_p8) }
 0x4b6   : > { %7140 = vst [vmem:[%s11342_s16 + $0x12a8] sm:$0x3f] %v6540_v41  ;;  %v6542_v34 = vadd.f32 0.5, %v5942_v52  ;;  %7212 = vst [vmem:[%s14535_s24 + $0xb0] sm:$0xff] (%p16290_p8), %v7211_v6  ;;  %v7249_v63 = vld [vmem:[%s11342_s16 + $0x148] sm:$0xff] (%p16290_p8)  ;;  %v7251_v39 = vld [vmem:[%s11342_s16 + $0x150] sm:$0xff] (%p16290_p8) }
 0x4b7   : > { %7214 = vst [vmem:[%s14535_s24 + $0xb8] sm:$0xff] (%p16290_p8), %v7213_v54  ;;  %7216 = vst [vmem:[%s14535_s24 + $0xc0] sm:$0xff] (%p16290_p8), %v7215_v44  ;;  %v7253_v1 = vld [vmem:[%s11342_s16 + $0x158] sm:$0xff] (%p16290_p8)  ;;  %v7255_v15 = vld [vmem:[%s11342_s16 + $0x160] sm:$0xff] (%p16290_p8) }
 0x4b8   : > { %7142 = vst [vmem:[%s11342_s16 + $0x12b8] sm:$0x3f] %v6542_v34  ;;  %7218 = vst [vmem:[%s14535_s24 + $0xc8] sm:$0xff] (%p16290_p8), %v7217_v12  ;;  %v7257_v38 = vld [vmem:[%s11342_s16 + $0x168] sm:$0xff] (%p16290_p8)  ;;  %v7259_v29 = vld [vmem:[%s11342_s16 + $0x170] sm:$0xff] (%p16290_p8) }
 0x4b9   : > { %7220 = vst [vmem:[%s14535_s24 + $0xd0] sm:$0xff] %v7219_v0  ;;  %7222 = vst [vmem:[%s14535_s24 + $0xd8] sm:$0xff] %v7221_v24  ;;  %v7261_v22 = vld [vmem:[%s11342_s16 + $0x178] sm:$0xff]  ;;  %v7263_v27 = vld [vmem:[%s11342_s16 + $0x180] sm:$0xff] }
 0x4ba   : > { %7224 = vst [vmem:[%s14535_s24 + $0xe0] sm:$0xff] %v7223_v37  ;;  %7226 = vst [vmem:[%s14535_s24 + $0xe8] sm:$0xff] %v7225_v35  ;;  %v7265_v31 = vld [vmem:[%s11342_s16 + $0x188] sm:$0xff]  ;;  %v7267_v42 = vld [vmem:[%s11342_s16 + $0x190] sm:$0xff] }
 0x4bb   : > { %7228 = vst [vmem:[%s14535_s24 + $0xf0] sm:$0xff] %v7227_v51  ;;  %7230 = vst [vmem:[%s14535_s24 + $0xf8] sm:$0xff] %v7229_v9  ;;  %v7269_v5 = vld [vmem:[%s11342_s16 + $0x198] sm:$0xff]  ;;  %v7271_v3 = vld [vmem:[%s11342_s16 + $0x1a0] sm:$0xff] }
 0x4bc   : > { %7232 = vst [vmem:[%s14535_s24 + $0x100] sm:$0xff] %v7231_v55  ;;  %7234 = vst [vmem:[%s14535_s24 + $0x108] sm:$0xff] %v7233_v32  ;;  %v7273_v62 = vld [vmem:[%s11342_s16 + $0x1a8] sm:$0xff]  ;;  %v7275_v18 = vld [vmem:[%s11342_s16 + $0x1b0] sm:$0xff] }
 0x4bd   : > { %7236 = vst [vmem:[%s14535_s24 + $0x110] sm:$0xff] %v7235_v13  ;;  %7238 = vst [vmem:[%s14535_s24 + $0x118] sm:$0xff] %v7237_v28  ;;  %v7277_v14 = vld [vmem:[%s11342_s16 + $0x1b8] sm:$0xff]  ;;  %v7279_v47 = vld [vmem:[%s11342_s16 + $0x1c0] sm:$0xff] }
 0x4be   : > { %7240 = vst [vmem:[%s14535_s24 + $0x120] sm:$0xff] %v7239_v61  ;;  %7242 = vst [vmem:[%s14535_s24 + $0x128] sm:$0xff] %v7241_v30  ;;  %v7281_v26 = vld [vmem:[%s11342_s16 + $0x1c8] sm:$0xff]  ;;  %v7283_v46 = vld [vmem:[%s11342_s16 + $0x1d0] sm:$0xff] }
 0x4bf   : > { %7244 = vst [vmem:[%s14535_s24 + $0x130] sm:$0xff] %v7243_v50  ;;  %7246 = vst [vmem:[%s14535_s24 + $0x138] sm:$0xff] %v7245_v40  ;;  %v7285_v25 = vld [vmem:[%s11342_s16 + $0x1d8] sm:$0xff]  ;;  %v7287_v4 = vld [vmem:[%s11342_s16 + $0x1e0] sm:$0xff] }
 0x4c0   : > { %7248 = vst [vmem:[%s14535_s24 + $0x140] sm:$0xff] %v7247_v10  ;;  %7250 = vst [vmem:[%s14535_s24 + $0x148] sm:$0xff] %v7249_v63  ;;  %v7289_v41 = vld [vmem:[%s11342_s16 + $0x1e8] sm:$0xff]  ;;  %v7291_v52 = vld [vmem:[%s11342_s16 + $0x1f0] sm:$0xff] }
 0x4c1   : > { %7252 = vst [vmem:[%s14535_s24 + $0x150] sm:$0xff] %v7251_v39  ;;  %7254 = vst [vmem:[%s14535_s24 + $0x158] sm:$0xff] %v7253_v1  ;;  %v7293_v34 = vld [vmem:[%s11342_s16 + $0x1f8] sm:$0xff]  ;;  %v7295_v17 = vld [vmem:[%s11342_s16 + $0x200] sm:$0xff] }
 0x4c2   : > { %7256 = vst [vmem:[%s14535_s24 + $0x160] sm:$0xff] %v7255_v15  ;;  %7258 = vst [vmem:[%s14535_s24 + $0x168] sm:$0xff] %v7257_v38  ;;  %v7297_v45 = vld [vmem:[%s11342_s16 + $0x208] sm:$0xff]  ;;  %v7299_v57 = vld [vmem:[%s11342_s16 + $0x210] sm:$0xff] }
 0x4c3   : > { %7260 = vst [vmem:[%s14535_s24 + $0x170] sm:$0xff] %v7259_v29  ;;  %7262 = vst [vmem:[%s14535_s24 + $0x178] sm:$0xff] %v7261_v22  ;;  %v7301_v16 = vld [vmem:[%s11342_s16 + $0x218] sm:$0xff]  ;;  %v7303_v20 = vld [vmem:[%s11342_s16 + $0x220] sm:$0xff] }
 0x4c4   : > { %7264 = vst [vmem:[%s14535_s24 + $0x180] sm:$0xff] %v7263_v27  ;;  %7266 = vst [vmem:[%s14535_s24 + $0x188] sm:$0xff] %v7265_v31  ;;  %v7305_v11 = vld [vmem:[%s11342_s16 + $0x228] sm:$0xff]  ;;  %v7307_v23 = vld [vmem:[%s11342_s16 + $0x230] sm:$0xff] }
 0x4c5   : > { %7268 = vst [vmem:[%s14535_s24 + $0x190] sm:$0xff] %v7267_v42  ;;  %7270 = vst [vmem:[%s14535_s24 + $0x198] sm:$0xff] %v7269_v5  ;;  %v7309_v58 = vld [vmem:[%s11342_s16 + $0x238] sm:$0xff]  ;;  %v7311_v2 = vld [vmem:[%s11342_s16 + $0x240] sm:$0xff] }
 0x4c6   : > { %7272 = vst [vmem:[%s14535_s24 + $0x1a0] sm:$0xff] %v7271_v3  ;;  %7274 = vst [vmem:[%s14535_s24 + $0x1a8] sm:$0xff] %v7273_v62  ;;  %v7313_v53 = vld [vmem:[%s11342_s16 + $0x248] sm:$0xff]  ;;  %v7315_v36 = vld [vmem:[%s11342_s16 + $0x250] sm:$0xff] }
 0x4c7   : > { %7276 = vst [vmem:[%s14535_s24 + $0x1b0] sm:$0xff] %v7275_v18  ;;  %7278 = vst [vmem:[%s14535_s24 + $0x1b8] sm:$0xff] %v7277_v14  ;;  %v7317_v49 = vld [vmem:[%s11342_s16 + $0x258] sm:$0xff]  ;;  %v7319_v8 = vld [vmem:[%s11342_s16 + $0x260] sm:$0xff] }
 0x4c8   : > { %7280 = vst [vmem:[%s14535_s24 + $0x1c0] sm:$0xff] %v7279_v47  ;;  %7282 = vst [vmem:[%s14535_s24 + $0x1c8] sm:$0xff] %v7281_v26  ;;  %v7321_v7 = vld [vmem:[%s11342_s16 + $0x268] sm:$0xff]  ;;  %v7323_v19 = vld [vmem:[%s11342_s16 + $0x270] sm:$0xff] }
 0x4c9   : > { %7284 = vst [vmem:[%s14535_s24 + $0x1d0] sm:$0xff] %v7283_v46  ;;  %7286 = vst [vmem:[%s14535_s24 + $0x1d8] sm:$0xff] %v7285_v25  ;;  %v7325_v33 = vld [vmem:[%s11342_s16 + $0x278] sm:$0xff]  ;;  %v7327_v59 = vld [vmem:[%s11342_s16 + $0x280] sm:$0xff] }
 0x4ca   : > { %7288 = vst [vmem:[%s14535_s24 + $0x780] sm:$0xff] %v7287_v4  ;;  %7290 = vst [vmem:[%s14535_s24 + $0x788] sm:$0xff] %v7289_v41  ;;  %v7329_v48 = vld [vmem:[%s11342_s16 + $0x288] sm:$0xff]  ;;  %v7331_v56 = vld [vmem:[%s11342_s16 + $0x290] sm:$0xff] }
 0x4cb   : > { %7292 = vst [vmem:[%s14535_s24 + $0x790] sm:$0xff] %v7291_v52  ;;  %7294 = vst [vmem:[%s14535_s24 + $0x798] sm:$0xff] %v7293_v34  ;;  %v7333_v43 = vld [vmem:[%s11342_s16 + $0x298] sm:$0xff]  ;;  %v7335_v21 = vld [vmem:[%s11342_s16 + $0x2a0] sm:$0xff] }
 0x4cc   : > { %7296 = vst [vmem:[%s14535_s24 + $0x7a0] sm:$0xff] %v7295_v17  ;;  %7298 = vst [vmem:[%s14535_s24 + $0x7a8] sm:$0xff] %v7297_v45  ;;  %v7337_v60 = vld [vmem:[%s11342_s16 + $0x2a8] sm:$0xff]  ;;  %v7339_v6 = vld [vmem:[%s11342_s16 + $0x2b0] sm:$0xff] }
 0x4cd   : > { %7300 = vst [vmem:[%s14535_s24 + $0x7b0] sm:$0xff] %v7299_v57  ;;  %7302 = vst [vmem:[%s14535_s24 + $0x7b8] sm:$0xff] %v7301_v16  ;;  %v7341_v54 = vld [vmem:[%s11342_s16 + $0x2b8] sm:$0xff]  ;;  %v7343_v44 = vld [vmem:[%s11342_s16 + $0x2c0] sm:$0xff] }
 0x4ce   : > { %7304 = vst [vmem:[%s14535_s24 + $0x7c0] sm:$0xff] %v7303_v20  ;;  %7306 = vst [vmem:[%s14535_s24 + $0x7c8] sm:$0xff] %v7305_v11  ;;  %v7345_v12 = vld [vmem:[%s11342_s16 + $0x2c8] sm:$0xff]  ;;  %v7347_v0 = vld [vmem:[%s11342_s16 + $0x2d0] sm:$0xff] }
 0x4cf   : > { %7308 = vst [vmem:[%s14535_s24 + $0x7d0] sm:$0xff] %v7307_v23  ;;  %7310 = vst [vmem:[%s14535_s24 + $0x7d8] sm:$0xff] %v7309_v58  ;;  %v7349_v24 = vld [vmem:[%s11342_s16 + $0x2d8] sm:$0xff]  ;;  %v7351_v37 = vld [vmem:[%s11342_s16 + $0x2e0] sm:$0xff] }
 0x4d0   : > { %7312 = vst [vmem:[%s14535_s24 + $0x7e0] sm:$0xff] %v7311_v2  ;;  %7314 = vst [vmem:[%s14535_s24 + $0x7e8] sm:$0xff] %v7313_v53  ;;  %v7353_v35 = vld [vmem:[%s11342_s16 + $0x2e8] sm:$0xff]  ;;  %v7355_v51 = vld [vmem:[%s11342_s16 + $0x2f0] sm:$0xff] }
 0x4d1   : > { %7316 = vst [vmem:[%s14535_s24 + $0x7f0] sm:$0xff] %v7315_v36  ;;  %7318 = vst [vmem:[%s14535_s24 + $0x7f8] sm:$0xff] %v7317_v49  ;;  %v7357_v9 = vld [vmem:[%s11342_s16 + $0x2f8] sm:$0xff]  ;;  %v7359_v55 = vld [vmem:[%s11342_s16 + $0x300] sm:$0xff] }
 0x4d2   : > { %7320 = vst [vmem:[%s14535_s24 + $0x800] sm:$0xff] %v7319_v8  ;;  %7322 = vst [vmem:[%s14535_s24 + $0x808] sm:$0xff] %v7321_v7  ;;  %v7361_v32 = vld [vmem:[%s11342_s16 + $0x308] sm:$0xff]  ;;  %v7363_v13 = vld [vmem:[%s11342_s16 + $0x310] sm:$0xff] }
 0x4d3   : > { %7324 = vst [vmem:[%s14535_s24 + $0x810] sm:$0xff] %v7323_v19  ;;  %7326 = vst [vmem:[%s14535_s24 + $0x818] sm:$0xff] %v7325_v33  ;;  %v7365_v28 = vld [vmem:[%s11342_s16 + $0x318] sm:$0xff]  ;;  %v7367_v61 = vld [vmem:[%s11342_s16 + $0x320] sm:$0xff] }
 0x4d4   : > { %7328 = vst [vmem:[%s14535_s24 + $0x820] sm:$0xff] %v7327_v59  ;;  %7330 = vst [vmem:[%s14535_s24 + $0x828] sm:$0xff] %v7329_v48  ;;  %v7369_v30 = vld [vmem:[%s11342_s16 + $0x328] sm:$0xff]  ;;  %v7371_v50 = vld [vmem:[%s11342_s16 + $0x330] sm:$0xff] }
 0x4d5   : > { %7332 = vst [vmem:[%s14535_s24 + $0x830] sm:$0xff] %v7331_v56  ;;  %7334 = vst [vmem:[%s14535_s24 + $0x838] sm:$0xff] %v7333_v43  ;;  %v7373_v40 = vld [vmem:[%s11342_s16 + $0x338] sm:$0xff]  ;;  %v7375_v10 = vld [vmem:[%s11342_s16 + $0x340] sm:$0xff] }
 0x4d6   : > { %7336 = vst [vmem:[%s14535_s24 + $0x840] sm:$0xff] %v7335_v21  ;;  %7338 = vst [vmem:[%s14535_s24 + $0x848] sm:$0xff] %v7337_v60  ;;  %v7377_v63 = vld [vmem:[%s11342_s16 + $0x348] sm:$0xff]  ;;  %v7379_v39 = vld [vmem:[%s11342_s16 + $0x350] sm:$0xff] }
 0x4d7   : > { %7340 = vst [vmem:[%s14535_s24 + $0x850] sm:$0xff] %v7339_v6  ;;  %7342 = vst [vmem:[%s14535_s24 + $0x858] sm:$0xff] %v7341_v54  ;;  %v7381_v1 = vld [vmem:[%s11342_s16 + $0x358] sm:$0xff]  ;;  %v7383_v15 = vld [vmem:[%s11342_s16 + $0x360] sm:$0xff] }
 0x4d8   : > { %7344 = vst [vmem:[%s14535_s24 + $0x860] sm:$0xff] %v7343_v44  ;;  %7346 = vst [vmem:[%s14535_s24 + $0x868] sm:$0xff] %v7345_v12  ;;  %v7385_v38 = vld [vmem:[%s11342_s16 + $0x368] sm:$0xff]  ;;  %v7387_v29 = vld [vmem:[%s11342_s16 + $0x370] sm:$0xff] }
 0x4d9   : > { %7348 = vst [vmem:[%s14535_s24 + $0x870] sm:$0xff] %v7347_v0  ;;  %7350 = vst [vmem:[%s14535_s24 + $0x878] sm:$0xff] %v7349_v24  ;;  %v7389_v22 = vld [vmem:[%s11342_s16 + $0x378] sm:$0xff]  ;;  %v7391_v27 = vld [vmem:[%s11342_s16 + $0x380] sm:$0xff] }
 0x4da   : > { %7352 = vst [vmem:[%s14535_s24 + $0x880] sm:$0xff] %v7351_v37  ;;  %7354 = vst [vmem:[%s14535_s24 + $0x888] sm:$0xff] %v7353_v35  ;;  %v7393_v31 = vld [vmem:[%s11342_s16 + $0x388] sm:$0xff]  ;;  %v7395_v42 = vld [vmem:[%s11342_s16 + $0x390] sm:$0xff] }
 0x4db   : > { %7356 = vst [vmem:[%s14535_s24 + $0x890] sm:$0xff] %v7355_v51  ;;  %7358 = vst [vmem:[%s14535_s24 + $0x898] sm:$0xff] %v7357_v9  ;;  %v7397_v5 = vld [vmem:[%s11342_s16 + $0x398] sm:$0xff]  ;;  %v7399_v3 = vld [vmem:[%s11342_s16 + $0x3a0] sm:$0xff] }
 0x4dc   : > { %7360 = vst [vmem:[%s14535_s24 + $0x8a0] sm:$0xff] %v7359_v55  ;;  %7362 = vst [vmem:[%s14535_s24 + $0x8a8] sm:$0xff] %v7361_v32  ;;  %v7401_v62 = vld [vmem:[%s11342_s16 + $0x3a8] sm:$0xff]  ;;  %v7403_v18 = vld [vmem:[%s11342_s16 + $0x3b0] sm:$0xff] }
 0x4dd   : > { %7364 = vst [vmem:[%s14535_s24 + $0x8b0] sm:$0xff] %v7363_v13  ;;  %7366 = vst [vmem:[%s14535_s24 + $0x8b8] sm:$0xff] %v7365_v28  ;;  %v7405_v14 = vld [vmem:[%s11342_s16 + $0x3b8] sm:$0xff]  ;;  %v7407_v47 = vld [vmem:[%s11342_s16 + $0x3c0] sm:$0xff] }
 0x4de   : > { %7368 = vst [vmem:[%s14535_s24 + $0x8c0] sm:$0xff] %v7367_v61  ;;  %7370 = vst [vmem:[%s14535_s24 + $0x8c8] sm:$0xff] %v7369_v30  ;;  %v7409_v26 = vld [vmem:[%s11342_s16 + $0x3c8] sm:$0xff]  ;;  %v7411_v46 = vld [vmem:[%s11342_s16 + $0x3d0] sm:$0xff] }
 0x4df   : > { %7372 = vst [vmem:[%s14535_s24 + $0x8d0] sm:$0xff] %v7371_v50  ;;  %7374 = vst [vmem:[%s14535_s24 + $0x8d8] sm:$0xff] %v7373_v40  ;;  %v7413_v25 = vld [vmem:[%s11342_s16 + $0x3d8] sm:$0xff]  ;;  %v7415_v4 = vld [vmem:[%s11342_s16 + $0x3e0] sm:$0xff] }
 0x4e0   : > { %7376 = vst [vmem:[%s14535_s24 + $0x8e0] sm:$0xff] %v7375_v10  ;;  %7378 = vst [vmem:[%s14535_s24 + $0x8e8] sm:$0xff] %v7377_v63  ;;  %v7417_v41 = vld [vmem:[%s11342_s16 + $0x3e8] sm:$0xff]  ;;  %v7419_v52 = vld [vmem:[%s11342_s16 + $0x3f0] sm:$0xff] }
 0x4e1   : > { %7380 = vst [vmem:[%s14535_s24 + $0x8f0] sm:$0xff] %v7379_v39  ;;  %7382 = vst [vmem:[%s14535_s24 + $0x8f8] sm:$0xff] %v7381_v1  ;;  %v7421_v34 = vld [vmem:[%s11342_s16 + $0x3f8] sm:$0xff]  ;;  %v7423_v17 = vld [vmem:[%s11342_s16 + $0x400] sm:$0xff] }
 0x4e2   : > { %7384 = vst [vmem:[%s14535_s24 + $0x900] sm:$0xff] %v7383_v15  ;;  %7386 = vst [vmem:[%s14535_s24 + $0x908] sm:$0xff] %v7385_v38  ;;  %v7425_v45 = vld [vmem:[%s11342_s16 + $0x408] sm:$0xff]  ;;  %v7427_v57 = vld [vmem:[%s11342_s16 + $0x410] sm:$0xff] }
 0x4e3   : > { %7388 = vst [vmem:[%s14535_s24 + $0x910] sm:$0xff] %v7387_v29  ;;  %7390 = vst [vmem:[%s14535_s24 + $0x918] sm:$0xff] %v7389_v22  ;;  %v7429_v16 = vld [vmem:[%s11342_s16 + $0x418] sm:$0xff]  ;;  %v7431_v20 = vld [vmem:[%s11342_s16 + $0x420] sm:$0xff] }
 0x4e4   : > { %7392 = vst [vmem:[%s14535_s24 + $0x920] sm:$0xff] %v7391_v27  ;;  %7394 = vst [vmem:[%s14535_s24 + $0x928] sm:$0xff] %v7393_v31  ;;  %v7433_v11 = vld [vmem:[%s11342_s16 + $0x428] sm:$0xff]  ;;  %v7435_v23 = vld [vmem:[%s11342_s16 + $0x430] sm:$0xff] }
 0x4e5   : > { %7396 = vst [vmem:[%s14535_s24 + $0x930] sm:$0xff] %v7395_v42  ;;  %7398 = vst [vmem:[%s14535_s24 + $0x938] sm:$0xff] %v7397_v5  ;;  %v7437_v58 = vld [vmem:[%s11342_s16 + $0x438] sm:$0xff]  ;;  %v7439_v2 = vld [vmem:[%s11342_s16 + $0x440] sm:$0xff] }
 0x4e6   : > { %7400 = vst [vmem:[%s14535_s24 + $0x940] sm:$0xff] %v7399_v3  ;;  %7402 = vst [vmem:[%s14535_s24 + $0x948] sm:$0xff] %v7401_v62  ;;  %v7441_v53 = vld [vmem:[%s11342_s16 + $0x448] sm:$0xff]  ;;  %v7443_v36 = vld [vmem:[%s11342_s16 + $0x450] sm:$0xff] }
 0x4e7   : > { %7404 = vst [vmem:[%s14535_s24 + $0x950] sm:$0xff] %v7403_v18  ;;  %7406 = vst [vmem:[%s14535_s24 + $0x958] sm:$0xff] %v7405_v14  ;;  %v7445_v49 = vld [vmem:[%s11342_s16 + $0x458] sm:$0xff]  ;;  %v7447_v8 = vld [vmem:[%s11342_s16 + $0x460] sm:$0xff] }
 0x4e8   : > { %7408 = vst [vmem:[%s14535_s24 + $0xf00] sm:$0xff] %v7407_v47  ;;  %7410 = vst [vmem:[%s14535_s24 + $0xf08] sm:$0xff] %v7409_v26  ;;  %v7449_v7 = vld [vmem:[%s11342_s16 + $0x468] sm:$0xff]  ;;  %v7451_v19 = vld [vmem:[%s11342_s16 + $0x470] sm:$0xff] }
 0x4e9   : > { %7412 = vst [vmem:[%s14535_s24 + $0xf10] sm:$0xff] %v7411_v46  ;;  %7414 = vst [vmem:[%s14535_s24 + $0xf18] sm:$0xff] %v7413_v25  ;;  %v7453_v33 = vld [vmem:[%s11342_s16 + $0x478] sm:$0xff]  ;;  %v7455_v59 = vld [vmem:[%s11342_s16 + $0x480] sm:$0xff] }
 0x4ea   : > { %7416 = vst [vmem:[%s14535_s24 + $0xf20] sm:$0xff] %v7415_v4  ;;  %7418 = vst [vmem:[%s14535_s24 + $0xf28] sm:$0xff] %v7417_v41  ;;  %v7457_v48 = vld [vmem:[%s11342_s16 + $0x488] sm:$0xff]  ;;  %v7459_v56 = vld [vmem:[%s11342_s16 + $0x490] sm:$0xff] }
 0x4eb   : > { %7420 = vst [vmem:[%s14535_s24 + $0xf30] sm:$0xff] %v7419_v52  ;;  %7422 = vst [vmem:[%s14535_s24 + $0xf38] sm:$0xff] %v7421_v34  ;;  %v7461_v43 = vld [vmem:[%s11342_s16 + $0x498] sm:$0xff]  ;;  %v7463_v21 = vld [vmem:[%s11342_s16 + $0x4a0] sm:$0xff] }
 0x4ec   : > { %7424 = vst [vmem:[%s14535_s24 + $0xf40] sm:$0xff] %v7423_v17  ;;  %7426 = vst [vmem:[%s14535_s24 + $0xf48] sm:$0xff] %v7425_v45  ;;  %v7465_v60 = vld [vmem:[%s11342_s16 + $0x4a8] sm:$0xff]  ;;  %v7467_v6 = vld [vmem:[%s11342_s16 + $0x4b0] sm:$0xff] }
 0x4ed   : > { %7428 = vst [vmem:[%s14535_s24 + $0xf50] sm:$0xff] %v7427_v57  ;;  %7430 = vst [vmem:[%s14535_s24 + $0xf58] sm:$0xff] %v7429_v16  ;;  %v7469_v54 = vld [vmem:[%s11342_s16 + $0x4b8] sm:$0xff]  ;;  %v7471_v44 = vld [vmem:[%s11342_s16 + $0x4c0] sm:$0xff] }
 0x4ee   : > { %7432 = vst [vmem:[%s14535_s24 + $0xf60] sm:$0xff] %v7431_v20  ;;  %7434 = vst [vmem:[%s14535_s24 + $0xf68] sm:$0xff] %v7433_v11  ;;  %v7473_v12 = vld [vmem:[%s11342_s16 + $0x4c8] sm:$0xff]  ;;  %v7475_v0 = vld [vmem:[%s11342_s16 + $0x4d0] sm:$0xff] }
 0x4ef   : > { %7436 = vst [vmem:[%s14535_s24 + $0xf70] sm:$0xff] %v7435_v23  ;;  %7438 = vst [vmem:[%s14535_s24 + $0xf78] sm:$0xff] %v7437_v58  ;;  %v7477_v24 = vld [vmem:[%s11342_s16 + $0x4d8] sm:$0xff]  ;;  %v7479_v37 = vld [vmem:[%s11342_s16 + $0x4e0] sm:$0xff] }
 0x4f0   : > { %7440 = vst [vmem:[%s14535_s24 + $0xf80] sm:$0xff] %v7439_v2  ;;  %7442 = vst [vmem:[%s14535_s24 + $0xf88] sm:$0xff] %v7441_v53  ;;  %v7481_v35 = vld [vmem:[%s11342_s16 + $0x4e8] sm:$0xff]  ;;  %v7483_v51 = vld [vmem:[%s11342_s16 + $0x4f0] sm:$0xff] }
 0x4f1   : > { %7444 = vst [vmem:[%s14535_s24 + $0xf90] sm:$0xff] %v7443_v36  ;;  %7446 = vst [vmem:[%s14535_s24 + $0xf98] sm:$0xff] %v7445_v49  ;;  %v7485_v9 = vld [vmem:[%s11342_s16 + $0x4f8] sm:$0xff]  ;;  %v7487_v55 = vld [vmem:[%s11342_s16 + $0x500] sm:$0xff] }
 0x4f2   : > { %7448 = vst [vmem:[%s14535_s24 + $0xfa0] sm:$0xff] %v7447_v8  ;;  %7450 = vst [vmem:[%s14535_s24 + $0xfa8] sm:$0xff] %v7449_v7  ;;  %v7489_v32 = vld [vmem:[%s11342_s16 + $0x508] sm:$0xff]  ;;  %v7491_v13 = vld [vmem:[%s11342_s16 + $0x510] sm:$0xff] }
 0x4f3   : > { %7452 = vst [vmem:[%s14535_s24 + $0xfb0] sm:$0xff] %v7451_v19  ;;  %7454 = vst [vmem:[%s14535_s24 + $0xfb8] sm:$0xff] %v7453_v33  ;;  %v7493_v28 = vld [vmem:[%s11342_s16 + $0x518] sm:$0xff]  ;;  %v7495_v61 = vld [vmem:[%s11342_s16 + $0x520] sm:$0xff] }
 0x4f4   : > { %7456 = vst [vmem:[%s14535_s24 + $0xfc0] sm:$0xff] %v7455_v59  ;;  %7458 = vst [vmem:[%s14535_s24 + $0xfc8] sm:$0xff] %v7457_v48  ;;  %v7497_v30 = vld [vmem:[%s11342_s16 + $0x528] sm:$0xff]  ;;  %v7499_v50 = vld [vmem:[%s11342_s16 + $0x530] sm:$0xff] }
 0x4f5   : > { %7460 = vst [vmem:[%s14535_s24 + $0xfd0] sm:$0xff] %v7459_v56  ;;  %7462 = vst [vmem:[%s14535_s24 + $0xfd8] sm:$0xff] %v7461_v43  ;;  %v7501_v40 = vld [vmem:[%s11342_s16 + $0x538] sm:$0xff]  ;;  %v7503_v10 = vld [vmem:[%s11342_s16 + $0x540] sm:$0xff] }
 0x4f6   : > { %7464 = vst [vmem:[%s14535_s24 + $0xfe0] sm:$0xff] %v7463_v21  ;;  %7466 = vst [vmem:[%s14535_s24 + $0xfe8] sm:$0xff] %v7465_v60  ;;  %v7505_v63 = vld [vmem:[%s11342_s16 + $0x548] sm:$0xff]  ;;  %v7507_v39 = vld [vmem:[%s11342_s16 + $0x550] sm:$0xff] }
 0x4f7   : > { %7468 = vst [vmem:[%s14535_s24 + $0xff0] sm:$0xff] %v7467_v6  ;;  %7470 = vst [vmem:[%s14535_s24 + $0xff8] sm:$0xff] %v7469_v54  ;;  %v7509_v1 = vld [vmem:[%s11342_s16 + $0x558] sm:$0xff]  ;;  %v7511_v15 = vld [vmem:[%s11342_s16 + $0x560] sm:$0xff] }
 0x4f8   : > { %7472 = vst [vmem:[%s14535_s24 + $0x1000] sm:$0xff] %v7471_v44  ;;  %7474 = vst [vmem:[%s14535_s24 + $0x1008] sm:$0xff] %v7473_v12  ;;  %v7513_v38 = vld [vmem:[%s11342_s16 + $0x568] sm:$0xff]  ;;  %v7515_v29 = vld [vmem:[%s11342_s16 + $0x570] sm:$0xff] }
 0x4f9   : > { %7476 = vst [vmem:[%s14535_s24 + $0x1010] sm:$0xff] %v7475_v0  ;;  %7478 = vst [vmem:[%s14535_s24 + $0x1018] sm:$0xff] %v7477_v24  ;;  %v7517_v22 = vld [vmem:[%s11342_s16 + $0x578] sm:$0xff]  ;;  %v7519_v27 = vld [vmem:[%s11342_s16 + $0x580] sm:$0xff] }
 0x4fa   : > { %7480 = vst [vmem:[%s14535_s24 + $0x1020] sm:$0xff] %v7479_v37  ;;  %7482 = vst [vmem:[%s14535_s24 + $0x1028] sm:$0xff] %v7481_v35  ;;  %v7521_v31 = vld [vmem:[%s11342_s16 + $0x588] sm:$0xff]  ;;  %v7523_v42 = vld [vmem:[%s11342_s16 + $0x590] sm:$0xff] }
 0x4fb   : > { %7484 = vst [vmem:[%s14535_s24 + $0x1030] sm:$0xff] %v7483_v51  ;;  %7486 = vst [vmem:[%s14535_s24 + $0x1038] sm:$0xff] %v7485_v9  ;;  %v7525_v5 = vld [vmem:[%s11342_s16 + $0x598] sm:$0xff]  ;;  %v7527_v3 = vld [vmem:[%s11342_s16 + $0x5a0] sm:$0xff] }
 0x4fc   : > { %7488 = vst [vmem:[%s14535_s24 + $0x1040] sm:$0xff] %v7487_v55  ;;  %7490 = vst [vmem:[%s14535_s24 + $0x1048] sm:$0xff] %v7489_v32  ;;  %v7529_v62 = vld [vmem:[%s11342_s16 + $0x5a8] sm:$0xff]  ;;  %v7531_v18 = vld [vmem:[%s11342_s16 + $0x5b0] sm:$0xff] }
 0x4fd   : > { %7492 = vst [vmem:[%s14535_s24 + $0x1050] sm:$0xff] %v7491_v13  ;;  %7494 = vst [vmem:[%s14535_s24 + $0x1058] sm:$0xff] %v7493_v28  ;;  %v7533_v14 = vld [vmem:[%s11342_s16 + $0x5b8] sm:$0xff]  ;;  %v7535_v47 = vld [vmem:[%s11342_s16 + $0x5c0] sm:$0xff] }
 0x4fe   : > { %7496 = vst [vmem:[%s14535_s24 + $0x1060] sm:$0xff] %v7495_v61  ;;  %7498 = vst [vmem:[%s14535_s24 + $0x1068] sm:$0xff] %v7497_v30  ;;  %v7537_v26 = vld [vmem:[%s11342_s16 + $0x5c8] sm:$0xff]  ;;  %v7539_v46 = vld [vmem:[%s11342_s16 + $0x5d0] sm:$0xff] }
 0x4ff   : > { %7500 = vst [vmem:[%s14535_s24 + $0x1070] sm:$0xff] %v7499_v50  ;;  %7502 = vst [vmem:[%s14535_s24 + $0x1078] sm:$0xff] %v7501_v40  ;;  %v7541_v25 = vld [vmem:[%s11342_s16 + $0x5d8] sm:$0xff]  ;;  %v7543_v4 = vld [vmem:[%s11342_s16 + $0x5e0] sm:$0xff] }
 0x500   : > { %7504 = vst [vmem:[%s14535_s24 + $0x1080] sm:$0xff] %v7503_v10  ;;  %7506 = vst [vmem:[%s14535_s24 + $0x1088] sm:$0xff] %v7505_v63  ;;  %v7545_v41 = vld [vmem:[%s11342_s16 + $0x5e8] sm:$0xff]  ;;  %v7547_v52 = vld [vmem:[%s11342_s16 + $0x5f0] sm:$0xff] }
 0x501   : > { %7508 = vst [vmem:[%s14535_s24 + $0x1090] sm:$0xff] %v7507_v39  ;;  %7510 = vst [vmem:[%s14535_s24 + $0x1098] sm:$0xff] %v7509_v1  ;;  %v7549_v34 = vld [vmem:[%s11342_s16 + $0x5f8] sm:$0xff]  ;;  %v7551_v17 = vld [vmem:[%s11342_s16 + $0x600] sm:$0xff] }
 0x502   : > { %7512 = vst [vmem:[%s14535_s24 + $0x10a0] sm:$0xff] %v7511_v15  ;;  %7514 = vst [vmem:[%s14535_s24 + $0x10a8] sm:$0xff] %v7513_v38  ;;  %v7553_v45 = vld [vmem:[%s11342_s16 + $0x608] sm:$0xff]  ;;  %v7555_v57 = vld [vmem:[%s11342_s16 + $0x610] sm:$0xff] }
 0x503   : > { %7516 = vst [vmem:[%s14535_s24 + $0x10b0] sm:$0xff] %v7515_v29  ;;  %7518 = vst [vmem:[%s14535_s24 + $0x10b8] sm:$0xff] %v7517_v22  ;;  %v7557_v16 = vld [vmem:[%s11342_s16 + $0x618] sm:$0xff]  ;;  %v7559_v20 = vld [vmem:[%s11342_s16 + $0x620] sm:$0xff] }
 0x504   : > { %7520 = vst [vmem:[%s14535_s24 + $0x10c0] sm:$0xff] %v7519_v27  ;;  %7522 = vst [vmem:[%s14535_s24 + $0x10c8] sm:$0xff] %v7521_v31  ;;  %v7561_v11 = vld [vmem:[%s11342_s16 + $0x628] sm:$0xff]  ;;  %v7563_v23 = vld [vmem:[%s11342_s16 + $0x630] sm:$0xff] }
 0x505   : > { %7524 = vst [vmem:[%s14535_s24 + $0x10d0] sm:$0xff] %v7523_v42  ;;  %7526 = vst [vmem:[%s14535_s24 + $0x10d8] sm:$0xff] %v7525_v5  ;;  %v7565_v58 = vld [vmem:[%s11342_s16 + $0x638] sm:$0xff]  ;;  %v7567_v2 = vld [vmem:[%s11342_s16 + $0x640] sm:$0xff] }
 0x506   : > { %7528 = vst [vmem:[%s14535_s24 + $0x1680] sm:$0xff] %v7527_v3  ;;  %7530 = vst [vmem:[%s14535_s24 + $0x1688] sm:$0xff] %v7529_v62  ;;  %v7569_v53 = vld [vmem:[%s11342_s16 + $0x648] sm:$0xff]  ;;  %v7571_v36 = vld [vmem:[%s11342_s16 + $0x650] sm:$0xff] }
 0x507   : > { %7532 = vst [vmem:[%s14535_s24 + $0x1690] sm:$0xff] %v7531_v18  ;;  %7534 = vst [vmem:[%s14535_s24 + $0x1698] sm:$0xff] %v7533_v14  ;;  %v7573_v49 = vld [vmem:[%s11342_s16 + $0x658] sm:$0xff]  ;;  %v7575_v8 = vld [vmem:[%s11342_s16 + $0x660] sm:$0xff] }
 0x508   : > { %7536 = vst [vmem:[%s14535_s24 + $0x16a0] sm:$0xff] %v7535_v47  ;;  %7538 = vst [vmem:[%s14535_s24 + $0x16a8] sm:$0xff] %v7537_v26  ;;  %v7577_v7 = vld [vmem:[%s11342_s16 + $0x668] sm:$0xff]  ;;  %v7579_v19 = vld [vmem:[%s11342_s16 + $0x670] sm:$0xff] }
 0x509   : > { %7540 = vst [vmem:[%s14535_s24 + $0x16b0] sm:$0xff] %v7539_v46  ;;  %7542 = vst [vmem:[%s14535_s24 + $0x16b8] sm:$0xff] %v7541_v25  ;;  %v7581_v33 = vld [vmem:[%s11342_s16 + $0x678] sm:$0xff]  ;;  %v7583_v59 = vld [vmem:[%s11342_s16 + $0x680] sm:$0xff] }
 0x50a   : > { %7544 = vst [vmem:[%s14535_s24 + $0x16c0] sm:$0xff] %v7543_v4  ;;  %7546 = vst [vmem:[%s14535_s24 + $0x16c8] sm:$0xff] %v7545_v41  ;;  %v7585_v48 = vld [vmem:[%s11342_s16 + $0x688] sm:$0xff]  ;;  %v7587_v56 = vld [vmem:[%s11342_s16 + $0x690] sm:$0xff] }
 0x50b   : > { %7548 = vst [vmem:[%s14535_s24 + $0x16d0] sm:$0xff] %v7547_v52  ;;  %7550 = vst [vmem:[%s14535_s24 + $0x16d8] sm:$0xff] %v7549_v34  ;;  %v7589_v43 = vld [vmem:[%s11342_s16 + $0x698] sm:$0xff]  ;;  %v7591_v21 = vld [vmem:[%s11342_s16 + $0x6a0] sm:$0xff] }
 0x50c   : > { %7552 = vst [vmem:[%s14535_s24 + $0x16e0] sm:$0xff] %v7551_v17  ;;  %7554 = vst [vmem:[%s14535_s24 + $0x16e8] sm:$0xff] %v7553_v45  ;;  %v7593_v60 = vld [vmem:[%s11342_s16 + $0x6a8] sm:$0xff]  ;;  %v7595_v6 = vld [vmem:[%s11342_s16 + $0x6b0] sm:$0xff] }
 0x50d   : > { %7556 = vst [vmem:[%s14535_s24 + $0x16f0] sm:$0xff] %v7555_v57  ;;  %7558 = vst [vmem:[%s14535_s24 + $0x16f8] sm:$0xff] %v7557_v16  ;;  %v7597_v54 = vld [vmem:[%s11342_s16 + $0x6b8] sm:$0xff]  ;;  %v7599_v44 = vld [vmem:[%s11342_s16 + $0x6c0] sm:$0xff] }
 0x50e   : > { %7560 = vst [vmem:[%s14535_s24 + $0x1700] sm:$0xff] %v7559_v20  ;;  %7562 = vst [vmem:[%s14535_s24 + $0x1708] sm:$0xff] %v7561_v11  ;;  %v7601_v12 = vld [vmem:[%s11342_s16 + $0x6c8] sm:$0xff]  ;;  %v7603_v0 = vld [vmem:[%s11342_s16 + $0x6d0] sm:$0xff] }
 0x50f   : > { %7564 = vst [vmem:[%s14535_s24 + $0x1710] sm:$0xff] %v7563_v23  ;;  %7566 = vst [vmem:[%s14535_s24 + $0x1718] sm:$0xff] %v7565_v58  ;;  %v7605_v24 = vld [vmem:[%s11342_s16 + $0x6d8] sm:$0xff]  ;;  %v7607_v37 = vld [vmem:[%s11342_s16 + $0x6e0] sm:$0xff] }
 0x510   : > { %7568 = vst [vmem:[%s14535_s24 + $0x1720] sm:$0xff] %v7567_v2  ;;  %7570 = vst [vmem:[%s14535_s24 + $0x1728] sm:$0xff] %v7569_v53  ;;  %v7609_v35 = vld [vmem:[%s11342_s16 + $0x6e8] sm:$0xff]  ;;  %v7611_v51 = vld [vmem:[%s11342_s16 + $0x6f0] sm:$0xff] }
 0x511   : > { %7572 = vst [vmem:[%s14535_s24 + $0x1730] sm:$0xff] %v7571_v36  ;;  %7574 = vst [vmem:[%s14535_s24 + $0x1738] sm:$0xff] %v7573_v49  ;;  %v7613_v9 = vld [vmem:[%s11342_s16 + $0x6f8] sm:$0xff]  ;;  %v7615_v55 = vld [vmem:[%s11342_s16 + $0x700] sm:$0xff] }
 0x512   : > { %7576 = vst [vmem:[%s14535_s24 + $0x1740] sm:$0xff] %v7575_v8  ;;  %7578 = vst [vmem:[%s14535_s24 + $0x1748] sm:$0xff] %v7577_v7  ;;  %v7617_v32 = vld [vmem:[%s11342_s16 + $0x708] sm:$0xff]  ;;  %v7619_v13 = vld [vmem:[%s11342_s16 + $0x710] sm:$0xff] }
 0x513   : > { %7580 = vst [vmem:[%s14535_s24 + $0x1750] sm:$0xff] %v7579_v19  ;;  %7582 = vst [vmem:[%s14535_s24 + $0x1758] sm:$0xff] %v7581_v33  ;;  %v7621_v28 = vld [vmem:[%s11342_s16 + $0x718] sm:$0xff]  ;;  %v7623_v61 = vld [vmem:[%s11342_s16 + $0x720] sm:$0xff] }
 0x514   : > { %7584 = vst [vmem:[%s14535_s24 + $0x1760] sm:$0xff] %v7583_v59  ;;  %7586 = vst [vmem:[%s14535_s24 + $0x1768] sm:$0xff] %v7585_v48  ;;  %v7625_v30 = vld [vmem:[%s11342_s16 + $0x728] sm:$0xff]  ;;  %v7627_v50 = vld [vmem:[%s11342_s16 + $0x730] sm:$0xff] }
 0x515   : > { %7588 = vst [vmem:[%s14535_s24 + $0x1770] sm:$0xff] %v7587_v56  ;;  %7590 = vst [vmem:[%s14535_s24 + $0x1778] sm:$0xff] %v7589_v43  ;;  %v7629_v40 = vld [vmem:[%s11342_s16 + $0x738] sm:$0xff]  ;;  %v7631_v10 = vld [vmem:[%s11342_s16 + $0x740] sm:$0xff] }
 0x516   : > { %7592 = vst [vmem:[%s14535_s24 + $0x1780] sm:$0xff] %v7591_v21  ;;  %7594 = vst [vmem:[%s14535_s24 + $0x1788] sm:$0xff] %v7593_v60  ;;  %v7633_v63 = vld [vmem:[%s11342_s16 + $0x748] sm:$0xff]  ;;  %v7635_v39 = vld [vmem:[%s11342_s16 + $0x750] sm:$0xff] }
 0x517   : > { %7596 = vst [vmem:[%s14535_s24 + $0x1790] sm:$0xff] %v7595_v6  ;;  %7598 = vst [vmem:[%s14535_s24 + $0x1798] sm:$0xff] %v7597_v54  ;;  %v7637_v1 = vld [vmem:[%s11342_s16 + $0x758] sm:$0xff]  ;;  %v7639_v15 = vld [vmem:[%s11342_s16 + $0x760] sm:$0xff] }
 0x518   : > { %7600 = vst [vmem:[%s14535_s24 + $0x17a0] sm:$0xff] %v7599_v44  ;;  %7602 = vst [vmem:[%s14535_s24 + $0x17a8] sm:$0xff] %v7601_v12  ;;  %v7641_v38 = vld [vmem:[%s11342_s16 + $0x768] sm:$0xff]  ;;  %v7643_v29 = vld [vmem:[%s11342_s16 + $0x770] sm:$0xff] }
 0x519   : > { %7604 = vst [vmem:[%s14535_s24 + $0x17b0] sm:$0xff] %v7603_v0  ;;  %7606 = vst [vmem:[%s14535_s24 + $0x17b8] sm:$0xff] %v7605_v24  ;;  %v7645_v22 = vld [vmem:[%s11342_s16 + $0x778] sm:$0xff]  ;;  %v7647_v27 = vld [vmem:[%s11342_s16 + $0x780] sm:$0xff] }
 0x51a   : > { %7608 = vst [vmem:[%s14535_s24 + $0x17c0] sm:$0xff] %v7607_v37  ;;  %7610 = vst [vmem:[%s14535_s24 + $0x17c8] sm:$0xff] %v7609_v35  ;;  %v7649_v31 = vld [vmem:[%s11342_s16 + $0x788] sm:$0xff]  ;;  %v7651_v42 = vld [vmem:[%s11342_s16 + $0x790] sm:$0xff] }
 0x51b   : > { %7612 = vst [vmem:[%s14535_s24 + $0x17d0] sm:$0xff] %v7611_v51  ;;  %7614 = vst [vmem:[%s14535_s24 + $0x17d8] sm:$0xff] %v7613_v9  ;;  %v7653_v5 = vld [vmem:[%s11342_s16 + $0x798] sm:$0xff]  ;;  %v7655_v3 = vld [vmem:[%s11342_s16 + $0x7a0] sm:$0xff] }
 0x51c   : > { %7616 = vst [vmem:[%s14535_s24 + $0x17e0] sm:$0xff] %v7615_v55  ;;  %7618 = vst [vmem:[%s14535_s24 + $0x17e8] sm:$0xff] %v7617_v32  ;;  %v7657_v62 = vld [vmem:[%s11342_s16 + $0x7a8] sm:$0xff]  ;;  %v7659_v18 = vld [vmem:[%s11342_s16 + $0x7b0] sm:$0xff] }
 0x51d   : > { %7620 = vst [vmem:[%s14535_s24 + $0x17f0] sm:$0xff] %v7619_v13  ;;  %7622 = vst [vmem:[%s14535_s24 + $0x17f8] sm:$0xff] %v7621_v28  ;;  %v7661_v14 = vld [vmem:[%s11342_s16 + $0x7b8] sm:$0xff]  ;;  %v7663_v47 = vld [vmem:[%s11342_s16 + $0x7c0] sm:$0xff] }
 0x51e   : > { %7624 = vst [vmem:[%s14535_s24 + $0x1800] sm:$0xff] %v7623_v61  ;;  %7626 = vst [vmem:[%s14535_s24 + $0x1808] sm:$0xff] %v7625_v30  ;;  %v7665_v26 = vld [vmem:[%s11342_s16 + $0x7c8] sm:$0xff]  ;;  %v7667_v46 = vld [vmem:[%s11342_s16 + $0x7d0] sm:$0xff] }
 0x51f   : > { %7628 = vst [vmem:[%s14535_s24 + $0x1810] sm:$0xff] %v7627_v50  ;;  %7630 = vst [vmem:[%s14535_s24 + $0x1818] sm:$0xff] %v7629_v40  ;;  %v7669_v25 = vld [vmem:[%s11342_s16 + $0x7d8] sm:$0xff]  ;;  %v7671_v4 = vld [vmem:[%s11342_s16 + $0x7e0] sm:$0xff] }
 0x520   : > { %7632 = vst [vmem:[%s14535_s24 + $0x1820] sm:$0xff] %v7631_v10  ;;  %7634 = vst [vmem:[%s14535_s24 + $0x1828] sm:$0xff] %v7633_v63  ;;  %v7673_v41 = vld [vmem:[%s11342_s16 + $0x7e8] sm:$0xff]  ;;  %v7675_v52 = vld [vmem:[%s11342_s16 + $0x7f0] sm:$0xff] }
 0x521   : > { %7636 = vst [vmem:[%s14535_s24 + $0x1830] sm:$0xff] %v7635_v39  ;;  %7638 = vst [vmem:[%s14535_s24 + $0x1838] sm:$0xff] %v7637_v1  ;;  %v7677_v34 = vld [vmem:[%s11342_s16 + $0x7f8] sm:$0xff]  ;;  %v7679_v17 = vld [vmem:[%s11342_s16 + $0x800] sm:$0xff] }
 0x522   : > { %7640 = vst [vmem:[%s14535_s24 + $0x1840] sm:$0xff] %v7639_v15  ;;  %7642 = vst [vmem:[%s14535_s24 + $0x1848] sm:$0xff] %v7641_v38  ;;  %v7681_v45 = vld [vmem:[%s11342_s16 + $0x808] sm:$0xff]  ;;  %v7683_v57 = vld [vmem:[%s11342_s16 + $0x810] sm:$0xff] }
 0x523   : > { %7644 = vst [vmem:[%s14535_s24 + $0x1850] sm:$0xff] %v7643_v29  ;;  %7646 = vst [vmem:[%s14535_s24 + $0x1858] sm:$0xff] %v7645_v22  ;;  %v7685_v16 = vld [vmem:[%s11342_s16 + $0x818] sm:$0xff]  ;;  %v7687_v20 = vld [vmem:[%s11342_s16 + $0x820] sm:$0xff] }
 0x524   : > { %7648 = vst [vmem:[%s14535_s24 + $0x1e00] sm:$0xff] %v7647_v27  ;;  %7650 = vst [vmem:[%s14535_s24 + $0x1e08] sm:$0xff] %v7649_v31  ;;  %v7689_v11 = vld [vmem:[%s11342_s16 + $0x828] sm:$0xff]  ;;  %v7691_v23 = vld [vmem:[%s11342_s16 + $0x830] sm:$0xff] }
 0x525   : > { %7652 = vst [vmem:[%s14535_s24 + $0x1e10] sm:$0xff] %v7651_v42  ;;  %7654 = vst [vmem:[%s14535_s24 + $0x1e18] sm:$0xff] %v7653_v5  ;;  %v7693_v58 = vld [vmem:[%s11342_s16 + $0x838] sm:$0xff]  ;;  %v7695_v2 = vld [vmem:[%s11342_s16 + $0x840] sm:$0xff] }
 0x526   : > { %7656 = vst [vmem:[%s14535_s24 + $0x1e20] sm:$0xff] %v7655_v3  ;;  %7658 = vst [vmem:[%s14535_s24 + $0x1e28] sm:$0xff] %v7657_v62  ;;  %v7697_v53 = vld [vmem:[%s11342_s16 + $0x848] sm:$0xff]  ;;  %v7699_v36 = vld [vmem:[%s11342_s16 + $0x850] sm:$0xff] }
 0x527   : > { %7660 = vst [vmem:[%s14535_s24 + $0x1e30] sm:$0xff] %v7659_v18  ;;  %7662 = vst [vmem:[%s14535_s24 + $0x1e38] sm:$0xff] %v7661_v14  ;;  %v7701_v49 = vld [vmem:[%s11342_s16 + $0x858] sm:$0xff]  ;;  %v7703_v8 = vld [vmem:[%s11342_s16 + $0x860] sm:$0xff] }
 0x528   : > { %7664 = vst [vmem:[%s14535_s24 + $0x1e40] sm:$0xff] %v7663_v47  ;;  %7666 = vst [vmem:[%s14535_s24 + $0x1e48] sm:$0xff] %v7665_v26  ;;  %v7705_v7 = vld [vmem:[%s11342_s16 + $0x868] sm:$0xff]  ;;  %v7707_v19 = vld [vmem:[%s11342_s16 + $0x870] sm:$0xff] }
 0x529   : > { %7668 = vst [vmem:[%s14535_s24 + $0x1e50] sm:$0xff] %v7667_v46  ;;  %7670 = vst [vmem:[%s14535_s24 + $0x1e58] sm:$0xff] %v7669_v25  ;;  %v7709_v33 = vld [vmem:[%s11342_s16 + $0x878] sm:$0xff]  ;;  %v7711_v59 = vld [vmem:[%s11342_s16 + $0x880] sm:$0xff] }
 0x52a   : > { %7672 = vst [vmem:[%s14535_s24 + $0x1e60] sm:$0xff] %v7671_v4  ;;  %7674 = vst [vmem:[%s14535_s24 + $0x1e68] sm:$0xff] %v7673_v41  ;;  %v7713_v48 = vld [vmem:[%s11342_s16 + $0x888] sm:$0xff]  ;;  %v7715_v56 = vld [vmem:[%s11342_s16 + $0x890] sm:$0xff] }
 0x52b   : > { %7676 = vst [vmem:[%s14535_s24 + $0x1e70] sm:$0xff] %v7675_v52  ;;  %7678 = vst [vmem:[%s14535_s24 + $0x1e78] sm:$0xff] %v7677_v34  ;;  %v7717_v43 = vld [vmem:[%s11342_s16 + $0x898] sm:$0xff]  ;;  %v7719_v21 = vld [vmem:[%s11342_s16 + $0x8a0] sm:$0xff] }
 0x52c   : > { %7680 = vst [vmem:[%s14535_s24 + $0x1e80] sm:$0xff] %v7679_v17  ;;  %7682 = vst [vmem:[%s14535_s24 + $0x1e88] sm:$0xff] %v7681_v45  ;;  %v7721_v60 = vld [vmem:[%s11342_s16 + $0x8a8] sm:$0xff]  ;;  %v7723_v6 = vld [vmem:[%s11342_s16 + $0x8b0] sm:$0xff] }
 0x52d   : > { %7684 = vst [vmem:[%s14535_s24 + $0x1e90] sm:$0xff] %v7683_v57  ;;  %7686 = vst [vmem:[%s14535_s24 + $0x1e98] sm:$0xff] %v7685_v16  ;;  %v7725_v54 = vld [vmem:[%s11342_s16 + $0x8b8] sm:$0xff]  ;;  %v7727_v44 = vld [vmem:[%s11342_s16 + $0x8c0] sm:$0xff] }
 0x52e   : > { %7688 = vst [vmem:[%s14535_s24 + $0x1ea0] sm:$0xff] %v7687_v20  ;;  %7690 = vst [vmem:[%s14535_s24 + $0x1ea8] sm:$0xff] %v7689_v11  ;;  %v7729_v12 = vld [vmem:[%s11342_s16 + $0x8c8] sm:$0xff]  ;;  %v7731_v0 = vld [vmem:[%s11342_s16 + $0x8d0] sm:$0xff] }
 0x52f   : > { %7692 = vst [vmem:[%s14535_s24 + $0x1eb0] sm:$0xff] %v7691_v23  ;;  %7694 = vst [vmem:[%s14535_s24 + $0x1eb8] sm:$0xff] %v7693_v58  ;;  %v7733_v24 = vld [vmem:[%s11342_s16 + $0x8d8] sm:$0xff]  ;;  %v7735_v37 = vld [vmem:[%s11342_s16 + $0x8e0] sm:$0xff] }
 0x530   : > { %7696 = vst [vmem:[%s14535_s24 + $0x1ec0] sm:$0xff] %v7695_v2  ;;  %7698 = vst [vmem:[%s14535_s24 + $0x1ec8] sm:$0xff] %v7697_v53  ;;  %v7737_v35 = vld [vmem:[%s11342_s16 + $0x8e8] sm:$0xff]  ;;  %v7739_v51 = vld [vmem:[%s11342_s16 + $0x8f0] sm:$0xff] }
 0x531   : > { %7700 = vst [vmem:[%s14535_s24 + $0x1ed0] sm:$0xff] %v7699_v36  ;;  %7702 = vst [vmem:[%s14535_s24 + $0x1ed8] sm:$0xff] %v7701_v49  ;;  %v7741_v9 = vld [vmem:[%s11342_s16 + $0x8f8] sm:$0xff]  ;;  %v7743_v55 = vld [vmem:[%s11342_s16 + $0x900] sm:$0xff] }
 0x532   : > { %7704 = vst [vmem:[%s14535_s24 + $0x1ee0] sm:$0xff] %v7703_v8  ;;  %7706 = vst [vmem:[%s14535_s24 + $0x1ee8] sm:$0xff] %v7705_v7  ;;  %v7745_v32 = vld [vmem:[%s11342_s16 + $0x908] sm:$0xff]  ;;  %v7747_v13 = vld [vmem:[%s11342_s16 + $0x910] sm:$0xff] }
 0x533   : > { %7708 = vst [vmem:[%s14535_s24 + $0x1ef0] sm:$0xff] %v7707_v19  ;;  %7710 = vst [vmem:[%s14535_s24 + $0x1ef8] sm:$0xff] %v7709_v33  ;;  %v7749_v28 = vld [vmem:[%s11342_s16 + $0x918] sm:$0xff]  ;;  %v7751_v61 = vld [vmem:[%s11342_s16 + $0x920] sm:$0xff] }
 0x534   : > { %7712 = vst [vmem:[%s14535_s24 + $0x1f00] sm:$0xff] %v7711_v59  ;;  %7714 = vst [vmem:[%s14535_s24 + $0x1f08] sm:$0xff] %v7713_v48  ;;  %v7753_v30 = vld [vmem:[%s11342_s16 + $0x928] sm:$0xff]  ;;  %v7755_v50 = vld [vmem:[%s11342_s16 + $0x930] sm:$0xff] }
 0x535   : > { %7716 = vst [vmem:[%s14535_s24 + $0x1f10] sm:$0xff] %v7715_v56  ;;  %7718 = vst [vmem:[%s14535_s24 + $0x1f18] sm:$0xff] %v7717_v43  ;;  %v7757_v40 = vld [vmem:[%s11342_s16 + $0x938] sm:$0xff]  ;;  %v7759_v10 = vld [vmem:[%s11342_s16 + $0x940] sm:$0xff] }
 0x536   : > { %7720 = vst [vmem:[%s14535_s24 + $0x1f20] sm:$0xff] %v7719_v21  ;;  %7722 = vst [vmem:[%s14535_s24 + $0x1f28] sm:$0xff] %v7721_v60  ;;  %v7761_v63 = vld [vmem:[%s11342_s16 + $0x948] sm:$0xff]  ;;  %v7763_v39 = vld [vmem:[%s11342_s16 + $0x950] sm:$0xff] }
 0x537   : > { %7724 = vst [vmem:[%s14535_s24 + $0x1f30] sm:$0xff] %v7723_v6  ;;  %7726 = vst [vmem:[%s14535_s24 + $0x1f38] sm:$0xff] %v7725_v54  ;;  %v7765_v1 = vld [vmem:[%s11342_s16 + $0x958] sm:$0xff]  ;;  %v7767_v15 = vld [vmem:[%s11342_s16 + $0x960] sm:$0xff] }
 0x538   : > { %7728 = vst [vmem:[%s14535_s24 + $0x1f40] sm:$0xff] %v7727_v44  ;;  %7730 = vst [vmem:[%s14535_s24 + $0x1f48] sm:$0xff] %v7729_v12  ;;  %v7769_v38 = vld [vmem:[%s11342_s16 + $0x968] sm:$0xff]  ;;  %v7771_v29 = vld [vmem:[%s11342_s16 + $0x970] sm:$0xff] }
 0x539   : > { %7732 = vst [vmem:[%s14535_s24 + $0x1f50] sm:$0xff] %v7731_v0  ;;  %7734 = vst [vmem:[%s14535_s24 + $0x1f58] sm:$0xff] %v7733_v24  ;;  %v7773_v22 = vld [vmem:[%s11342_s16 + $0x978] sm:$0xff]  ;;  %v7775_v27 = vld [vmem:[%s11342_s16 + $0x980] sm:$0xff] }
 0x53a   : > { %7736 = vst [vmem:[%s14535_s24 + $0x1f60] sm:$0xff] %v7735_v37  ;;  %7738 = vst [vmem:[%s14535_s24 + $0x1f68] sm:$0xff] %v7737_v35  ;;  %v7777_v31 = vld [vmem:[%s11342_s16 + $0x988] sm:$0xff]  ;;  %v7779_v42 = vld [vmem:[%s11342_s16 + $0x990] sm:$0xff] }
 0x53b   : > { %7740 = vst [vmem:[%s14535_s24 + $0x1f70] sm:$0xff] %v7739_v51  ;;  %7742 = vst [vmem:[%s14535_s24 + $0x1f78] sm:$0xff] %v7741_v9  ;;  %v7781_v5 = vld [vmem:[%s11342_s16 + $0x998] sm:$0xff]  ;;  %v7783_v3 = vld [vmem:[%s11342_s16 + $0x9a0] sm:$0xff] }
 0x53c   : > { %7744 = vst [vmem:[%s14535_s24 + $0x1f80] sm:$0xff] %v7743_v55  ;;  %7746 = vst [vmem:[%s14535_s24 + $0x1f88] sm:$0xff] %v7745_v32  ;;  %v7785_v62 = vld [vmem:[%s11342_s16 + $0x9a8] sm:$0xff]  ;;  %v7787_v18 = vld [vmem:[%s11342_s16 + $0x9b0] sm:$0xff] }
 0x53d   : > { %7748 = vst [vmem:[%s14535_s24 + $0x1f90] sm:$0xff] %v7747_v13  ;;  %7750 = vst [vmem:[%s14535_s24 + $0x1f98] sm:$0xff] %v7749_v28  ;;  %v7789_v14 = vld [vmem:[%s11342_s16 + $0x9b8] sm:$0xff]  ;;  %v7791_v47 = vld [vmem:[%s11342_s16 + $0x9c0] sm:$0xff] }
 0x53e   : > { %7752 = vst [vmem:[%s14535_s24 + $0x1fa0] sm:$0xff] %v7751_v61  ;;  %7754 = vst [vmem:[%s14535_s24 + $0x1fa8] sm:$0xff] %v7753_v30  ;;  %v7793_v26 = vld [vmem:[%s11342_s16 + $0x9c8] sm:$0xff]  ;;  %v7795_v46 = vld [vmem:[%s11342_s16 + $0x9d0] sm:$0xff] }
 0x53f   : > { %7756 = vst [vmem:[%s14535_s24 + $0x1fb0] sm:$0xff] %v7755_v50  ;;  %7758 = vst [vmem:[%s14535_s24 + $0x1fb8] sm:$0xff] %v7757_v40  ;;  %v7797_v25 = vld [vmem:[%s11342_s16 + $0x9d8] sm:$0xff]  ;;  %v7799_v4 = vld [vmem:[%s11342_s16 + $0x9e0] sm:$0xff] }
 0x540   : > { %7760 = vst [vmem:[%s14535_s24 + $0x1fc0] sm:$0xff] %v7759_v10  ;;  %7762 = vst [vmem:[%s14535_s24 + $0x1fc8] sm:$0xff] %v7761_v63  ;;  %v7801_v41 = vld [vmem:[%s11342_s16 + $0x9e8] sm:$0xff]  ;;  %v7803_v52 = vld [vmem:[%s11342_s16 + $0x9f0] sm:$0xff] }
 0x541   : > { %7764 = vst [vmem:[%s14535_s24 + $0x1fd0] sm:$0xff] %v7763_v39  ;;  %7766 = vst [vmem:[%s14535_s24 + $0x1fd8] sm:$0xff] %v7765_v1  ;;  %v7805_v34 = vld [vmem:[%s11342_s16 + $0x9f8] sm:$0xff]  ;;  %v7807_v17 = vld [vmem:[%s11342_s16 + $0xa00] sm:$0xff] }
 0x542   : > { %7768 = vst [vmem:[%s14535_s24 + $0x2580] sm:$0xff] %v7767_v15  ;;  %7770 = vst [vmem:[%s14535_s24 + $0x2588] sm:$0xff] %v7769_v38  ;;  %v7809_v45 = vld [vmem:[%s11342_s16 + $0xa08] sm:$0xff]  ;;  %v7811_v57 = vld [vmem:[%s11342_s16 + $0xa10] sm:$0xff] }
 0x543   : > { %7772 = vst [vmem:[%s14535_s24 + $0x2590] sm:$0xff] %v7771_v29  ;;  %7774 = vst [vmem:[%s14535_s24 + $0x2598] sm:$0xff] %v7773_v22  ;;  %v7813_v16 = vld [vmem:[%s11342_s16 + $0xa18] sm:$0xff]  ;;  %v7815_v20 = vld [vmem:[%s11342_s16 + $0xa20] sm:$0xff] }
 0x544   : > { %7776 = vst [vmem:[%s14535_s24 + $0x25a0] sm:$0xff] %v7775_v27  ;;  %7778 = vst [vmem:[%s14535_s24 + $0x25a8] sm:$0xff] %v7777_v31  ;;  %v7817_v11 = vld [vmem:[%s11342_s16 + $0xa28] sm:$0xff]  ;;  %v7819_v23 = vld [vmem:[%s11342_s16 + $0xa30] sm:$0xff] }
 0x545   : > { %7780 = vst [vmem:[%s14535_s24 + $0x25b0] sm:$0xff] %v7779_v42  ;;  %7782 = vst [vmem:[%s14535_s24 + $0x25b8] sm:$0xff] %v7781_v5  ;;  %v7821_v58 = vld [vmem:[%s11342_s16 + $0xa38] sm:$0xff]  ;;  %v7823_v2 = vld [vmem:[%s11342_s16 + $0xa40] sm:$0xff] }
 0x546   : > { %7784 = vst [vmem:[%s14535_s24 + $0x25c0] sm:$0xff] %v7783_v3  ;;  %7786 = vst [vmem:[%s14535_s24 + $0x25c8] sm:$0xff] %v7785_v62  ;;  %v7825_v53 = vld [vmem:[%s11342_s16 + $0xa48] sm:$0xff]  ;;  %v7827_v36 = vld [vmem:[%s11342_s16 + $0xa50] sm:$0xff] }
 0x547   : > { %7788 = vst [vmem:[%s14535_s24 + $0x25d0] sm:$0xff] %v7787_v18  ;;  %7790 = vst [vmem:[%s14535_s24 + $0x25d8] sm:$0xff] %v7789_v14  ;;  %v7829_v49 = vld [vmem:[%s11342_s16 + $0xa58] sm:$0xff]  ;;  %v7831_v8 = vld [vmem:[%s11342_s16 + $0xa60] sm:$0xff] }
 0x548   : > { %7792 = vst [vmem:[%s14535_s24 + $0x25e0] sm:$0xff] %v7791_v47  ;;  %7794 = vst [vmem:[%s14535_s24 + $0x25e8] sm:$0xff] %v7793_v26  ;;  %v7833_v7 = vld [vmem:[%s11342_s16 + $0xa68] sm:$0xff]  ;;  %v7835_v19 = vld [vmem:[%s11342_s16 + $0xa70] sm:$0xff] }
 0x549   : > { %7796 = vst [vmem:[%s14535_s24 + $0x25f0] sm:$0xff] %v7795_v46  ;;  %7798 = vst [vmem:[%s14535_s24 + $0x25f8] sm:$0xff] %v7797_v25  ;;  %v7837_v33 = vld [vmem:[%s11342_s16 + $0xa78] sm:$0xff]  ;;  %v7839_v59 = vld [vmem:[%s11342_s16 + $0xa80] sm:$0xff] }
 0x54a   : > { %7800 = vst [vmem:[%s14535_s24 + $0x2600] sm:$0xff] %v7799_v4  ;;  %7802 = vst [vmem:[%s14535_s24 + $0x2608] sm:$0xff] %v7801_v41  ;;  %v7841_v48 = vld [vmem:[%s11342_s16 + $0xa88] sm:$0xff]  ;;  %v7843_v56 = vld [vmem:[%s11342_s16 + $0xa90] sm:$0xff] }
 0x54b   : > { %7804 = vst [vmem:[%s14535_s24 + $0x2610] sm:$0xff] %v7803_v52  ;;  %7806 = vst [vmem:[%s14535_s24 + $0x2618] sm:$0xff] %v7805_v34  ;;  %v7845_v43 = vld [vmem:[%s11342_s16 + $0xa98] sm:$0xff]  ;;  %v7847_v21 = vld [vmem:[%s11342_s16 + $0xaa0] sm:$0xff] }
 0x54c   : > { %7808 = vst [vmem:[%s14535_s24 + $0x2620] sm:$0xff] %v7807_v17  ;;  %7810 = vst [vmem:[%s14535_s24 + $0x2628] sm:$0xff] %v7809_v45  ;;  %v7849_v60 = vld [vmem:[%s11342_s16 + $0xaa8] sm:$0xff]  ;;  %v7851_v6 = vld [vmem:[%s11342_s16 + $0xab0] sm:$0xff] }
 0x54d   : > { %7812 = vst [vmem:[%s14535_s24 + $0x2630] sm:$0xff] %v7811_v57  ;;  %7814 = vst [vmem:[%s14535_s24 + $0x2638] sm:$0xff] %v7813_v16  ;;  %v7853_v54 = vld [vmem:[%s11342_s16 + $0xab8] sm:$0xff]  ;;  %v7855_v44 = vld [vmem:[%s11342_s16 + $0xac0] sm:$0xff] }
 0x54e   : > { %7816 = vst [vmem:[%s14535_s24 + $0x2640] sm:$0xff] %v7815_v20  ;;  %7818 = vst [vmem:[%s14535_s24 + $0x2648] sm:$0xff] %v7817_v11  ;;  %v7857_v12 = vld [vmem:[%s11342_s16 + $0xac8] sm:$0xff]  ;;  %v7859_v0 = vld [vmem:[%s11342_s16 + $0xad0] sm:$0xff] }
 0x54f   : > { %7820 = vst [vmem:[%s14535_s24 + $0x2650] sm:$0xff] %v7819_v23  ;;  %7822 = vst [vmem:[%s14535_s24 + $0x2658] sm:$0xff] %v7821_v58  ;;  %v7861_v24 = vld [vmem:[%s11342_s16 + $0xad8] sm:$0xff]  ;;  %v7863_v37 = vld [vmem:[%s11342_s16 + $0xae0] sm:$0xff] }
 0x550   : > { %7824 = vst [vmem:[%s14535_s24 + $0x2660] sm:$0xff] %v7823_v2  ;;  %7826 = vst [vmem:[%s14535_s24 + $0x2668] sm:$0xff] %v7825_v53  ;;  %v7865_v35 = vld [vmem:[%s11342_s16 + $0xae8] sm:$0xff]  ;;  %v7867_v51 = vld [vmem:[%s11342_s16 + $0xaf0] sm:$0xff] }
 0x551   : > { %7828 = vst [vmem:[%s14535_s24 + $0x2670] sm:$0xff] %v7827_v36  ;;  %7830 = vst [vmem:[%s14535_s24 + $0x2678] sm:$0xff] %v7829_v49  ;;  %v7869_v9 = vld [vmem:[%s11342_s16 + $0xaf8] sm:$0xff]  ;;  %v7871_v55 = vld [vmem:[%s11342_s16 + $0xb00] sm:$0xff] }
 0x552   : > { %7832 = vst [vmem:[%s14535_s24 + $0x2680] sm:$0xff] %v7831_v8  ;;  %7834 = vst [vmem:[%s14535_s24 + $0x2688] sm:$0xff] %v7833_v7  ;;  %v7873_v32 = vld [vmem:[%s11342_s16 + $0xb08] sm:$0xff]  ;;  %v7875_v13 = vld [vmem:[%s11342_s16 + $0xb10] sm:$0xff] }
 0x553   : > { %7836 = vst [vmem:[%s14535_s24 + $0x2690] sm:$0xff] %v7835_v19  ;;  %7838 = vst [vmem:[%s14535_s24 + $0x2698] sm:$0xff] %v7837_v33  ;;  %v7877_v28 = vld [vmem:[%s11342_s16 + $0xb18] sm:$0xff]  ;;  %v7879_v61 = vld [vmem:[%s11342_s16 + $0xb20] sm:$0xff] }
 0x554   : > { %7840 = vst [vmem:[%s14535_s24 + $0x26a0] sm:$0xff] %v7839_v59  ;;  %7842 = vst [vmem:[%s14535_s24 + $0x26a8] sm:$0xff] %v7841_v48  ;;  %v7881_v30 = vld [vmem:[%s11342_s16 + $0xb28] sm:$0xff]  ;;  %v7883_v50 = vld [vmem:[%s11342_s16 + $0xb30] sm:$0xff] }
 0x555   : > { %7844 = vst [vmem:[%s14535_s24 + $0x26b0] sm:$0xff] %v7843_v56  ;;  %7846 = vst [vmem:[%s14535_s24 + $0x26b8] sm:$0xff] %v7845_v43  ;;  %v7885_v40 = vld [vmem:[%s11342_s16 + $0xb38] sm:$0xff]  ;;  %v7887_v10 = vld [vmem:[%s11342_s16 + $0xb40] sm:$0xff] }
 0x556   : > { %7848 = vst [vmem:[%s14535_s24 + $0x26c0] sm:$0xff] %v7847_v21  ;;  %7850 = vst [vmem:[%s14535_s24 + $0x26c8] sm:$0xff] %v7849_v60  ;;  %v7889_v63 = vld [vmem:[%s11342_s16 + $0xb48] sm:$0xff]  ;;  %v7891_v39 = vld [vmem:[%s11342_s16 + $0xb50] sm:$0xff] }
 0x557   : > { %7852 = vst [vmem:[%s14535_s24 + $0x26d0] sm:$0xff] %v7851_v6  ;;  %7854 = vst [vmem:[%s14535_s24 + $0x26d8] sm:$0xff] %v7853_v54  ;;  %v7893_v1 = vld [vmem:[%s11342_s16 + $0xb58] sm:$0xff]  ;;  %v7895_v15 = vld [vmem:[%s11342_s16 + $0xb60] sm:$0xff] }
 0x558   : > { %7856 = vst [vmem:[%s14535_s24 + $0x26e0] sm:$0xff] %v7855_v44  ;;  %7858 = vst [vmem:[%s14535_s24 + $0x26e8] sm:$0xff] %v7857_v12  ;;  %v7897_v38 = vld [vmem:[%s11342_s16 + $0xb68] sm:$0xff]  ;;  %v7899_v29 = vld [vmem:[%s11342_s16 + $0xb70] sm:$0xff] }
 0x559   : > { %7860 = vst [vmem:[%s14535_s24 + $0x26f0] sm:$0xff] %v7859_v0  ;;  %7862 = vst [vmem:[%s14535_s24 + $0x26f8] sm:$0xff] %v7861_v24  ;;  %v7901_v22 = vld [vmem:[%s11342_s16 + $0xb78] sm:$0xff]  ;;  %v7903_v27 = vld [vmem:[%s11342_s16 + $0xb80] sm:$0xff] }
 0x55a   : > { %7864 = vst [vmem:[%s14535_s24 + $0x2700] sm:$0xff] %v7863_v37  ;;  %7866 = vst [vmem:[%s14535_s24 + $0x2708] sm:$0xff] %v7865_v35  ;;  %v7905_v31 = vld [vmem:[%s11342_s16 + $0xb88] sm:$0xff]  ;;  %v7907_v42 = vld [vmem:[%s11342_s16 + $0xb90] sm:$0xff] }
 0x55b   : > { %7868 = vst [vmem:[%s14535_s24 + $0x2710] sm:$0xff] %v7867_v51  ;;  %7870 = vst [vmem:[%s14535_s24 + $0x2718] sm:$0xff] %v7869_v9  ;;  %v7909_v5 = vld [vmem:[%s11342_s16 + $0xb98] sm:$0xff]  ;;  %v7911_v3 = vld [vmem:[%s11342_s16 + $0xba0] sm:$0xff] }
 0x55c   : > { %7872 = vst [vmem:[%s14535_s24 + $0x2720] sm:$0xff] %v7871_v55  ;;  %7874 = vst [vmem:[%s14535_s24 + $0x2728] sm:$0xff] %v7873_v32  ;;  %v7913_v62 = vld [vmem:[%s11342_s16 + $0xba8] sm:$0xff]  ;;  %v7915_v18 = vld [vmem:[%s11342_s16 + $0xbb0] sm:$0xff] }
 0x55d   : > { %7876 = vst [vmem:[%s14535_s24 + $0x2730] sm:$0xff] %v7875_v13  ;;  %7878 = vst [vmem:[%s14535_s24 + $0x2738] sm:$0xff] %v7877_v28  ;;  %v7917_v14 = vld [vmem:[%s11342_s16 + $0xbb8] sm:$0xff]  ;;  %v7919_v47 = vld [vmem:[%s11342_s16 + $0xbc0] sm:$0xff] }
 0x55e   : > { %7880 = vst [vmem:[%s14535_s24 + $0x2740] sm:$0xff] %v7879_v61  ;;  %7882 = vst [vmem:[%s14535_s24 + $0x2748] sm:$0xff] %v7881_v30  ;;  %v7921_v26 = vld [vmem:[%s11342_s16 + $0xbc8] sm:$0xff]  ;;  %v7923_v46 = vld [vmem:[%s11342_s16 + $0xbd0] sm:$0xff] }
 0x55f   : > { %7884 = vst [vmem:[%s14535_s24 + $0x2750] sm:$0xff] %v7883_v50  ;;  %7886 = vst [vmem:[%s14535_s24 + $0x2758] sm:$0xff] %v7885_v40  ;;  %v7925_v25 = vld [vmem:[%s11342_s16 + $0xbd8] sm:$0xff]  ;;  %v7927_v4 = vld [vmem:[%s11342_s16 + $0xbe0] sm:$0xff] }
 0x560   : > { %7888 = vst [vmem:[%s14535_s24 + $0x2d00] sm:$0xff] %v7887_v10  ;;  %7890 = vst [vmem:[%s14535_s24 + $0x2d08] sm:$0xff] %v7889_v63  ;;  %v7929_v41 = vld [vmem:[%s11342_s16 + $0xbe8] sm:$0xff]  ;;  %v7931_v52 = vld [vmem:[%s11342_s16 + $0xbf0] sm:$0xff] }
 0x561   : > { %7892 = vst [vmem:[%s14535_s24 + $0x2d10] sm:$0xff] %v7891_v39  ;;  %7894 = vst [vmem:[%s14535_s24 + $0x2d18] sm:$0xff] %v7893_v1  ;;  %v7933_v34 = vld [vmem:[%s11342_s16 + $0xbf8] sm:$0xff]  ;;  %v7935_v17 = vld [vmem:[%s11342_s16 + $0xc00] sm:$0xff] }
 0x562   : > { %7896 = vst [vmem:[%s14535_s24 + $0x2d20] sm:$0xff] %v7895_v15  ;;  %7898 = vst [vmem:[%s14535_s24 + $0x2d28] sm:$0xff] %v7897_v38  ;;  %v7937_v45 = vld [vmem:[%s11342_s16 + $0xc08] sm:$0xff]  ;;  %v7939_v57 = vld [vmem:[%s11342_s16 + $0xc10] sm:$0xff] }
 0x563   : > { %7900 = vst [vmem:[%s14535_s24 + $0x2d30] sm:$0xff] %v7899_v29  ;;  %7902 = vst [vmem:[%s14535_s24 + $0x2d38] sm:$0xff] %v7901_v22  ;;  %v7941_v16 = vld [vmem:[%s11342_s16 + $0xc18] sm:$0xff]  ;;  %v7943_v20 = vld [vmem:[%s11342_s16 + $0xc20] sm:$0xff] }
 0x564   : > { %7904 = vst [vmem:[%s14535_s24 + $0x2d40] sm:$0xff] %v7903_v27  ;;  %7906 = vst [vmem:[%s14535_s24 + $0x2d48] sm:$0xff] %v7905_v31  ;;  %v7945_v11 = vld [vmem:[%s11342_s16 + $0xc28] sm:$0xff]  ;;  %v7947_v23 = vld [vmem:[%s11342_s16 + $0xc30] sm:$0xff] }
 0x565   : > { %7908 = vst [vmem:[%s14535_s24 + $0x2d50] sm:$0xff] %v7907_v42  ;;  %7910 = vst [vmem:[%s14535_s24 + $0x2d58] sm:$0xff] %v7909_v5  ;;  %v7949_v58 = vld [vmem:[%s11342_s16 + $0xc38] sm:$0xff]  ;;  %v7951_v2 = vld [vmem:[%s11342_s16 + $0xc40] sm:$0xff] }
 0x566   : > { %7912 = vst [vmem:[%s14535_s24 + $0x2d60] sm:$0xff] %v7911_v3  ;;  %7914 = vst [vmem:[%s14535_s24 + $0x2d68] sm:$0xff] %v7913_v62  ;;  %v7953_v53 = vld [vmem:[%s11342_s16 + $0xc48] sm:$0xff]  ;;  %v7955_v36 = vld [vmem:[%s11342_s16 + $0xc50] sm:$0xff] }
 0x567   : > { %7916 = vst [vmem:[%s14535_s24 + $0x2d70] sm:$0xff] %v7915_v18  ;;  %7918 = vst [vmem:[%s14535_s24 + $0x2d78] sm:$0xff] %v7917_v14  ;;  %v7957_v49 = vld [vmem:[%s11342_s16 + $0xc58] sm:$0xff]  ;;  %v7959_v8 = vld [vmem:[%s11342_s16 + $0xc60] sm:$0xff] }
 0x568   : > { %7920 = vst [vmem:[%s14535_s24 + $0x2d80] sm:$0xff] %v7919_v47  ;;  %7922 = vst [vmem:[%s14535_s24 + $0x2d88] sm:$0xff] %v7921_v26  ;;  %v7961_v7 = vld [vmem:[%s11342_s16 + $0xc68] sm:$0xff]  ;;  %v7963_v19 = vld [vmem:[%s11342_s16 + $0xc70] sm:$0xff] }
 0x569   : > { %7924 = vst [vmem:[%s14535_s24 + $0x2d90] sm:$0xff] %v7923_v46  ;;  %7926 = vst [vmem:[%s14535_s24 + $0x2d98] sm:$0xff] %v7925_v25  ;;  %v7965_v33 = vld [vmem:[%s11342_s16 + $0xc78] sm:$0xff]  ;;  %v7967_v59 = vld [vmem:[%s11342_s16 + $0xc80] sm:$0xff] }
 0x56a   : > { %7928 = vst [vmem:[%s14535_s24 + $0x2da0] sm:$0xff] %v7927_v4  ;;  %7930 = vst [vmem:[%s14535_s24 + $0x2da8] sm:$0xff] %v7929_v41  ;;  %v7969_v48 = vld [vmem:[%s11342_s16 + $0xc88] sm:$0xff]  ;;  %v7971_v56 = vld [vmem:[%s11342_s16 + $0xc90] sm:$0xff] }
 0x56b   : > { %7932 = vst [vmem:[%s14535_s24 + $0x2db0] sm:$0xff] %v7931_v52  ;;  %7934 = vst [vmem:[%s14535_s24 + $0x2db8] sm:$0xff] %v7933_v34  ;;  %v7973_v43 = vld [vmem:[%s11342_s16 + $0xc98] sm:$0xff]  ;;  %v7975_v21 = vld [vmem:[%s11342_s16 + $0xca0] sm:$0xff] }
 0x56c   : > { %7936 = vst [vmem:[%s14535_s24 + $0x2dc0] sm:$0xff] %v7935_v17  ;;  %7938 = vst [vmem:[%s14535_s24 + $0x2dc8] sm:$0xff] %v7937_v45  ;;  %v7977_v60 = vld [vmem:[%s11342_s16 + $0xca8] sm:$0xff]  ;;  %v7979_v6 = vld [vmem:[%s11342_s16 + $0xcb0] sm:$0xff] }
 0x56d   : > { %7940 = vst [vmem:[%s14535_s24 + $0x2dd0] sm:$0xff] %v7939_v57  ;;  %7942 = vst [vmem:[%s14535_s24 + $0x2dd8] sm:$0xff] %v7941_v16  ;;  %v7981_v54 = vld [vmem:[%s11342_s16 + $0xcb8] sm:$0xff]  ;;  %v7983_v44 = vld [vmem:[%s11342_s16 + $0xcc0] sm:$0xff] }
 0x56e   : > { %7944 = vst [vmem:[%s14535_s24 + $0x2de0] sm:$0xff] %v7943_v20  ;;  %7946 = vst [vmem:[%s14535_s24 + $0x2de8] sm:$0xff] %v7945_v11  ;;  %v7985_v12 = vld [vmem:[%s11342_s16 + $0xcc8] sm:$0xff]  ;;  %v7987_v0 = vld [vmem:[%s11342_s16 + $0xcd0] sm:$0xff] }
 0x56f   : > { %7948 = vst [vmem:[%s14535_s24 + $0x2df0] sm:$0xff] %v7947_v23  ;;  %7950 = vst [vmem:[%s14535_s24 + $0x2df8] sm:$0xff] %v7949_v58  ;;  %v7989_v24 = vld [vmem:[%s11342_s16 + $0xcd8] sm:$0xff]  ;;  %v7991_v37 = vld [vmem:[%s11342_s16 + $0xce0] sm:$0xff] }
 0x570   : > { %7952 = vst [vmem:[%s14535_s24 + $0x2e00] sm:$0xff] %v7951_v2  ;;  %7954 = vst [vmem:[%s14535_s24 + $0x2e08] sm:$0xff] %v7953_v53  ;;  %v7993_v35 = vld [vmem:[%s11342_s16 + $0xce8] sm:$0xff]  ;;  %v7995_v51 = vld [vmem:[%s11342_s16 + $0xcf0] sm:$0xff] }
 0x571   : > { %7956 = vst [vmem:[%s14535_s24 + $0x2e10] sm:$0xff] %v7955_v36  ;;  %7958 = vst [vmem:[%s14535_s24 + $0x2e18] sm:$0xff] %v7957_v49  ;;  %v7997_v9 = vld [vmem:[%s11342_s16 + $0xcf8] sm:$0xff]  ;;  %v7999_v55 = vld [vmem:[%s11342_s16 + $0xd00] sm:$0xff] }
 0x572   : > { %7960 = vst [vmem:[%s14535_s24 + $0x2e20] sm:$0xff] %v7959_v8  ;;  %7962 = vst [vmem:[%s14535_s24 + $0x2e28] sm:$0xff] %v7961_v7  ;;  %v8001_v32 = vld [vmem:[%s11342_s16 + $0xd08] sm:$0xff]  ;;  %v8003_v13 = vld [vmem:[%s11342_s16 + $0xd10] sm:$0xff] }
 0x573   : > { %7964 = vst [vmem:[%s14535_s24 + $0x2e30] sm:$0xff] %v7963_v19  ;;  %7966 = vst [vmem:[%s14535_s24 + $0x2e38] sm:$0xff] %v7965_v33  ;;  %v8005_v28 = vld [vmem:[%s11342_s16 + $0xd18] sm:$0xff]  ;;  %v8007_v61 = vld [vmem:[%s11342_s16 + $0xd20] sm:$0xff] }
 0x574   : > { %7968 = vst [vmem:[%s14535_s24 + $0x2e40] sm:$0xff] %v7967_v59  ;;  %7970 = vst [vmem:[%s14535_s24 + $0x2e48] sm:$0xff] %v7969_v48  ;;  %v8009_v30 = vld [vmem:[%s11342_s16 + $0xd28] sm:$0xff]  ;;  %v8011_v50 = vld [vmem:[%s11342_s16 + $0xd30] sm:$0xff] }
 0x575   : > { %7972 = vst [vmem:[%s14535_s24 + $0x2e50] sm:$0xff] %v7971_v56  ;;  %7974 = vst [vmem:[%s14535_s24 + $0x2e58] sm:$0xff] %v7973_v43  ;;  %v8013_v40 = vld [vmem:[%s11342_s16 + $0xd38] sm:$0xff]  ;;  %v8015_v10 = vld [vmem:[%s11342_s16 + $0xd40] sm:$0xff] }
 0x576   : > { %7976 = vst [vmem:[%s14535_s24 + $0x2e60] sm:$0xff] %v7975_v21  ;;  %7978 = vst [vmem:[%s14535_s24 + $0x2e68] sm:$0xff] %v7977_v60  ;;  %v8017_v63 = vld [vmem:[%s11342_s16 + $0xd48] sm:$0xff]  ;;  %v8019_v39 = vld [vmem:[%s11342_s16 + $0xd50] sm:$0xff] }
 0x577   : > { %7980 = vst [vmem:[%s14535_s24 + $0x2e70] sm:$0xff] %v7979_v6  ;;  %7982 = vst [vmem:[%s14535_s24 + $0x2e78] sm:$0xff] %v7981_v54  ;;  %v8021_v1 = vld [vmem:[%s11342_s16 + $0xd58] sm:$0xff]  ;;  %v8023_v15 = vld [vmem:[%s11342_s16 + $0xd60] sm:$0xff] }
 0x578   : > { %7984 = vst [vmem:[%s14535_s24 + $0x2e80] sm:$0xff] %v7983_v44  ;;  %7986 = vst [vmem:[%s14535_s24 + $0x2e88] sm:$0xff] %v7985_v12  ;;  %v8025_v38 = vld [vmem:[%s11342_s16 + $0xd68] sm:$0xff]  ;;  %v8027_v29 = vld [vmem:[%s11342_s16 + $0xd70] sm:$0xff] }
 0x579   : > { %7988 = vst [vmem:[%s14535_s24 + $0x2e90] sm:$0xff] %v7987_v0  ;;  %7990 = vst [vmem:[%s14535_s24 + $0x2e98] sm:$0xff] %v7989_v24  ;;  %v8029_v22 = vld [vmem:[%s11342_s16 + $0xd78] sm:$0xff]  ;;  %v8031_v27 = vld [vmem:[%s11342_s16 + $0xd80] sm:$0xff] }
 0x57a   : > { %7992 = vst [vmem:[%s14535_s24 + $0x2ea0] sm:$0xff] %v7991_v37  ;;  %7994 = vst [vmem:[%s14535_s24 + $0x2ea8] sm:$0xff] %v7993_v35  ;;  %v8033_v31 = vld [vmem:[%s11342_s16 + $0xd88] sm:$0xff]  ;;  %v8035_v42 = vld [vmem:[%s11342_s16 + $0xd90] sm:$0xff] }
 0x57b   : > { %7996 = vst [vmem:[%s14535_s24 + $0x2eb0] sm:$0xff] %v7995_v51  ;;  %7998 = vst [vmem:[%s14535_s24 + $0x2eb8] sm:$0xff] %v7997_v9  ;;  %v8037_v5 = vld [vmem:[%s11342_s16 + $0xd98] sm:$0xff]  ;;  %v8039_v3 = vld [vmem:[%s11342_s16 + $0xda0] sm:$0xff] }
 0x57c   : > { %8000 = vst [vmem:[%s14535_s24 + $0x2ec0] sm:$0xff] %v7999_v55  ;;  %8002 = vst [vmem:[%s14535_s24 + $0x2ec8] sm:$0xff] %v8001_v32  ;;  %v8041_v62 = vld [vmem:[%s11342_s16 + $0xda8] sm:$0xff]  ;;  %v8043_v18 = vld [vmem:[%s11342_s16 + $0xdb0] sm:$0xff] }
 0x57d   : > { %8004 = vst [vmem:[%s14535_s24 + $0x2ed0] sm:$0xff] %v8003_v13  ;;  %8006 = vst [vmem:[%s14535_s24 + $0x2ed8] sm:$0xff] %v8005_v28  ;;  %v8045_v14 = vld [vmem:[%s11342_s16 + $0xdb8] sm:$0xff]  ;;  %v8047_v47 = vld [vmem:[%s11342_s16 + $0xdc0] sm:$0xff] }
 0x57e   : > { %8008 = vst [vmem:[%s14535_s24 + $0x3480] sm:$0xff] %v8007_v61  ;;  %8010 = vst [vmem:[%s14535_s24 + $0x3488] sm:$0xff] %v8009_v30  ;;  %v8049_v26 = vld [vmem:[%s11342_s16 + $0xdc8] sm:$0xff]  ;;  %v8051_v46 = vld [vmem:[%s11342_s16 + $0xdd0] sm:$0xff] }
 0x57f   : > { %8012 = vst [vmem:[%s14535_s24 + $0x3490] sm:$0xff] %v8011_v50  ;;  %8014 = vst [vmem:[%s14535_s24 + $0x3498] sm:$0xff] %v8013_v40  ;;  %v8053_v25 = vld [vmem:[%s11342_s16 + $0xdd8] sm:$0xff]  ;;  %v8055_v4 = vld [vmem:[%s11342_s16 + $0xde0] sm:$0xff] }
 0x580   : > { %8016 = vst [vmem:[%s14535_s24 + $0x34a0] sm:$0xff] %v8015_v10  ;;  %8018 = vst [vmem:[%s14535_s24 + $0x34a8] sm:$0xff] %v8017_v63  ;;  %v8057_v41 = vld [vmem:[%s11342_s16 + $0xde8] sm:$0xff]  ;;  %v8059_v52 = vld [vmem:[%s11342_s16 + $0xdf0] sm:$0xff] }
 0x581   : > { %8020 = vst [vmem:[%s14535_s24 + $0x34b0] sm:$0xff] %v8019_v39  ;;  %8022 = vst [vmem:[%s14535_s24 + $0x34b8] sm:$0xff] %v8021_v1  ;;  %v8061_v34 = vld [vmem:[%s11342_s16 + $0xdf8] sm:$0xff]  ;;  %v8063_v17 = vld [vmem:[%s11342_s16 + $0xe00] sm:$0xff] }
 0x582   : > { %8024 = vst [vmem:[%s14535_s24 + $0x34c0] sm:$0xff] %v8023_v15  ;;  %8026 = vst [vmem:[%s14535_s24 + $0x34c8] sm:$0xff] %v8025_v38  ;;  %v8065_v45 = vld [vmem:[%s11342_s16 + $0xe08] sm:$0xff]  ;;  %v8067_v57 = vld [vmem:[%s11342_s16 + $0xe10] sm:$0xff] }
 0x583   : > { %8028 = vst [vmem:[%s14535_s24 + $0x34d0] sm:$0xff] %v8027_v29  ;;  %8030 = vst [vmem:[%s14535_s24 + $0x34d8] sm:$0xff] %v8029_v22  ;;  %v8069_v16 = vld [vmem:[%s11342_s16 + $0xe18] sm:$0xff]  ;;  %v8071_v20 = vld [vmem:[%s11342_s16 + $0xe20] sm:$0xff] }
 0x584   : > { %8032 = vst [vmem:[%s14535_s24 + $0x34e0] sm:$0xff] %v8031_v27  ;;  %8034 = vst [vmem:[%s14535_s24 + $0x34e8] sm:$0xff] %v8033_v31  ;;  %v8073_v11 = vld [vmem:[%s11342_s16 + $0xe28] sm:$0xff]  ;;  %v8075_v23 = vld [vmem:[%s11342_s16 + $0xe30] sm:$0xff] }
 0x585   : > { %8036 = vst [vmem:[%s14535_s24 + $0x34f0] sm:$0xff] %v8035_v42  ;;  %8038 = vst [vmem:[%s14535_s24 + $0x34f8] sm:$0xff] %v8037_v5  ;;  %v8077_v58 = vld [vmem:[%s11342_s16 + $0xe38] sm:$0xff]  ;;  %v8079_v2 = vld [vmem:[%s11342_s16 + $0xe40] sm:$0xff] }
 0x586   : > { %8040 = vst [vmem:[%s14535_s24 + $0x3500] sm:$0xff] %v8039_v3  ;;  %8042 = vst [vmem:[%s14535_s24 + $0x3508] sm:$0xff] %v8041_v62  ;;  %v8081_v53 = vld [vmem:[%s11342_s16 + $0xe48] sm:$0xff]  ;;  %v8083_v36 = vld [vmem:[%s11342_s16 + $0xe50] sm:$0xff] }
 0x587   : > { %8044 = vst [vmem:[%s14535_s24 + $0x3510] sm:$0xff] %v8043_v18  ;;  %8046 = vst [vmem:[%s14535_s24 + $0x3518] sm:$0xff] %v8045_v14  ;;  %v8085_v49 = vld [vmem:[%s11342_s16 + $0xe58] sm:$0xff]  ;;  %v8087_v8 = vld [vmem:[%s11342_s16 + $0xe60] sm:$0xff] }
 0x588   : > { %8048 = vst [vmem:[%s14535_s24 + $0x3520] sm:$0xff] %v8047_v47  ;;  %8050 = vst [vmem:[%s14535_s24 + $0x3528] sm:$0xff] %v8049_v26  ;;  %v8089_v7 = vld [vmem:[%s11342_s16 + $0xe68] sm:$0xff]  ;;  %v8091_v19 = vld [vmem:[%s11342_s16 + $0xe70] sm:$0xff] }
 0x589   : > { %8052 = vst [vmem:[%s14535_s24 + $0x3530] sm:$0xff] %v8051_v46  ;;  %8054 = vst [vmem:[%s14535_s24 + $0x3538] sm:$0xff] %v8053_v25  ;;  %v8093_v33 = vld [vmem:[%s11342_s16 + $0xe78] sm:$0xff]  ;;  %v8095_v59 = vld [vmem:[%s11342_s16 + $0xe80] sm:$0xff] }
 0x58a   : > { %8056 = vst [vmem:[%s14535_s24 + $0x3540] sm:$0xff] %v8055_v4  ;;  %8058 = vst [vmem:[%s14535_s24 + $0x3548] sm:$0xff] %v8057_v41  ;;  %v8097_v48 = vld [vmem:[%s11342_s16 + $0xe88] sm:$0xff]  ;;  %v8099_v56 = vld [vmem:[%s11342_s16 + $0xe90] sm:$0xff] }
 0x58b   : > { %8060 = vst [vmem:[%s14535_s24 + $0x3550] sm:$0xff] %v8059_v52  ;;  %8062 = vst [vmem:[%s14535_s24 + $0x3558] sm:$0xff] %v8061_v34  ;;  %v8101_v43 = vld [vmem:[%s11342_s16 + $0xe98] sm:$0xff]  ;;  %v8103_v21 = vld [vmem:[%s11342_s16 + $0xea0] sm:$0xff] }
 0x58c   : > { %8064 = vst [vmem:[%s14535_s24 + $0x3560] sm:$0xff] %v8063_v17  ;;  %8066 = vst [vmem:[%s14535_s24 + $0x3568] sm:$0xff] %v8065_v45  ;;  %v8105_v60 = vld [vmem:[%s11342_s16 + $0xea8] sm:$0xff]  ;;  %v8107_v6 = vld [vmem:[%s11342_s16 + $0xeb0] sm:$0xff] }
 0x58d   : > { %8068 = vst [vmem:[%s14535_s24 + $0x3570] sm:$0xff] %v8067_v57  ;;  %8070 = vst [vmem:[%s14535_s24 + $0x3578] sm:$0xff] %v8069_v16  ;;  %v8109_v54 = vld [vmem:[%s11342_s16 + $0xeb8] sm:$0xff]  ;;  %v8111_v44 = vld [vmem:[%s11342_s16 + $0xec0] sm:$0xff] }
 0x58e   : > { %8072 = vst [vmem:[%s14535_s24 + $0x3580] sm:$0xff] %v8071_v20  ;;  %8074 = vst [vmem:[%s14535_s24 + $0x3588] sm:$0xff] %v8073_v11  ;;  %v8113_v12 = vld [vmem:[%s11342_s16 + $0xec8] sm:$0xff]  ;;  %v8115_v0 = vld [vmem:[%s11342_s16 + $0xed0] sm:$0xff] }
 0x58f   : > { %8076 = vst [vmem:[%s14535_s24 + $0x3590] sm:$0xff] %v8075_v23  ;;  %8078 = vst [vmem:[%s14535_s24 + $0x3598] sm:$0xff] %v8077_v58  ;;  %v8117_v24 = vld [vmem:[%s11342_s16 + $0xed8] sm:$0xff]  ;;  %v8119_v37 = vld [vmem:[%s11342_s16 + $0xee0] sm:$0xff] }
 0x590   : > { %8080 = vst [vmem:[%s14535_s24 + $0x35a0] sm:$0xff] %v8079_v2  ;;  %8082 = vst [vmem:[%s14535_s24 + $0x35a8] sm:$0xff] %v8081_v53  ;;  %v8121_v35 = vld [vmem:[%s11342_s16 + $0xee8] sm:$0xff]  ;;  %v8123_v51 = vld [vmem:[%s11342_s16 + $0xef0] sm:$0xff] }
 0x591   : > { %8084 = vst [vmem:[%s14535_s24 + $0x35b0] sm:$0xff] %v8083_v36  ;;  %8086 = vst [vmem:[%s14535_s24 + $0x35b8] sm:$0xff] %v8085_v49  ;;  %v8125_v9 = vld [vmem:[%s11342_s16 + $0xef8] sm:$0xff]  ;;  %v8127_v55 = vld [vmem:[%s11342_s16 + $0xf00] sm:$0xff] }
 0x592   : > { %8088 = vst [vmem:[%s14535_s24 + $0x35c0] sm:$0xff] %v8087_v8  ;;  %8090 = vst [vmem:[%s14535_s24 + $0x35c8] sm:$0xff] %v8089_v7  ;;  %v8129_v32 = vld [vmem:[%s11342_s16 + $0xf08] sm:$0xff]  ;;  %v8131_v13 = vld [vmem:[%s11342_s16 + $0xf10] sm:$0xff] }
 0x593   : > { %8092 = vst [vmem:[%s14535_s24 + $0x35d0] sm:$0xff] %v8091_v19  ;;  %8094 = vst [vmem:[%s14535_s24 + $0x35d8] sm:$0xff] %v8093_v33  ;;  %v8133_v28 = vld [vmem:[%s11342_s16 + $0xf18] sm:$0xff]  ;;  %v8135_v61 = vld [vmem:[%s11342_s16 + $0xf20] sm:$0xff] }
 0x594   : > { %8096 = vst [vmem:[%s14535_s24 + $0x35e0] sm:$0xff] %v8095_v59  ;;  %8098 = vst [vmem:[%s14535_s24 + $0x35e8] sm:$0xff] %v8097_v48  ;;  %v8137_v30 = vld [vmem:[%s11342_s16 + $0xf28] sm:$0xff]  ;;  %v8139_v50 = vld [vmem:[%s11342_s16 + $0xf30] sm:$0xff] }
 0x595   : > { %8100 = vst [vmem:[%s14535_s24 + $0x35f0] sm:$0xff] %v8099_v56  ;;  %8102 = vst [vmem:[%s14535_s24 + $0x35f8] sm:$0xff] %v8101_v43  ;;  %v8141_v40 = vld [vmem:[%s11342_s16 + $0xf38] sm:$0xff]  ;;  %v8143_v10 = vld [vmem:[%s11342_s16 + $0xf40] sm:$0xff] }
 0x596   : > { %8104 = vst [vmem:[%s14535_s24 + $0x3600] sm:$0xff] %v8103_v21  ;;  %8106 = vst [vmem:[%s14535_s24 + $0x3608] sm:$0xff] %v8105_v60  ;;  %v8145_v63 = vld [vmem:[%s11342_s16 + $0xf48] sm:$0xff]  ;;  %v8147_v39 = vld [vmem:[%s11342_s16 + $0xf50] sm:$0xff] }
 0x597   : > { %8108 = vst [vmem:[%s14535_s24 + $0x3610] sm:$0xff] %v8107_v6  ;;  %8110 = vst [vmem:[%s14535_s24 + $0x3618] sm:$0xff] %v8109_v54  ;;  %v8149_v1 = vld [vmem:[%s11342_s16 + $0xf58] sm:$0xff]  ;;  %v8151_v15 = vld [vmem:[%s11342_s16 + $0xf60] sm:$0xff] }
 0x598   : > { %8112 = vst [vmem:[%s14535_s24 + $0x3620] sm:$0xff] %v8111_v44  ;;  %8114 = vst [vmem:[%s14535_s24 + $0x3628] sm:$0xff] %v8113_v12  ;;  %v8153_v38 = vld [vmem:[%s11342_s16 + $0xf68] sm:$0xff]  ;;  %v8155_v29 = vld [vmem:[%s11342_s16 + $0xf70] sm:$0xff] }
 0x599   : > { %8116 = vst [vmem:[%s14535_s24 + $0x3630] sm:$0xff] %v8115_v0  ;;  %8118 = vst [vmem:[%s14535_s24 + $0x3638] sm:$0xff] %v8117_v24  ;;  %v8157_v22 = vld [vmem:[%s11342_s16 + $0xf78] sm:$0xff]  ;;  %v8159_v27 = vld [vmem:[%s11342_s16 + $0xf80] sm:$0xff] }
 0x59a   : > { %8120 = vst [vmem:[%s14535_s24 + $0x3640] sm:$0xff] %v8119_v37  ;;  %8122 = vst [vmem:[%s14535_s24 + $0x3648] sm:$0xff] %v8121_v35  ;;  %v8161_v31 = vld [vmem:[%s11342_s16 + $0xf88] sm:$0xff]  ;;  %v8163_v42 = vld [vmem:[%s11342_s16 + $0xf90] sm:$0xff] }
 0x59b   : > { %8124 = vst [vmem:[%s14535_s24 + $0x3650] sm:$0xff] %v8123_v51  ;;  %8126 = vst [vmem:[%s14535_s24 + $0x3658] sm:$0xff] %v8125_v9  ;;  %v8165_v5 = vld [vmem:[%s11342_s16 + $0xf98] sm:$0xff]  ;;  %v8167_v3 = vld [vmem:[%s11342_s16 + $0xfa0] sm:$0xff] }
 0x59c   : > { %8128 = vst [vmem:[%s14535_s24 + $0x3c00] sm:$0xff] %v8127_v55  ;;  %8130 = vst [vmem:[%s14535_s24 + $0x3c08] sm:$0xff] %v8129_v32  ;;  %v8169_v62 = vld [vmem:[%s11342_s16 + $0xfa8] sm:$0xff]  ;;  %v8171_v18 = vld [vmem:[%s11342_s16 + $0xfb0] sm:$0xff] }
 0x59d   : > { %8132 = vst [vmem:[%s14535_s24 + $0x3c10] sm:$0xff] %v8131_v13  ;;  %8134 = vst [vmem:[%s14535_s24 + $0x3c18] sm:$0xff] %v8133_v28  ;;  %v8173_v14 = vld [vmem:[%s11342_s16 + $0xfb8] sm:$0xff]  ;;  %v8175_v47 = vld [vmem:[%s11342_s16 + $0xfc0] sm:$0xff] }
 0x59e   : > { %8136 = vst [vmem:[%s14535_s24 + $0x3c20] sm:$0xff] %v8135_v61  ;;  %8138 = vst [vmem:[%s14535_s24 + $0x3c28] sm:$0xff] %v8137_v30  ;;  %v8177_v26 = vld [vmem:[%s11342_s16 + $0xfc8] sm:$0xff]  ;;  %v8179_v46 = vld [vmem:[%s11342_s16 + $0xfd0] sm:$0xff] }
 0x59f   : > { %8140 = vst [vmem:[%s14535_s24 + $0x3c30] sm:$0xff] %v8139_v50  ;;  %8142 = vst [vmem:[%s14535_s24 + $0x3c38] sm:$0xff] %v8141_v40  ;;  %v8181_v25 = vld [vmem:[%s11342_s16 + $0xfd8] sm:$0xff]  ;;  %v8183_v4 = vld [vmem:[%s11342_s16 + $0xfe0] sm:$0xff] }
 0x5a0   : > { %8144 = vst [vmem:[%s14535_s24 + $0x3c40] sm:$0xff] %v8143_v10  ;;  %8146 = vst [vmem:[%s14535_s24 + $0x3c48] sm:$0xff] %v8145_v63  ;;  %v8185_v41 = vld [vmem:[%s11342_s16 + $0xfe8] sm:$0xff]  ;;  %v8187_v52 = vld [vmem:[%s11342_s16 + $0xff0] sm:$0xff] }
 0x5a1   : > { %8148 = vst [vmem:[%s14535_s24 + $0x3c50] sm:$0xff] %v8147_v39  ;;  %8150 = vst [vmem:[%s14535_s24 + $0x3c58] sm:$0xff] %v8149_v1  ;;  %v8189_v34 = vld [vmem:[%s11342_s16 + $0xff8] sm:$0xff]  ;;  %v8191_v17 = vld [vmem:[%s11342_s16 + $0x1000] sm:$0xff] }
 0x5a2   : > { %8152 = vst [vmem:[%s14535_s24 + $0x3c60] sm:$0xff] %v8151_v15  ;;  %8154 = vst [vmem:[%s14535_s24 + $0x3c68] sm:$0xff] %v8153_v38  ;;  %v8193_v45 = vld [vmem:[%s11342_s16 + $0x1008] sm:$0xff]  ;;  %v8195_v57 = vld [vmem:[%s11342_s16 + $0x1010] sm:$0xff] }
 0x5a3   : > { %8156 = vst [vmem:[%s14535_s24 + $0x3c70] sm:$0xff] %v8155_v29  ;;  %8158 = vst [vmem:[%s14535_s24 + $0x3c78] sm:$0xff] %v8157_v22  ;;  %v8197_v16 = vld [vmem:[%s11342_s16 + $0x1018] sm:$0xff]  ;;  %v8199_v20 = vld [vmem:[%s11342_s16 + $0x1020] sm:$0xff] }
 0x5a4   : > { %8160 = vst [vmem:[%s14535_s24 + $0x3c80] sm:$0xff] %v8159_v27  ;;  %8162 = vst [vmem:[%s14535_s24 + $0x3c88] sm:$0xff] %v8161_v31  ;;  %v8201_v11 = vld [vmem:[%s11342_s16 + $0x1028] sm:$0xff]  ;;  %v8203_v23 = vld [vmem:[%s11342_s16 + $0x1030] sm:$0xff] }
 0x5a5   : > { %8164 = vst [vmem:[%s14535_s24 + $0x3c90] sm:$0xff] %v8163_v42  ;;  %8166 = vst [vmem:[%s14535_s24 + $0x3c98] sm:$0xff] %v8165_v5  ;;  %v8205_v58 = vld [vmem:[%s11342_s16 + $0x1038] sm:$0xff]  ;;  %v8207_v2 = vld [vmem:[%s11342_s16 + $0x1040] sm:$0xff] }
 0x5a6   : > { %8168 = vst [vmem:[%s14535_s24 + $0x3ca0] sm:$0xff] %v8167_v3  ;;  %8170 = vst [vmem:[%s14535_s24 + $0x3ca8] sm:$0xff] %v8169_v62  ;;  %v8209_v53 = vld [vmem:[%s11342_s16 + $0x1048] sm:$0xff]  ;;  %v8211_v36 = vld [vmem:[%s11342_s16 + $0x1050] sm:$0xff] }
 0x5a7   : > { %8172 = vst [vmem:[%s14535_s24 + $0x3cb0] sm:$0xff] %v8171_v18  ;;  %8174 = vst [vmem:[%s14535_s24 + $0x3cb8] sm:$0xff] %v8173_v14  ;;  %v8213_v49 = vld [vmem:[%s11342_s16 + $0x1058] sm:$0xff]  ;;  %v8215_v8 = vld [vmem:[%s11342_s16 + $0x1060] sm:$0xff] }
 0x5a8   : > { %8176 = vst [vmem:[%s14535_s24 + $0x3cc0] sm:$0xff] %v8175_v47  ;;  %8178 = vst [vmem:[%s14535_s24 + $0x3cc8] sm:$0xff] %v8177_v26  ;;  %v8217_v7 = vld [vmem:[%s11342_s16 + $0x1068] sm:$0xff]  ;;  %v8219_v19 = vld [vmem:[%s11342_s16 + $0x1070] sm:$0xff] }
 0x5a9   : > { %8180 = vst [vmem:[%s14535_s24 + $0x3cd0] sm:$0xff] %v8179_v46  ;;  %8182 = vst [vmem:[%s14535_s24 + $0x3cd8] sm:$0xff] %v8181_v25  ;;  %v8221_v33 = vld [vmem:[%s11342_s16 + $0x1078] sm:$0xff]  ;;  %v8223_v59 = vld [vmem:[%s11342_s16 + $0x1080] sm:$0xff] }
 0x5aa   : > { %8184 = vst [vmem:[%s14535_s24 + $0x3ce0] sm:$0xff] %v8183_v4  ;;  %8186 = vst [vmem:[%s14535_s24 + $0x3ce8] sm:$0xff] %v8185_v41  ;;  %v8225_v48 = vld [vmem:[%s11342_s16 + $0x1088] sm:$0xff]  ;;  %v8227_v56 = vld [vmem:[%s11342_s16 + $0x1090] sm:$0xff] }
 0x5ab   : > { %8188 = vst [vmem:[%s14535_s24 + $0x3cf0] sm:$0xff] %v8187_v52  ;;  %8190 = vst [vmem:[%s14535_s24 + $0x3cf8] sm:$0xff] %v8189_v34  ;;  %v8229_v43 = vld [vmem:[%s11342_s16 + $0x1098] sm:$0xff]  ;;  %v8231_v21 = vld [vmem:[%s11342_s16 + $0x10a0] sm:$0xff] }
 0x5ac   : > { %8192 = vst [vmem:[%s14535_s24 + $0x3d00] sm:$0xff] %v8191_v17  ;;  %8194 = vst [vmem:[%s14535_s24 + $0x3d08] sm:$0xff] %v8193_v45  ;;  %v8233_v60 = vld [vmem:[%s11342_s16 + $0x10a8] sm:$0xff]  ;;  %v8235_v6 = vld [vmem:[%s11342_s16 + $0x10b0] sm:$0xff] }
 0x5ad   : > { %8196 = vst [vmem:[%s14535_s24 + $0x3d10] sm:$0xff] %v8195_v57  ;;  %8198 = vst [vmem:[%s14535_s24 + $0x3d18] sm:$0xff] %v8197_v16  ;;  %v8237_v54 = vld [vmem:[%s11342_s16 + $0x10b8] sm:$0xff]  ;;  %v8239_v44 = vld [vmem:[%s11342_s16 + $0x10c0] sm:$0xff] }
 0x5ae   : > { %8200 = vst [vmem:[%s14535_s24 + $0x3d20] sm:$0xff] %v8199_v20  ;;  %8202 = vst [vmem:[%s14535_s24 + $0x3d28] sm:$0xff] %v8201_v11  ;;  %v8241_v12 = vld [vmem:[%s11342_s16 + $0x10c8] sm:$0xff]  ;;  %v8243_v0 = vld [vmem:[%s11342_s16 + $0x10d0] sm:$0xff] }
 0x5af   : > { %8204 = vst [vmem:[%s14535_s24 + $0x3d30] sm:$0xff] %v8203_v23  ;;  %8206 = vst [vmem:[%s14535_s24 + $0x3d38] sm:$0xff] %v8205_v58  ;;  %v8245_v24 = vld [vmem:[%s11342_s16 + $0x10d8] sm:$0xff]  ;;  %v8247_v37 = vld [vmem:[%s11342_s16 + $0x10e0] sm:$0xff] }
 0x5b0   : > { %8208 = vst [vmem:[%s14535_s24 + $0x3d40] sm:$0xff] %v8207_v2  ;;  %8210 = vst [vmem:[%s14535_s24 + $0x3d48] sm:$0xff] %v8209_v53  ;;  %v8249_v35 = vld [vmem:[%s11342_s16 + $0x10e8] sm:$0xff]  ;;  %v8251_v51 = vld [vmem:[%s11342_s16 + $0x10f0] sm:$0xff] }
 0x5b1   : > { %8212 = vst [vmem:[%s14535_s24 + $0x3d50] sm:$0xff] %v8211_v36  ;;  %8214 = vst [vmem:[%s14535_s24 + $0x3d58] sm:$0xff] %v8213_v49  ;;  %v8253_v9 = vld [vmem:[%s11342_s16 + $0x10f8] sm:$0xff]  ;;  %v8255_v55 = vld [vmem:[%s11342_s16 + $0x1100] sm:$0xff] }
 0x5b2   : > { %8216 = vst [vmem:[%s14535_s24 + $0x3d60] sm:$0xff] %v8215_v8  ;;  %8218 = vst [vmem:[%s14535_s24 + $0x3d68] sm:$0xff] %v8217_v7  ;;  %v8257_v32 = vld [vmem:[%s11342_s16 + $0x1108] sm:$0xff]  ;;  %v8259_v13 = vld [vmem:[%s11342_s16 + $0x1110] sm:$0xff] }
 0x5b3   : > { %8220 = vst [vmem:[%s14535_s24 + $0x3d70] sm:$0xff] %v8219_v19  ;;  %8222 = vst [vmem:[%s14535_s24 + $0x3d78] sm:$0xff] %v8221_v33  ;;  %v8261_v28 = vld [vmem:[%s11342_s16 + $0x1118] sm:$0xff]  ;;  %v8263_v61 = vld [vmem:[%s11342_s16 + $0x1120] sm:$0xff] }
 0x5b4   : > { %8224 = vst [vmem:[%s14535_s24 + $0x3d80] sm:$0xff] %v8223_v59  ;;  %8226 = vst [vmem:[%s14535_s24 + $0x3d88] sm:$0xff] %v8225_v48  ;;  %v8265_v30 = vld [vmem:[%s11342_s16 + $0x1128] sm:$0xff]  ;;  %v8267_v50 = vld [vmem:[%s11342_s16 + $0x1130] sm:$0xff] }
 0x5b5   : > { %8228 = vst [vmem:[%s14535_s24 + $0x3d90] sm:$0xff] %v8227_v56  ;;  %8230 = vst [vmem:[%s14535_s24 + $0x3d98] sm:$0xff] %v8229_v43  ;;  %v8269_v40 = vld [vmem:[%s11342_s16 + $0x1138] sm:$0xff]  ;;  %v8271_v10 = vld [vmem:[%s11342_s16 + $0x1140] sm:$0xff] }
 0x5b6   : > { %8232 = vst [vmem:[%s14535_s24 + $0x3da0] sm:$0xff] %v8231_v21  ;;  %8234 = vst [vmem:[%s14535_s24 + $0x3da8] sm:$0xff] %v8233_v60  ;;  %v8273_v63 = vld [vmem:[%s11342_s16 + $0x1148] sm:$0xff]  ;;  %v8275_v39 = vld [vmem:[%s11342_s16 + $0x1150] sm:$0xff] }
 0x5b7   : > { %8236 = vst [vmem:[%s14535_s24 + $0x3db0] sm:$0xff] %v8235_v6  ;;  %8238 = vst [vmem:[%s14535_s24 + $0x3db8] sm:$0xff] %v8237_v54  ;;  %v8277_v1 = vld [vmem:[%s11342_s16 + $0x1158] sm:$0xff]  ;;  %v8279_v15 = vld [vmem:[%s11342_s16 + $0x1160] sm:$0xff] }
 0x5b8   : > { %8240 = vst [vmem:[%s14535_s24 + $0x3dc0] sm:$0xff] %v8239_v44  ;;  %8242 = vst [vmem:[%s14535_s24 + $0x3dc8] sm:$0xff] %v8241_v12  ;;  %v8281_v38 = vld [vmem:[%s11342_s16 + $0x1168] sm:$0xff]  ;;  %v8283_v29 = vld [vmem:[%s11342_s16 + $0x1170] sm:$0xff] }
 0x5b9   : > { %8244 = vst [vmem:[%s14535_s24 + $0x3dd0] sm:$0xff] %v8243_v0  ;;  %8246 = vst [vmem:[%s14535_s24 + $0x3dd8] sm:$0xff] %v8245_v24  ;;  %v8285_v22 = vld [vmem:[%s11342_s16 + $0x1178] sm:$0xff]  ;;  %v8287_v27 = vld [vmem:[%s11342_s16 + $0x1180] sm:$0xff] }
 0x5ba   : > { %8248 = vst [vmem:[%s14535_s24 + $0x4380] sm:$0xff] %v8247_v37  ;;  %8250 = vst [vmem:[%s14535_s24 + $0x4388] sm:$0xff] %v8249_v35  ;;  %v8289_v31 = vld [vmem:[%s11342_s16 + $0x1188] sm:$0xff]  ;;  %v8291_v42 = vld [vmem:[%s11342_s16 + $0x1190] sm:$0xff] }
 0x5bb   : > { %8252 = vst [vmem:[%s14535_s24 + $0x4390] sm:$0xff] %v8251_v51  ;;  %8254 = vst [vmem:[%s14535_s24 + $0x4398] sm:$0xff] %v8253_v9  ;;  %v8293_v5 = vld [vmem:[%s11342_s16 + $0x1198] sm:$0xff]  ;;  %v8295_v3 = vld [vmem:[%s11342_s16 + $0x11a0] sm:$0xff] }
 0x5bc   : > { %8256 = vst [vmem:[%s14535_s24 + $0x43a0] sm:$0xff] %v8255_v55  ;;  %8258 = vst [vmem:[%s14535_s24 + $0x43a8] sm:$0xff] %v8257_v32  ;;  %v8297_v62 = vld [vmem:[%s11342_s16 + $0x11a8] sm:$0xff]  ;;  %v8299_v18 = vld [vmem:[%s11342_s16 + $0x11b0] sm:$0xff] }
 0x5bd   : > { %8260 = vst [vmem:[%s14535_s24 + $0x43b0] sm:$0xff] %v8259_v13  ;;  %8262 = vst [vmem:[%s14535_s24 + $0x43b8] sm:$0xff] %v8261_v28  ;;  %v8301_v14 = vld [vmem:[%s11342_s16 + $0x11b8] sm:$0xff]  ;;  %v8303_v47 = vld [vmem:[%s11342_s16 + $0x11c0] sm:$0xff] }
 0x5be   : > { %8264 = vst [vmem:[%s14535_s24 + $0x43c0] sm:$0xff] %v8263_v61  ;;  %8266 = vst [vmem:[%s14535_s24 + $0x43c8] sm:$0xff] %v8265_v30  ;;  %v8305_v26 = vld [vmem:[%s11342_s16 + $0x11c8] sm:$0xff]  ;;  %v8307_v46 = vld [vmem:[%s11342_s16 + $0x11d0] sm:$0xff] }
 0x5bf   : > { %8268 = vst [vmem:[%s14535_s24 + $0x43d0] sm:$0xff] %v8267_v50  ;;  %8270 = vst [vmem:[%s14535_s24 + $0x43d8] sm:$0xff] %v8269_v40  ;;  %v8309_v25 = vld [vmem:[%s11342_s16 + $0x11d8] sm:$0xff]  ;;  %v8311_v4 = vld [vmem:[%s11342_s16 + $0x11e0] sm:$0xff] }
 0x5c0   : > { %8272 = vst [vmem:[%s14535_s24 + $0x43e0] sm:$0xff] %v8271_v10  ;;  %8274 = vst [vmem:[%s14535_s24 + $0x43e8] sm:$0xff] %v8273_v63  ;;  %v8313_v41 = vld [vmem:[%s11342_s16 + $0x11e8] sm:$0xff]  ;;  %v8315_v52 = vld [vmem:[%s11342_s16 + $0x11f0] sm:$0xff] }
 0x5c1   : > { %8276 = vst [vmem:[%s14535_s24 + $0x43f0] sm:$0xff] %v8275_v39  ;;  %8278 = vst [vmem:[%s14535_s24 + $0x43f8] sm:$0xff] %v8277_v1  ;;  %v8317_v34 = vld [vmem:[%s11342_s16 + $0x11f8] sm:$0xff]  ;;  %v8319_v17 = vld [vmem:[%s11342_s16 + $0x1200] sm:$0xff] }
 0x5c2   : > { %8280 = vst [vmem:[%s14535_s24 + $0x4400] sm:$0xff] %v8279_v15  ;;  %8282 = vst [vmem:[%s14535_s24 + $0x4408] sm:$0xff] %v8281_v38  ;;  %v8321_v45 = vld [vmem:[%s11342_s16 + $0x1208] sm:$0xff]  ;;  %v8323_v57 = vld [vmem:[%s11342_s16 + $0x1210] sm:$0xff] }
 0x5c3   : > { %8284 = vst [vmem:[%s14535_s24 + $0x4410] sm:$0xff] %v8283_v29  ;;  %8286 = vst [vmem:[%s14535_s24 + $0x4418] sm:$0xff] %v8285_v22  ;;  %v8325_v16 = vld [vmem:[%s11342_s16 + $0x1218] sm:$0xff]  ;;  %v8327_v20 = vld [vmem:[%s11342_s16 + $0x1220] sm:$0xff] }
 0x5c4   : > { %8288 = vst [vmem:[%s14535_s24 + $0x4420] sm:$0xff] %v8287_v27  ;;  %8290 = vst [vmem:[%s14535_s24 + $0x4428] sm:$0xff] %v8289_v31  ;;  %v8329_v11 = vld [vmem:[%s11342_s16 + $0x1228] sm:$0xff]  ;;  %v8331_v23 = vld [vmem:[%s11342_s16 + $0x1230] sm:$0xff] }
 0x5c5   : > { %8292 = vst [vmem:[%s14535_s24 + $0x4430] sm:$0xff] %v8291_v42  ;;  %8294 = vst [vmem:[%s14535_s24 + $0x4438] sm:$0xff] %v8293_v5  ;;  %v8333_v58 = vld [vmem:[%s11342_s16 + $0x1238] sm:$0xff]  ;;  %v8335_v2 = vld [vmem:[%s11342_s16 + $0x1240] sm:$0xff] }
 0x5c6   : > { %8296 = vst [vmem:[%s14535_s24 + $0x4440] sm:$0xff] %v8295_v3  ;;  %8298 = vst [vmem:[%s14535_s24 + $0x4448] sm:$0xff] %v8297_v62  ;;  %v8337_v53 = vld [vmem:[%s11342_s16 + $0x1248] sm:$0xff]  ;;  %v8339_v36 = vld [vmem:[%s11342_s16 + $0x1250] sm:$0xff] }
 0x5c7   : > { %8300 = vst [vmem:[%s14535_s24 + $0x4450] sm:$0xff] %v8299_v18  ;;  %8302 = vst [vmem:[%s14535_s24 + $0x4458] sm:$0xff] %v8301_v14  ;;  %v8341_v49 = vld [vmem:[%s11342_s16 + $0x1258] sm:$0xff]  ;;  %v8343_v8 = vld [vmem:[%s11342_s16 + $0x1260] sm:$0xff] }
 0x5c8   : > { %8304 = vst [vmem:[%s14535_s24 + $0x4460] sm:$0xff] %v8303_v47  ;;  %8306 = vst [vmem:[%s14535_s24 + $0x4468] sm:$0xff] %v8305_v26  ;;  %v8345_v7 = vld [vmem:[%s11342_s16 + $0x1268] sm:$0xff]  ;;  %v8347_v19 = vld [vmem:[%s11342_s16 + $0x1270] sm:$0xff] }
 0x5c9   : > { %8308 = vst [vmem:[%s14535_s24 + $0x4470] sm:$0xff] %v8307_v46  ;;  %8310 = vst [vmem:[%s14535_s24 + $0x4478] sm:$0xff] %v8309_v25  ;;  %v8349_v33 = vld [vmem:[%s11342_s16 + $0x1278] sm:$0xff]  ;;  %v8351_v59 = vld [vmem:[%s11342_s16 + $0x1280] sm:$0xff] }
 0x5ca   : > { %8312 = vst [vmem:[%s14535_s24 + $0x4480] sm:$0xff] %v8311_v4  ;;  %8314 = vst [vmem:[%s14535_s24 + $0x4488] sm:$0xff] %v8313_v41  ;;  %v8353_v48 = vld [vmem:[%s11342_s16 + $0x1288] sm:$0xff]  ;;  %v8355_v56 = vld [vmem:[%s11342_s16 + $0x1290] sm:$0xff] }
 0x5cb   : > { %8316 = vst [vmem:[%s14535_s24 + $0x4490] sm:$0xff] %v8315_v52  ;;  %8318 = vst [vmem:[%s14535_s24 + $0x4498] sm:$0xff] %v8317_v34  ;;  %v8357_v43 = vld [vmem:[%s11342_s16 + $0x1298] sm:$0xff]  ;;  %v8359_v21 = vld [vmem:[%s11342_s16 + $0x12a0] sm:$0xff] }
 0x5cc   : > { %8320 = vst [vmem:[%s14535_s24 + $0x44a0] sm:$0xff] %v8319_v17  ;;  %8322 = vst [vmem:[%s14535_s24 + $0x44a8] sm:$0xff] %v8321_v45  ;;  %v8361_v60 = vld [vmem:[%s11342_s16 + $0x12a8] sm:$0xff]  ;;  %v8363_v6 = vld [vmem:[%s11342_s16 + $0x12b0] sm:$0xff] }
 0x5cd   : > { %8324 = vst [vmem:[%s14535_s24 + $0x44b0] sm:$0xff] %v8323_v57  ;;  %8326 = vst [vmem:[%s14535_s24 + $0x44b8] sm:$0xff] %v8325_v16  ;;  %v8365_v54 = vld [vmem:[%s11342_s16 + $0x12b8] sm:$0xff] }
 0x5ce   : > { %8328 = vst [vmem:[%s14535_s24 + $0x44c0] sm:$0xff] %v8327_v20  ;;  %8330 = vst [vmem:[%s14535_s24 + $0x44c8] sm:$0xff] %v8329_v11 }
 0x5cf   : > { %8332 = vst [vmem:[%s14535_s24 + $0x44d0] sm:$0xff] %v8331_v23  ;;  %8334 = vst [vmem:[%s14535_s24 + $0x44d8] sm:$0xff] %v8333_v58 }
 0x5d0   : > { %8336 = vst [vmem:[%s14535_s24 + $0x44e0] sm:$0xff] %v8335_v2  ;;  %8338 = vst [vmem:[%s14535_s24 + $0x44e8] sm:$0xff] %v8337_v53 }
 0x5d1   : > { %8340 = vst [vmem:[%s14535_s24 + $0x44f0] sm:$0xff] %v8339_v36  ;;  %8342 = vst [vmem:[%s14535_s24 + $0x44f8] sm:$0xff] %v8341_v49 }
 0x5d2   : > { %8344 = vst [vmem:[%s14535_s24 + $0x4500] sm:$0xff] %v8343_v8  ;;  %8346 = vst [vmem:[%s14535_s24 + $0x4508] sm:$0xff] %v8345_v7 }
 0x5d3   : > { %8348 = vst [vmem:[%s14535_s24 + $0x4510] sm:$0xff] %v8347_v19  ;;  %8350 = vst [vmem:[%s14535_s24 + $0x4518] sm:$0xff] %v8349_v33 }
 0x5d4   : > { %8352 = vst [vmem:[%s14535_s24 + $0x4520] sm:$0xff] %v8351_v59  ;;  %8354 = vst [vmem:[%s14535_s24 + $0x4528] sm:$0xff] %v8353_v48 }
 0x5d5   : > { %8356 = vst [vmem:[%s14535_s24 + $0x4530] sm:$0xff] %v8355_v56  ;;  %8358 = vst [vmem:[%s14535_s24 + $0x4538] sm:$0xff] %v8357_v43 }
 0x5d6   : > { %8360 = vst [vmem:[%s14535_s24 + $0x4540] sm:$0xff] %v8359_v21  ;;  %8362 = vst [vmem:[%s14535_s24 + $0x4548] sm:$0xff] %v8361_v60 }
 0x5d7   : > { %8364 = vst [vmem:[%s14535_s24 + $0x4550] sm:$0xff] %v8363_v6  ;;  %8366 = vst [vmem:[%s14535_s24 + $0x4558] sm:$0xff] %v8365_v54 }
 0x5d8 PF: > { %s18_s23 = sadd.s32 1, %s10189_s23   ;;  %s16291_s18 = smov %s10173_s19 }
 0x5d9   : > { %p15_p9 = scmp.ge.s32.totalorder %s18_s23, 6   ;;  %s16292_s19 = smov %s10177_s20 }
 0x5da   : > { %s16293_s20 = smov %s10272_s30  ;;  %s16294_s21 = smov %s10185_s22 }
 0x5db   : > { %s16295_s22 = smov %s16297_s25  ;;  %17 = sbr.rel (!%p15_p9) target bundleno = 4 (0x4), region = 103 }
 0x5e2   :  { %8382 = vsyncpa [#allocation3], 1 }
 0x5e3   :  { %8384 = vsyncpa [#allocation3 + $0x1], 1 }

</bundles_post_ra>
